<compile_context>
chip_gen: v7x
topology: tpu7x:2x2x1
jax: 0.10.0
libtpu: 0.0.40
codegen_flags: <defaults>
</compile_context>

<pallas_src>
import jax
import jax.numpy as jnp
from jax import lax
from jax.experimental import pallas as pl
from jax.experimental.pallas import tpu as pltpu

IN_F = 1 * 28 * 28   # 784
HID = 500            # logical hidden width (nn.Linear(784, 500))
HID_PAD = 512        # lane-aligned hidden width (extra cols/rows are zero)
FC3_F = 10
FC3_PAD = 128        # fc3 output padded to one full lane group


def _round_up(n, m):
    return (n + m - 1) // m * m


def mlp_kernel(x_ref, w1_ref, b1_ref, w2_ref, b2_ref,
               w3_ref, b3_ref, w4_ref, b4_ref, o_ref):
    # In-kernel bf16 cast of x (VPU has slack; avoids a wrapper-side HBM pass).
    x = x_ref[...].astype(jnp.bfloat16)
    # fc1 + ReLU : bf16 operands on the MXU, f32 accumulation.
    h = jnp.dot(x, w1_ref[...], preferred_element_type=jnp.float32)
    h = jnp.maximum(h + b1_ref[...], 0.0)
    # fc2 + ReLU
    h = jnp.dot(h.astype(jnp.bfloat16), w2_ref[...],
                preferred_element_type=jnp.float32)
    h = jnp.maximum(h + b2_ref[...], 0.0)
    # fc3 + ReLU  (N padded 10 -> 128; padded cols are exact zeros after ReLU)
    h = jnp.dot(h.astype(jnp.bfloat16), w3_ref[...],
                preferred_element_type=jnp.float32)
    h = jnp.maximum(h + b3_ref[...], 0.0)                       # (TB, 128)
    # fc4 (10 -> 1): contract the zero-padded 128-lane axis against the w4 row.
    # Result lands lane-major as (1, TB) so the output store is lane-dense.
    out = lax.dot_general(w4_ref[...], h,
                          dimension_numbers=(((1,), (1,)), ((), ())),
                          preferred_element_type=jnp.float32)    # (1, TB)
    out = out + b4_ref[...]                                      # + (1, 1) bias
    o_ref[...] = out.reshape(o_ref.shape).astype(o_ref.dtype)    # (1, 1, TB)


def prepare_params(params):
    """Zero-pad hiddens 500->512 and the fc3/fc4 width 10->128 (numerically inert),
    cast matmul weights to bf16 (f32 accumulation stays in-kernel)."""
    (w1, b1), (w2, b2), (w3, b3), (w4, b4) = params
    ph = HID_PAD - HID
    pn = FC3_PAD - FC3_F
    w1p = jnp.pad(w1, ((0, 0), (0, ph))).astype(jnp.bfloat16)      # (784, 512)
    b1p = jnp.pad(b1, ((0, 0), (0, ph))).astype(jnp.float32)       # (1, 512)
    w2p = jnp.pad(w2, ((0, ph), (0, ph))).astype(jnp.bfloat16)     # (512, 512)
    b2p = jnp.pad(b2, ((0, 0), (0, ph))).astype(jnp.float32)       # (1, 512)
    w3p = jnp.pad(w3, ((0, ph), (0, pn))).astype(jnp.bfloat16)     # (512, 128)
    b3p = jnp.pad(b3, ((0, 0), (0, pn))).astype(jnp.float32)       # (1, 128)
    w4p = jnp.pad(w4.reshape(1, FC3_F), ((0, 0), (0, pn))).astype(jnp.float32)  # (1, 128)
    b4p = b4.reshape(1, 1).astype(jnp.float32)                     # (1, 1)
    return (w1p, b1p, w2p, b2p, w3p, b3p, w4p, b4p)


def fcl_regression_forward(x_nchw, prepared):
    """x_nchw: (B, 1, 28, 28) float32. Returns (B, 1) float32."""
    w1, b1, w2, b2, w3, b3, w4, b4 = prepared
    B = x_nchw.shape[0]
    x = x_nchw.reshape(B, -1)            # torch.flatten(x, 1); stays f32 (cast is in-kernel)

    # Batch tile: multiple of 256 (v6e/v7x MXU M tile; also a multiple of 128 for
    # v5e), capped at 512 rows (f32 x tile = 1.6 MiB per pipeline buffer).
    TB = min(512, _round_up(pl.cdiv(B, 2), 256))
    # >= 2 grid steps so the "parallel" batch axis shards across both v7x TCs.
    B_pad = max(_round_up(B, TB), 2 * TB)
    if B_pad != B:
        x = jnp.pad(x, ((0, B_pad - B), (0, 0)))   # padded rows are sliced off below
    num_tiles = B_pad // TB

    flops = 2 * B_pad * (IN_F * HID_PAD + HID_PAD * HID_PAD
                         + HID_PAD * FC3_PAD + FC3_PAD)
    bytes_accessed = int(
        x.size * x.dtype.itemsize
        + sum(a.size * a.dtype.itemsize for a in (w1, b1, w2, b2, w3, b3, w4, b4))
        + B_pad * 4)

    resident = lambda i: (0, 0)   # same block every grid step -> DMA'd once, stays in VMEM

    def run(single_buffer_weights):
        wkw = ({"pipeline_mode": pl.Buffered(1)} if single_buffer_weights else {})
        weight_specs = [pl.BlockSpec(a.shape, resident, **wkw)
                        for a in (w1, b1, w2, b2, w3, b3, w4, b4)]
        return pl.pallas_call(
            mlp_kernel,
            out_shape=jax.ShapeDtypeStruct((num_tiles, 1, TB), jnp.float32),
            grid=(num_tiles,),
            in_specs=[pl.BlockSpec((TB, IN_F), lambda i: (i, 0))] + weight_specs,
            # Lane-dense output: batch rows live on the 128-lane axis.
            out_specs=pl.BlockSpec((1, 1, TB), lambda i: (i, 0, 0)),
            compiler_params=pltpu.CompilerParams(
                dimension_semantics=("parallel",),   # megacore-shard batch (v7x: 2 TCs)
                vmem_limit_bytes=32 << 20,           # working set <= ~7 MiB; headroom kept
            ),
            cost_estimate=pl.CostEstimate(
                flops=flops, transcendentals=0, bytes_accessed=bytes_accessed),
        )(x, w1, b1, w2, b2, w3, b3, w4, b4)

    try:
        # Grid-invariant weights/biases single-buffered (~1.5 MiB VMEM saved).
        out = run(True)
    except Exception:
        # pl.Buffered(1) not supported on this jax version -> default double buffering.
        out = run(False)

    return out.reshape(B_pad, 1)[:B]


def init_linear(key, in_f, out_f):
    """Deterministic init mimicking PyTorch nn.Linear (U[-1/sqrt(in), 1/sqrt(in)]).
    Weight returned as (in_f, out_f) so the kernel computes x @ W; bias as (1, out_f)."""
    kw, kb = jax.random.split(key)
    bound = 1.0 / jnp.sqrt(jnp.float32(in_f))
    w = jax.random.uniform(kw, (in_f, out_f), jnp.float32, -bound, bound)
    b = jax.random.uniform(kb, (1, out_f), jnp.float32, -bound, bound)
    return w, b


if __name__ == "__main__":
    key = jax.random.PRNGKey(0)
    k_x, k1, k2, k3, k4 = jax.random.split(key, 5)

    # Small-batch MNIST-shaped input, NCHW like the PyTorch module expects.
    B = 8
    x = jax.random.normal(k_x, (B, 1, 28, 28), jnp.float32)

    params = (
        init_linear(k1, IN_F, HID),    # fc1
        init_linear(k2, HID, HID),     # fc2
        init_linear(k3, HID, FC3_F),   # fc3
        init_linear(k4, FC3_F, 1),     # fc4
    )
    prepared = prepare_params(params)

    out = fcl_regression_forward(x, prepared)
    out = jax.block_until_ready(out)

    # Pure-JAX reference using the same bf16 weight/activation casting with f32 accumulation.
    (w1, b1), (w2, b2), (w3, b3), (w4, b4) = params
    xr = x.reshape(B, -1).astype(jnp.bfloat16)
    h = jnp.maximum(
        jnp.dot(xr, w1.astype(jnp.bfloat16), preferred_element_type=jnp.float32) + b1, 0.0)
    h = jnp.maximum(
        jnp.dot(h.astype(jnp.bfloat16), w2.astype(jnp.bfloat16),
                preferred_element_type=jnp.float32) + b2, 0.0)
    h = jnp.maximum(
        jnp.dot(h.astype(jnp.bfloat16), w3.astype(jnp.bfloat16),
                preferred_element_type=jnp.float32) + b3, 0.0)
    ref = h @ w4 + b4

    assert out.shape == (B, 1), out.shape
    assert jnp.allclose(out, ref, atol=2e-2, rtol=2e-2), "mismatch vs JAX reference"

    print("KERNEL_OK")
</pallas_src>

<mosaic_0001>
module attributes {stable_mosaic.version = 11 : i64} {
  func.func @mlp_kernel(%arg0: i32, %arg1: memref<256x784xf32, #tpu.memory_space<vmem>>, %arg2: memref<784x512xbf16, #tpu.memory_space<vmem>>, %arg3: memref<1x512xf32, #tpu.memory_space<vmem>>, %arg4: memref<512x512xbf16, #tpu.memory_space<vmem>>, %arg5: memref<1x512xf32, #tpu.memory_space<vmem>>, %arg6: memref<512x128xbf16, #tpu.memory_space<vmem>>, %arg7: memref<1x128xf32, #tpu.memory_space<vmem>>, %arg8: memref<1x128xf32, #tpu.memory_space<vmem>>, %arg9: memref<1x1xf32, #tpu.memory_space<vmem>>, %arg10: memref<1x1x256xf32, #tpu.memory_space<vmem>>) attributes {dimension_semantics = [#tpu.dimension_semantics<parallel>], iteration_bounds = array<i64: 2>, scalar_prefetch = 0 : i64, scratch_operands = 0 : i64, tpu.core_type = #tpu.core_type<tc>, window_params = [{transform_indices = @transform_0, window_bounds = array<i64: 256, 784>}, {pipeline_mode = #tpu.pipeline_mode<synchronous>, transform_indices = @transform_1, window_bounds = array<i64: 784, 512>}, {pipeline_mode = #tpu.pipeline_mode<synchronous>, transform_indices = @transform_2, window_bounds = array<i64: 1, 512>}, {pipeline_mode = #tpu.pipeline_mode<synchronous>, transform_indices = @transform_3, window_bounds = array<i64: 512, 512>}, {pipeline_mode = #tpu.pipeline_mode<synchronous>, transform_indices = @transform_4, window_bounds = array<i64: 1, 512>}, {pipeline_mode = #tpu.pipeline_mode<synchronous>, transform_indices = @transform_5, window_bounds = array<i64: 512, 128>}, {pipeline_mode = #tpu.pipeline_mode<synchronous>, transform_indices = @transform_6, window_bounds = array<i64: 1, 128>}, {pipeline_mode = #tpu.pipeline_mode<synchronous>, transform_indices = @transform_7, window_bounds = array<i64: 1, 128>}, {pipeline_mode = #tpu.pipeline_mode<synchronous>, transform_indices = @transform_8, window_bounds = array<i64: 1, 1>}, {transform_indices = @transform_9, window_bounds = array<i64: 1, 1, 256>}]} {
    %c0 = arith.constant 0 : index
    %c0_0 = arith.constant 0 : index
    %0 = vector.load %arg1[%c0, %c0_0] : memref<256x784xf32, #tpu.memory_space<vmem>>, vector<256x784xf32>
    %1 = arith.truncf %0 : vector<256x784xf32> to vector<256x784xbf16>
    %c0_1 = arith.constant 0 : index
    %c0_2 = arith.constant 0 : index
    %2 = vector.load %arg2[%c0_1, %c0_2] : memref<784x512xbf16, #tpu.memory_space<vmem>>, vector<784x512xbf16>
    %cst = arith.constant dense<0.000000e+00> : vector<256x512xf32>
    %3 = tpu.matmul %1, %2, %cst {dimension_numbers = #tpu.dot_dimension_numbers<[1], [0], [0], [1], [0, 0, 1, 1], [], []>} : vector<256x784xbf16>, vector<784x512xbf16>, vector<256x512xf32> -> vector<256x512xf32>
    %c0_3 = arith.constant 0 : index
    %c0_4 = arith.constant 0 : index
    %4 = vector.load %arg3[%c0_3, %c0_4] : memref<1x512xf32, #tpu.memory_space<vmem>>, vector<1x512xf32>
    %5 = vector.broadcast %4 : vector<1x512xf32> to vector<256x512xf32>
    %6 = arith.addf %3, %5 : vector<256x512xf32>
    %cst_5 = arith.constant 0.000000e+00 : f32
    %7 = vector.broadcast %cst_5 : f32 to vector<256x512xf32>
    %8 = arith.maximumf %6, %7 : vector<256x512xf32>
    %9 = arith.truncf %8 : vector<256x512xf32> to vector<256x512xbf16>
    %c0_6 = arith.constant 0 : index
    %c0_7 = arith.constant 0 : index
    %10 = vector.load %arg4[%c0_6, %c0_7] : memref<512x512xbf16, #tpu.memory_space<vmem>>, vector<512x512xbf16>
    %cst_8 = arith.constant dense<0.000000e+00> : vector<256x512xf32>
    %11 = tpu.matmul %9, %10, %cst_8 {dimension_numbers = #tpu.dot_dimension_numbers<[1], [0], [0], [1], [0, 0, 1, 1], [], []>} : vector<256x512xbf16>, vector<512x512xbf16>, vector<256x512xf32> -> vector<256x512xf32>
    %c0_9 = arith.constant 0 : index
    %c0_10 = arith.constant 0 : index
    %12 = vector.load %arg5[%c0_9, %c0_10] : memref<1x512xf32, #tpu.memory_space<vmem>>, vector<1x512xf32>
    %13 = vector.broadcast %12 : vector<1x512xf32> to vector<256x512xf32>
    %14 = arith.addf %11, %13 : vector<256x512xf32>
    %cst_11 = arith.constant 0.000000e+00 : f32
    %15 = vector.broadcast %cst_11 : f32 to vector<256x512xf32>
    %16 = arith.maximumf %14, %15 : vector<256x512xf32>
    %17 = arith.truncf %16 : vector<256x512xf32> to vector<256x512xbf16>
    %c0_12 = arith.constant 0 : index
    %c0_13 = arith.constant 0 : index
    %18 = vector.load %arg6[%c0_12, %c0_13] : memref<512x128xbf16, #tpu.memory_space<vmem>>, vector<512x128xbf16>
    %cst_14 = arith.constant dense<0.000000e+00> : vector<256x128xf32>
    %19 = tpu.matmul %17, %18, %cst_14 {dimension_numbers = #tpu.dot_dimension_numbers<[1], [0], [0], [1], [0, 0, 1, 1], [], []>} : vector<256x512xbf16>, vector<512x128xbf16>, vector<256x128xf32> -> vector<256x128xf32>
    %c0_15 = arith.constant 0 : index
    %c0_16 = arith.constant 0 : index
    %20 = vector.load %arg7[%c0_15, %c0_16] : memref<1x128xf32, #tpu.memory_space<vmem>>, vector<1x128xf32>
    %21 = vector.broadcast %20 : vector<1x128xf32> to vector<256x128xf32>
    %22 = arith.addf %19, %21 : vector<256x128xf32>
    %cst_17 = arith.constant 0.000000e+00 : f32
    %23 = vector.broadcast %cst_17 : f32 to vector<256x128xf32>
    %24 = arith.maximumf %22, %23 : vector<256x128xf32>
    %c0_18 = arith.constant 0 : index
    %c0_19 = arith.constant 0 : index
    %25 = vector.load %arg8[%c0_18, %c0_19] : memref<1x128xf32, #tpu.memory_space<vmem>>, vector<1x128xf32>
    %cst_20 = arith.constant dense<0.000000e+00> : vector<1x256xf32>
    %26 = tpu.matmul %25, %24, %cst_20 {dimension_numbers = #tpu.dot_dimension_numbers<[1], [1], [0], [0], [0, 0, 1, 0], [], []>} : vector<1x128xf32>, vector<256x128xf32>, vector<1x256xf32> -> vector<1x256xf32>
    %c0_21 = arith.constant 0 : index
    %c0_22 = arith.constant 0 : index
    %27 = vector.load %arg9[%c0_21, %c0_22] : memref<1x1xf32, #tpu.memory_space<vmem>>, vector<1x1xf32>
    %28 = vector.broadcast %27 : vector<1x1xf32> to vector<1x256xf32>
    %29 = arith.addf %26, %28 : vector<1x256xf32>
    %30 = vector.shape_cast %29 : vector<1x256xf32> to vector<1x1x256xf32>
    %c0_23 = arith.constant 0 : index
    %c0_24 = arith.constant 0 : index
    %c0_25 = arith.constant 0 : index
    %31 = vector.load %arg10[%c0_23, %c0_24, %c0_25] : memref<1x1x256xf32, #tpu.memory_space<vmem>>, vector<1x1x256xf32>
    tpu.vector_store %arg10[%c0_23, %c0_24, %c0_25], %30 {strides = array<i32>} : memref<1x1x256xf32, #tpu.memory_space<vmem>>, vector<1x1x256xf32>,
    return
  }
  func.func @transform_0(%arg0: i32) -> (i32, i32) {
    %c0_i32 = arith.constant 0 : i32
    %c0_i32_0 = arith.constant 0 : i32
    return %arg0, %c0_i32 : i32, i32
  }
  func.func @transform_1(%arg0: i32) -> (i32, i32) {
    %c0_i32 = arith.constant 0 : i32
    %c0_i32_0 = arith.constant 0 : i32
    %c0_i32_1 = arith.constant 0 : i32
    return %c0_i32, %c0_i32_0 : i32, i32
  }
  func.func @transform_2(%arg0: i32) -> (i32, i32) {
    %c0_i32 = arith.constant 0 : i32
    %c0_i32_0 = arith.constant 0 : i32
    %c0_i32_1 = arith.constant 0 : i32
    return %c0_i32, %c0_i32_0 : i32, i32
  }
  func.func @transform_3(%arg0: i32) -> (i32, i32) {
    %c0_i32 = arith.constant 0 : i32
    %c0_i32_0 = arith.constant 0 : i32
    %c0_i32_1 = arith.constant 0 : i32
    return %c0_i32, %c0_i32_0 : i32, i32
  }
  func.func @transform_4(%arg0: i32) -> (i32, i32) {
    %c0_i32 = arith.constant 0 : i32
    %c0_i32_0 = arith.constant 0 : i32
    %c0_i32_1 = arith.constant 0 : i32
    return %c0_i32, %c0_i32_0 : i32, i32
  }
  func.func @transform_5(%arg0: i32) -> (i32, i32) {
    %c0_i32 = arith.constant 0 : i32
    %c0_i32_0 = arith.constant 0 : i32
    %c0_i32_1 = arith.constant 0 : i32
    return %c0_i32, %c0_i32_0 : i32, i32
  }
  func.func @transform_6(%arg0: i32) -> (i32, i32) {
    %c0_i32 = arith.constant 0 : i32
    %c0_i32_0 = arith.constant 0 : i32
    %c0_i32_1 = arith.constant 0 : i32
    return %c0_i32, %c0_i32_0 : i32, i32
  }
  func.func @transform_7(%arg0: i32) -> (i32, i32) {
    %c0_i32 = arith.constant 0 : i32
    %c0_i32_0 = arith.constant 0 : i32
    %c0_i32_1 = arith.constant 0 : i32
    return %c0_i32, %c0_i32_0 : i32, i32
  }
  func.func @transform_8(%arg0: i32) -> (i32, i32) {
    %c0_i32 = arith.constant 0 : i32
    %c0_i32_0 = arith.constant 0 : i32
    %c0_i32_1 = arith.constant 0 : i32
    return %c0_i32, %c0_i32_0 : i32, i32
  }
  func.func @transform_9(%arg0: i32) -> (i32, i32, i32) {
    %c0_i32 = arith.constant 0 : i32
    %c0_i32_0 = arith.constant 0 : i32
    %c0_i32_1 = arith.constant 0 : i32
    return %arg0, %c0_i32, %c0_i32_0 : i32, i32, i32
  }
}

module attributes {stable_mosaic.version = 11 : i64} {
  func.func @mlp_kernel(%arg0: i32, %arg1: memref<256x784xf32, #tpu.memory_space<vmem>>, %arg2: memref<784x512xbf16, #tpu.memory_space<vmem>>, %arg3: memref<1x512xf32, #tpu.memory_space<vmem>>, %arg4: memref<512x512xbf16, #tpu.memory_space<vmem>>, %arg5: memref<1x512xf32, #tpu.memory_space<vmem>>, %arg6: memref<512x128xbf16, #tpu.memory_space<vmem>>, %arg7: memref<1x128xf32, #tpu.memory_space<vmem>>, %arg8: memref<1x128xf32, #tpu.memory_space<vmem>>, %arg9: memref<1x1xf32, #tpu.memory_space<vmem>>, %arg10: memref<1x1x256xf32, #tpu.memory_space<vmem>>) attributes {dimension_semantics = [#tpu.dimension_semantics<parallel>], iteration_bounds = array<i64: 2>, scalar_prefetch = 0 : i64, scratch_operands = 0 : i64, tpu.core_type = #tpu.core_type<tc>, window_params = [{transform_indices = @transform_0, window_bounds = array<i64: 256, 784>}, {pipeline_mode = #tpu.pipeline_mode<synchronous>, transform_indices = @transform_1, window_bounds = array<i64: 784, 512>}, {pipeline_mode = #tpu.pipeline_mode<synchronous>, transform_indices = @transform_2, window_bounds = array<i64: 1, 512>}, {pipeline_mode = #tpu.pipeline_mode<synchronous>, transform_indices = @transform_3, window_bounds = array<i64: 512, 512>}, {pipeline_mode = #tpu.pipeline_mode<synchronous>, transform_indices = @transform_4, window_bounds = array<i64: 1, 512>}, {pipeline_mode = #tpu.pipeline_mode<synchronous>, transform_indices = @transform_5, window_bounds = array<i64: 512, 128>}, {pipeline_mode = #tpu.pipeline_mode<synchronous>, transform_indices = @transform_6, window_bounds = array<i64: 1, 128>}, {pipeline_mode = #tpu.pipeline_mode<synchronous>, transform_indices = @transform_7, window_bounds = array<i64: 1, 128>}, {pipeline_mode = #tpu.pipeline_mode<synchronous>, transform_indices = @transform_8, window_bounds = array<i64: 1, 1>}, {transform_indices = @transform_9, window_bounds = array<i64: 1, 1, 256>}]} {
    %c0 = arith.constant 0 : index
    %c0_0 = arith.constant 0 : index
    %0 = vector.load %arg1[%c0, %c0_0] : memref<256x784xf32, #tpu.memory_space<vmem>>, vector<256x784xf32>
    %1 = arith.truncf %0 : vector<256x784xf32> to vector<256x784xbf16>
    %c0_1 = arith.constant 0 : index
    %c0_2 = arith.constant 0 : index
    %2 = vector.load %arg2[%c0_1, %c0_2] : memref<784x512xbf16, #tpu.memory_space<vmem>>, vector<784x512xbf16>
    %cst = arith.constant dense<0.000000e+00> : vector<256x512xf32>
    %3 = tpu.matmul %1, %2, %cst {dimension_numbers = #tpu.dot_dimension_numbers<[1], [0], [0], [1], [0, 0, 1, 1], [], []>} : vector<256x784xbf16>, vector<784x512xbf16>, vector<256x512xf32> -> vector<256x512xf32>
    %c0_3 = arith.constant 0 : index
    %c0_4 = arith.constant 0 : index
    %4 = vector.load %arg3[%c0_3, %c0_4] : memref<1x512xf32, #tpu.memory_space<vmem>>, vector<1x512xf32>
    %5 = vector.broadcast %4 : vector<1x512xf32> to vector<256x512xf32>
    %6 = arith.addf %3, %5 : vector<256x512xf32>
    %cst_5 = arith.constant 0.000000e+00 : f32
    %7 = vector.broadcast %cst_5 : f32 to vector<256x512xf32>
    %8 = arith.maximumf %6, %7 : vector<256x512xf32>
    %9 = arith.truncf %8 : vector<256x512xf32> to vector<256x512xbf16>
    %c0_6 = arith.constant 0 : index
    %c0_7 = arith.constant 0 : index
    %10 = vector.load %arg4[%c0_6, %c0_7] : memref<512x512xbf16, #tpu.memory_space<vmem>>, vector<512x512xbf16>
    %cst_8 = arith.constant dense<0.000000e+00> : vector<256x512xf32>
    %11 = tpu.matmul %9, %10, %cst_8 {dimension_numbers = #tpu.dot_dimension_numbers<[1], [0], [0], [1], [0, 0, 1, 1], [], []>} : vector<256x512xbf16>, vector<512x512xbf16>, vector<256x512xf32> -> vector<256x512xf32>
    %c0_9 = arith.constant 0 : index
    %c0_10 = arith.constant 0 : index
    %12 = vector.load %arg5[%c0_9, %c0_10] : memref<1x512xf32, #tpu.memory_space<vmem>>, vector<1x512xf32>
    %13 = vector.broadcast %12 : vector<1x512xf32> to vector<256x512xf32>
    %14 = arith.addf %11, %13 : vector<256x512xf32>
    %cst_11 = arith.constant 0.000000e+00 : f32
    %15 = vector.broadcast %cst_11 : f32 to vector<256x512xf32>
    %16 = arith.maximumf %14, %15 : vector<256x512xf32>
    %17 = arith.truncf %16 : vector<256x512xf32> to vector<256x512xbf16>
    %c0_12 = arith.constant 0 : index
    %c0_13 = arith.constant 0 : index
    %18 = vector.load %arg6[%c0_12, %c0_13] : memref<512x128xbf16, #tpu.memory_space<vmem>>, vector<512x128xbf16>
    %cst_14 = arith.constant dense<0.000000e+00> : vector<256x128xf32>
    %19 = tpu.matmul %17, %18, %cst_14 {dimension_numbers = #tpu.dot_dimension_numbers<[1], [0], [0], [1], [0, 0, 1, 1], [], []>} : vector<256x512xbf16>, vector<512x128xbf16>, vector<256x128xf32> -> vector<256x128xf32>
    %c0_15 = arith.constant 0 : index
    %c0_16 = arith.constant 0 : index
    %20 = vector.load %arg7[%c0_15, %c0_16] : memref<1x128xf32, #tpu.memory_space<vmem>>, vector<1x128xf32>
    %21 = vector.broadcast %20 : vector<1x128xf32> to vector<256x128xf32>
    %22 = arith.addf %19, %21 : vector<256x128xf32>
    %cst_17 = arith.constant 0.000000e+00 : f32
    %23 = vector.broadcast %cst_17 : f32 to vector<256x128xf32>
    %24 = arith.maximumf %22, %23 : vector<256x128xf32>
    %c0_18 = arith.constant 0 : index
    %c0_19 = arith.constant 0 : index
    %25 = vector.load %arg8[%c0_18, %c0_19] : memref<1x128xf32, #tpu.memory_space<vmem>>, vector<1x128xf32>
    %cst_20 = arith.constant dense<0.000000e+00> : vector<1x256xf32>
    %26 = tpu.matmul %25, %24, %cst_20 {dimension_numbers = #tpu.dot_dimension_numbers<[1], [1], [0], [0], [0, 0, 1, 0], [], []>} : vector<1x128xf32>, vector<256x128xf32>, vector<1x256xf32> -> vector<1x256xf32>
    %c0_21 = arith.constant 0 : index
    %c0_22 = arith.constant 0 : index
    %27 = vector.load %arg9[%c0_21, %c0_22] : memref<1x1xf32, #tpu.memory_space<vmem>>, vector<1x1xf32>
    %28 = vector.broadcast %27 : vector<1x1xf32> to vector<1x256xf32>
    %29 = arith.addf %26, %28 : vector<1x256xf32>
    %30 = vector.shape_cast %29 : vector<1x256xf32> to vector<1x1x256xf32>
    %c0_23 = arith.constant 0 : index
    %c0_24 = arith.constant 0 : index
    %c0_25 = arith.constant 0 : index
    %31 = vector.load %arg10[%c0_23, %c0_24, %c0_25] : memref<1x1x256xf32, #tpu.memory_space<vmem>>, vector<1x1x256xf32>
    tpu.vector_store %arg10[%c0_23, %c0_24, %c0_25], %30 {strides = array<i32>} : memref<1x1x256xf32, #tpu.memory_space<vmem>>, vector<1x1x256xf32>,
    return
  }
  func.func @transform_0(%arg0: i32) -> (i32, i32) {
    %c0_i32 = arith.constant 0 : i32
    %c0_i32_0 = arith.constant 0 : i32
    return %arg0, %c0_i32 : i32, i32
  }
  func.func @transform_1(%arg0: i32) -> (i32, i32) {
    %c0_i32 = arith.constant 0 : i32
    %c0_i32_0 = arith.constant 0 : i32
    %c0_i32_1 = arith.constant 0 : i32
    return %c0_i32, %c0_i32_0 : i32, i32
  }
  func.func @transform_2(%arg0: i32) -> (i32, i32) {
    %c0_i32 = arith.constant 0 : i32
    %c0_i32_0 = arith.constant 0 : i32
    %c0_i32_1 = arith.constant 0 : i32
    return %c0_i32, %c0_i32_0 : i32, i32
  }
  func.func @transform_3(%arg0: i32) -> (i32, i32) {
    %c0_i32 = arith.constant 0 : i32
    %c0_i32_0 = arith.constant 0 : i32
    %c0_i32_1 = arith.constant 0 : i32
    return %c0_i32, %c0_i32_0 : i32, i32
  }
  func.func @transform_4(%arg0: i32) -> (i32, i32) {
    %c0_i32 = arith.constant 0 : i32
    %c0_i32_0 = arith.constant 0 : i32
    %c0_i32_1 = arith.constant 0 : i32
    return %c0_i32, %c0_i32_0 : i32, i32
  }
  func.func @transform_5(%arg0: i32) -> (i32, i32) {
    %c0_i32 = arith.constant 0 : i32
    %c0_i32_0 = arith.constant 0 : i32
    %c0_i32_1 = arith.constant 0 : i32
    return %c0_i32, %c0_i32_0 : i32, i32
  }
  func.func @transform_6(%arg0: i32) -> (i32, i32) {
    %c0_i32 = arith.constant 0 : i32
    %c0_i32_0 = arith.constant 0 : i32
    %c0_i32_1 = arith.constant 0 : i32
    return %c0_i32, %c0_i32_0 : i32, i32
  }
  func.func @transform_7(%arg0: i32) -> (i32, i32) {
    %c0_i32 = arith.constant 0 : i32
    %c0_i32_0 = arith.constant 0 : i32
    %c0_i32_1 = arith.constant 0 : i32
    return %c0_i32, %c0_i32_0 : i32, i32
  }
  func.func @transform_8(%arg0: i32) -> (i32, i32) {
    %c0_i32 = arith.constant 0 : i32
    %c0_i32_0 = arith.constant 0 : i32
    %c0_i32_1 = arith.constant 0 : i32
    return %c0_i32, %c0_i32_0 : i32, i32
  }
  func.func @transform_9(%arg0: i32) -> (i32, i32, i32) {
    %c0_i32 = arith.constant 0 : i32
    %c0_i32_0 = arith.constant 0 : i32
    %c0_i32_1 = arith.constant 0 : i32
    return %arg0, %c0_i32, %c0_i32_0 : i32, i32, i32
  }
}

</mosaic_0001>

<bundles_post_ra>
// kernel: tpu_custom_call.1
= control target key start
LH: loop header
LB: loop body
LE: loop exit
PB: predicated region body
PF: predicated region fallthrough
CT: control target
= control target key end

     0   :  { %s10311_s0 = inlined_call_operand.vmem [shape: f32[512,784], index: 0, kind: input, shape index: {}]   ;;  %s10312_s1 = inlined_call_operand.vmem [shape: bf16[784,512], index: 1, kind: input, shape index: {}]   ;;  %s10313_s2 = inlined_call_operand.vmem [shape: f32[1,512], index: 2, kind: input, shape index: {}]   ;;  %s10314_s3 = inlined_call_operand.vmem [shape: bf16[512,512], index: 3, kind: input, shape index: {}]   ;;  %s10315_s4 = inlined_call_operand.vmem [shape: f32[1,512], index: 4, kind: input, shape index: {}]   ;;  %s10316_s5 = inlined_call_operand.vmem [shape: bf16[512,128], index: 5, kind: input, shape index: {}]   ;;  %s10317_s6 = inlined_call_operand.vmem [shape: f32[1,128], index: 6, kind: input, shape index: {}]   ;;  %s10318_s7 = inlined_call_operand.vmem [shape: f32[1,128], index: 7, kind: input, shape index: {}]   ;;  %s10319_s8 = inlined_call_operand.<no memory space> [shape: f32[1,1], index: 8, kind: input, shape index: {}]   ;;  %s10320_s9 = inlined_call_operand.hbm [shape: f32[2,1,256], index: 9, kind: output, shape index: {}]  }
   0x1   :  { %v14_v0 = vstv %s10319_s8 }
   0x2   :  { %15 = vst [vmem:[#allocation2] sm:$0x1] %v14_v0 }
   0x3   :  { %16 = vsyncpa [#allocation4], 0 }
   0x4   :  { %18 = vsyncpa [#allocation4 + $0x1], 0  ;;  %s8349_s11 = smov 0   ;;  %s8351_s12 = smov 0  }
   0x5   :  { %s8353_s13 = smov 0   ;;  %s8355_s14 = smov 0  }
   0x6 LB: > { %s6207_s8 = sadd.s32 4294967295, %s8291_s14   ;;  %s6208_s15 = sadd.s32 4294967294, %s8291_s14   ;;  %s8291_s14 = sphi %s8355_s14, %s10326_s14   ;;  %s8287_s13 = sphi %s8353_s13, %s10325_s13   ;;  %s8283_s12 = sphi %s8351_s12, %s10324_s12   ;;  %s8279_s11 = sphi %s8349_s11, %s10323_s11  }
   0x7   : > { %s8372_s16 = sadd.s32 1, %s8291_s14   ;;  %s225_s17 = sadd.s32 1, %s8287_s13 }
   0x8   : > { %s222_s18 = ssub.s32 %s8291_s14, %s8372_s16  ;;  %p235_p0 = scmp.ne.s32.totalorder %s8287_s13, %s8283_s12 }
   0x9   : > { %p223_p1 = scmp.eq.s32.totalorder %s222_s18, 0  ;;  %p236_p2 = scmp.eq.s32.totalorder %s6207_s8, 1 }
   0xa   : > { %p241_p3 = scmp.ne.s32.totalorder %s8283_s12, %s8279_s11  ;;  %p242_p4 = scmp.eq.s32.totalorder %s6208_s15, 1 }
   0xb   : > { %s8384_s19 = scalar_select %p223_p1, %s8287_s13, %s225_s17  }
   0xc   : > { %p8386_p5 = por %p236_p2, %p235_p0  ;;  %p8390_p6 = por %p242_p4, %p241_p3 }
   0xd   : > { %p6211_p7 = scmp.ge.s32.totalorder %s8291_s14, 1  ;;  %p294_p8 = scmp.lt.s32.totalorder %s8291_s14, 3 }
   0xf   : > { %p295_p9 = pnand %p6211_p7, %p294_p8 }
  0x10   : > { %v7711_v1 = vld [vmem:[%s10312_s1 + $0x4] ss:$16 sps:$4 sm:$0xff] (!%p295_p9)   ;;  %v7713_v2 = vld [vmem:[%s10312_s1 + $0xc] ss:$16 sps:$4 sm:$0xff] (!%p295_p9)   ;;  %v7715_v3 = vld [vmem:[%s10312_s1] ss:$16 sps:$4 sm:$0xff] (!%p295_p9)  }
  0x11   : > { %298 = sbr.rel (%p295_p9) target bundleno = 1625 (0x659), region = 56  ;;  %1922 = vmatprep.subr.bf16.mxu0 (!%p295_p9), %v7711_v1  ;;  %v7716_v4 = vld [vmem:[%s10312_s1 + $0x8] ss:$16 sps:$4 sm:$0xff] (!%p295_p9)   ;;  %2694 = vmatprep.subr.bf16.mxu1 (!%p295_p9), %v7713_v2  ;;  %v7717_v5 = vld [vmem:[%s10312_s1 + $0x24] ss:$16 sps:$4 sm:$0xff] (!%p295_p9)   ;;  %s8485_s28 = sshll.u32 (!%p295_p9), %s6207_s8, 5 }
  0x12   : > { %1923 = vmatpush1.bf16.msra.mxu0 (!%p295_p9), %v7715_v3  ;;  %2695 = vmatpush1.bf16.msra.mxu1 (!%p295_p9), %v7716_v4  ;;  %v7719_v6 = vld [vmem:[%s10312_s1 + $0x2c] ss:$16 sps:$4 sm:$0xff] (!%p295_p9)   ;;  %v7721_v7 = vld [vmem:[%s10312_s1 + $0x20] ss:$16 sps:$4 sm:$0xff] (!%p295_p9)   ;;  %v7722_v8 = vld [vmem:[%s10312_s1 + $0x28] ss:$16 sps:$4 sm:$0xff] (!%p295_p9)   ;;  %s10269_s8 = scalar_lea.hbm (!%p295_p9), %s10320_s9, %s8485_s28 }
  0x13   : > { %1924 = vmatprep.subr.bf16.mxu0 (!%p295_p9), %v7717_v5  ;;  %2696 = vmatprep.subr.bf16.mxu1 (!%p295_p9), %v7719_v6  ;;  %v7723_v9 = vld [vmem:[%s10312_s1 + $0x44] ss:$16 sps:$4 sm:$0xff] (!%p295_p9)   ;;  %v7725_v10 = vld [vmem:[%s10312_s1 + $0x4c] ss:$16 sps:$4 sm:$0xff] (!%p295_p9)   ;;  %v7727_v11 = vld [vmem:[%s10312_s1 + $0x40] ss:$16 sps:$4 sm:$0xff] (!%p295_p9)  }
  0x14   : > { %v7728_v12 = vld [vmem:[%s10312_s1 + $0x48] ss:$16 sps:$4 sm:$0xff] (!%p295_p9)   ;;  %v7729_v13 = vld [vmem:[%s10312_s1 + $0x64] ss:$16 sps:$4 sm:$0xff] (!%p295_p9)   ;;  %v7731_v14 = vld [vmem:[%s10312_s1 + $0x6c] ss:$16 sps:$4 sm:$0xff] (!%p295_p9)  }
  0x15   : > { %v7733_v15 = vld [vmem:[%s10312_s1 + $0x60] ss:$16 sps:$4 sm:$0xff] (!%p295_p9)   ;;  %v7734_v16 = vld [vmem:[%s10312_s1 + $0x68] ss:$16 sps:$4 sm:$0xff] (!%p295_p9)   ;;  %v7735_v17 = vld [vmem:[%s10312_s1 + $0x84] ss:$16 sps:$4 sm:$0xff] (!%p295_p9)  }
  0x16   : > { %1925 = vmatpush1.bf16.msra.mxu0 (!%p295_p9), %v7721_v7  ;;  %2697 = vmatpush1.bf16.msra.mxu1 (!%p295_p9), %v7722_v8  ;;  %v7737_v18 = vld [vmem:[%s10312_s1 + $0x8c] ss:$16 sps:$4 sm:$0xff] (!%p295_p9)   ;;  %v7739_v19 = vld [vmem:[%s10312_s1 + $0x80] ss:$16 sps:$4 sm:$0xff] (!%p295_p9)   ;;  %v7740_v20 = vld [vmem:[%s10312_s1 + $0x88] ss:$16 sps:$4 sm:$0xff] (!%p295_p9)  }
  0x17   : > { %1926 = vmatprep.subr.bf16.mxu0 (!%p295_p9), %v7723_v9  ;;  %2698 = vmatprep.subr.bf16.mxu1 (!%p295_p9), %v7725_v10  ;;  %v7741_v21 = vld [vmem:[%s10312_s1 + $0xa4] ss:$16 sps:$4 sm:$0xff] (!%p295_p9)   ;;  %v7743_v22 = vld [vmem:[%s10312_s1 + $0xac] ss:$16 sps:$4 sm:$0xff] (!%p295_p9)   ;;  %v7745_v23 = vld [vmem:[%s10312_s1 + $0xa0] ss:$16 sps:$4 sm:$0xff] (!%p295_p9)  }
  0x18   : > { %v7746_v24 = vld [vmem:[%s10312_s1 + $0xa8] ss:$16 sps:$4 sm:$0xff]   ;;  %v7747_v25 = vld [vmem:[%s10312_s1 + $0xc4] ss:$16 sps:$4 sm:$0xff]   ;;  %v7749_v26 = vld [vmem:[%s10312_s1 + $0xcc] ss:$16 sps:$4 sm:$0xff]  }
  0x19   : > { %v7751_v27 = vld [vmem:[%s10312_s1 + $0xc0] ss:$16 sps:$4 sm:$0xff]   ;;  %v7752_v28 = vld [vmem:[%s10312_s1 + $0xc8] ss:$16 sps:$4 sm:$0xff]   ;;  %v7753_v29 = vld [vmem:[%s10312_s1 + $0xe4] ss:$16 sps:$4 sm:$0xff]  }
  0x1a   : > { %1927 = vmatpush1.bf16.msra.mxu0 %v7727_v11  ;;  %2699 = vmatpush1.bf16.msra.mxu1 %v7728_v12  ;;  %v7755_v30 = vld [vmem:[%s10312_s1 + $0xec] ss:$16 sps:$4 sm:$0xff]   ;;  %v7757_v31 = vld [vmem:[%s10312_s1 + $0xe0] ss:$16 sps:$4 sm:$0xff]   ;;  %p332_p10 = scmp.lt.s32.totalorder %s8485_s28, 63  ;;  %vm1873_vm0 = vcmask 130048  }
  0x1b   : > { %1928 = vmatprep.subr.bf16.mxu0 %v7729_v13  ;;  %2700 = vmatprep.subr.bf16.mxu1 %v7731_v14  ;;  %v7758_v32 = vld [vmem:[%s10312_s1 + $0xe8] ss:$16 sps:$4 sm:$0xff]   ;;  %v7759_v33 = vld [vmem:[%s10312_s1 + $0x104] ss:$16 sps:$4 sm:$0xff]   ;;  %v7761_v34 = vld [vmem:[%s10312_s1 + $0x10c] ss:$16 sps:$4 sm:$0xff]  }
  0x1c   : > { %v7763_v35 = vld [vmem:[%s10312_s1 + $0x100] ss:$16 sps:$4 sm:$0xff]   ;;  %v7764_v36 = vld [vmem:[%s10312_s1 + $0x108] ss:$16 sps:$4 sm:$0xff]   ;;  %s333_s30 = scalar_select %p332_p10, %s8485_s28, 63 }
  0x1d   : > { %v7765_v37 = vld [vmem:[%s10312_s1 + $0x124] ss:$16 sps:$4 sm:$0xff]   ;;  %v7767_v38 = vld [vmem:[%s10312_s1 + $0x12c] ss:$16 sps:$4 sm:$0xff]   ;;  %v7769_v39 = vld [vmem:[%s10312_s1 + $0x120] ss:$16 sps:$4 sm:$0xff]  }
  0x1e   : > { %1929 = vmatpush1.bf16.msra.mxu0 %v7733_v15  ;;  %2701 = vmatpush1.bf16.msra.mxu1 %v7734_v16  ;;  %s7668_s23 = smul.u32 56, %s333_s30  ;;  %v7770_v40 = vld [vmem:[%s10312_s1 + $0x128] ss:$16 sps:$4 sm:$0xff]   ;;  %v7771_v41 = vld [vmem:[%s10312_s1 + $0x144] ss:$16 sps:$4 sm:$0xff]   ;;  %s8295_s26 = smov [#allocation3]  }
  0x1f   : > { %1930 = vmatprep.subr.bf16.mxu0 %v7735_v17  ;;  %2702 = vmatprep.subr.bf16.mxu1 %v7737_v18  ;;  %v7773_v42 = vld [vmem:[%s10312_s1 + $0x14c] ss:$16 sps:$4 sm:$0xff]   ;;  %v7775_v43 = vld [vmem:[%s10312_s1 + $0x140] ss:$16 sps:$4 sm:$0xff]   ;;  %v7776_v44 = vld [vmem:[%s10312_s1 + $0x148] ss:$16 sps:$4 sm:$0xff]  }
  0x20   : > { %s8537_s24 = scalar_lea.vmem %s10311_s0, %s7668_s23  ;;  %v7777_v45 = vld [vmem:[%s10312_s1 + $0x164] ss:$16 sps:$4 sm:$0xff]   ;;  %v7779_v46 = vld [vmem:[%s10312_s1 + $0x16c] ss:$16 sps:$4 sm:$0xff]   ;;  %v7781_v49 = vld [vmem:[%s10312_s1 + $0x160] ss:$16 sps:$4 sm:$0xff]  }
  0x21   : > { %v340_v47 = vld [vmem:[%s8537_s24 + $0x8] sm:$0xff]  ;;  %v347_v48 = vld [vmem:[%s8537_s24 + $0x40] sm:$0xff]  ;;  %v346_v5 = vld [vmem:[%s8537_s24 + $0x38] sm:$0xff]  ;;  %s328_s23 = sand.u32 1, %s8283_s12   ;;  %s8233_s27 = sshll.u32 %s8295_s26, 4  ;;  %s8234_s27 = int_to_ptr.vmem [resolvable:$false] %s8233_s27 }
  0x22   : > { %1931 = vmatpush1.bf16.msra.mxu0 %v7739_v19  ;;  %2703 = vmatpush1.bf16.msra.mxu1 %v7740_v20  ;;  %v7782_v50 = vld [vmem:[%s10312_s1 + $0x168] ss:$16 sps:$4 sm:$0xff]   ;;  %v564_v51 = vpack.c.bf16 %v347_v48, %v340_v47  ;;  %v7783_v52 = vld [vmem:[%s10312_s1 + $0x184] ss:$16 sps:$4 sm:$0xff]   ;;  %v7785_v53 = vld [vmem:[%s10312_s1 + $0x18c] ss:$16 sps:$4 sm:$0xff]  }
  0x23   : > { %1932 = vmatprep.subr.bf16.mxu0 %v7741_v21  ;;  %2704 = vmatprep.subr.bf16.mxu1 %v7743_v22  ;;  %v7787_v54 = vld [vmem:[%s10312_s1 + $0x180] ss:$16 sps:$4 sm:$0xff]   ;;  %v7788_v55 = vld [vmem:[%s10312_s1 + $0x188] ss:$16 sps:$4 sm:$0xff]   ;;  %v7789_v56 = vld [vmem:[%s10312_s1 + $0x1a4] ss:$16 sps:$4 sm:$0xff]  }
  0x24   : > { %1954 = vmatprep.mubr.bf16.mxu0 %v564_v51  ;;  %2726 = vmatprep.mubr.bf16.mxu1 %v564_v51  ;;  %v7791_v57 = vld [vmem:[%s10312_s1 + $0x1ac] ss:$16 sps:$4 sm:$0xff]   ;;  %v7793_v58 = vld [vmem:[%s10312_s1 + $0x1a0] ss:$16 sps:$4 sm:$0xff]   ;;  %v7794_v59 = vld [vmem:[%s10312_s1 + $0x1a8] ss:$16 sps:$4 sm:$0xff]  }
  0x25   : > { %v7795_v60 = vld [vmem:[%s10312_s1 + $0x1c4] ss:$16 sps:$4 sm:$0xff]   ;;  %v7797_v61 = vld [vmem:[%s10312_s1 + $0x1cc] ss:$16 sps:$4 sm:$0xff]   ;;  %v7799_v62 = vld [vmem:[%s10312_s1 + $0x1c0] ss:$16 sps:$4 sm:$0xff]  }
  0x26   : > { %1933 = vmatpush1.bf16.msra.mxu0 %v7745_v23  ;;  %2705 = vmatpush1.bf16.msra.mxu1 %v7746_v24  ;;  %v7800_v63 = vld [vmem:[%s10312_s1 + $0x1c8] ss:$16 sps:$4 sm:$0xff]   ;;  %v7801_v0 = vld [vmem:[%s10312_s1 + $0x1e4] ss:$16 sps:$4 sm:$0xff]   ;;  %v7803_v1 = vld [vmem:[%s10312_s1 + $0x1ec] ss:$16 sps:$4 sm:$0xff]  }
  0x27   : > { %1934 = vmatprep.subr.bf16.mxu0 %v7747_v25  ;;  %2706 = vmatprep.subr.bf16.mxu1 %v7749_v26  ;;  %v7805_v2 = vld [vmem:[%s10312_s1 + $0x1e0] ss:$16 sps:$4 sm:$0xff]   ;;  %v7806_v3 = vld [vmem:[%s10312_s1 + $0x1e8] ss:$16 sps:$4 sm:$0xff]   ;;  %v7809_v8 = vld [vmem:[%s10312_s1 + $0x204] ss:$16 sps:$4 sm:$0xff]  }
  0x28   : > { %v339_v4 = vld [vmem:[%s8537_s24] sm:$0xff]  ;;  %v354_v6 = vld [vmem:[%s8537_s24 + $0x78] sm:$0xff]  ;;  %v361_v7 = vld [vmem:[%s8537_s24 + $0xb0] sm:$0xff]  ;;  %s6212_s10 = sshll.u32 %s328_s23, 1  ;;  %s6135_s22 = scalar_lea.sflag [#allocation4], %s328_s23 }
  0x29   : > { %v7812_v9 = vld [vmem:[%s10312_s1 + $0x20c] ss:$16 sps:$4 sm:$0xff]   ;;  %v563_v10 = vpack.c.bf16 %v346_v5, %v339_v4  ;;  %v571_v11 = vpack.c.bf16 %v361_v7, %v354_v6  ;;  %v7807_v12 = vld [vmem:[%s10312_s1 + $0x200] ss:$16 sps:$4 sm:$0xff]   ;;  %v7810_v13 = vld [vmem:[%s10312_s1 + $0x208] ss:$16 sps:$4 sm:$0xff]  }
  0x2a   : > { %1935 = vmatpush1.bf16.msra.mxu0 %v7751_v27  ;;  %2707 = vmatpush1.bf16.msra.mxu1 %v7752_v28  ;;  %v353_v14 = vld [vmem:[%s8537_s24 + $0x70] sm:$0xff]  ;;  %v7818_v16 = vld [vmem:[%s10312_s1 + $0x22c] ss:$16 sps:$4 sm:$0xff]   ;;  %v375_v19 = vld [vmem:[%s8537_s24 + $0x120] sm:$0xff]  ;;  %s330_s15 = scalar_lea.vmem [#allocation3], %s6212_s10  ;;  %s8235_s29 = scalar_lea.vmem %s8234_s27, 64 }
  0x2b   : > { %1936 = vmatprep.subr.bf16.mxu0 %v7753_v29  ;;  %2708 = vmatprep.subr.bf16.mxu1 %v7755_v30  ;;  %v7815_v15 = vld [vmem:[%s10312_s1 + $0x224] ss:$16 sps:$4 sm:$0xff]   ;;  %v360_v17 = vld [vmem:[%s8537_s24 + $0xa8] sm:$0xff]  ;;  %v7813_v20 = vld [vmem:[%s10312_s1 + $0x220] ss:$16 sps:$4 sm:$0xff]   ;;  %s6149_s17 = sshll.u32 %s330_s15, 4  ;;  %s10271_s17 = int_to_ptr.vmem [resolvable:$true] %s6149_s17 }
  0x2c   : > { %v368_v18 = vld [vmem:[%s8537_s24 + $0xe8] sm:$0xff]  ;;  %v7821_v22 = vld [vmem:[%s10312_s1 + $0x244] ss:$16 sps:$4 sm:$0xff]   ;;  %v570_v24 = vpack.c.bf16 %v360_v17, %v353_v14  ;;  %v7819_v26 = vld [vmem:[%s10312_s1 + $0x240] ss:$16 sps:$4 sm:$0xff]   ;;  %s8229_s25 = scalar_lea.vmem %s10271_s17, 32  ;;  %p8236_p0 = scmp.lt.s32.totalorder %s10271_s17, %s8234_s27 }
  0x2d   : > { %v7816_v21 = vld [vmem:[%s10312_s1 + $0x228] ss:$16 sps:$4 sm:$0xff]   ;;  %v7824_v23 = vld [vmem:[%s10312_s1 + $0x24c] ss:$16 sps:$4 sm:$0xff]   ;;  %v578_v25 = vpack.c.bf16 %v375_v19, %v368_v18  ;;  %v367_v28 = vld [vmem:[%s8537_s24 + $0xe0] sm:$0xff]  ;;  %p8230_p11 = scmp.ne.s32.totalorder %s10271_s17, %s8229_s25  ;;  %p8237_p1 = scmp.lt.s32.totalorder %s8235_s29, %s8229_s25 }
  0x2e   : > { %1937 = vmatpush1.bf16.msra.mxu0 %v7757_v31  ;;  %2709 = vmatpush1.bf16.msra.mxu1 %v7758_v32  ;;  %v7822_v27 = vld [vmem:[%s10312_s1 + $0x248] ss:$16 sps:$4 sm:$0xff]   ;;  %v7827_v30 = vld [vmem:[%s10312_s1 + $0x264] ss:$16 sps:$4 sm:$0xff]   ;;  %v7830_v31 = vld [vmem:[%s10312_s1 + $0x26c] ss:$16 sps:$4 sm:$0xff]  }
  0x2f   : > { %1938 = vmatprep.subr.bf16.mxu0 %v7759_v33  ;;  %2710 = vmatprep.subr.bf16.mxu1 %v7761_v34  ;;  %v374_v29 = vld [vmem:[%s8537_s24 + $0x118] sm:$0xff]  ;;  %v389_v33 = vld [vmem:[%s8537_s24 + $0x190] sm:$0xff]  ;;  %v403_v47 = vld [vmem:[%s8537_s24 + $0x200] sm:$0xff]  ;;  %p8231_p12 = pnand %p8230_p11, %p8386_p5  ;;  %p8238_p2 = por %p8237_p1, %p8236_p0 }
  0x30   : > { %v382_v32 = vld [vmem:[%s8537_s24 + $0x158] sm:$0xff]  ;;  %v7825_v34 = vld [vmem:[%s10312_s1 + $0x260] ss:$16 sps:$4 sm:$0xff]   ;;  %v7863_v6 = vld [vmem:[%s10312_s1 + $0x324] ss:$16 sps:$4 sm:$0xff]  }
  0x31   : > { %v7837_v48 = vld [vmem:[%s10312_s1 + $0x2a0] ss:$16 sps:$4 sm:$0xff]   ;;  %v7848_v51 = vld [vmem:[%s10312_s1 + $0x2cc] ss:$16 sps:$4 sm:$0xff]   ;;  %v7858_v5 = vld [vmem:[%s10312_s1 + $0x308] ss:$16 sps:$4 sm:$0xff]   ;;  %p8232_p13 = pneg %p8231_p12 }
  0x32   : > { %1939 = vmatpush1.bf16.msra.mxu0 %v7763_v35  ;;  %2711 = vmatpush1.bf16.msra.mxu1 %v7764_v36  ;;  %v7828_v35 = vld [vmem:[%s10312_s1 + $0x268] ss:$16 sps:$4 sm:$0xff]   ;;  %v7833_v36 = vld [vmem:[%s10312_s1 + $0x284] ss:$16 sps:$4 sm:$0xff]   ;;  %v7855_v4 = vld [vmem:[%s10312_s1 + $0x300] ss:$16 sps:$4 sm:$0xff]  }
  0x33   : > { %1940 = vmatprep.subr.bf16.mxu0 %v7765_v37  ;;  %2712 = vmatprep.subr.bf16.mxu1 %v7767_v38  ;;  %v7836_v37 = vld [vmem:[%s10312_s1 + $0x28c] ss:$16 sps:$4 sm:$0xff]   ;;  %v577_v38 = vpack.c.bf16 %v374_v29, %v367_v28  ;;  %v7869_v14 = vld [vmem:[%s10312_s1 + $0x344] ss:$16 sps:$4 sm:$0xff]   ;;  %v7867_v18 = vld [vmem:[%s10312_s1 + $0x340] ss:$16 sps:$4 sm:$0xff]   ;;  %p8239_p3 = pnand %p8238_p2, %p8232_p13 }
  0x34   : > { %v7866_v7 = vld [vmem:[%s10312_s1 + $0x32c] ss:$16 sps:$4 sm:$0xff]   ;;  %v7870_v19 = vld [vmem:[%s10312_s1 + $0x348] ss:$16 sps:$4 sm:$0xff]   ;;  %v7881_v28 = vld [vmem:[%s10312_s1 + $0x384] ss:$16 sps:$4 sm:$0xff]  }
  0x35   : > { %v7884_v29 = vld [vmem:[%s10312_s1 + $0x38c] ss:$16 sps:$4 sm:$0xff]  }
  0x36   : > { %1941 = vmatpush1.bf16.msra.mxu0 %v7769_v39  ;;  %2713 = vmatpush1.bf16.msra.mxu1 %v7770_v40  ;;  %v585_v39 = vpack.c.bf16 %v389_v33, %v382_v32  ;;  %v7831_v40 = vld [vmem:[%s10312_s1 + $0x280] ss:$16 sps:$4 sm:$0xff]   ;;  %v7882_v33 = vld [vmem:[%s10312_s1 + $0x388] ss:$16 sps:$4 sm:$0xff]  }
  0x37   : > { %1942 = vmatprep.subr.bf16.mxu0 %v7771_v41  ;;  %2714 = vmatprep.subr.bf16.mxu1 %v7773_v42  ;;  %v7834_v41 = vld [vmem:[%s10312_s1 + $0x288] ss:$16 sps:$4 sm:$0xff]   ;;  %v381_v42 = vld [vmem:[%s8537_s24 + $0x150] sm:$0xff] }
  0x38   : > { %v7879_v32 = vld [vmem:[%s10312_s1 + $0x380] ss:$16 sps:$4 sm:$0xff]  }
  0x3a   : > { %1943 = vmatpush1.bf16.msra.mxu0 %v7775_v43  ;;  %2715 = vmatpush1.bf16.msra.mxu1 %v7776_v44  ;;  %v388_v43 = vld [vmem:[%s8537_s24 + $0x188] sm:$0xff]  ;;  %v7839_v44 = vld [vmem:[%s10312_s1 + $0x2a4] ss:$16 sps:$4 sm:$0xff]  }
  0x3b   : > { %1944 = vmatprep.subr.bf16.mxu0 %v7777_v45  ;;  %2716 = vmatprep.subr.bf16.mxu1 %v7779_v46  ;;  %v7842_v45 = vld [vmem:[%s10312_s1 + $0x2ac] ss:$16 sps:$4 sm:$0xff]  }
  0x3c   : > { %v396_v46 = vld [vmem:[%s8537_s24 + $0x1c8] sm:$0xff] }
  0x3e   : > { %1945 = vmatpush1.bf16.msra.mxu0 %v7781_v49  ;;  %2717 = vmatpush1.bf16.msra.mxu1 %v7782_v50  ;;  %v7840_v49 = vld [vmem:[%s10312_s1 + $0x2a8] ss:$16 sps:$4 sm:$0xff]   ;;  %v7845_v50 = vld [vmem:[%s10312_s1 + $0x2c4] ss:$16 sps:$4 sm:$0xff]  }
  0x3f   : > { %1946 = vmatprep.subr.bf16.mxu0 %v7783_v52  ;;  %2718 = vmatprep.subr.bf16.mxu1 %v7785_v53  ;;  %v584_v52 = vpack.c.bf16 %v388_v43, %v381_v42  ;;  %v592_v53 = vpack.c.bf16 %v403_v47, %v396_v46  ;;  %v7893_v42 = vld [vmem:[%s10312_s1 + $0x3c4] ss:$16 sps:$4 sm:$0xff]   ;;  %v7896_v43 = vld [vmem:[%s10312_s1 + $0x3cc] ss:$16 sps:$4 sm:$0xff]   ;;  %v7894_v46 = vld [vmem:[%s10312_s1 + $0x3c8] ss:$16 sps:$4 sm:$0xff]  }
  0x42   : > { %1947 = vmatpush1.bf16.msra.mxu0 %v7787_v54  ;;  %2719 = vmatpush1.bf16.msra.mxu1 %v7788_v55  ;;  %v7843_v54 = vld [vmem:[%s10312_s1 + $0x2c0] ss:$16 sps:$4 sm:$0xff]   ;;  %v7846_v55 = vld [vmem:[%s10312_s1 + $0x2c8] ss:$16 sps:$4 sm:$0xff]  }
  0x43   : > { %1948 = vmatprep.subr.bf16.mxu0 %v7789_v56  ;;  %2720 = vmatprep.subr.bf16.mxu1 %v7791_v57  ;;  %v7851_v56 = vld [vmem:[%s10312_s1 + $0x2e4] ss:$16 sps:$4 sm:$0xff]   ;;  %v7854_v57 = vld [vmem:[%s10312_s1 + $0x2ec] ss:$16 sps:$4 sm:$0xff]  }
  0x46   : > { %1949 = vmatpush1.bf16.msra.mxu0 %v7793_v58  ;;  %2721 = vmatpush1.bf16.msra.mxu1 %v7794_v59  ;;  %v395_v58 = vld [vmem:[%s8537_s24 + $0x1c0] sm:$0xff]  ;;  %v402_v59 = vld [vmem:[%s8537_s24 + $0x1f8] sm:$0xff] }
  0x47   : > { %1950 = vmatprep.subr.bf16.mxu0 %v7795_v60  ;;  %2722 = vmatprep.subr.bf16.mxu1 %v7797_v61  ;;  %v410_v60 = vld [vmem:[%s8537_s24 + $0x238] sm:$0xff]  ;;  %v417_v61 = vld [vmem:[%s8537_s24 + $0x270] sm:$0xff] }
  0x4a   : > { %1951 = vmatpush1.bf16.msra.mxu0 %v7799_v62  ;;  %2723 = vmatpush1.bf16.msra.mxu1 %v7800_v63  ;;  %v7849_v62 = vld [vmem:[%s10312_s1 + $0x2e0] ss:$16 sps:$4 sm:$0xff]   ;;  %v7852_v63 = vld [vmem:[%s10312_s1 + $0x2e8] ss:$16 sps:$4 sm:$0xff]  }
  0x4b   : > { %1952 = vmatprep.subr.bf16.mxu0 %v7801_v0  ;;  %2724 = vmatprep.subr.bf16.mxu1 %v7803_v1  ;;  %v7857_v0 = vld [vmem:[%s10312_s1 + $0x304] ss:$16 sps:$4 sm:$0xff]   ;;  %v7860_v1 = vld [vmem:[%s10312_s1 + $0x30c] ss:$16 sps:$4 sm:$0xff]  }
  0x4e   : > { %1953 = vmatpush1.bf16.msra.mxu0 %v7805_v2  ;;  %2725 = vmatpush1.bf16.msra.mxu1 %v7806_v3  ;;  %v591_v2 = vpack.c.bf16 %v402_v59, %v395_v58  ;;  %v599_v3 = vpack.c.bf16 %v417_v61, %v410_v60  ;;  %v7905_v58 = vld [vmem:[%s10312_s1 + $0x404] ss:$16 sps:$4 sm:$0xff]   ;;  %v7908_v59 = vld [vmem:[%s10312_s1 + $0x40c] ss:$16 sps:$4 sm:$0xff]  }
  0x4f   : > { %2115 = vmatprep.subr.bf16.mxu0 %v7809_v8  ;;  %2887 = vmatprep.subr.bf16.mxu1 %v7812_v9  ;;  %v409_v8 = vld [vmem:[%s8537_s24 + $0x230] sm:$0xff]  ;;  %v416_v9 = vld [vmem:[%s8537_s24 + $0x268] sm:$0xff] }
  0x50   : > { %v465_v60 = vld [vmem:[%s8537_s24 + $0x3f0] sm:$0xff]  ;;  %v472_v61 = vld [vmem:[%s8537_s24 + $0x428] sm:$0xff] }
  0x51   : > { %1955 = vmatmul.mubr.bf16.vlgmr.msra.gmra.mrb[0].mxu0 %v563_v10  ;;  %2727 = vmatmul.mubr.bf16.vlgmr.msra.gmra.mrb[0].mxu1 %v563_v10  ;;  %v424_v10 = vld [vmem:[%s8537_s24 + $0x2a8] sm:$0xff] }
  0x52   : > { %1964 = vmatprep.mubr.bf16.mxu0 %v571_v11  ;;  %2736 = vmatprep.mubr.bf16.mxu1 %v571_v11  ;;  %v431_v11 = vld [vmem:[%s8537_s24 + $0x2e0] sm:$0xff] }
  0x53   : > { %2116 = vmatpush1.bf16.msra.mxu0 %v7807_v12  ;;  %2888 = vmatpush1.bf16.msra.mxu1 %v7810_v13  ;;  %v7861_v12 = vld [vmem:[%s10312_s1 + $0x320] ss:$16 sps:$4 sm:$0xff]   ;;  %v7864_v13 = vld [vmem:[%s10312_s1 + $0x328] ss:$16 sps:$4 sm:$0xff]   ;;  %v606_v17 = vpack.c.bf16 %v431_v11, %v424_v10 }
  0x54   : > { %2117 = vmatprep.subr.bf16.mxu0 %v7815_v15  ;;  %2889 = vmatprep.subr.bf16.mxu1 %v7818_v16  ;;  %v7872_v15 = vld [vmem:[%s10312_s1 + $0x34c] ss:$16 sps:$4 sm:$0xff]   ;;  %v598_v16 = vpack.c.bf16 %v416_v9, %v409_v8  ;;  %v493_v8 = vld [vmem:[%s8537_s24 + $0x4d0] sm:$0xff]  ;;  %v515_v11 = vld [vmem:[%s8537_s24 + $0x580] sm:$0xff] }
  0x55   : > { %v500_v9 = vld [vmem:[%s8537_s24 + $0x508] sm:$0xff] }
  0x56   : > { %v508_v10 = vld [vmem:[%s8537_s24 + $0x548] sm:$0xff] }
  0x57   : > { %2118 = vmatpush1.bf16.msra.mxu0 %v7813_v20  ;;  %2890 = vmatpush1.bf16.msra.mxu1 %v7816_v21  ;;  %v7875_v20 = vld [vmem:[%s10312_s1 + $0x364] ss:$16 sps:$4 sm:$0xff]   ;;  %v7878_v21 = vld [vmem:[%s10312_s1 + $0x36c] ss:$16 sps:$4 sm:$0xff]  }
  0x58   : > { %2119 = vmatprep.subr.bf16.mxu0 %v7821_v22  ;;  %2891 = vmatprep.subr.bf16.mxu1 %v7824_v23  ;;  %v423_v22 = vld [vmem:[%s8537_s24 + $0x2a0] sm:$0xff]  ;;  %v430_v23 = vld [vmem:[%s8537_s24 + $0x2d8] sm:$0xff] }
  0x59   : > { %1965 = vmatmul.mubr.bf16.gmra.mrb[4].mxu0 %v570_v24  ;;  %2737 = vmatmul.mubr.bf16.gmra.mrb[4].mxu1 %v570_v24  ;;  %v438_v24 = vld [vmem:[%s8537_s24 + $0x318] sm:$0xff] }
  0x5a   : > { %1974 = vmatprep.mubr.bf16.mxu0 %v578_v25  ;;  %2746 = vmatprep.mubr.bf16.mxu1 %v578_v25  ;;  %v445_v25 = vld [vmem:[%s8537_s24 + $0x350] sm:$0xff] }
  0x5b   : > { %2120 = vmatpush1.bf16.msra.mxu0 %v7819_v26  ;;  %2892 = vmatpush1.bf16.msra.mxu1 %v7822_v27  ;;  %v7873_v26 = vld [vmem:[%s10312_s1 + $0x360] ss:$16 sps:$4 sm:$0xff]   ;;  %v7876_v27 = vld [vmem:[%s10312_s1 + $0x368] ss:$16 sps:$4 sm:$0xff]  }
  0x5c   : > { %2121 = vmatprep.subr.bf16.mxu0 %v7827_v30  ;;  %2893 = vmatprep.subr.bf16.mxu1 %v7830_v31  ;;  %v605_v30 = vpack.c.bf16 %v430_v23, %v423_v22  ;;  %v613_v31 = vpack.c.bf16 %v445_v25, %v438_v24  ;;  %v536_v22 = vld [vmem:[%s8537_s24 + $0x628] sm:$0xff]  ;;  %v543_v23 = vld [vmem:[%s8537_s24 + $0x660] sm:$0xff] }
  0x5d   : > { %v662_v25 = vpack.c.bf16 %v543_v23, %v536_v22  ;;  %v7942_v22 = vld [vmem:[%s10312_s1 + $0x4c8] ss:$16 sps:$4 sm:$0xff]  }
  0x5f   : > { %2122 = vmatpush1.bf16.msra.mxu0 %v7825_v34  ;;  %2894 = vmatpush1.bf16.msra.mxu1 %v7828_v35  ;;  %v437_v34 = vld [vmem:[%s8537_s24 + $0x310] sm:$0xff] }
  0x60   : > { %2123 = vmatprep.subr.bf16.mxu0 %v7833_v36  ;;  %2895 = vmatprep.subr.bf16.mxu1 %v7836_v37  ;;  %v7887_v35 = vld [vmem:[%s10312_s1 + $0x3a4] ss:$16 sps:$4 sm:$0xff]   ;;  %v7890_v36 = vld [vmem:[%s10312_s1 + $0x3ac] ss:$16 sps:$4 sm:$0xff]  }
  0x61   : > { %1975 = vmatmul.mubr.bf16.gmra.mrb[8].mxu0 %v577_v38  ;;  %2747 = vmatmul.mubr.bf16.gmra.mrb[8].mxu1 %v577_v38  ;;  %v444_v37 = vld [vmem:[%s8537_s24 + $0x348] sm:$0xff] }
  0x62   : > { %1984 = vmatprep.mubr.bf16.mxu0 %v585_v39  ;;  %2756 = vmatprep.mubr.bf16.mxu1 %v585_v39  ;;  %v452_v38 = vld [vmem:[%s8537_s24 + $0x388] sm:$0xff]  ;;  %v459_v39 = vld [vmem:[%s8537_s24 + $0x3c0] sm:$0xff] }
  0x63   : > { %2124 = vmatpush1.bf16.msra.mxu0 %v7831_v40  ;;  %2896 = vmatpush1.bf16.msra.mxu1 %v7834_v41  ;;  %v7885_v40 = vld [vmem:[%s10312_s1 + $0x3a0] ss:$16 sps:$4 sm:$0xff]   ;;  %v7888_v41 = vld [vmem:[%s10312_s1 + $0x3a8] ss:$16 sps:$4 sm:$0xff]   ;;  %v620_v47 = vpack.c.bf16 %v459_v39, %v452_v38 }
  0x64   : > { %2125 = vmatprep.subr.bf16.mxu0 %v7839_v44  ;;  %2897 = vmatprep.subr.bf16.mxu1 %v7842_v45  ;;  %v612_v44 = vpack.c.bf16 %v444_v37, %v437_v34  ;;  %v7891_v45 = vld [vmem:[%s10312_s1 + $0x3c0] ss:$16 sps:$4 sm:$0xff]   ;;  %v342_v34 = vld [vmem:[%s8537_s24 + $0x18] sm:$0xff]  ;;  %v348_v39 = vld [vmem:[%s8537_s24 + $0x48] sm:$0xff] }
  0x65   : > { %v341_v38 = vld [vmem:[%s8537_s24 + $0x10] sm:$0xff] }
  0x67   : > { %2126 = vmatpush1.bf16.msra.mxu0 %v7837_v48  ;;  %2898 = vmatpush1.bf16.msra.mxu1 %v7840_v49  ;;  %v7899_v48 = vld [vmem:[%s10312_s1 + $0x3e4] ss:$16 sps:$4 sm:$0xff]   ;;  %v7902_v49 = vld [vmem:[%s10312_s1 + $0x3ec] ss:$16 sps:$4 sm:$0xff]  }
  0x68   : > { %2127 = vmatprep.subr.bf16.mxu0 %v7845_v50  ;;  %2899 = vmatprep.subr.bf16.mxu1 %v7848_v51  ;;  %v451_v50 = vld [vmem:[%s8537_s24 + $0x380] sm:$0xff]  ;;  %v458_v51 = vld [vmem:[%s8537_s24 + $0x3b8] sm:$0xff] }
  0x69   : > { %1985 = vmatmul.mubr.bf16.gmra.mrb[12].mxu0 %v584_v52  ;;  %2757 = vmatmul.mubr.bf16.gmra.mrb[12].mxu1 %v584_v52  ;;  %v466_v52 = vld [vmem:[%s8537_s24 + $0x3f8] sm:$0xff] }
  0x6a   : > { %1994 = vmatprep.mubr.bf16.mxu0 %v592_v53  ;;  %2766 = vmatprep.mubr.bf16.mxu1 %v592_v53  ;;  %v473_v53 = vld [vmem:[%s8537_s24 + $0x430] sm:$0xff] }
  0x6b   : > { %2128 = vmatpush1.bf16.msra.mxu0 %v7843_v54  ;;  %2900 = vmatpush1.bf16.msra.mxu1 %v7846_v55  ;;  %v7897_v54 = vld [vmem:[%s10312_s1 + $0x3e0] ss:$16 sps:$4 sm:$0xff]   ;;  %v7900_v55 = vld [vmem:[%s10312_s1 + $0x3e8] ss:$16 sps:$4 sm:$0xff]  }
  0x6c   : > { %2129 = vmatprep.subr.bf16.mxu0 %v7851_v56  ;;  %2901 = vmatprep.subr.bf16.mxu1 %v7854_v57  ;;  %v619_v56 = vpack.c.bf16 %v458_v51, %v451_v50  ;;  %v627_v57 = vpack.c.bf16 %v473_v53, %v466_v52  ;;  %v370_v50 = vld [vmem:[%s8537_s24 + $0xf8] sm:$0xff]  ;;  %v377_v51 = vld [vmem:[%s8537_s24 + $0x130] sm:$0xff] }
  0x6d   : > { %v7909_v52 = vld [vmem:[%s10312_s1 + $0x420] ss:$16 sps:$4 sm:$0xff]   ;;  %v7912_v53 = vld [vmem:[%s10312_s1 + $0x428] ss:$16 sps:$4 sm:$0xff]  }
  0x6f   : > { %2130 = vmatpush1.bf16.msra.mxu0 %v7849_v62  ;;  %2902 = vmatpush1.bf16.msra.mxu1 %v7852_v63  ;;  %v480_v62 = vld [vmem:[%s8537_s24 + $0x468] sm:$0xff]  ;;  %v487_v63 = vld [vmem:[%s8537_s24 + $0x4a0] sm:$0xff] }
  0x70   : > { %2131 = vmatprep.subr.bf16.mxu0 %v7857_v0  ;;  %2903 = vmatprep.subr.bf16.mxu1 %v7860_v1  ;;  %v626_v0 = vpack.c.bf16 %v472_v61, %v465_v60  ;;  %v634_v1 = vpack.c.bf16 %v487_v63, %v480_v62  ;;  %v7923_v60 = vld [vmem:[%s10312_s1 + $0x464] ss:$16 sps:$4 sm:$0xff]   ;;  %v7926_v61 = vld [vmem:[%s10312_s1 + $0x46c] ss:$16 sps:$4 sm:$0xff]  }
  0x71   : > { %1995 = vmatmul.mubr.bf16.gmra.mrb[16].mxu0 %v591_v2  ;;  %2767 = vmatmul.mubr.bf16.gmra.mrb[16].mxu1 %v591_v2  ;;  %v479_v2 = vld [vmem:[%s8537_s24 + $0x460] sm:$0xff]  ;;  %v369_v62 = vld [vmem:[%s8537_s24 + $0xf0] sm:$0xff]  ;;  %v376_v63 = vld [vmem:[%s8537_s24 + $0x128] sm:$0xff] }
  0x72   : > { %2004 = vmatprep.mubr.bf16.mxu0 %v599_v3  ;;  %2776 = vmatprep.mubr.bf16.mxu1 %v599_v3  ;;  %v486_v3 = vld [vmem:[%s8537_s24 + $0x498] sm:$0xff] }
  0x73   : > { %2132 = vmatpush1.bf16.msra.mxu0 %v7855_v4  ;;  %2904 = vmatpush1.bf16.msra.mxu1 %v7858_v5  ;;  %v494_v4 = vld [vmem:[%s8537_s24 + $0x4d8] sm:$0xff]  ;;  %v501_v5 = vld [vmem:[%s8537_s24 + $0x510] sm:$0xff] }
  0x74   : > { %2133 = vmatprep.subr.bf16.mxu0 %v7863_v6  ;;  %2905 = vmatprep.subr.bf16.mxu1 %v7866_v7  ;;  %v633_v6 = vpack.c.bf16 %v486_v3, %v479_v2  ;;  %v641_v7 = vpack.c.bf16 %v501_v5, %v494_v4  ;;  %v7921_v2 = vld [vmem:[%s10312_s1 + $0x460] ss:$16 sps:$4 sm:$0xff]   ;;  %v7924_v3 = vld [vmem:[%s10312_s1 + $0x468] ss:$16 sps:$4 sm:$0xff]   ;;  %v7929_v4 = vld [vmem:[%s10312_s1 + $0x484] ss:$16 sps:$4 sm:$0xff]  }
  0x75   : > { %v7932_v5 = vld [vmem:[%s10312_s1 + $0x48c] ss:$16 sps:$4 sm:$0xff]  }
  0x77   : > { %2134 = vmatpush1.bf16.msra.mxu0 %v7861_v12  ;;  %2906 = vmatpush1.bf16.msra.mxu1 %v7864_v13  ;;  %v640_v12 = vpack.c.bf16 %v500_v9, %v493_v8  ;;  %v648_v13 = vpack.c.bf16 %v515_v11, %v508_v10  ;;  %v7930_v8 = vld [vmem:[%s10312_s1 + $0x488] ss:$16 sps:$4 sm:$0xff]   ;;  %v7935_v10 = vld [vmem:[%s10312_s1 + $0x4a4] ss:$16 sps:$4 sm:$0xff]   ;;  %v7938_v11 = vld [vmem:[%s10312_s1 + $0x4ac] ss:$16 sps:$4 sm:$0xff]  }
  0x78   : > { %2135 = vmatprep.subr.bf16.mxu0 %v7869_v14  ;;  %2907 = vmatprep.subr.bf16.mxu1 %v7872_v15  ;;  %v507_v14 = vld [vmem:[%s8537_s24 + $0x540] sm:$0xff]  ;;  %v514_v15 = vld [vmem:[%s8537_s24 + $0x578] sm:$0xff] }
  0x79   : > { %2005 = vmatmul.mubr.bf16.gmra.mrb[20].mxu0 %v598_v16  ;;  %2777 = vmatmul.mubr.bf16.gmra.mrb[20].mxu1 %v598_v16  ;;  %v522_v16 = vld [vmem:[%s8537_s24 + $0x5b8] sm:$0xff] }
  0x7a   : > { %2014 = vmatprep.mubr.bf16.mxu0 %v606_v17  ;;  %2786 = vmatprep.mubr.bf16.mxu1 %v606_v17  ;;  %v529_v17 = vld [vmem:[%s8537_s24 + $0x5f0] sm:$0xff] }
  0x7b   : > { %2136 = vmatpush1.bf16.msra.mxu0 %v7867_v18  ;;  %2908 = vmatpush1.bf16.msra.mxu1 %v7870_v19  ;;  %v647_v18 = vpack.c.bf16 %v514_v15, %v507_v14  ;;  %v655_v19 = vpack.c.bf16 %v529_v17, %v522_v16  ;;  %v398_v14 = vld [vmem:[%s8537_s24 + $0x1d8] sm:$0xff]  ;;  %v405_v15 = vld [vmem:[%s8537_s24 + $0x210] sm:$0xff] }
  0x7c   : > { %2137 = vmatprep.subr.bf16.mxu0 %v7875_v20  ;;  %2909 = vmatprep.subr.bf16.mxu1 %v7878_v21  ;;  %v521_v20 = vld [vmem:[%s8537_s24 + $0x5b0] sm:$0xff]  ;;  %v528_v21 = vld [vmem:[%s8537_s24 + $0x5e8] sm:$0xff]  ;;  %v594_v23 = vpack.c.bf16 %v405_v15, %v398_v14 }
  0x7d   : > { %v654_v24 = vpack.c.bf16 %v528_v21, %v521_v20  ;;  %v7933_v16 = vld [vmem:[%s10312_s1 + $0x4a0] ss:$16 sps:$4 sm:$0xff]   ;;  %v7936_v17 = vld [vmem:[%s10312_s1 + $0x4a8] ss:$16 sps:$4 sm:$0xff]  }
  0x7e   : > { %v7939_v21 = vld [vmem:[%s10312_s1 + $0x4c0] ss:$16 sps:$4 sm:$0xff]   ;;  %v7990_v15 = vld [vmem:[%s10312_s1 + $0x5c8] ss:$16 sps:$4 sm:$0xff]  }
  0x7f   : > { %2138 = vmatpush1.bf16.msra.mxu0 %v7873_v26  ;;  %2910 = vmatpush1.bf16.msra.mxu1 %v7876_v27  ;;  %v535_v26 = vld [vmem:[%s8537_s24 + $0x620] sm:$0xff]  ;;  %v542_v27 = vld [vmem:[%s8537_s24 + $0x658] sm:$0xff] }
  0x80   : > { %2139 = vmatprep.subr.bf16.mxu0 %v7881_v28  ;;  %2911 = vmatprep.subr.bf16.mxu1 %v7884_v29  ;;  %v550_v28 = vld [vmem:[%s8537_s24 + $0x698] sm:$0xff]  ;;  %v557_v29 = vld [vmem:[%s8537_s24 + $0x6d0] sm:$0xff] }
  0x81   : > { %2015 = vmatmul.mubr.bf16.gmra.mrb[24].mxu0 %v605_v30  ;;  %2787 = vmatmul.mubr.bf16.gmra.mrb[24].mxu1 %v605_v30  ;;  %v661_v30 = vpack.c.bf16 %v542_v27, %v535_v26  ;;  %v397_v26 = vld [vmem:[%s8537_s24 + $0x1d0] sm:$0xff]  ;;  %v404_v27 = vld [vmem:[%s8537_s24 + $0x208] sm:$0xff] }
  0x82   : > { %2024 = vmatprep.mubr.bf16.mxu0 %v613_v31  ;;  %2796 = vmatprep.mubr.bf16.mxu1 %v613_v31  ;;  %v669_v31 = vpack.c.bf16 %v557_v29, %v550_v28  ;;  %v412_v28 = vld [vmem:[%s8537_s24 + $0x248] sm:$0xff]  ;;  %v419_v29 = vld [vmem:[%s8537_s24 + $0x280] sm:$0xff] }
  0x83   : > { %2140 = vmatpush1.bf16.msra.mxu0 %v7879_v32  ;;  %2912 = vmatpush1.bf16.msra.mxu1 %v7882_v33  ;;  %v549_v32 = vld [vmem:[%s8537_s24 + $0x690] sm:$0xff]  ;;  %v556_v33 = vld [vmem:[%s8537_s24 + $0x6c8] sm:$0xff] }
  0x84   : > { %2141 = vmatprep.subr.bf16.mxu0 %v7887_v35  ;;  %2913 = vmatprep.subr.bf16.mxu1 %v7890_v36  ;;  %v349_v35 = vld [vmem:[%s8537_s24 + $0x50] sm:$0xff]  ;;  %v668_v36 = vpack.c.bf16 %v556_v33, %v549_v32  ;;  %v7956_v33 = vld [vmem:[%s10312_s1 + $0x50c] ss:$16 sps:$4 sm:$0xff]  }
  0x85   : > { %v566_v37 = vpack.c.bf16 %v349_v35, %v342_v34  ;;  %v7953_v32 = vld [vmem:[%s10312_s1 + $0x504] ss:$16 sps:$4 sm:$0xff]   ;;  %v593_v34 = vpack.c.bf16 %v404_v27, %v397_v26  ;;  %v7951_v35 = vld [vmem:[%s10312_s1 + $0x500] ss:$16 sps:$4 sm:$0xff]  }
  0x86   : > { %v7987_v14 = vld [vmem:[%s10312_s1 + $0x5c0] ss:$16 sps:$4 sm:$0xff]   ;;  %v8001_v26 = vld [vmem:[%s10312_s1 + $0x604] ss:$16 sps:$4 sm:$0xff]  }
  0x87   : > { %2142 = vmatpush1.bf16.msra.mxu0 %v7885_v40  ;;  %2914 = vmatpush1.bf16.msra.mxu1 %v7888_v41  ;;  %v356_v40 = vld [vmem:[%s8537_s24 + $0x88] sm:$0xff]  ;;  %v363_v41 = vld [vmem:[%s8537_s24 + $0xc0] sm:$0xff] }
  0x88   : > { %2143 = vmatprep.subr.bf16.mxu0 %v7893_v42  ;;  %2915 = vmatprep.subr.bf16.mxu1 %v7896_v43  ;;  %v565_v42 = vpack.c.bf16 %v348_v39, %v341_v38  ;;  %v7903_v43 = vld [vmem:[%s10312_s1 + $0x400] ss:$16 sps:$4 sm:$0xff]   ;;  %v7959_v38 = vld [vmem:[%s10312_s1 + $0x524] ss:$16 sps:$4 sm:$0xff]   ;;  %v7962_v39 = vld [vmem:[%s10312_s1 + $0x52c] ss:$16 sps:$4 sm:$0xff]  }
  0x89   : > { %2025 = vmatmul.mubr.bf16.gmra.mrb[28].mxu0 %v612_v44  ;;  %2797 = vmatmul.mubr.bf16.gmra.mrb[28].mxu1 %v612_v44  ;;  %v7906_v44 = vld [vmem:[%s10312_s1 + $0x408] ss:$16 sps:$4 sm:$0xff]   ;;  %v467_v27 = vld [vmem:[%s8537_s24 + $0x400] sm:$0xff] }
  0x8a   : > { %2034 = vmatprep.mubr.bf16.mxu0 %v620_v47  ;;  %2806 = vmatprep.mubr.bf16.mxu1 %v620_v47  ;;  %v7914_v47 = vld [vmem:[%s10312_s1 + $0x42c] ss:$16 sps:$4 sm:$0xff]  }
  0x8b   : > { %2144 = vmatpush1.bf16.msra.mxu0 %v7891_v45  ;;  %2916 = vmatpush1.bf16.msra.mxu1 %v7894_v46  ;;  %v573_v45 = vpack.c.bf16 %v363_v41, %v356_v40  ;;  %v7911_v46 = vld [vmem:[%s10312_s1 + $0x424] ss:$16 sps:$4 sm:$0xff]   ;;  %v418_v41 = vld [vmem:[%s8537_s24 + $0x278] sm:$0xff] }
  0x8c   : > { %2145 = vmatprep.subr.bf16.mxu0 %v7899_v48  ;;  %2917 = vmatprep.subr.bf16.mxu1 %v7902_v49  ;;  %v355_v48 = vld [vmem:[%s8537_s24 + $0x80] sm:$0xff]  ;;  %v362_v49 = vld [vmem:[%s8537_s24 + $0xb8] sm:$0xff] }
  0x8d   : > { %v411_v40 = vld [vmem:[%s8537_s24 + $0x240] sm:$0xff] }
  0x8f   : > { %2146 = vmatpush1.bf16.msra.mxu0 %v7897_v54  ;;  %2918 = vmatpush1.bf16.msra.mxu1 %v7900_v55  ;;  %v7917_v54 = vld [vmem:[%s10312_s1 + $0x444] ss:$16 sps:$4 sm:$0xff]   ;;  %v7920_v55 = vld [vmem:[%s10312_s1 + $0x44c] ss:$16 sps:$4 sm:$0xff]  }
  0x90   : > { %2308 = vmatprep.subr.bf16.mxu0 %v7905_v58  ;;  %3080 = vmatprep.subr.bf16.mxu1 %v7908_v59  ;;  %v7918_v58 = vld [vmem:[%s10312_s1 + $0x448] ss:$16 sps:$4 sm:$0xff]   ;;  %v580_v59 = vpack.c.bf16 %v377_v51, %v370_v50 }
  0x91   : > { %2035 = vmatmul.mubr.bf16.gmra.mrb[32].mxu0 %v619_v56  ;;  %2807 = vmatmul.mubr.bf16.gmra.mrb[32].mxu1 %v619_v56  ;;  %v572_v56 = vpack.c.bf16 %v362_v49, %v355_v48  ;;  %v600_v48 = vpack.c.bf16 %v418_v41, %v411_v40  ;;  %v7963_v49 = vld [vmem:[%s10312_s1 + $0x540] ss:$16 sps:$4 sm:$0xff]   ;;  %v7966_v50 = vld [vmem:[%s10312_s1 + $0x548] ss:$16 sps:$4 sm:$0xff]  }
  0x92   : > { %2044 = vmatprep.mubr.bf16.mxu0 %v627_v57  ;;  %2816 = vmatprep.mubr.bf16.mxu1 %v627_v57  ;;  %v7915_v57 = vld [vmem:[%s10312_s1 + $0x440] ss:$16 sps:$4 sm:$0xff]   ;;  %v502_v40 = vld [vmem:[%s8537_s24 + $0x518] sm:$0xff] }
  0x93   : > { %v510_v41 = vld [vmem:[%s8537_s24 + $0x558] sm:$0xff] }
  0x99   : > { %2045 = vmatmul.mubr.bf16.gmra.mrb[36].mxu0 %v626_v0  ;;  %2817 = vmatmul.mubr.bf16.gmra.mrb[36].mxu1 %v626_v0  ;;  %v384_v0 = vld [vmem:[%s8537_s24 + $0x168] sm:$0xff] }
  0x9a   : > { %2054 = vmatprep.mubr.bf16.mxu0 %v634_v1  ;;  %2826 = vmatprep.mubr.bf16.mxu1 %v634_v1  ;;  %v391_v1 = vld [vmem:[%s8537_s24 + $0x1a0] sm:$0xff] }
  0x9b   : > { %v587_v9 = vpack.c.bf16 %v391_v1, %v384_v0  ;;  %v7978_v0 = vld [vmem:[%s10312_s1 + $0x588] ss:$16 sps:$4 sm:$0xff]  }
  0xa1   : > { %2055 = vmatmul.mubr.bf16.gmra.mrb[40].mxu0 %v633_v6  ;;  %2827 = vmatmul.mubr.bf16.gmra.mrb[40].mxu1 %v633_v6  ;;  %v579_v6 = vpack.c.bf16 %v376_v63, %v369_v62  ;;  %v7975_v63 = vld [vmem:[%s10312_s1 + $0x580] ss:$16 sps:$4 sm:$0xff]  }
  0xa2   : > { %2064 = vmatprep.mubr.bf16.mxu0 %v641_v7  ;;  %2836 = vmatprep.mubr.bf16.mxu1 %v641_v7  ;;  %v7927_v7 = vld [vmem:[%s10312_s1 + $0x480] ss:$16 sps:$4 sm:$0xff]  }
  0xa9   : > { %2065 = vmatmul.mubr.bf16.gmra.mrb[44].mxu0 %v640_v12  ;;  %2837 = vmatmul.mubr.bf16.gmra.mrb[44].mxu1 %v640_v12  ;;  %v383_v12 = vld [vmem:[%s8537_s24 + $0x160] sm:$0xff] }
  0xaa   : > { %2074 = vmatprep.mubr.bf16.mxu0 %v648_v13  ;;  %2846 = vmatprep.mubr.bf16.mxu1 %v648_v13  ;;  %v390_v13 = vld [vmem:[%s8537_s24 + $0x198] sm:$0xff] }
  0xab   : > { %v586_v20 = vpack.c.bf16 %v390_v13, %v383_v12 }
  0xb1   : > { %2075 = vmatmul.mubr.bf16.gmra.mrb[48].mxu0 %v647_v18  ;;  %2847 = vmatmul.mubr.bf16.gmra.mrb[48].mxu1 %v647_v18  ;;  %v7941_v18 = vld [vmem:[%s10312_s1 + $0x4c4] ss:$16 sps:$4 sm:$0xff]  }
  0xb2   : > { %2084 = vmatprep.mubr.bf16.mxu0 %v655_v19  ;;  %2856 = vmatprep.mubr.bf16.mxu1 %v655_v19  ;;  %v7944_v19 = vld [vmem:[%s10312_s1 + $0x4cc] ss:$16 sps:$4 sm:$0xff]  }
  0xb9   : > { %2085 = vmatmul.mubr.bf16.gmra.mrb[52].mxu0 %v654_v24  ;;  %2857 = vmatmul.mubr.bf16.gmra.mrb[52].mxu1 %v654_v24  ;;  %v7947_v24 = vld [vmem:[%s10312_s1 + $0x4e4] ss:$16 sps:$4 sm:$0xff]  }
  0xba   : > { %2094 = vmatprep.mubr.bf16.mxu0 %v662_v25  ;;  %2866 = vmatprep.mubr.bf16.mxu1 %v662_v25  ;;  %v7950_v25 = vld [vmem:[%s10312_s1 + $0x4ec] ss:$16 sps:$4 sm:$0xff]  }
  0xc1   : > { %2095 = vmatmul.mubr.bf16.gmra.mrb[56].mxu0 %v661_v30  ;;  %2867 = vmatmul.mubr.bf16.gmra.mrb[56].mxu1 %v661_v30  ;;  %v7945_v30 = vld [vmem:[%s10312_s1 + $0x4e0] ss:$16 sps:$4 sm:$0xff]  }
  0xc2   : > { %2104 = vmatprep.mubr.bf16.mxu0 %v669_v31  ;;  %2876 = vmatprep.mubr.bf16.mxu1 %v669_v31  ;;  %v7948_v31 = vld [vmem:[%s10312_s1 + $0x4e8] ss:$16 sps:$4 sm:$0xff]  }
  0xc9   : > { %2105 = vmatmul.mubr.bf16.gmra.mrb[60].mxu0 %v668_v36  ;;  %2877 = vmatmul.mubr.bf16.gmra.mrb[60].mxu1 %v668_v36  ;;  %v7954_v36 = vld [vmem:[%s10312_s1 + $0x508] ss:$16 sps:$4 sm:$0xff]  }
  0xca   : > { %2147 = vmatprep.mubr.bf16.mxu0 %v566_v37  ;;  %2919 = vmatprep.mubr.bf16.mxu1 %v566_v37  ;;  %v601_v37 = vpack.c.bf16 %v419_v29, %v412_v28  ;;  %v474_v28 = vld [vmem:[%s8537_s24 + $0x438] sm:$0xff] }
  0xcb   : > { %v482_v29 = vld [vmem:[%s8537_s24 + $0x478] sm:$0xff] }
  0xd1   : > { %2148 = vmatmul.mubr.bf16.vlgmr.msra.gmra.mrb[0].mxu0 %v565_v42  ;;  %2920 = vmatmul.mubr.bf16.vlgmr.msra.gmra.mrb[0].mxu1 %v565_v42  ;;  %v426_v42 = vld [vmem:[%s8537_s24 + $0x2b8] sm:$0xff] }
  0xd2   : > { %2157 = vmatprep.mubr.bf16.mxu0 %v573_v45  ;;  %2929 = vmatprep.mubr.bf16.mxu1 %v573_v45  ;;  %v7960_v45 = vld [vmem:[%s10312_s1 + $0x528] ss:$16 sps:$4 sm:$0xff]  }
  0xd3   : > { %2309 = vmatpush1.bf16.msra.mxu0 %v7903_v43  ;;  %3081 = vmatpush1.bf16.msra.mxu1 %v7906_v44  ;;  %v433_v43 = vld [vmem:[%s8537_s24 + $0x2f0] sm:$0xff] }
  0xd4   : > { %2310 = vmatprep.subr.bf16.mxu0 %v7911_v46  ;;  %3082 = vmatprep.subr.bf16.mxu1 %v7914_v47  ;;  %v7957_v44 = vld [vmem:[%s10312_s1 + $0x520] ss:$16 sps:$4 sm:$0xff]   ;;  %v7965_v46 = vld [vmem:[%s10312_s1 + $0x544] ss:$16 sps:$4 sm:$0xff]   ;;  %v7968_v47 = vld [vmem:[%s10312_s1 + $0x54c] ss:$16 sps:$4 sm:$0xff]   ;;  %v608_v51 = vpack.c.bf16 %v433_v43, %v426_v42 }
  0xd5   : > { %v517_v42 = vld [vmem:[%s8537_s24 + $0x590] sm:$0xff] }
  0xd7   : > { %2311 = vmatpush1.bf16.msra.mxu0 %v7909_v52  ;;  %3083 = vmatpush1.bf16.msra.mxu1 %v7912_v53  ;;  %v7971_v52 = vld [vmem:[%s10312_s1 + $0x564] ss:$16 sps:$4 sm:$0xff]   ;;  %v7974_v53 = vld [vmem:[%s10312_s1 + $0x56c] ss:$16 sps:$4 sm:$0xff]  }
  0xd8   : > { %2312 = vmatprep.subr.bf16.mxu0 %v7917_v54  ;;  %3084 = vmatprep.subr.bf16.mxu1 %v7920_v55  ;;  %v425_v54 = vld [vmem:[%s8537_s24 + $0x2b0] sm:$0xff]  ;;  %v432_v55 = vld [vmem:[%s8537_s24 + $0x2e8] sm:$0xff] }
  0xd9   : > { %2158 = vmatmul.mubr.bf16.gmra.mrb[4].mxu0 %v572_v56  ;;  %2930 = vmatmul.mubr.bf16.gmra.mrb[4].mxu1 %v572_v56  ;;  %v440_v56 = vld [vmem:[%s8537_s24 + $0x328] sm:$0xff]  ;;  %v607_v62 = vpack.c.bf16 %v432_v55, %v425_v54  ;;  %v545_v54 = vld [vmem:[%s8537_s24 + $0x670] sm:$0xff] }
  0xda   : > { %2167 = vmatprep.mubr.bf16.mxu0 %v580_v59  ;;  %2939 = vmatprep.mubr.bf16.mxu1 %v580_v59  ;;  %v7972_v59 = vld [vmem:[%s10312_s1 + $0x568] ss:$16 sps:$4 sm:$0xff]  }
  0xdb   : > { %2313 = vmatpush1.bf16.msra.mxu0 %v7915_v57  ;;  %3085 = vmatpush1.bf16.msra.mxu1 %v7918_v58  ;;  %v447_v57 = vld [vmem:[%s8537_s24 + $0x360] sm:$0xff] }
  0xdc   : > { %2314 = vmatprep.subr.bf16.mxu0 %v7923_v60  ;;  %3086 = vmatprep.subr.bf16.mxu1 %v7926_v61  ;;  %v7969_v58 = vld [vmem:[%s10312_s1 + $0x560] ss:$16 sps:$4 sm:$0xff]   ;;  %v7977_v60 = vld [vmem:[%s10312_s1 + $0x584] ss:$16 sps:$4 sm:$0xff]   ;;  %v7980_v61 = vld [vmem:[%s10312_s1 + $0x58c] ss:$16 sps:$4 sm:$0xff]   ;;  %v615_v1 = vpack.c.bf16 %v447_v57, %v440_v56 }
  0xdd   : > { %v537_v57 = vld [vmem:[%s8537_s24 + $0x630] sm:$0xff] }
  0xdf   : > { %2315 = vmatpush1.bf16.msra.mxu0 %v7921_v2  ;;  %3087 = vmatpush1.bf16.msra.mxu1 %v7924_v3  ;;  %v7983_v2 = vld [vmem:[%s10312_s1 + $0x5a4] ss:$16 sps:$4 sm:$0xff]   ;;  %v7986_v3 = vld [vmem:[%s10312_s1 + $0x5ac] ss:$16 sps:$4 sm:$0xff]  }
  0xe0   : > { %2316 = vmatprep.subr.bf16.mxu0 %v7929_v4  ;;  %3088 = vmatprep.subr.bf16.mxu1 %v7932_v5  ;;  %v439_v4 = vld [vmem:[%s8537_s24 + $0x320] sm:$0xff]  ;;  %v446_v5 = vld [vmem:[%s8537_s24 + $0x358] sm:$0xff] }
  0xe1   : > { %2168 = vmatmul.mubr.bf16.gmra.mrb[8].mxu0 %v579_v6  ;;  %2940 = vmatmul.mubr.bf16.gmra.mrb[8].mxu1 %v579_v6  ;;  %v454_v6 = vld [vmem:[%s8537_s24 + $0x398] sm:$0xff]  ;;  %v614_v12 = vpack.c.bf16 %v446_v5, %v439_v4 }
  0xe2   : > { %2177 = vmatprep.mubr.bf16.mxu0 %v587_v9  ;;  %2949 = vmatprep.mubr.bf16.mxu1 %v587_v9  ;;  %v7984_v9 = vld [vmem:[%s10312_s1 + $0x5a8] ss:$16 sps:$4 sm:$0xff]   ;;  %v8004_v5 = vld [vmem:[%s10312_s1 + $0x60c] ss:$16 sps:$4 sm:$0xff]  }
  0xe3   : > { %2317 = vmatpush1.bf16.msra.mxu0 %v7927_v7  ;;  %3089 = vmatpush1.bf16.msra.mxu1 %v7930_v8  ;;  %v461_v7 = vld [vmem:[%s8537_s24 + $0x3d0] sm:$0xff] }
  0xe4   : > { %2318 = vmatprep.subr.bf16.mxu0 %v7935_v10  ;;  %3090 = vmatprep.subr.bf16.mxu1 %v7938_v11  ;;  %v7981_v8 = vld [vmem:[%s10312_s1 + $0x5a0] ss:$16 sps:$4 sm:$0xff]   ;;  %v7989_v10 = vld [vmem:[%s10312_s1 + $0x5c4] ss:$16 sps:$4 sm:$0xff]   ;;  %v7992_v11 = vld [vmem:[%s10312_s1 + $0x5cc] ss:$16 sps:$4 sm:$0xff]   ;;  %v622_v13 = vpack.c.bf16 %v461_v7, %v454_v6 }
  0xe5   : > { %v343_v6 = vld [vmem:[%s8537_s24 + $0x20] sm:$0xff]  ;;  %v350_v7 = vld [vmem:[%s8537_s24 + $0x58] sm:$0xff] }
  0xe7   : > { %2319 = vmatpush1.bf16.msra.mxu0 %v7933_v16  ;;  %3091 = vmatpush1.bf16.msra.mxu1 %v7936_v17  ;;  %v7995_v16 = vld [vmem:[%s10312_s1 + $0x5e4] ss:$16 sps:$4 sm:$0xff]   ;;  %v7998_v17 = vld [vmem:[%s10312_s1 + $0x5ec] ss:$16 sps:$4 sm:$0xff]  }
  0xe8   : > { %2320 = vmatprep.subr.bf16.mxu0 %v7941_v18  ;;  %3092 = vmatprep.subr.bf16.mxu1 %v7944_v19  ;;  %v453_v18 = vld [vmem:[%s8537_s24 + $0x390] sm:$0xff]  ;;  %v460_v19 = vld [vmem:[%s8537_s24 + $0x3c8] sm:$0xff] }
  0xe9   : > { %2178 = vmatmul.mubr.bf16.gmra.mrb[12].mxu0 %v586_v20  ;;  %2950 = vmatmul.mubr.bf16.gmra.mrb[12].mxu1 %v586_v20  ;;  %v468_v20 = vld [vmem:[%s8537_s24 + $0x408] sm:$0xff] }
  0xea   : > { %2187 = vmatprep.mubr.bf16.mxu0 %v594_v23  ;;  %2959 = vmatprep.mubr.bf16.mxu1 %v594_v23  ;;  %v7996_v23 = vld [vmem:[%s10312_s1 + $0x5e8] ss:$16 sps:$4 sm:$0xff]  }
  0xeb   : > { %2321 = vmatpush1.bf16.msra.mxu0 %v7939_v21  ;;  %3093 = vmatpush1.bf16.msra.mxu1 %v7942_v22  ;;  %v475_v21 = vld [vmem:[%s8537_s24 + $0x440] sm:$0xff] }
  0xec   : > { %2322 = vmatprep.subr.bf16.mxu0 %v7947_v24  ;;  %3094 = vmatprep.subr.bf16.mxu1 %v7950_v25  ;;  %v7993_v22 = vld [vmem:[%s10312_s1 + $0x5e0] ss:$16 sps:$4 sm:$0xff]   ;;  %v621_v24 = vpack.c.bf16 %v460_v19, %v453_v18  ;;  %v629_v25 = vpack.c.bf16 %v475_v21, %v468_v20 }
  0xed   : > { %v379_v18 = vld [vmem:[%s8537_s24 + $0x140] sm:$0xff] }
  0xee   : > { %v371_v21 = vld [vmem:[%s8537_s24 + $0x100] sm:$0xff] }
  0xef   : > { %2323 = vmatpush1.bf16.msra.mxu0 %v7945_v30  ;;  %3095 = vmatpush1.bf16.msra.mxu1 %v7948_v31  ;;  %v489_v30 = vld [vmem:[%s8537_s24 + $0x4b0] sm:$0xff]  ;;  %v628_v31 = vpack.c.bf16 %v474_v28, %v467_v27  ;;  %v392_v28 = vld [vmem:[%s8537_s24 + $0x1a8] sm:$0xff] }
  0xf0   : > { %2324 = vmatprep.subr.bf16.mxu0 %v7953_v32  ;;  %3096 = vmatprep.subr.bf16.mxu1 %v7956_v33  ;;  %v636_v32 = vpack.c.bf16 %v489_v30, %v482_v29  ;;  %v481_v33 = vld [vmem:[%s8537_s24 + $0x470] sm:$0xff]  ;;  %v400_v29 = vld [vmem:[%s8537_s24 + $0x1e8] sm:$0xff]  ;;  %v407_v30 = vld [vmem:[%s8537_s24 + $0x220] sm:$0xff] }
  0xf1   : > { %2188 = vmatmul.mubr.bf16.gmra.mrb[16].mxu0 %v593_v34  ;;  %2960 = vmatmul.mubr.bf16.gmra.mrb[16].mxu1 %v593_v34  ;;  %v488_v34 = vld [vmem:[%s8537_s24 + $0x4a8] sm:$0xff]  ;;  %v385_v27 = vld [vmem:[%s8537_s24 + $0x170] sm:$0xff] }
  0xf2   : > { %2197 = vmatprep.mubr.bf16.mxu0 %v601_v37  ;;  %2969 = vmatprep.mubr.bf16.mxu1 %v601_v37  ;;  %v635_v37 = vpack.c.bf16 %v488_v34, %v481_v33  ;;  %v399_v33 = vld [vmem:[%s8537_s24 + $0x1e0] sm:$0xff]  ;;  %v406_v34 = vld [vmem:[%s8537_s24 + $0x218] sm:$0xff] }
  0xf3   : > { %2325 = vmatpush1.bf16.msra.mxu0 %v7951_v35  ;;  %3097 = vmatpush1.bf16.msra.mxu1 %v7954_v36  ;;  %v496_v35 = vld [vmem:[%s8537_s24 + $0x4e8] sm:$0xff]  ;;  %v503_v36 = vld [vmem:[%s8537_s24 + $0x520] sm:$0xff] }
  0xf4   : > { %2326 = vmatprep.subr.bf16.mxu0 %v7959_v38  ;;  %3098 = vmatprep.subr.bf16.mxu1 %v7962_v39  ;;  %v643_v38 = vpack.c.bf16 %v503_v36, %v496_v35  ;;  %v495_v39 = vld [vmem:[%s8537_s24 + $0x4e0] sm:$0xff]  ;;  %v414_v35 = vld [vmem:[%s8537_s24 + $0x258] sm:$0xff]  ;;  %v421_v36 = vld [vmem:[%s8537_s24 + $0x290] sm:$0xff] }
  0xf5   : > { %v642_v43 = vpack.c.bf16 %v502_v40, %v495_v39  ;;  %v413_v39 = vld [vmem:[%s8537_s24 + $0x250] sm:$0xff]  ;;  %v420_v40 = vld [vmem:[%s8537_s24 + $0x288] sm:$0xff] }
  0xf7   : > { %2327 = vmatpush1.bf16.msra.mxu0 %v7957_v44  ;;  %3099 = vmatpush1.bf16.msra.mxu1 %v7960_v45  ;;  %v650_v44 = vpack.c.bf16 %v517_v42, %v510_v41  ;;  %v509_v45 = vld [vmem:[%s8537_s24 + $0x550] sm:$0xff]  ;;  %v428_v41 = vld [vmem:[%s8537_s24 + $0x2c8] sm:$0xff]  ;;  %v435_v42 = vld [vmem:[%s8537_s24 + $0x300] sm:$0xff] }
  0xf8   : > { %2328 = vmatprep.subr.bf16.mxu0 %v7965_v46  ;;  %3100 = vmatprep.subr.bf16.mxu1 %v7968_v47  ;;  %v516_v46 = vld [vmem:[%s8537_s24 + $0x588] sm:$0xff] }
  0xf9   : > { %2198 = vmatmul.mubr.bf16.gmra.mrb[20].mxu0 %v600_v48  ;;  %2970 = vmatmul.mubr.bf16.gmra.mrb[20].mxu1 %v600_v48  ;;  %v524_v47 = vld [vmem:[%s8537_s24 + $0x5c8] sm:$0xff]  ;;  %v531_v48 = vld [vmem:[%s8537_s24 + $0x600] sm:$0xff] }
  0xfa   : > { %2207 = vmatprep.mubr.bf16.mxu0 %v608_v51  ;;  %2979 = vmatprep.mubr.bf16.mxu1 %v608_v51  ;;  %v523_v51 = vld [vmem:[%s8537_s24 + $0x5c0] sm:$0xff] }
  0xfb   : > { %2329 = vmatpush1.bf16.msra.mxu0 %v7963_v49  ;;  %3101 = vmatpush1.bf16.msra.mxu1 %v7966_v50  ;;  %v649_v49 = vpack.c.bf16 %v516_v46, %v509_v45  ;;  %v657_v50 = vpack.c.bf16 %v531_v48, %v524_v47  ;;  %v427_v45 = vld [vmem:[%s8537_s24 + $0x2c0] sm:$0xff]  ;;  %v434_v46 = vld [vmem:[%s8537_s24 + $0x2f8] sm:$0xff]  ;;  %v449_v48 = vld [vmem:[%s8537_s24 + $0x370] sm:$0xff] }
  0xfc   : > { %2330 = vmatprep.subr.bf16.mxu0 %v7971_v52  ;;  %3102 = vmatprep.subr.bf16.mxu1 %v7974_v53  ;;  %v530_v52 = vld [vmem:[%s8537_s24 + $0x5f8] sm:$0xff] }
  0xfd   : > { %v538_v53 = vld [vmem:[%s8537_s24 + $0x638] sm:$0xff]  ;;  %v656_v55 = vpack.c.bf16 %v530_v52, %v523_v51  ;;  %v441_v51 = vld [vmem:[%s8537_s24 + $0x330] sm:$0xff]  ;;  %v448_v52 = vld [vmem:[%s8537_s24 + $0x368] sm:$0xff] }
  0xfe   : > { %v664_v56 = vpack.c.bf16 %v545_v54, %v538_v53  ;;  %v442_v47 = vld [vmem:[%s8537_s24 + $0x338] sm:$0xff]  ;;  %v456_v53 = vld [vmem:[%s8537_s24 + $0x3a8] sm:$0xff]  ;;  %v463_v54 = vld [vmem:[%s8537_s24 + $0x3e0] sm:$0xff] }
  0xff   : > { %2331 = vmatpush1.bf16.msra.mxu0 %v7969_v58  ;;  %3103 = vmatpush1.bf16.msra.mxu1 %v7972_v59  ;;  %v544_v58 = vld [vmem:[%s8537_s24 + $0x668] sm:$0xff] }
 0x100   : > { %2332 = vmatprep.subr.bf16.mxu0 %v7977_v60  ;;  %3104 = vmatprep.subr.bf16.mxu1 %v7980_v61  ;;  %v552_v59 = vld [vmem:[%s8537_s24 + $0x6a8] sm:$0xff]  ;;  %v559_v60 = vld [vmem:[%s8537_s24 + $0x6e0] sm:$0xff]  ;;  %v663_v61 = vpack.c.bf16 %v544_v58, %v537_v57  ;;  %v462_v58 = vld [vmem:[%s8537_s24 + $0x3d8] sm:$0xff] }
 0x101   : > { %2208 = vmatmul.mubr.bf16.gmra.mrb[24].mxu0 %v607_v62  ;;  %2980 = vmatmul.mubr.bf16.gmra.mrb[24].mxu1 %v607_v62  ;;  %v671_v62 = vpack.c.bf16 %v559_v60, %v552_v59  ;;  %v455_v57 = vld [vmem:[%s8537_s24 + $0x3a0] sm:$0xff]  ;;  %v470_v59 = vld [vmem:[%s8537_s24 + $0x418] sm:$0xff]  ;;  %v477_v60 = vld [vmem:[%s8537_s24 + $0x450] sm:$0xff] }
 0x102   : > { %2217 = vmatprep.mubr.bf16.mxu0 %v615_v1  ;;  %2989 = vmatprep.mubr.bf16.mxu1 %v615_v1  ;;  %v344_v1 = vld [vmem:[%s8537_s24 + $0x28] sm:$0xff] }
 0x103   : > { %2333 = vmatpush1.bf16.msra.mxu0 %v7975_v63  ;;  %3105 = vmatpush1.bf16.msra.mxu1 %v7978_v0  ;;  %v551_v63 = vld [vmem:[%s8537_s24 + $0x6a0] sm:$0xff]  ;;  %v558_v0 = vld [vmem:[%s8537_s24 + $0x6d8] sm:$0xff] }
 0x104   : > { %2334 = vmatprep.subr.bf16.mxu0 %v7983_v2  ;;  %3106 = vmatprep.subr.bf16.mxu1 %v7986_v3  ;;  %v351_v2 = vld [vmem:[%s8537_s24 + $0x60] sm:$0xff]  ;;  %v670_v3 = vpack.c.bf16 %v558_v0, %v551_v63  ;;  %v469_v63 = vld [vmem:[%s8537_s24 + $0x410] sm:$0xff]  ;;  %v476_v0 = vld [vmem:[%s8537_s24 + $0x448] sm:$0xff] }
 0x105   : > { %v568_v4 = vpack.c.bf16 %v351_v2, %v344_v1  ;;  %v484_v1 = vld [vmem:[%s8537_s24 + $0x488] sm:$0xff]  ;;  %v491_v2 = vld [vmem:[%s8537_s24 + $0x4c0] sm:$0xff] }
 0x107   : > { %2335 = vmatpush1.bf16.msra.mxu0 %v7981_v8  ;;  %3107 = vmatpush1.bf16.msra.mxu1 %v7984_v9  ;;  %v358_v8 = vld [vmem:[%s8537_s24 + $0x98] sm:$0xff]  ;;  %v365_v9 = vld [vmem:[%s8537_s24 + $0xd0] sm:$0xff] }
 0x108   : > { %2336 = vmatprep.subr.bf16.mxu0 %v7989_v10  ;;  %3108 = vmatprep.subr.bf16.mxu1 %v7992_v11  ;;  %v8293_v10 = vmov 0   ;;  %v567_v11 = vpack.c.bf16 %v350_v7, %v343_v6  ;;  %v490_v6 = vld [vmem:[%s8537_s24 + $0x4b8] sm:$0xff] }
 0x109   : > { %2218 = vmatmul.mubr.bf16.gmra.mrb[28].mxu0 %v614_v12  ;;  %2990 = vmatmul.mubr.bf16.gmra.mrb[28].mxu1 %v614_v12  ;;  %v575_v12 = vpack.c.bf16 %v365_v9, %v358_v8  ;;  %v498_v7 = vld [vmem:[%s8537_s24 + $0x4f8] sm:$0xff]  ;;  %v505_v8 = vld [vmem:[%s8537_s24 + $0x530] sm:$0xff] }
 0x10a   : > { %2227 = vmatprep.mubr.bf16.mxu0 %v622_v13  ;;  %2999 = vmatprep.mubr.bf16.mxu1 %v622_v13  ;;  %v7999_v13 = vld [vmem:[%s10312_s1 + $0x600] ss:$16 sps:$4 sm:$0xff]  }
 0x10b   : > { %2337 = vmatpush1.bf16.msra.mxu0 %v7987_v14  ;;  %3109 = vmatpush1.bf16.msra.mxu1 %v7990_v15  ;;  %v8002_v14 = vld [vmem:[%s10312_s1 + $0x608] ss:$16 sps:$4 sm:$0xff]   ;;  %v357_v15 = vld [vmem:[%s8537_s24 + $0x90] sm:$0xff] }
 0x10c   : > { %2338 = vmatprep.subr.bf16.mxu0 %v7995_v16  ;;  %3110 = vmatprep.subr.bf16.mxu1 %v7998_v17  ;;  %v364_v16 = vld [vmem:[%s8537_s24 + $0xc8] sm:$0xff] }
 0x10d   : > { %7710 = vset.pattern.permute.xlu0 %v8293_v10  ;;  %v372_v17 = vld [vmem:[%s8537_s24 + $0x108] sm:$0xff]  ;;  %v574_v19 = vpack.c.bf16 %v364_v16, %v357_v15  ;;  %v519_v15 = vld [vmem:[%s8537_s24 + $0x5a0] sm:$0xff] }
 0x10e   : > { %v582_v20 = vpack.c.bf16 %v379_v18, %v372_v17  ;;  %v511_v18 = vld [vmem:[%s8537_s24 + $0x560] sm:$0xff] }
 0x10f   : > { %2339 = vmatpush1.bf16.msra.mxu0 %v7993_v22  ;;  %3111 = vmatpush1.bf16.msra.mxu1 %v7996_v23  ;;  %v378_v22 = vld [vmem:[%s8537_s24 + $0x138] sm:$0xff] }
 0x110   : > { %2501 = vmatprep.subr.bf16.mxu0 %v8001_v26  ;;  %3273 = vmatprep.subr.bf16.mxu1 %v8004_v5  ;;  %v386_v23 = vld [vmem:[%s8537_s24 + $0x178] sm:$0xff]  ;;  %v483_v5 = vld [vmem:[%s8537_s24 + $0x480] sm:$0xff] }
 0x111   : > { %2228 = vmatmul.mubr.bf16.gmra.mrb[32].mxu0 %v621_v24  ;;  %3000 = vmatmul.mubr.bf16.gmra.mrb[32].mxu1 %v621_v24  ;;  %v393_v24 = vld [vmem:[%s8537_s24 + $0x1b0] sm:$0xff]  ;;  %v637_v9 = vpack.c.bf16 %v490_v6, %v483_v5  ;;  %v8040_v5 = vld [vmem:[%s10314_s3 + $0xac] ss:$16 sps:$4 sm:$0xff]   ;;  %v387_v6 = vld [vmem:[%s8537_s24 + $0x180] sm:$0xff] }
 0x112   : > { %2237 = vmatprep.mubr.bf16.mxu0 %v629_v25  ;;  %3009 = vmatprep.mubr.bf16.mxu1 %v629_v25  ;;  %v581_v25 = vpack.c.bf16 %v378_v22, %v371_v21  ;;  %v589_v26 = vpack.c.bf16 %v393_v24, %v386_v23  ;;  %v533_v21 = vld [vmem:[%s8537_s24 + $0x610] sm:$0xff] }
 0x113   : > { %v525_v24 = vld [vmem:[%s8537_s24 + $0x5d0] sm:$0xff] }
 0x119   : > { %2238 = vmatmul.mubr.bf16.gmra.mrb[36].mxu0 %v628_v31  ;;  %3010 = vmatmul.mubr.bf16.gmra.mrb[36].mxu1 %v628_v31  ;;  %v588_v31 = vpack.c.bf16 %v392_v28, %v385_v27  ;;  %v547_v27 = vld [vmem:[%s8537_s24 + $0x680] sm:$0xff] }
 0x11a   : > { %2247 = vmatprep.mubr.bf16.mxu0 %v636_v32  ;;  %3019 = vmatprep.mubr.bf16.mxu1 %v636_v32  ;;  %v596_v32 = vpack.c.bf16 %v407_v30, %v400_v29  ;;  %v539_v30 = vld [vmem:[%s8537_s24 + $0x640] sm:$0xff] }
 0x121   : > { %2248 = vmatmul.mubr.bf16.gmra.mrb[40].mxu0 %v635_v37  ;;  %3020 = vmatmul.mubr.bf16.gmra.mrb[40].mxu1 %v635_v37  ;;  %v595_v37 = vpack.c.bf16 %v406_v34, %v399_v33  ;;  %v561_v33 = vld [vmem:[%s8537_s24 + $0x6f0] sm:$0xff] }
 0x122   : > { %2257 = vmatprep.mubr.bf16.mxu0 %v643_v38  ;;  %3029 = vmatprep.mubr.bf16.mxu1 %v643_v38  ;;  %v603_v38 = vpack.c.bf16 %v421_v36, %v414_v35  ;;  %v553_v36 = vld [vmem:[%s8537_s24 + $0x6b0] sm:$0xff] }
 0x129   : > { %2258 = vmatmul.mubr.bf16.gmra.mrb[44].mxu0 %v642_v43  ;;  %3030 = vmatmul.mubr.bf16.gmra.mrb[44].mxu1 %v642_v43  ;;  %v602_v43 = vpack.c.bf16 %v420_v40, %v413_v39  ;;  %v8007_v39 = vld [vmem:[%s10314_s3 + $0x4] ss:$16 sps:$4 sm:$0xff]  }
 0x12a   : > { %2267 = vmatprep.mubr.bf16.mxu0 %v650_v44  ;;  %3039 = vmatprep.mubr.bf16.mxu1 %v650_v44  ;;  %v610_v44 = vpack.c.bf16 %v435_v42, %v428_v41  ;;  %v345_v40 = vld [vmem:[%s8537_s24 + $0x30] sm:$0xff]  ;;  %v352_v41 = vld [vmem:[%s8537_s24 + $0x68] sm:$0xff] }
 0x12b   : > { %v8010_v42 = vld [vmem:[%s10314_s3 + $0xc] ss:$16 sps:$4 sm:$0xff]  }
 0x131   : > { %2268 = vmatmul.mubr.bf16.gmra.mrb[48].mxu0 %v649_v49  ;;  %3040 = vmatmul.mubr.bf16.gmra.mrb[48].mxu1 %v649_v49  ;;  %v609_v49 = vpack.c.bf16 %v434_v46, %v427_v45  ;;  %v8008_v45 = vld [vmem:[%s10314_s3 + $0x8] ss:$16 sps:$4 sm:$0xff]   ;;  %v8013_v46 = vld [vmem:[%s10314_s3 + $0x24] ss:$16 sps:$4 sm:$0xff]  }
 0x132   : > { %2277 = vmatprep.mubr.bf16.mxu0 %v657_v50  ;;  %3049 = vmatprep.mubr.bf16.mxu1 %v657_v50  ;;  %v617_v50 = vpack.c.bf16 %v449_v48, %v442_v47  ;;  %v8016_v47 = vld [vmem:[%s10314_s3 + $0x2c] ss:$16 sps:$4 sm:$0xff]   ;;  %v359_v48 = vld [vmem:[%s8537_s24 + $0xa0] sm:$0xff] }
 0x139   : > { %2278 = vmatmul.mubr.bf16.gmra.mrb[52].mxu0 %v656_v55  ;;  %3050 = vmatmul.mubr.bf16.gmra.mrb[52].mxu1 %v656_v55  ;;  %v616_v55 = vpack.c.bf16 %v448_v52, %v441_v51  ;;  %v8014_v51 = vld [vmem:[%s10314_s3 + $0x28] ss:$16 sps:$4 sm:$0xff]   ;;  %v8019_v52 = vld [vmem:[%s10314_s3 + $0x44] ss:$16 sps:$4 sm:$0xff]  }
 0x13a   : > { %2287 = vmatprep.mubr.bf16.mxu0 %v664_v56  ;;  %3059 = vmatprep.mubr.bf16.mxu1 %v664_v56  ;;  %v624_v56 = vpack.c.bf16 %v463_v54, %v456_v53  ;;  %v8022_v53 = vld [vmem:[%s10314_s3 + $0x4c] ss:$16 sps:$4 sm:$0xff]  }
 0x141   : > { %2288 = vmatmul.mubr.bf16.gmra.mrb[56].mxu0 %v663_v61  ;;  %3060 = vmatmul.mubr.bf16.gmra.mrb[56].mxu1 %v663_v61  ;;  %v623_v61 = vpack.c.bf16 %v462_v58, %v455_v57  ;;  %v8025_v57 = vld [vmem:[%s10314_s3 + $0x64] ss:$16 sps:$4 sm:$0xff]   ;;  %v8028_v58 = vld [vmem:[%s10314_s3 + $0x6c] ss:$16 sps:$4 sm:$0xff]  }
 0x142   : > { %2297 = vmatprep.mubr.bf16.mxu0 %v671_v62  ;;  %3069 = vmatprep.mubr.bf16.mxu1 %v671_v62  ;;  %v631_v62 = vpack.c.bf16 %v477_v60, %v470_v59  ;;  %v373_v59 = vld [vmem:[%s8537_s24 + $0x110] sm:$0xff]  ;;  %v380_v60 = vld [vmem:[%s8537_s24 + $0x148] sm:$0xff] }
 0x149   : > { %2298 = vmatmul.mubr.bf16.gmra.mrb[60].mxu0 %v670_v3  ;;  %3070 = vmatmul.mubr.bf16.gmra.mrb[60].mxu1 %v670_v3  ;;  %v630_v3 = vpack.c.bf16 %v476_v0, %v469_v63  ;;  %v8031_v63 = vld [vmem:[%s10314_s3 + $0x84] ss:$16 sps:$4 sm:$0xff]   ;;  %v8034_v0 = vld [vmem:[%s10314_s3 + $0x8c] ss:$16 sps:$4 sm:$0xff]  }
 0x14a   : > { %2340 = vmatprep.mubr.bf16.mxu0 %v568_v4  ;;  %3112 = vmatprep.mubr.bf16.mxu1 %v568_v4  ;;  %v638_v4 = vpack.c.bf16 %v491_v2, %v484_v1  ;;  %v583_v1 = vpack.c.bf16 %v380_v60, %v373_v59  ;;  %v8029_v2 = vld [vmem:[%s10314_s3 + $0x80] ss:$16 sps:$4 sm:$0xff]   ;;  %v478_v60 = vld [vmem:[%s8537_s24 + $0x458] sm:$0xff] }
 0x14b   : > { %v471_v59 = vld [vmem:[%s8537_s24 + $0x420] sm:$0xff] }
 0x151   : > { %2341 = vmatmul.mubr.bf16.vlgmr.msra.gmra.mrb[0].mxu0 %v567_v11  ;;  %3113 = vmatmul.mubr.bf16.vlgmr.msra.gmra.mrb[0].mxu1 %v567_v11  ;;  %v645_v11 = vpack.c.bf16 %v505_v8, %v498_v7  ;;  %v394_v7 = vld [vmem:[%s8537_s24 + $0x1b8] sm:$0xff]  ;;  %v8035_v8 = vld [vmem:[%s10314_s3 + $0xa0] ss:$16 sps:$4 sm:$0xff]  }
 0x152   : > { %2350 = vmatprep.mubr.bf16.mxu0 %v575_v12  ;;  %3122 = vmatprep.mubr.bf16.mxu1 %v575_v12  ;;  %v497_v12 = vld [vmem:[%s8537_s24 + $0x4f0] sm:$0xff] }
 0x153   : > { %2502 = vmatpush1.bf16.msra.mxu0 %v7999_v13  ;;  %3274 = vmatpush1.bf16.msra.mxu1 %v8002_v14  ;;  %v504_v13 = vld [vmem:[%s8537_s24 + $0x528] sm:$0xff] }
 0x154   : > { %v512_v14 = vld [vmem:[%s8537_s24 + $0x568] sm:$0xff]  ;;  %v644_v16 = vpack.c.bf16 %v504_v13, %v497_v12  ;;  %4448 = vmatprep.subr.bf16.mxu0 %v8007_v39  ;;  %4834 = vmatprep.subr.bf16.mxu1 %v8010_v42  ;;  %v590_v13 = vpack.c.bf16 %v394_v7, %v387_v6  ;;  %v8071_v42 = vld [vmem:[%s10314_s3 + $0x160] ss:$16 sps:$4 sm:$0xff]  }
 0x155   : > { %v652_v17 = vpack.c.bf16 %v519_v15, %v512_v14  ;;  %v8046_v12 = vld [vmem:[%s10314_s3 + $0xcc] ss:$16 sps:$4 sm:$0xff]   ;;  %v8041_v14 = vld [vmem:[%s10314_s3 + $0xc0] ss:$16 sps:$4 sm:$0xff]   ;;  %v8044_v15 = vld [vmem:[%s10314_s3 + $0xc8] ss:$16 sps:$4 sm:$0xff]  }
 0x156   : > { %v8076_v39 = vld [vmem:[%s10314_s3 + $0x16c] ss:$16 sps:$4 sm:$0xff]   ;;  %v8089_v6 = vld [vmem:[%s10314_s3 + $0x1c0] ss:$16 sps:$4 sm:$0xff]   ;;  %v8092_v7 = vld [vmem:[%s10314_s3 + $0x1c8] ss:$16 sps:$4 sm:$0xff]  }
 0x159   : > { %2351 = vmatmul.mubr.bf16.gmra.mrb[4].mxu0 %v574_v19  ;;  %3123 = vmatmul.mubr.bf16.gmra.mrb[4].mxu1 %v574_v19  ;;  %v518_v19 = vld [vmem:[%s8537_s24 + $0x598] sm:$0xff] }
 0x15a   : > { %2360 = vmatprep.mubr.bf16.mxu0 %v582_v20  ;;  %3132 = vmatprep.mubr.bf16.mxu1 %v582_v20  ;;  %v526_v20 = vld [vmem:[%s8537_s24 + $0x5d8] sm:$0xff]  ;;  %v651_v22 = vpack.c.bf16 %v518_v19, %v511_v18  ;;  %v401_v18 = vld [vmem:[%s8537_s24 + $0x1f0] sm:$0xff]  ;;  %v408_v19 = vld [vmem:[%s8537_s24 + $0x228] sm:$0xff] }
 0x15b   : > { %v659_v23 = vpack.c.bf16 %v533_v21, %v526_v20  ;;  %v8047_v20 = vld [vmem:[%s10314_s3 + $0xe0] ss:$16 sps:$4 sm:$0xff]   ;;  %v8050_v21 = vld [vmem:[%s10314_s3 + $0xe8] ss:$16 sps:$4 sm:$0xff]  }
 0x161   : > { %2361 = vmatmul.mubr.bf16.gmra.mrb[8].mxu0 %v581_v25  ;;  %3133 = vmatmul.mubr.bf16.gmra.mrb[8].mxu1 %v581_v25  ;;  %v532_v25 = vld [vmem:[%s8537_s24 + $0x608] sm:$0xff] }
 0x162   : > { %2370 = vmatprep.mubr.bf16.mxu0 %v589_v26  ;;  %3142 = vmatprep.mubr.bf16.mxu1 %v589_v26  ;;  %v540_v26 = vld [vmem:[%s8537_s24 + $0x648] sm:$0xff]  ;;  %v658_v28 = vpack.c.bf16 %v532_v25, %v525_v24  ;;  %v597_v24 = vpack.c.bf16 %v408_v19, %v401_v18  ;;  %v8053_v25 = vld [vmem:[%s10314_s3 + $0x100] ss:$16 sps:$4 sm:$0xff]  }
 0x163   : > { %v666_v29 = vpack.c.bf16 %v547_v27, %v540_v26  ;;  %v8056_v26 = vld [vmem:[%s10314_s3 + $0x108] ss:$16 sps:$4 sm:$0xff]   ;;  %v8061_v27 = vld [vmem:[%s10314_s3 + $0x124] ss:$16 sps:$4 sm:$0xff]  }
 0x164   : > { %v541_v19 = vld [vmem:[%s8537_s24 + $0x650] sm:$0xff] }
 0x169   : > { %2371 = vmatmul.mubr.bf16.gmra.mrb[12].mxu0 %v588_v31  ;;  %3143 = vmatmul.mubr.bf16.gmra.mrb[12].mxu1 %v588_v31  ;;  %v546_v31 = vld [vmem:[%s8537_s24 + $0x678] sm:$0xff] }
 0x16a   : > { %2380 = vmatprep.mubr.bf16.mxu0 %v596_v32  ;;  %3152 = vmatprep.mubr.bf16.mxu1 %v596_v32  ;;  %v554_v32 = vld [vmem:[%s8537_s24 + $0x6b8] sm:$0xff]  ;;  %v665_v34 = vpack.c.bf16 %v546_v31, %v539_v30  ;;  %v8059_v31 = vld [vmem:[%s10314_s3 + $0x120] ss:$16 sps:$4 sm:$0xff]  }
 0x16b   : > { %v673_v35 = vpack.c.bf16 %v561_v33, %v554_v32  ;;  %v422_v30 = vld [vmem:[%s8537_s24 + $0x298] sm:$0xff]  ;;  %v8067_v33 = vld [vmem:[%s10314_s3 + $0x144] ss:$16 sps:$4 sm:$0xff]  }
 0x16c   : > { %v8062_v32 = vld [vmem:[%s10314_s3 + $0x128] ss:$16 sps:$4 sm:$0xff]  }
 0x171   : > { %2381 = vmatmul.mubr.bf16.gmra.mrb[16].mxu0 %v595_v37  ;;  %3153 = vmatmul.mubr.bf16.gmra.mrb[16].mxu1 %v595_v37  ;;  %v560_v37 = vld [vmem:[%s8537_s24 + $0x6e8] sm:$0xff] }
 0x172   : > { %2390 = vmatprep.mubr.bf16.mxu0 %v603_v38  ;;  %3162 = vmatprep.mubr.bf16.mxu1 %v603_v38  ;;  %v672_v38 = vpack.c.bf16 %v560_v37, %v553_v36  ;;  %v8065_v36 = vld [vmem:[%s10314_s3 + $0x140] ss:$16 sps:$4 sm:$0xff]   ;;  %v8068_v37 = vld [vmem:[%s10314_s3 + $0x148] ss:$16 sps:$4 sm:$0xff]  }
 0x179   : > { %2391 = vmatmul.mubr.bf16.gmra.mrb[20].mxu0 %v602_v43  ;;  %3163 = vmatmul.mubr.bf16.gmra.mrb[20].mxu1 %v602_v43  ;;  %v569_v43 = vpack.c.bf16 %v352_v41, %v345_v40  ;;  %v429_v40 = vld [vmem:[%s8537_s24 + $0x2d0] sm:$0xff]  ;;  %v436_v41 = vld [vmem:[%s8537_s24 + $0x308] sm:$0xff] }
 0x17a   : > { %2400 = vmatprep.mubr.bf16.mxu0 %v610_v44  ;;  %3172 = vmatprep.mubr.bf16.mxu1 %v610_v44  ;;  %v8005_v44 = vld [vmem:[%s10314_s3] ss:$16 sps:$4 sm:$0xff]  }
 0x181   : > { %2401 = vmatmul.mubr.bf16.gmra.mrb[24].mxu0 %v609_v49  ;;  %3173 = vmatmul.mubr.bf16.gmra.mrb[24].mxu1 %v609_v49  ;;  %v366_v49 = vld [vmem:[%s8537_s24 + $0xd8] sm:$0xff] }
 0x182   : > { %2410 = vmatprep.mubr.bf16.mxu0 %v617_v50  ;;  %3182 = vmatprep.mubr.bf16.mxu1 %v617_v50  ;;  %v8011_v50 = vld [vmem:[%s10314_s3 + $0x20] ss:$16 sps:$4 sm:$0xff]   ;;  %v576_v54 = vpack.c.bf16 %v366_v49, %v359_v48  ;;  %v8080_v48 = vld [vmem:[%s10314_s3 + $0x188] ss:$16 sps:$4 sm:$0xff]   ;;  %v8085_v49 = vld [vmem:[%s10314_s3 + $0x1a4] ss:$16 sps:$4 sm:$0xff]  }
 0x189   : > { %2411 = vmatmul.mubr.bf16.gmra.mrb[28].mxu0 %v616_v55  ;;  %3183 = vmatmul.mubr.bf16.gmra.mrb[28].mxu1 %v616_v55  ;;  %v8017_v55 = vld [vmem:[%s10314_s3 + $0x40] ss:$16 sps:$4 sm:$0xff]  }
 0x18a   : > { %2420 = vmatprep.mubr.bf16.mxu0 %v624_v56  ;;  %3192 = vmatprep.mubr.bf16.mxu1 %v624_v56  ;;  %v8020_v56 = vld [vmem:[%s10314_s3 + $0x48] ss:$16 sps:$4 sm:$0xff]  }
 0x191   : > { %2421 = vmatmul.mubr.bf16.gmra.mrb[32].mxu0 %v623_v61  ;;  %3193 = vmatmul.mubr.bf16.gmra.mrb[32].mxu1 %v623_v61  ;;  %v8023_v61 = vld [vmem:[%s10314_s3 + $0x60] ss:$16 sps:$4 sm:$0xff]  }
 0x192   : > { %2430 = vmatprep.mubr.bf16.mxu0 %v631_v62  ;;  %3202 = vmatprep.mubr.bf16.mxu1 %v631_v62  ;;  %v8026_v62 = vld [vmem:[%s10314_s3 + $0x68] ss:$16 sps:$4 sm:$0xff]  }
 0x199   : > { %2431 = vmatmul.mubr.bf16.gmra.mrb[36].mxu0 %v630_v3  ;;  %3203 = vmatmul.mubr.bf16.gmra.mrb[36].mxu1 %v630_v3  ;;  %v8032_v3 = vld [vmem:[%s10314_s3 + $0x88] ss:$16 sps:$4 sm:$0xff]  }
 0x19a   : > { %2440 = vmatprep.mubr.bf16.mxu0 %v638_v4  ;;  %3212 = vmatprep.mubr.bf16.mxu1 %v638_v4  ;;  %v8037_v4 = vld [vmem:[%s10314_s3 + $0xa4] ss:$16 sps:$4 sm:$0xff]  }
 0x1a1   : > { %2441 = vmatmul.mubr.bf16.gmra.mrb[40].mxu0 %v637_v9  ;;  %3213 = vmatmul.mubr.bf16.gmra.mrb[40].mxu1 %v637_v9  ;;  %v8038_v9 = vld [vmem:[%s10314_s3 + $0xa8] ss:$16 sps:$4 sm:$0xff]  }
 0x1a2   : > { %2450 = vmatprep.mubr.bf16.mxu0 %v645_v11  ;;  %3222 = vmatprep.mubr.bf16.mxu1 %v645_v11  ;;  %v8043_v11 = vld [vmem:[%s10314_s3 + $0xc4] ss:$16 sps:$4 sm:$0xff]  }
 0x1a9   : > { %2451 = vmatmul.mubr.bf16.gmra.mrb[44].mxu0 %v644_v16  ;;  %3223 = vmatmul.mubr.bf16.gmra.mrb[44].mxu1 %v644_v16  ;;  %v8049_v16 = vld [vmem:[%s10314_s3 + $0xe4] ss:$16 sps:$4 sm:$0xff]  }
 0x1aa   : > { %2460 = vmatprep.mubr.bf16.mxu0 %v652_v17  ;;  %3232 = vmatprep.mubr.bf16.mxu1 %v652_v17  ;;  %v8052_v17 = vld [vmem:[%s10314_s3 + $0xec] ss:$16 sps:$4 sm:$0xff]  }
 0x1b1   : > { %2461 = vmatmul.mubr.bf16.gmra.mrb[48].mxu0 %v651_v22  ;;  %3233 = vmatmul.mubr.bf16.gmra.mrb[48].mxu1 %v651_v22  ;;  %v8055_v22 = vld [vmem:[%s10314_s3 + $0x104] ss:$16 sps:$4 sm:$0xff]  }
 0x1b2   : > { %2470 = vmatprep.mubr.bf16.mxu0 %v659_v23  ;;  %3242 = vmatprep.mubr.bf16.mxu1 %v659_v23  ;;  %v8058_v23 = vld [vmem:[%s10314_s3 + $0x10c] ss:$16 sps:$4 sm:$0xff]  }
 0x1b9   : > { %2471 = vmatmul.mubr.bf16.gmra.mrb[52].mxu0 %v658_v28  ;;  %3243 = vmatmul.mubr.bf16.gmra.mrb[52].mxu1 %v658_v28  ;;  %v8064_v28 = vld [vmem:[%s10314_s3 + $0x12c] ss:$16 sps:$4 sm:$0xff]  }
 0x1ba   : > { %2480 = vmatprep.mubr.bf16.mxu0 %v666_v29  ;;  %3252 = vmatprep.mubr.bf16.mxu1 %v666_v29  ;;  %v415_v29 = vld [vmem:[%s8537_s24 + $0x260] sm:$0xff] }
 0x1c1   : > { %2481 = vmatmul.mubr.bf16.gmra.mrb[56].mxu0 %v665_v34  ;;  %3253 = vmatmul.mubr.bf16.gmra.mrb[56].mxu1 %v665_v34  ;;  %v8070_v34 = vld [vmem:[%s10314_s3 + $0x14c] ss:$16 sps:$4 sm:$0xff]  }
 0x1c2   : > { %2490 = vmatprep.mubr.bf16.mxu0 %v673_v35  ;;  %3262 = vmatprep.mubr.bf16.mxu1 %v673_v35  ;;  %v604_v35 = vpack.c.bf16 %v422_v30, %v415_v29  ;;  %v871_v30 = vld [vmem:[%s10313_s2] sm:$0xf] }
 0x1c9   : > { %2491 = vmatmul.mubr.bf16.gmra.mrb[60].mxu0 %v672_v38  ;;  %3263 = vmatmul.mubr.bf16.gmra.mrb[60].mxu1 %v672_v38  ;;  %v8073_v38 = vld [vmem:[%s10314_s3 + $0x164] ss:$16 sps:$4 sm:$0xff]  }
 0x1ca   : > { %2533 = vmatprep.mubr.bf16.mxu0 %v8293_v10  ;;  %3305 = vmatprep.mubr.bf16.mxu1 %v8293_v10 }
 0x1d1   : > { %6411 = vmatmul.mubr.msk.bf16.vlgmr.msra.gmra.mrb[0].mxu0 %vm1873_vm0, %v569_v43  ;;  %6427 = vmatmul.mubr.msk.bf16.vlgmr.msra.gmra.mrb[0].mxu1 %vm1873_vm0, %v569_v43  ;;  %v8074_v43 = vld [vmem:[%s10314_s3 + $0x168] ss:$16 sps:$4 sm:$0xff]  }
 0x1d2   : > { %2543 = vmatprep.mubr.bf16.mxu0 %v8293_v10  ;;  %3315 = vmatprep.mubr.bf16.mxu1 %v8293_v10 }
 0x1d3   : > { %4449 = vmatpush1.bf16.msra.mxu0 %v8005_v44  ;;  %4835 = vmatpush1.bf16.msra.mxu1 %v8008_v45  ;;  %v8079_v44 = vld [vmem:[%s10314_s3 + $0x184] ss:$16 sps:$4 sm:$0xff]   ;;  %v8082_v45 = vld [vmem:[%s10314_s3 + $0x18c] ss:$16 sps:$4 sm:$0xff]  }
 0x1d4   : > { %4450 = vmatprep.subr.bf16.mxu0 %v8013_v46  ;;  %4836 = vmatprep.subr.bf16.mxu1 %v8016_v47  ;;  %v611_v46 = vpack.c.bf16 %v436_v41, %v429_v40  ;;  %v8077_v47 = vld [vmem:[%s10314_s3 + $0x180] ss:$16 sps:$4 sm:$0xff]  }
 0x1d7   : > { %4451 = vmatpush1.bf16.msra.mxu0 %v8011_v50  ;;  %4837 = vmatpush1.bf16.msra.mxu1 %v8014_v51  ;;  %v8088_v50 = vld [vmem:[%s10314_s3 + $0x1ac] ss:$16 sps:$4 sm:$0xff]   ;;  %v443_v51 = vld [vmem:[%s8537_s24 + $0x340] sm:$0xff] }
 0x1d8   : > { %4452 = vmatprep.subr.bf16.mxu0 %v8019_v52  ;;  %4838 = vmatprep.subr.bf16.mxu1 %v8022_v53  ;;  %v450_v52 = vld [vmem:[%s8537_s24 + $0x378] sm:$0xff]  ;;  %v8083_v53 = vld [vmem:[%s10314_s3 + $0x1a0] ss:$16 sps:$4 sm:$0xff]  }
 0x1d9   : > { %6412 = vmatmul.mubr.msk.bf16.gmra.mrb[4].mxu0 %vm1873_vm0, %v576_v54  ;;  %6428 = vmatmul.mubr.msk.bf16.gmra.mrb[4].mxu1 %vm1873_vm0, %v576_v54  ;;  %v8086_v54 = vld [vmem:[%s10314_s3 + $0x1a8] ss:$16 sps:$4 sm:$0xff]  }
 0x1da   : > { %2553 = vmatprep.mubr.bf16.mxu0 %v8293_v10  ;;  %3325 = vmatprep.mubr.bf16.mxu1 %v8293_v10 }
 0x1db   : > { %4453 = vmatpush1.bf16.msra.mxu0 %v8017_v55  ;;  %4839 = vmatpush1.bf16.msra.mxu1 %v8020_v56  ;;  %v618_v55 = vpack.c.bf16 %v450_v52, %v443_v51  ;;  %v457_v56 = vld [vmem:[%s8537_s24 + $0x3b0] sm:$0xff] }
 0x1dc   : > { %4454 = vmatprep.subr.bf16.mxu0 %v8025_v57  ;;  %4840 = vmatprep.subr.bf16.mxu1 %v8028_v58  ;;  %v464_v57 = vld [vmem:[%s8537_s24 + $0x3e8] sm:$0xff] }
 0x1dd   : > { %v625_v58 = vpack.c.bf16 %v464_v57, %v457_v56 }
 0x1df   : > { %4455 = vmatpush1.bf16.msra.mxu0 %v8023_v61  ;;  %4841 = vmatpush1.bf16.msra.mxu1 %v8026_v62  ;;  %v632_v61 = vpack.c.bf16 %v478_v60, %v471_v59  ;;  %v485_v62 = vld [vmem:[%s8537_s24 + $0x490] sm:$0xff] }
 0x1e0   : > { %4456 = vmatprep.subr.bf16.mxu0 %v8031_v63  ;;  %4842 = vmatprep.subr.bf16.mxu1 %v8034_v0  ;;  %v492_v63 = vld [vmem:[%s8537_s24 + $0x4c8] sm:$0xff] }
 0x1e1   : > { %6413 = vmatmul.mubr.msk.bf16.gmra.mrb[8].mxu0 %vm1873_vm0, %v583_v1  ;;  %6429 = vmatmul.mubr.msk.bf16.gmra.mrb[8].mxu1 %vm1873_vm0, %v583_v1  ;;  %v639_v0 = vpack.c.bf16 %v492_v63, %v485_v62  ;;  %v499_v1 = vld [vmem:[%s8537_s24 + $0x500] sm:$0xff] }
 0x1e2   : > { %2563 = vmatprep.mubr.bf16.mxu0 %v8293_v10  ;;  %3335 = vmatprep.mubr.bf16.mxu1 %v8293_v10 }
 0x1e3   : > { %4457 = vmatpush1.bf16.msra.mxu0 %v8029_v2  ;;  %4843 = vmatpush1.bf16.msra.mxu1 %v8032_v3  ;;  %v506_v2 = vld [vmem:[%s8537_s24 + $0x538] sm:$0xff] }
 0x1e4   : > { %4458 = vmatprep.subr.bf16.mxu0 %v8037_v4  ;;  %4844 = vmatprep.subr.bf16.mxu1 %v8040_v5  ;;  %v646_v3 = vpack.c.bf16 %v506_v2, %v499_v1  ;;  %v8091_v4 = vld [vmem:[%s10314_s3 + $0x1c4] ss:$16 sps:$4 sm:$0xff]   ;;  %v8094_v5 = vld [vmem:[%s10314_s3 + $0x1cc] ss:$16 sps:$4 sm:$0xff]  }
 0x1e7   : > { %4459 = vmatpush1.bf16.msra.mxu0 %v8035_v8  ;;  %4845 = vmatpush1.bf16.msra.mxu1 %v8038_v9  ;;  %v513_v8 = vld [vmem:[%s8537_s24 + $0x570] sm:$0xff] }
 0x1e8   : > { %4460 = vmatprep.subr.bf16.mxu0 %v8043_v11  ;;  %4846 = vmatprep.subr.bf16.mxu1 %v8046_v12  ;;  %v8097_v9 = vld [vmem:[%s10314_s3 + $0x1e4] ss:$16 sps:$4 sm:$0xff]   ;;  %v8100_v11 = vld [vmem:[%s10314_s3 + $0x1ec] ss:$16 sps:$4 sm:$0xff]  }
 0x1e9   : > { %6414 = vmatmul.mubr.msk.bf16.gmra.mrb[12].mxu0 %vm1873_vm0, %v590_v13  ;;  %6430 = vmatmul.mubr.msk.bf16.gmra.mrb[12].mxu1 %vm1873_vm0, %v590_v13  ;;  %v520_v12 = vld [vmem:[%s8537_s24 + $0x5a8] sm:$0xff]  ;;  %v8095_v13 = vld [vmem:[%s10314_s3 + $0x1e0] ss:$16 sps:$4 sm:$0xff]  }
 0x1ea   : > { %2573 = vmatprep.mubr.bf16.mxu0 %v8293_v10  ;;  %3345 = vmatprep.mubr.bf16.mxu1 %v8293_v10 }
 0x1eb   : > { %4461 = vmatpush1.bf16.msra.mxu0 %v8041_v14  ;;  %4847 = vmatpush1.bf16.msra.mxu1 %v8044_v15  ;;  %v8098_v14 = vld [vmem:[%s10314_s3 + $0x1e8] ss:$16 sps:$4 sm:$0xff]   ;;  %v653_v15 = vpack.c.bf16 %v520_v12, %v513_v8 }
 0x1ec   : > { %4462 = vmatprep.subr.bf16.mxu0 %v8049_v16  ;;  %4848 = vmatprep.subr.bf16.mxu1 %v8052_v17  ;;  %v527_v16 = vld [vmem:[%s8537_s24 + $0x5e0] sm:$0xff]  ;;  %v534_v17 = vld [vmem:[%s8537_s24 + $0x618] sm:$0xff] }
 0x1ed   : > { %v660_v18 = vpack.c.bf16 %v534_v17, %v527_v16 }
 0x1ef   : > { %4463 = vmatpush1.bf16.msra.mxu0 %v8047_v20  ;;  %4849 = vmatpush1.bf16.msra.mxu1 %v8050_v21  ;;  %v548_v20 = vld [vmem:[%s8537_s24 + $0x688] sm:$0xff] }
 0x1f0   : > { %4464 = vmatprep.subr.bf16.mxu0 %v8055_v22  ;;  %4850 = vmatprep.subr.bf16.mxu1 %v8058_v23  ;;  %v667_v21 = vpack.c.bf16 %v548_v20, %v541_v19  ;;  %v555_v22 = vld [vmem:[%s8537_s24 + $0x6c0] sm:$0xff]  ;;  %v562_v23 = vld [vmem:[%s8537_s24 + $0x6f8] sm:$0xff] }
 0x1f1   : > { %6415 = vmatmul.mubr.msk.bf16.gmra.mrb[16].mxu0 %vm1873_vm0, %v597_v24  ;;  %6431 = vmatmul.mubr.msk.bf16.gmra.mrb[16].mxu1 %vm1873_vm0, %v597_v24  ;;  %v674_v24 = vpack.c.bf16 %v562_v23, %v555_v22  ;;  %v8107_v22 = vld [vmem:[%s10314_s3 + $0x220] ss:$16 sps:$4 sm:$0xff]   ;;  %v8110_v23 = vld [vmem:[%s10314_s3 + $0x228] ss:$16 sps:$4 sm:$0xff]  }
 0x1f2   : > { %2583 = vmatprep.mubr.bf16.mxu0 %v8293_v10  ;;  %3355 = vmatprep.mubr.bf16.mxu1 %v8293_v10 }
 0x1f3   : > { %4465 = vmatpush1.bf16.msra.mxu0 %v8053_v25  ;;  %4851 = vmatpush1.bf16.msra.mxu1 %v8056_v26  ;;  %v8103_v25 = vld [vmem:[%s10314_s3 + $0x204] ss:$16 sps:$4 sm:$0xff]   ;;  %v8106_v26 = vld [vmem:[%s10314_s3 + $0x20c] ss:$16 sps:$4 sm:$0xff]  }
 0x1f4   : > { %4466 = vmatprep.subr.bf16.mxu0 %v8061_v27  ;;  %4852 = vmatprep.subr.bf16.mxu1 %v8064_v28  ;;  %v873_v27 = vlaneseq }
 0x1f6   : > { %vm6131_vm1 = vcmp.lt.s32.totalorder %v873_v27, 256 }
 0x1f7   : > { %4467 = vmatpush1.bf16.msra.mxu0 %v8059_v31  ;;  %4853 = vmatpush1.bf16.msra.mxu1 %v8062_v32 }
 0x1f8   : > { %4468 = vmatprep.subr.bf16.mxu0 %v8067_v33  ;;  %4854 = vmatprep.subr.bf16.mxu1 %v8070_v34 }
 0x1f9   : > { %6416 = vmatmul.mubr.msk.bf16.gmra.mrb[20].mxu0 %vm1873_vm0, %v604_v35  ;;  %6432 = vmatmul.mubr.msk.bf16.gmra.mrb[20].mxu1 %vm1873_vm0, %v604_v35 }
 0x1fa   : > { %2593 = vmatprep.mubr.bf16.mxu0 %v8293_v10  ;;  %3365 = vmatprep.mubr.bf16.mxu1 %v8293_v10 }
 0x1fb   : > { %4469 = vmatpush1.bf16.msra.mxu0 %v8065_v36  ;;  %4855 = vmatpush1.bf16.msra.mxu1 %v8068_v37 }
 0x1fc   : > { %4470 = vmatprep.subr.bf16.mxu0 %v8073_v38  ;;  %4856 = vmatprep.subr.bf16.mxu1 %v8076_v39 }
 0x1ff   : > { %4471 = vmatpush1.bf16.msra.mxu0 %v8071_v42  ;;  %4857 = vmatpush1.bf16.msra.mxu1 %v8074_v43 }
 0x200   : > { %4472 = vmatprep.subr.bf16.mxu0 %v8079_v44  ;;  %4858 = vmatprep.subr.bf16.mxu1 %v8082_v45 }
 0x201   : > { %6417 = vmatmul.mubr.msk.bf16.gmra.mrb[24].mxu0 %vm1873_vm0, %v611_v46  ;;  %6433 = vmatmul.mubr.msk.bf16.gmra.mrb[24].mxu1 %vm1873_vm0, %v611_v46 }
 0x202   : > { %2603 = vmatprep.mubr.bf16.mxu0 %v8293_v10  ;;  %3375 = vmatprep.mubr.bf16.mxu1 %v8293_v10 }
 0x203   : > { %4473 = vmatpush1.bf16.msra.mxu0 %v8077_v47  ;;  %4859 = vmatpush1.bf16.msra.mxu1 %v8080_v48 }
 0x204   : > { %4474 = vmatprep.subr.bf16.mxu0 %v8085_v49  ;;  %4860 = vmatprep.subr.bf16.mxu1 %v8088_v50 }
 0x207   : > { %4475 = vmatpush1.bf16.msra.mxu0 %v8083_v53  ;;  %4861 = vmatpush1.bf16.msra.mxu1 %v8086_v54 }
 0x208   : > { %4476 = vmatprep.subr.bf16.mxu0 %v8091_v4  ;;  %4862 = vmatprep.subr.bf16.mxu1 %v8094_v5  ;;  %v8104_v4 = vld [vmem:[%s10314_s3 + $0x208] ss:$16 sps:$4 sm:$0xff]  }
 0x209   : > { %6418 = vmatmul.mubr.msk.bf16.gmra.mrb[28].mxu0 %vm1873_vm0, %v618_v55  ;;  %6434 = vmatmul.mubr.msk.bf16.gmra.mrb[28].mxu1 %vm1873_vm0, %v618_v55 }
 0x20a   : > { %2613 = vmatprep.mubr.bf16.mxu0 %v8293_v10  ;;  %3385 = vmatprep.mubr.bf16.mxu1 %v8293_v10 }
 0x20b   : > { %4477 = vmatpush1.bf16.msra.mxu0 %v8089_v6  ;;  %4863 = vmatpush1.bf16.msra.mxu1 %v8092_v7 }
 0x20c   : > { %4478 = vmatprep.subr.bf16.mxu0 %v8097_v9  ;;  %4864 = vmatprep.subr.bf16.mxu1 %v8100_v11  ;;  %v8109_v9 = vld [vmem:[%s10314_s3 + $0x224] ss:$16 sps:$4 sm:$0xff]   ;;  %v8112_v11 = vld [vmem:[%s10314_s3 + $0x22c] ss:$16 sps:$4 sm:$0xff]  }
 0x20f   : > { %4479 = vmatpush1.bf16.msra.mxu0 %v8095_v13  ;;  %4865 = vmatpush1.bf16.msra.mxu1 %v8098_v14 }
 0x210   : > { %4641 = vmatprep.subr.bf16.mxu0 %v8103_v25  ;;  %5027 = vmatprep.subr.bf16.mxu1 %v8106_v26 }
 0x211   : > { %6419 = vmatmul.mubr.msk.bf16.gmra.mrb[32].mxu0 %vm1873_vm0, %v625_v58  ;;  %6435 = vmatmul.mubr.msk.bf16.gmra.mrb[32].mxu1 %vm1873_vm0, %v625_v58 }
 0x212   : > { %2623 = vmatprep.mubr.bf16.mxu0 %v8293_v10  ;;  %3395 = vmatprep.mubr.bf16.mxu1 %v8293_v10 }
 0x219   : > { %6420 = vmatmul.mubr.msk.bf16.gmra.mrb[36].mxu0 %vm1873_vm0, %v632_v61  ;;  %6436 = vmatmul.mubr.msk.bf16.gmra.mrb[36].mxu1 %vm1873_vm0, %v632_v61 }
 0x21a   : > { %2633 = vmatprep.mubr.bf16.mxu0 %v8293_v10  ;;  %3405 = vmatprep.mubr.bf16.mxu1 %v8293_v10 }
 0x221   : > { %6421 = vmatmul.mubr.msk.bf16.gmra.mrb[40].mxu0 %vm1873_vm0, %v639_v0  ;;  %6437 = vmatmul.mubr.msk.bf16.gmra.mrb[40].mxu1 %vm1873_vm0, %v639_v0 }
 0x222   : > { %2643 = vmatprep.mubr.bf16.mxu0 %v8293_v10  ;;  %3415 = vmatprep.mubr.bf16.mxu1 %v8293_v10 }
 0x229   : > { %6422 = vmatmul.mubr.msk.bf16.gmra.mrb[44].mxu0 %vm1873_vm0, %v646_v3  ;;  %6438 = vmatmul.mubr.msk.bf16.gmra.mrb[44].mxu1 %vm1873_vm0, %v646_v3  ;;  %v8101_v3 = vld [vmem:[%s10314_s3 + $0x200] ss:$16 sps:$4 sm:$0xff]  }
 0x22a   : > { %2653 = vmatprep.mubr.bf16.mxu0 %v8293_v10  ;;  %3425 = vmatprep.mubr.bf16.mxu1 %v8293_v10 }
 0x231   : > { %6423 = vmatmul.mubr.msk.bf16.gmra.mrb[48].mxu0 %vm1873_vm0, %v653_v15  ;;  %6439 = vmatmul.mubr.msk.bf16.gmra.mrb[48].mxu1 %vm1873_vm0, %v653_v15 }
 0x232   : > { %2663 = vmatprep.mubr.bf16.mxu0 %v8293_v10  ;;  %3435 = vmatprep.mubr.bf16.mxu1 %v8293_v10 }
 0x239   : > { %6424 = vmatmul.mubr.msk.bf16.gmra.mrb[52].mxu0 %vm1873_vm0, %v660_v18  ;;  %6440 = vmatmul.mubr.msk.bf16.gmra.mrb[52].mxu1 %vm1873_vm0, %v660_v18 }
 0x23a   : > { %2673 = vmatprep.mubr.bf16.mxu0 %v8293_v10  ;;  %3445 = vmatprep.mubr.bf16.mxu1 %v8293_v10 }
 0x241   : > { %6425 = vmatmul.mubr.msk.bf16.gmra.mrb[56].mxu0 %vm1873_vm0, %v667_v21  ;;  %6441 = vmatmul.mubr.msk.bf16.gmra.mrb[56].mxu1 %vm1873_vm0, %v667_v21 }
 0x242   : > { %2683 = vmatprep.mubr.bf16.mxu0 %v8293_v10  ;;  %3455 = vmatprep.mubr.bf16.mxu1 %v8293_v10  ;;  %v9483_v10 = vshrl.u32 %v873_v27, 7 }
 0x244   : > { %v9486_v28 = vsub.s32 0, %v9483_v10  ;;  %v883_v29 = vsub.s32 2, %v9483_v10  ;;  %v879_v31 = vsub.s32 1, %v9483_v10  ;;  %v887_v32 = vsub.s32 3, %v9483_v10 }
 0x246   : > { %v9495_v33 = vrot.slane %v871_v30, %v9486_v28  ;;  %v9499_v34 = vrot.slane %v871_v30, %v883_v29  ;;  %v9503_v35 = vrot.slane %v871_v30, %v879_v31  ;;  %v9507_v36 = vrot.slane %v871_v30, %v887_v32 }
 0x249   : > { %6426 = vmatmul.mubr.msk.bf16.gmra.mrb[60].mxu0 %vm1873_vm0, %v674_v24  ;;  %6442 = vmatmul.mubr.msk.bf16.gmra.mrb[60].mxu1 %vm1873_vm0, %v674_v24  ;;  %v8115_v24 = vld [vmem:[%s10314_s3 + $0x244] ss:$16 sps:$4 sm:$0xff]  }
 0x2a4   : > { %v2535_v37 = vpop.f32.mrb[0].mxu0  ;;  %v3307_v38 = vpop.f32.mrb[0].mxu1 }
 0x2a5   : > { %v6900_v39 = vadd.f32 %v2535_v37, %v9495_v33  ;;  %v6964_v40 = vadd.f32 %v3307_v38, %v9499_v34  ;;  %v2537_v41 = vpop.f32.mrb[1].mxu0  ;;  %v3309_v42 = vpop.f32.mrb[1].mxu1  ;;  %v8118_v38 = vld [vmem:[%s10314_s3 + $0x24c] ss:$16 sps:$4 sm:$0xff]  }
 0x2a6   : > { %v6901_v43 = vadd.f32 %v2537_v41, %v9503_v35  ;;  %v6965_v44 = vadd.f32 %v3309_v42, %v9507_v36  ;;  %v2539_v45 = vpop.f32.mrb[2].mxu0  ;;  %v3311_v46 = vpop.f32.mrb[2].mxu1 }
 0x2a7   : > { %v6902_v47 = vadd.f32 %v2539_v45, %v9495_v33  ;;  %v6966_v48 = vadd.f32 %v3311_v46, %v9499_v34  ;;  %v2541_v49 = vpop.f32.mrb[3].mxu0  ;;  %v3313_v50 = vpop.f32.mrb[3].mxu1  ;;  %v3466_v53 = vmax.f32 %v6900_v39, 0.0  ;;  %v3468_v54 = vmax.f32 %v6964_v40, 0.0 }
 0x2a8   : > { %v6903_v51 = vadd.f32 %v2541_v49, %v9503_v35  ;;  %v6967_v52 = vadd.f32 %v3313_v50, %v9507_v36  ;;  %v3467_v57 = vmax.f32 %v6901_v43, 0.0  ;;  %v3469_v58 = vmax.f32 %v6965_v44, 0.0  ;;  %v8113_v49 = vld [vmem:[%s10314_s3 + $0x240] ss:$16 sps:$4 sm:$0xff]   ;;  %v8116_v50 = vld [vmem:[%s10314_s3 + $0x248] ss:$16 sps:$4 sm:$0xff]  }
 0x2a9   : > { %v3470_v55 = vmax.f32 %v6902_v47, 0.0  ;;  %v3472_v56 = vmax.f32 %v6966_v48, 0.0 }
 0x2aa   : > { %v3471_v59 = vmax.f32 %v6903_v51, 0.0  ;;  %v3473_v60 = vmax.f32 %v6967_v52, 0.0 }
 0x2ab   : > { %v3594_v61 = vpack.c.bf16 %v3470_v55, %v3466_v53  ;;  %v9517_v62 = vpack.c.bf16 %v3472_v56, %v3468_v54  ;;  %v8121_v55 = vld [vmem:[%s10314_s3 + $0x264] ss:$16 sps:$4 sm:$0xff]   ;;  %v8124_v56 = vld [vmem:[%s10314_s3 + $0x26c] ss:$16 sps:$4 sm:$0xff]  }
 0x2ac   : > { %v3595_v63 = vpack.c.bf16 %v3471_v59, %v3467_v57  ;;  %v9519_v0 = vpack.c.bf16 %v3473_v60, %v3469_v58  ;;  %v2545_v1 = vpop.f32.mrb[4].mxu0  ;;  %v3317_v2 = vpop.f32.mrb[4].mxu1 }
 0x2ad   : > { %v6904_v5 = vadd.f32 %v2545_v1, %v9495_v33  ;;  %v6968_v6 = vadd.f32 %v3317_v2, %v9499_v34  ;;  %v2547_v7 = vpop.f32.mrb[5].mxu0  ;;  %v3319_v8 = vpop.f32.mrb[5].mxu1 }
 0x2ae   : > { %v6905_v12 = vadd.f32 %v2547_v7, %v9503_v35  ;;  %v6969_v13 = vadd.f32 %v3319_v8, %v9507_v36  ;;  %v2549_v14 = vpop.f32.mrb[6].mxu0  ;;  %v3321_v15 = vpop.f32.mrb[6].mxu1  ;;  %4480 = vmatprep.mubr.bf16.mxu0 %v3595_v63  ;;  %4866 = vmatprep.mubr.bf16.mxu1 %v3595_v63  ;;  %v8127_v7 = vld [vmem:[%s10314_s3 + $0x284] ss:$16 sps:$4 sm:$0xff]  }
 0x2af   : > { %v6906_v16 = vadd.f32 %v2549_v14, %v9495_v33  ;;  %v6970_v17 = vadd.f32 %v3321_v15, %v9499_v34  ;;  %v2551_v18 = vpop.f32.mrb[7].mxu0  ;;  %v3323_v19 = vpop.f32.mrb[7].mxu1  ;;  %4481 = vmatmul.mubr.bf16.vlgmr.msra.gmra.mrb[64].mxu0 %v3594_v61  ;;  %4867 = vmatmul.mubr.bf16.vlgmr.msra.gmra.mrb[64].mxu1 %v3594_v61  ;;  %v3474_v25 = vmax.f32 %v6904_v5, 0.0  ;;  %v3476_v26 = vmax.f32 %v6968_v6, 0.0  ;;  %v8119_v5 = vld [vmem:[%s10314_s3 + $0x260] ss:$16 sps:$4 sm:$0xff]  }
 0x2b0   : > { %v6907_v20 = vadd.f32 %v2551_v18, %v9503_v35  ;;  %v6971_v21 = vadd.f32 %v3323_v19, %v9507_v36  ;;  %4642 = vmatpush1.bf16.msra.mxu0 %v8101_v3  ;;  %5028 = vmatpush1.bf16.msra.mxu1 %v8104_v4  ;;  %v3475_v39 = vmax.f32 %v6905_v12, 0.0  ;;  %v3477_v40 = vmax.f32 %v6969_v13, 0.0  ;;  %v8122_v6 = vld [vmem:[%s10314_s3 + $0x268] ss:$16 sps:$4 sm:$0xff]   ;;  %v8130_v13 = vld [vmem:[%s10314_s3 + $0x28c] ss:$16 sps:$4 sm:$0xff]  }
 0x2b1   : > { %v3478_v30 = vmax.f32 %v6906_v16, 0.0  ;;  %v3480_v37 = vmax.f32 %v6970_v17, 0.0  ;;  %4643 = vmatprep.subr.bf16.mxu0 %v8109_v9  ;;  %5029 = vmatprep.subr.bf16.mxu1 %v8112_v11 }
 0x2b2   : > { %v3479_v41 = vmax.f32 %v6907_v20, 0.0  ;;  %v3481_v42 = vmax.f32 %v6971_v21, 0.0 }
 0x2b3   : > { %v3598_v43 = vpack.c.bf16 %v3478_v30, %v3474_v25  ;;  %v9553_v44 = vpack.c.bf16 %v3480_v37, %v3476_v26  ;;  %v8128_v25 = vld [vmem:[%s10314_s3 + $0x288] ss:$16 sps:$4 sm:$0xff]  }
 0x2b4   : > { %v3599_v45 = vpack.c.bf16 %v3479_v41, %v3475_v39  ;;  %v9555_v46 = vpack.c.bf16 %v3481_v42, %v3477_v40  ;;  %v2555_v47 = vpop.f32.mrb[8].mxu0  ;;  %v3327_v48 = vpop.f32.mrb[8].mxu1  ;;  %4644 = vmatpush1.bf16.msra.mxu0 %v8107_v22  ;;  %5030 = vmatpush1.bf16.msra.mxu1 %v8110_v23  ;;  %v8133_v39 = vld [vmem:[%s10314_s3 + $0x2a4] ss:$16 sps:$4 sm:$0xff]   ;;  %v8136_v40 = vld [vmem:[%s10314_s3 + $0x2ac] ss:$16 sps:$4 sm:$0xff]  }
 0x2b5   : > { %v6908_v51 = vadd.f32 %v2555_v47, %v9495_v33  ;;  %v6972_v52 = vadd.f32 %v3327_v48, %v9499_v34  ;;  %v2557_v53 = vpop.f32.mrb[9].mxu0  ;;  %v3329_v54 = vpop.f32.mrb[9].mxu1  ;;  %4645 = vmatprep.subr.bf16.mxu0 %v8115_v24  ;;  %5031 = vmatprep.subr.bf16.mxu1 %v8118_v38  ;;  %v8125_v24 = vld [vmem:[%s10314_s3 + $0x280] ss:$16 sps:$4 sm:$0xff]  }
 0x2b6   : > { %v6909_v57 = vadd.f32 %v2557_v53, %v9503_v35  ;;  %v6973_v58 = vadd.f32 %v3329_v54, %v9507_v36  ;;  %v2559_v59 = vpop.f32.mrb[10].mxu0  ;;  %v3331_v60 = vpop.f32.mrb[10].mxu1  ;;  %4490 = vmatprep.mubr.bf16.mxu0 %v3599_v45  ;;  %4876 = vmatprep.mubr.bf16.mxu1 %v3599_v45  ;;  %v8131_v53 = vld [vmem:[%s10314_s3 + $0x2a0] ss:$16 sps:$4 sm:$0xff]   ;;  %v8134_v54 = vld [vmem:[%s10314_s3 + $0x2a8] ss:$16 sps:$4 sm:$0xff]  }
 0x2b7   : > { %v6910_v61 = vadd.f32 %v2559_v59, %v9495_v33  ;;  %v6974_v63 = vadd.f32 %v3331_v60, %v9499_v34  ;;  %v2561_v1 = vpop.f32.mrb[11].mxu0  ;;  %v3333_v2 = vpop.f32.mrb[11].mxu1  ;;  %4491 = vmatmul.mubr.bf16.gmra.mrb[68].mxu0 %v3598_v43  ;;  %4877 = vmatmul.mubr.bf16.gmra.mrb[68].mxu1 %v3598_v43  ;;  %v3482_v8 = vmax.f32 %v6908_v51, 0.0  ;;  %v3484_v9 = vmax.f32 %v6972_v52, 0.0  ;;  %v8142_v60 = vld [vmem:[%s10314_s3 + $0x2cc] ss:$16 sps:$4 sm:$0xff]  }
 0x2b8   : > { %v6911_v3 = vadd.f32 %v2561_v1, %v9503_v35  ;;  %v6975_v4 = vadd.f32 %v3333_v2, %v9507_v36  ;;  %4646 = vmatpush1.bf16.msra.mxu0 %v8113_v49  ;;  %5032 = vmatpush1.bf16.msra.mxu1 %v8116_v50  ;;  %v3483_v14 = vmax.f32 %v6909_v57, 0.0  ;;  %v3485_v15 = vmax.f32 %v6973_v58, 0.0 }
 0x2b9   : > { %v3486_v11 = vmax.f32 %v6910_v61, 0.0  ;;  %v3488_v12 = vmax.f32 %v6974_v63, 0.0  ;;  %4647 = vmatprep.subr.bf16.mxu0 %v8121_v55  ;;  %5033 = vmatprep.subr.bf16.mxu1 %v8124_v56  ;;  %v8139_v55 = vld [vmem:[%s10314_s3 + $0x2c4] ss:$16 sps:$4 sm:$0xff]  }
 0x2ba   : > { %v3487_v16 = vmax.f32 %v6911_v3, 0.0  ;;  %v3489_v17 = vmax.f32 %v6975_v4, 0.0 }
 0x2bb   : > { %v3602_v18 = vpack.c.bf16 %v3486_v11, %v3482_v8  ;;  %v9589_v19 = vpack.c.bf16 %v3488_v12, %v3484_v9  ;;  %v8137_v9 = vld [vmem:[%s10314_s3 + $0x2c0] ss:$16 sps:$4 sm:$0xff]   ;;  %v8140_v11 = vld [vmem:[%s10314_s3 + $0x2c8] ss:$16 sps:$4 sm:$0xff]  }
 0x2bc   : > { %v3603_v20 = vpack.c.bf16 %v3487_v16, %v3483_v14  ;;  %v9591_v21 = vpack.c.bf16 %v3489_v17, %v3485_v15  ;;  %v2565_v22 = vpop.f32.mrb[12].mxu0  ;;  %v3337_v23 = vpop.f32.mrb[12].mxu1  ;;  %4648 = vmatpush1.bf16.msra.mxu0 %v8119_v5  ;;  %5034 = vmatpush1.bf16.msra.mxu1 %v8122_v6  ;;  %v8145_v16 = vld [vmem:[%s10314_s3 + $0x2e4] ss:$16 sps:$4 sm:$0xff]   ;;  %v8148_v17 = vld [vmem:[%s10314_s3 + $0x2ec] ss:$16 sps:$4 sm:$0xff]  }
 0x2bd   : > { %v6912_v26 = vadd.f32 %v2565_v22, %v9495_v33  ;;  %v6976_v30 = vadd.f32 %v3337_v23, %v9499_v34  ;;  %v2567_v37 = vpop.f32.mrb[13].mxu0  ;;  %v3339_v38 = vpop.f32.mrb[13].mxu1  ;;  %4649 = vmatprep.subr.bf16.mxu0 %v8127_v7  ;;  %5035 = vmatprep.subr.bf16.mxu1 %v8130_v13 }
 0x2be   : > { %v6913_v41 = vadd.f32 %v2567_v37, %v9503_v35  ;;  %v6977_v42 = vadd.f32 %v3339_v38, %v9507_v36  ;;  %v2569_v43 = vpop.f32.mrb[14].mxu0  ;;  %v3341_v45 = vpop.f32.mrb[14].mxu1  ;;  %4500 = vmatprep.mubr.bf16.mxu0 %v3603_v20  ;;  %4886 = vmatprep.mubr.bf16.mxu1 %v3603_v20 }
 0x2bf   : > { %v6914_v47 = vadd.f32 %v2569_v43, %v9495_v33  ;;  %v6978_v48 = vadd.f32 %v3341_v45, %v9499_v34  ;;  %v2571_v49 = vpop.f32.mrb[15].mxu0  ;;  %v3343_v50 = vpop.f32.mrb[15].mxu1  ;;  %4501 = vmatmul.mubr.bf16.gmra.mrb[72].mxu0 %v3602_v18  ;;  %4887 = vmatmul.mubr.bf16.gmra.mrb[72].mxu1 %v3602_v18  ;;  %v3490_v56 = vmax.f32 %v6912_v26, 0.0  ;;  %v3492_v57 = vmax.f32 %v6976_v30, 0.0 }
 0x2c0   : > { %v6915_v51 = vadd.f32 %v2571_v49, %v9503_v35  ;;  %v6979_v52 = vadd.f32 %v3343_v50, %v9507_v36  ;;  %4650 = vmatpush1.bf16.msra.mxu0 %v8125_v24  ;;  %5036 = vmatpush1.bf16.msra.mxu1 %v8128_v25  ;;  %v3491_v61 = vmax.f32 %v6913_v41, 0.0  ;;  %v3493_v63 = vmax.f32 %v6977_v42, 0.0  ;;  %v8151_v41 = vld [vmem:[%s10314_s3 + $0x304] ss:$16 sps:$4 sm:$0xff]  }
 0x2c1   : > { %v3494_v58 = vmax.f32 %v6914_v47, 0.0  ;;  %v3496_v59 = vmax.f32 %v6978_v48, 0.0  ;;  %4651 = vmatprep.subr.bf16.mxu0 %v8133_v39  ;;  %5037 = vmatprep.subr.bf16.mxu1 %v8136_v40  ;;  %v8143_v39 = vld [vmem:[%s10314_s3 + $0x2e0] ss:$16 sps:$4 sm:$0xff]   ;;  %v8146_v40 = vld [vmem:[%s10314_s3 + $0x2e8] ss:$16 sps:$4 sm:$0xff]  }
 0x2c2   : > { %v3495_v1 = vmax.f32 %v6915_v51, 0.0  ;;  %v3497_v2 = vmax.f32 %v6979_v52, 0.0  ;;  %v8154_v48 = vld [vmem:[%s10314_s3 + $0x30c] ss:$16 sps:$4 sm:$0xff]  }
 0x2c3   : > { %v3606_v3 = vpack.c.bf16 %v3494_v58, %v3490_v56  ;;  %v9625_v4 = vpack.c.bf16 %v3496_v59, %v3492_v57  ;;  %v8149_v59 = vld [vmem:[%s10314_s3 + $0x300] ss:$16 sps:$4 sm:$0xff]  }
 0x2c4   : > { %v3607_v5 = vpack.c.bf16 %v3495_v1, %v3491_v61  ;;  %v9627_v6 = vpack.c.bf16 %v3497_v2, %v3493_v63  ;;  %v2575_v7 = vpop.f32.mrb[16].mxu0  ;;  %v3347_v8 = vpop.f32.mrb[16].mxu1  ;;  %4652 = vmatpush1.bf16.msra.mxu0 %v8131_v53  ;;  %5038 = vmatpush1.bf16.msra.mxu1 %v8134_v54 }
 0x2c5   : > { %v6916_v12 = vadd.f32 %v2575_v7, %v9495_v33  ;;  %v6980_v13 = vadd.f32 %v3347_v8, %v9499_v34  ;;  %v2577_v14 = vpop.f32.mrb[17].mxu0  ;;  %v3349_v15 = vpop.f32.mrb[17].mxu1  ;;  %4653 = vmatprep.subr.bf16.mxu0 %v8139_v55  ;;  %5039 = vmatprep.subr.bf16.mxu1 %v8142_v60  ;;  %v8152_v60 = vld [vmem:[%s10314_s3 + $0x308] ss:$16 sps:$4 sm:$0xff]  }
 0x2c6   : > { %v6917_v18 = vadd.f32 %v2577_v14, %v9503_v35  ;;  %v6981_v20 = vadd.f32 %v3349_v15, %v9507_v36  ;;  %v2579_v22 = vpop.f32.mrb[18].mxu0  ;;  %v3351_v23 = vpop.f32.mrb[18].mxu1  ;;  %4510 = vmatprep.mubr.bf16.mxu0 %v3607_v5  ;;  %4896 = vmatprep.mubr.bf16.mxu1 %v3607_v5  ;;  %v8160_v5 = vld [vmem:[%s10314_s3 + $0x32c] ss:$16 sps:$4 sm:$0xff]  }
 0x2c7   : > { %v6918_v24 = vadd.f32 %v2579_v22, %v9495_v33  ;;  %v6982_v25 = vadd.f32 %v3351_v23, %v9499_v34  ;;  %v2581_v26 = vpop.f32.mrb[19].mxu0  ;;  %v3353_v30 = vpop.f32.mrb[19].mxu1  ;;  %4511 = vmatmul.mubr.bf16.gmra.mrb[76].mxu0 %v3606_v3  ;;  %4897 = vmatmul.mubr.bf16.gmra.mrb[76].mxu1 %v3606_v3  ;;  %v3498_v42 = vmax.f32 %v6916_v12, 0.0  ;;  %v3500_v43 = vmax.f32 %v6980_v13, 0.0  ;;  %v8157_v3 = vld [vmem:[%s10314_s3 + $0x324] ss:$16 sps:$4 sm:$0xff]  }
 0x2c8   : > { %v6919_v37 = vadd.f32 %v2581_v26, %v9503_v35  ;;  %v6983_v38 = vadd.f32 %v3353_v30, %v9507_v36  ;;  %4654 = vmatpush1.bf16.msra.mxu0 %v8137_v9  ;;  %5040 = vmatpush1.bf16.msra.mxu1 %v8140_v11  ;;  %v3499_v49 = vmax.f32 %v6917_v18, 0.0  ;;  %v3501_v50 = vmax.f32 %v6981_v20, 0.0  ;;  %v8155_v18 = vld [vmem:[%s10314_s3 + $0x320] ss:$16 sps:$4 sm:$0xff]   ;;  %v8158_v20 = vld [vmem:[%s10314_s3 + $0x328] ss:$16 sps:$4 sm:$0xff]  }
 0x2c9   : > { %v3502_v45 = vmax.f32 %v6918_v24, 0.0  ;;  %v3504_v47 = vmax.f32 %v6982_v25, 0.0  ;;  %4655 = vmatprep.subr.bf16.mxu0 %v8145_v16  ;;  %5041 = vmatprep.subr.bf16.mxu1 %v8148_v17  ;;  %v8163_v22 = vld [vmem:[%s10314_s3 + $0x344] ss:$16 sps:$4 sm:$0xff]   ;;  %v8166_v30 = vld [vmem:[%s10314_s3 + $0x34c] ss:$16 sps:$4 sm:$0xff]  }
 0x2ca   : > { %v3503_v51 = vmax.f32 %v6919_v37, 0.0  ;;  %v3505_v52 = vmax.f32 %v6983_v38, 0.0 }
 0x2cb   : > { %v3610_v53 = vpack.c.bf16 %v3502_v45, %v3498_v42  ;;  %v9661_v54 = vpack.c.bf16 %v3504_v47, %v3500_v43 }
 0x2cc   : > { %v3611_v55 = vpack.c.bf16 %v3503_v51, %v3499_v49  ;;  %v9663_v56 = vpack.c.bf16 %v3505_v52, %v3501_v50  ;;  %v2585_v57 = vpop.f32.mrb[20].mxu0  ;;  %v3357_v58 = vpop.f32.mrb[20].mxu1  ;;  %4656 = vmatpush1.bf16.msra.mxu0 %v8143_v39  ;;  %5042 = vmatpush1.bf16.msra.mxu1 %v8146_v40  ;;  %v8161_v49 = vld [vmem:[%s10314_s3 + $0x340] ss:$16 sps:$4 sm:$0xff]   ;;  %v8164_v50 = vld [vmem:[%s10314_s3 + $0x348] ss:$16 sps:$4 sm:$0xff]  }
 0x2cd   : > { %v6920_v61 = vadd.f32 %v2585_v57, %v9495_v33  ;;  %v6984_v63 = vadd.f32 %v3357_v58, %v9499_v34  ;;  %v2587_v1 = vpop.f32.mrb[21].mxu0  ;;  %v3359_v2 = vpop.f32.mrb[21].mxu1  ;;  %4657 = vmatprep.subr.bf16.mxu0 %v8151_v41  ;;  %5043 = vmatprep.subr.bf16.mxu1 %v8154_v48  ;;  %v8169_v57 = vld [vmem:[%s10314_s3 + $0x364] ss:$16 sps:$4 sm:$0xff]   ;;  %v8172_v58 = vld [vmem:[%s10314_s3 + $0x36c] ss:$16 sps:$4 sm:$0xff]  }
 0x2ce   : > { %v6921_v7 = vadd.f32 %v2587_v1, %v9503_v35  ;;  %v6985_v8 = vadd.f32 %v3359_v2, %v9507_v36  ;;  %v2589_v9 = vpop.f32.mrb[22].mxu0  ;;  %v3361_v11 = vpop.f32.mrb[22].mxu1  ;;  %4520 = vmatprep.mubr.bf16.mxu0 %v3611_v55  ;;  %4906 = vmatprep.mubr.bf16.mxu1 %v3611_v55 }
 0x2cf   : > { %v6922_v12 = vadd.f32 %v2589_v9, %v9495_v33  ;;  %v6986_v13 = vadd.f32 %v3361_v11, %v9499_v34  ;;  %v2591_v14 = vpop.f32.mrb[23].mxu0  ;;  %v3363_v15 = vpop.f32.mrb[23].mxu1  ;;  %4521 = vmatmul.mubr.bf16.gmra.mrb[80].mxu0 %v3610_v53  ;;  %4907 = vmatmul.mubr.bf16.gmra.mrb[80].mxu1 %v3610_v53  ;;  %v3506_v23 = vmax.f32 %v6920_v61, 0.0  ;;  %v3508_v24 = vmax.f32 %v6984_v63, 0.0  ;;  %v8167_v9 = vld [vmem:[%s10314_s3 + $0x360] ss:$16 sps:$4 sm:$0xff]  }
 0x2d0   : > { %v6923_v16 = vadd.f32 %v2591_v14, %v9503_v35  ;;  %v6987_v17 = vadd.f32 %v3363_v15, %v9507_v36  ;;  %4658 = vmatpush1.bf16.msra.mxu0 %v8149_v59  ;;  %5044 = vmatpush1.bf16.msra.mxu1 %v8152_v60  ;;  %v3507_v37 = vmax.f32 %v6921_v7, 0.0  ;;  %v3509_v38 = vmax.f32 %v6985_v8, 0.0  ;;  %v8170_v11 = vld [vmem:[%s10314_s3 + $0x368] ss:$16 sps:$4 sm:$0xff]  }
 0x2d1   : > { %v3510_v25 = vmax.f32 %v6922_v12, 0.0  ;;  %v3512_v26 = vmax.f32 %v6986_v13, 0.0  ;;  %4659 = vmatprep.subr.bf16.mxu0 %v8157_v3  ;;  %5045 = vmatprep.subr.bf16.mxu1 %v8160_v5  ;;  %v8175_v12 = vld [vmem:[%s10314_s3 + $0x384] ss:$16 sps:$4 sm:$0xff]  }
 0x2d2   : > { %v3511_v39 = vmax.f32 %v6923_v16, 0.0  ;;  %v3513_v40 = vmax.f32 %v6987_v17, 0.0  ;;  %v8178_v17 = vld [vmem:[%s10314_s3 + $0x38c] ss:$16 sps:$4 sm:$0xff]  }
 0x2d3   : > { %v3614_v41 = vpack.c.bf16 %v3510_v25, %v3506_v23  ;;  %v9697_v42 = vpack.c.bf16 %v3512_v26, %v3508_v24 }
 0x2d4   : > { %v3615_v43 = vpack.c.bf16 %v3511_v39, %v3507_v37  ;;  %v9699_v45 = vpack.c.bf16 %v3513_v40, %v3509_v38  ;;  %v2595_v47 = vpop.f32.mrb[24].mxu0  ;;  %v3367_v48 = vpop.f32.mrb[24].mxu1  ;;  %4660 = vmatpush1.bf16.msra.mxu0 %v8155_v18  ;;  %5046 = vmatpush1.bf16.msra.mxu1 %v8158_v20  ;;  %v8173_v39 = vld [vmem:[%s10314_s3 + $0x380] ss:$16 sps:$4 sm:$0xff]   ;;  %v8176_v40 = vld [vmem:[%s10314_s3 + $0x388] ss:$16 sps:$4 sm:$0xff]  }
 0x2d5   : > { %v6924_v51 = vadd.f32 %v2595_v47, %v9495_v33  ;;  %v6988_v52 = vadd.f32 %v3367_v48, %v9499_v34  ;;  %v2597_v53 = vpop.f32.mrb[25].mxu0  ;;  %v3369_v55 = vpop.f32.mrb[25].mxu1  ;;  %4661 = vmatprep.subr.bf16.mxu0 %v8163_v22  ;;  %5047 = vmatprep.subr.bf16.mxu1 %v8166_v30 }
 0x2d6   : > { %v6925_v59 = vadd.f32 %v2597_v53, %v9503_v35  ;;  %v6989_v60 = vadd.f32 %v3369_v55, %v9507_v36  ;;  %v2599_v61 = vpop.f32.mrb[26].mxu0  ;;  %v3371_v63 = vpop.f32.mrb[26].mxu1  ;;  %4530 = vmatprep.mubr.bf16.mxu0 %v3615_v43  ;;  %4916 = vmatprep.mubr.bf16.mxu1 %v3615_v43 }
 0x2d7   : > { %v6926_v1 = vadd.f32 %v2599_v61, %v9495_v33  ;;  %v6990_v2 = vadd.f32 %v3371_v63, %v9499_v34  ;;  %v2601_v3 = vpop.f32.mrb[27].mxu0  ;;  %v3373_v5 = vpop.f32.mrb[27].mxu1  ;;  %4531 = vmatmul.mubr.bf16.gmra.mrb[84].mxu0 %v3614_v41  ;;  %4917 = vmatmul.mubr.bf16.gmra.mrb[84].mxu1 %v3614_v41  ;;  %v3514_v13 = vmax.f32 %v6924_v51, 0.0  ;;  %v3516_v14 = vmax.f32 %v6988_v52, 0.0 }
 0x2d8   : > { %v6927_v7 = vadd.f32 %v2601_v3, %v9503_v35  ;;  %v6991_v8 = vadd.f32 %v3373_v5, %v9507_v36  ;;  %4662 = vmatpush1.bf16.msra.mxu0 %v8161_v49  ;;  %5048 = vmatpush1.bf16.msra.mxu1 %v8164_v50  ;;  %v3515_v18 = vmax.f32 %v6925_v59, 0.0  ;;  %v3517_v20 = vmax.f32 %v6989_v60, 0.0  ;;  %v8181_v49 = vld [vmem:[%s10314_s3 + $0x3a4] ss:$16 sps:$4 sm:$0xff]   ;;  %v8184_v50 = vld [vmem:[%s10314_s3 + $0x3ac] ss:$16 sps:$4 sm:$0xff]  }
 0x2d9   : > { %v3518_v15 = vmax.f32 %v6926_v1, 0.0  ;;  %v3520_v16 = vmax.f32 %v6990_v2, 0.0  ;;  %4663 = vmatprep.subr.bf16.mxu0 %v8169_v57  ;;  %5049 = vmatprep.subr.bf16.mxu1 %v8172_v58  ;;  %v8179_v1 = vld [vmem:[%s10314_s3 + $0x3a0] ss:$16 sps:$4 sm:$0xff]   ;;  %v8182_v2 = vld [vmem:[%s10314_s3 + $0x3a8] ss:$16 sps:$4 sm:$0xff]  }
 0x2da   : > { %v3519_v22 = vmax.f32 %v6927_v7, 0.0  ;;  %v3521_v23 = vmax.f32 %v6991_v8, 0.0  ;;  %v8187_v3 = vld [vmem:[%s10314_s3 + $0x3c4] ss:$16 sps:$4 sm:$0xff]  }
 0x2db   : > { %v3618_v24 = vpack.c.bf16 %v3518_v15, %v3514_v13  ;;  %v9733_v25 = vpack.c.bf16 %v3520_v16, %v3516_v14 }
 0x2dc   : > { %v3619_v26 = vpack.c.bf16 %v3519_v22, %v3515_v18  ;;  %v9735_v30 = vpack.c.bf16 %v3521_v23, %v3517_v20  ;;  %v2605_v37 = vpop.f32.mrb[28].mxu0  ;;  %v3377_v38 = vpop.f32.mrb[28].mxu1  ;;  %4664 = vmatpush1.bf16.msra.mxu0 %v8167_v9  ;;  %5050 = vmatpush1.bf16.msra.mxu1 %v8170_v11  ;;  %v8190_v11 = vld [vmem:[%s10314_s3 + $0x3cc] ss:$16 sps:$4 sm:$0xff]  }
 0x2dd   : > { %v6928_v41 = vadd.f32 %v2605_v37, %v9495_v33  ;;  %v6992_v43 = vadd.f32 %v3377_v38, %v9499_v34  ;;  %v2607_v47 = vpop.f32.mrb[29].mxu0  ;;  %v3379_v48 = vpop.f32.mrb[29].mxu1  ;;  %4665 = vmatprep.subr.bf16.mxu0 %v8175_v12  ;;  %5051 = vmatprep.subr.bf16.mxu1 %v8178_v17 }
 0x2de   : > { %v6929_v51 = vadd.f32 %v2607_v47, %v9503_v35  ;;  %v6993_v52 = vadd.f32 %v3379_v48, %v9507_v36  ;;  %v2609_v53 = vpop.f32.mrb[30].mxu0  ;;  %v3381_v55 = vpop.f32.mrb[30].mxu1  ;;  %4540 = vmatprep.mubr.bf16.mxu0 %v3619_v26  ;;  %4926 = vmatprep.mubr.bf16.mxu1 %v3619_v26  ;;  %v8188_v26 = vld [vmem:[%s10314_s3 + $0x3c8] ss:$16 sps:$4 sm:$0xff]  }
 0x2df   : > { %v6930_v57 = vadd.f32 %v2609_v53, %v9495_v33  ;;  %v6994_v58 = vadd.f32 %v3381_v55, %v9499_v34  ;;  %v2611_v59 = vpop.f32.mrb[31].mxu0  ;;  %v3383_v60 = vpop.f32.mrb[31].mxu1  ;;  %4541 = vmatmul.mubr.bf16.gmra.mrb[88].mxu0 %v3618_v24  ;;  %4927 = vmatmul.mubr.bf16.gmra.mrb[88].mxu1 %v3618_v24  ;;  %v3522_v5 = vmax.f32 %v6928_v41, 0.0  ;;  %v3524_v7 = vmax.f32 %v6992_v43, 0.0  ;;  %v8185_v24 = vld [vmem:[%s10314_s3 + $0x3c0] ss:$16 sps:$4 sm:$0xff]  }
 0x2e0   : > { %v6931_v61 = vadd.f32 %v2611_v59, %v9503_v35  ;;  %v6995_v63 = vadd.f32 %v3383_v60, %v9507_v36  ;;  %4666 = vmatpush1.bf16.msra.mxu0 %v8173_v39  ;;  %5052 = vmatpush1.bf16.msra.mxu1 %v8176_v40  ;;  %v3523_v12 = vmax.f32 %v6929_v51, 0.0  ;;  %v3525_v13 = vmax.f32 %v6993_v52, 0.0  ;;  %v8193_v41 = vld [vmem:[%s10314_s3 + $0x3e4] ss:$16 sps:$4 sm:$0xff]   ;;  %v8196_v43 = vld [vmem:[%s10314_s3 + $0x3ec] ss:$16 sps:$4 sm:$0xff]  }
 0x2e1   : > { %v3526_v8 = vmax.f32 %v6930_v57, 0.0  ;;  %v3528_v9 = vmax.f32 %v6994_v58, 0.0  ;;  %4667 = vmatprep.subr.bf16.mxu0 %v8181_v49  ;;  %5053 = vmatprep.subr.bf16.mxu1 %v8184_v50  ;;  %v8191_v59 = vld [vmem:[%s10314_s3 + $0x3e0] ss:$16 sps:$4 sm:$0xff]   ;;  %v8194_v60 = vld [vmem:[%s10314_s3 + $0x3e8] ss:$16 sps:$4 sm:$0xff]  }
 0x2e2   : > { %v3527_v14 = vmax.f32 %v6931_v61, 0.0  ;;  %v3529_v15 = vmax.f32 %v6995_v63, 0.0 }
 0x2e3   : > { %v3622_v16 = vpack.c.bf16 %v3526_v8, %v3522_v5  ;;  %v9769_v17 = vpack.c.bf16 %v3528_v9, %v3524_v7 }
 0x2e4   : > { %v3623_v18 = vpack.c.bf16 %v3527_v14, %v3523_v12  ;;  %v9771_v20 = vpack.c.bf16 %v3529_v15, %v3525_v13  ;;  %v2615_v22 = vpop.f32.mrb[32].mxu0  ;;  %v3387_v23 = vpop.f32.mrb[32].mxu1  ;;  %4668 = vmatpush1.bf16.msra.mxu0 %v8179_v1  ;;  %5054 = vmatpush1.bf16.msra.mxu1 %v8182_v2 }
 0x2e5   : > { %v6932_v37 = vadd.f32 %v2615_v22, %v9495_v33  ;;  %v6996_v38 = vadd.f32 %v3387_v23, %v9499_v34  ;;  %v2617_v39 = vpop.f32.mrb[33].mxu0  ;;  %v3389_v40 = vpop.f32.mrb[33].mxu1  ;;  %4669 = vmatprep.subr.bf16.mxu0 %v8187_v3  ;;  %5055 = vmatprep.subr.bf16.mxu1 %v8190_v11 }
 0x2e6   : > { %v6933_v47 = vadd.f32 %v2617_v39, %v9503_v35  ;;  %v6997_v48 = vadd.f32 %v3389_v40, %v9507_v36  ;;  %v2619_v49 = vpop.f32.mrb[34].mxu0  ;;  %v3391_v50 = vpop.f32.mrb[34].mxu1  ;;  %4550 = vmatprep.mubr.bf16.mxu0 %v3623_v18  ;;  %4936 = vmatprep.mubr.bf16.mxu1 %v3623_v18 }
 0x2e7   : > { %v6934_v51 = vadd.f32 %v2619_v49, %v9495_v33  ;;  %v6998_v52 = vadd.f32 %v3391_v50, %v9499_v34  ;;  %v2621_v53 = vpop.f32.mrb[35].mxu0  ;;  %v3393_v55 = vpop.f32.mrb[35].mxu1  ;;  %4551 = vmatmul.mubr.bf16.gmra.mrb[92].mxu0 %v3622_v16  ;;  %4937 = vmatmul.mubr.bf16.gmra.mrb[92].mxu1 %v3622_v16  ;;  %v3530_v61 = vmax.f32 %v6932_v37, 0.0  ;;  %v3532_v63 = vmax.f32 %v6996_v38, 0.0 }
 0x2e8   : > { %v6935_v57 = vadd.f32 %v2621_v53, %v9503_v35  ;;  %v6999_v58 = vadd.f32 %v3393_v55, %v9507_v36  ;;  %4670 = vmatpush1.bf16.msra.mxu0 %v8185_v24  ;;  %5056 = vmatpush1.bf16.msra.mxu1 %v8188_v26  ;;  %v3531_v3 = vmax.f32 %v6933_v47, 0.0  ;;  %v3533_v5 = vmax.f32 %v6997_v48, 0.0 }
 0x2e9   : > { %v3534_v1 = vmax.f32 %v6934_v51, 0.0  ;;  %v3536_v2 = vmax.f32 %v6998_v52, 0.0  ;;  %4671 = vmatprep.subr.bf16.mxu0 %v8193_v41  ;;  %5057 = vmatprep.subr.bf16.mxu1 %v8196_v43 }
 0x2ea   : > { %v3535_v7 = vmax.f32 %v6935_v57, 0.0  ;;  %v3537_v8 = vmax.f32 %v6999_v58, 0.0 }
 0x2eb   : > { %v3626_v9 = vpack.c.bf16 %v3534_v1, %v3530_v61  ;;  %v9799_v11 = vpack.c.bf16 %v3536_v2, %v3532_v63 }
 0x2ec   : > { %v3627_v12 = vpack.c.bf16 %v3535_v7, %v3531_v3  ;;  %v9801_v13 = vpack.c.bf16 %v3537_v8, %v3533_v5  ;;  %v2625_v14 = vpop.f32.mrb[36].mxu0  ;;  %v3397_v15 = vpop.f32.mrb[36].mxu1  ;;  %4672 = vmatpush1.bf16.msra.mxu0 %v8191_v59  ;;  %5058 = vmatpush1.bf16.msra.mxu1 %v8194_v60 }
 0x2ed   : > { %v6936_v16 = vadd.f32 %v2625_v14, %v9495_v33  ;;  %v7000_v18 = vadd.f32 %v3397_v15, %v9499_v34  ;;  %v2627_v22 = vpop.f32.mrb[37].mxu0  ;;  %v3399_v23 = vpop.f32.mrb[37].mxu1 }
 0x2ee   : > { %v6937_v24 = vadd.f32 %v2627_v22, %v9503_v35  ;;  %v7001_v26 = vadd.f32 %v3399_v23, %v9507_v36  ;;  %v2629_v37 = vpop.f32.mrb[38].mxu0  ;;  %v3401_v38 = vpop.f32.mrb[38].mxu1  ;;  %4560 = vmatprep.mubr.bf16.mxu0 %v3627_v12  ;;  %4946 = vmatprep.mubr.bf16.mxu1 %v3627_v12 }
 0x2ef   : > { %v6938_v39 = vadd.f32 %v2629_v37, %v9495_v33  ;;  %v7002_v40 = vadd.f32 %v3401_v38, %v9499_v34  ;;  %v2631_v41 = vpop.f32.mrb[39].mxu0  ;;  %v3403_v43 = vpop.f32.mrb[39].mxu1  ;;  %4561 = vmatmul.mubr.bf16.gmra.mrb[96].mxu0 %v3626_v9  ;;  %4947 = vmatmul.mubr.bf16.gmra.mrb[96].mxu1 %v3626_v9  ;;  %v3538_v49 = vmax.f32 %v6936_v16, 0.0  ;;  %v3540_v50 = vmax.f32 %v7000_v18, 0.0 }
 0x2f0   : > { %v6939_v47 = vadd.f32 %v2631_v41, %v9503_v35  ;;  %v7003_v48 = vadd.f32 %v3403_v43, %v9507_v36  ;;  %v3539_v53 = vmax.f32 %v6937_v24, 0.0  ;;  %v3541_v55 = vmax.f32 %v7001_v26, 0.0 }
 0x2f1   : > { %v3542_v51 = vmax.f32 %v6938_v39, 0.0  ;;  %v3544_v52 = vmax.f32 %v7002_v40, 0.0 }
 0x2f2   : > { %v3543_v57 = vmax.f32 %v6939_v47, 0.0  ;;  %v3545_v58 = vmax.f32 %v7003_v48, 0.0 }
 0x2f3   : > { %v3630_v59 = vpack.c.bf16 %v3542_v51, %v3538_v49  ;;  %v9811_v60 = vpack.c.bf16 %v3544_v52, %v3540_v50 }
 0x2f4   : > { %v3631_v61 = vpack.c.bf16 %v3543_v57, %v3539_v53  ;;  %v9813_v63 = vpack.c.bf16 %v3545_v58, %v3541_v55  ;;  %v2635_v1 = vpop.f32.mrb[40].mxu0  ;;  %v3407_v2 = vpop.f32.mrb[40].mxu1 }
 0x2f5   : > { %v6940_v3 = vadd.f32 %v2635_v1, %v9495_v33  ;;  %v7004_v5 = vadd.f32 %v3407_v2, %v9499_v34  ;;  %v2637_v7 = vpop.f32.mrb[41].mxu0  ;;  %v3409_v8 = vpop.f32.mrb[41].mxu1 }
 0x2f6   : > { %v6941_v9 = vadd.f32 %v2637_v7, %v9503_v35  ;;  %v7005_v12 = vadd.f32 %v3409_v8, %v9507_v36  ;;  %v2639_v14 = vpop.f32.mrb[42].mxu0  ;;  %v3411_v15 = vpop.f32.mrb[42].mxu1  ;;  %4570 = vmatprep.mubr.bf16.mxu0 %v3631_v61  ;;  %4956 = vmatprep.mubr.bf16.mxu1 %v3631_v61 }
 0x2f7   : > { %v6942_v16 = vadd.f32 %v2639_v14, %v9495_v33  ;;  %v7006_v18 = vadd.f32 %v3411_v15, %v9499_v34  ;;  %v2641_v22 = vpop.f32.mrb[43].mxu0  ;;  %v3413_v23 = vpop.f32.mrb[43].mxu1  ;;  %4571 = vmatmul.mubr.bf16.gmra.mrb[100].mxu0 %v3630_v59  ;;  %4957 = vmatmul.mubr.bf16.gmra.mrb[100].mxu1 %v3630_v59  ;;  %v3546_v37 = vmax.f32 %v6940_v3, 0.0  ;;  %v3548_v38 = vmax.f32 %v7004_v5, 0.0 }
 0x2f8   : > { %v6943_v24 = vadd.f32 %v2641_v22, %v9503_v35  ;;  %v7007_v26 = vadd.f32 %v3413_v23, %v9507_v36  ;;  %v3547_v41 = vmax.f32 %v6941_v9, 0.0  ;;  %v3549_v43 = vmax.f32 %v7005_v12, 0.0 }
 0x2f9   : > { %v3550_v39 = vmax.f32 %v6942_v16, 0.0  ;;  %v3552_v40 = vmax.f32 %v7006_v18, 0.0 }
 0x2fa   : > { %v3551_v47 = vmax.f32 %v6943_v24, 0.0  ;;  %v3553_v48 = vmax.f32 %v7007_v26, 0.0 }
 0x2fb   : > { %v3634_v49 = vpack.c.bf16 %v3550_v39, %v3546_v37  ;;  %v9823_v50 = vpack.c.bf16 %v3552_v40, %v3548_v38 }
 0x2fc   : > { %v3635_v51 = vpack.c.bf16 %v3551_v47, %v3547_v41  ;;  %v9825_v52 = vpack.c.bf16 %v3553_v48, %v3549_v43  ;;  %v2645_v53 = vpop.f32.mrb[44].mxu0  ;;  %v3417_v55 = vpop.f32.mrb[44].mxu1 }
 0x2fd   : > { %v6944_v57 = vadd.f32 %v2645_v53, %v9495_v33  ;;  %v7008_v58 = vadd.f32 %v3417_v55, %v9499_v34  ;;  %v2647_v59 = vpop.f32.mrb[45].mxu0  ;;  %v3419_v61 = vpop.f32.mrb[45].mxu1 }
 0x2fe   : > { %v6945_v1 = vadd.f32 %v2647_v59, %v9503_v35  ;;  %v7009_v2 = vadd.f32 %v3419_v61, %v9507_v36  ;;  %v2649_v3 = vpop.f32.mrb[46].mxu0  ;;  %v3421_v5 = vpop.f32.mrb[46].mxu1  ;;  %4580 = vmatprep.mubr.bf16.mxu0 %v3635_v51  ;;  %4966 = vmatprep.mubr.bf16.mxu1 %v3635_v51 }
 0x2ff   : > { %v6946_v7 = vadd.f32 %v2649_v3, %v9495_v33  ;;  %v7010_v8 = vadd.f32 %v3421_v5, %v9499_v34  ;;  %v2651_v9 = vpop.f32.mrb[47].mxu0  ;;  %v3423_v12 = vpop.f32.mrb[47].mxu1  ;;  %4581 = vmatmul.mubr.bf16.gmra.mrb[104].mxu0 %v3634_v49  ;;  %4967 = vmatmul.mubr.bf16.gmra.mrb[104].mxu1 %v3634_v49  ;;  %v3554_v16 = vmax.f32 %v6944_v57, 0.0  ;;  %v3556_v18 = vmax.f32 %v7008_v58, 0.0 }
 0x300   : > { %v6947_v14 = vadd.f32 %v2651_v9, %v9503_v35  ;;  %v7011_v15 = vadd.f32 %v3423_v12, %v9507_v36  ;;  %v3555_v24 = vmax.f32 %v6945_v1, 0.0  ;;  %v3557_v26 = vmax.f32 %v7009_v2, 0.0 }
 0x301   : > { %v3558_v22 = vmax.f32 %v6946_v7, 0.0  ;;  %v3560_v23 = vmax.f32 %v7010_v8, 0.0 }
 0x302   : > { %v3559_v37 = vmax.f32 %v6947_v14, 0.0  ;;  %v3561_v38 = vmax.f32 %v7011_v15, 0.0 }
 0x303   : > { %v3638_v39 = vpack.c.bf16 %v3558_v22, %v3554_v16  ;;  %v9835_v40 = vpack.c.bf16 %v3560_v23, %v3556_v18 }
 0x304   : > { %v3639_v41 = vpack.c.bf16 %v3559_v37, %v3555_v24  ;;  %v9837_v43 = vpack.c.bf16 %v3561_v38, %v3557_v26  ;;  %v2655_v47 = vpop.f32.mrb[48].mxu0  ;;  %v3427_v48 = vpop.f32.mrb[48].mxu1 }
 0x305   : > { %v6948_v49 = vadd.f32 %v2655_v47, %v9495_v33  ;;  %v7012_v51 = vadd.f32 %v3427_v48, %v9499_v34  ;;  %v2657_v53 = vpop.f32.mrb[49].mxu0  ;;  %v3429_v55 = vpop.f32.mrb[49].mxu1 }
 0x306   : > { %v6949_v57 = vadd.f32 %v2657_v53, %v9503_v35  ;;  %v7013_v58 = vadd.f32 %v3429_v55, %v9507_v36  ;;  %v2659_v59 = vpop.f32.mrb[50].mxu0  ;;  %v3431_v61 = vpop.f32.mrb[50].mxu1  ;;  %4590 = vmatprep.mubr.bf16.mxu0 %v3639_v41  ;;  %4976 = vmatprep.mubr.bf16.mxu1 %v3639_v41 }
 0x307   : > { %v6950_v1 = vadd.f32 %v2659_v59, %v9495_v33  ;;  %v7014_v2 = vadd.f32 %v3431_v61, %v9499_v34  ;;  %v2661_v3 = vpop.f32.mrb[51].mxu0  ;;  %v3433_v5 = vpop.f32.mrb[51].mxu1  ;;  %4591 = vmatmul.mubr.bf16.gmra.mrb[108].mxu0 %v3638_v39  ;;  %4977 = vmatmul.mubr.bf16.gmra.mrb[108].mxu1 %v3638_v39  ;;  %v3562_v9 = vmax.f32 %v6948_v49, 0.0  ;;  %v3564_v12 = vmax.f32 %v7012_v51, 0.0 }
 0x308   : > { %v6951_v7 = vadd.f32 %v2661_v3, %v9503_v35  ;;  %v7015_v8 = vadd.f32 %v3433_v5, %v9507_v36  ;;  %v3563_v16 = vmax.f32 %v6949_v57, 0.0  ;;  %v3565_v18 = vmax.f32 %v7013_v58, 0.0 }
 0x309   : > { %v3566_v14 = vmax.f32 %v6950_v1, 0.0  ;;  %v3568_v15 = vmax.f32 %v7014_v2, 0.0 }
 0x30a   : > { %v3567_v22 = vmax.f32 %v6951_v7, 0.0  ;;  %v3569_v23 = vmax.f32 %v7015_v8, 0.0 }
 0x30b   : > { %v3642_v24 = vpack.c.bf16 %v3566_v14, %v3562_v9  ;;  %v9847_v26 = vpack.c.bf16 %v3568_v15, %v3564_v12 }
 0x30c   : > { %v3643_v37 = vpack.c.bf16 %v3567_v22, %v3563_v16  ;;  %v9849_v38 = vpack.c.bf16 %v3569_v23, %v3565_v18  ;;  %v2665_v41 = vpop.f32.mrb[52].mxu0  ;;  %v3437_v39 = vpop.f32.mrb[52].mxu1 }
 0x30d   : > { %v6952_v47 = vadd.f32 %v2665_v41, %v9495_v33  ;;  %v7016_v48 = vadd.f32 %v3437_v39, %v9499_v34  ;;  %v2667_v49 = vpop.f32.mrb[53].mxu0  ;;  %v3439_v51 = vpop.f32.mrb[53].mxu1 }
 0x30e   : > { %v6953_v53 = vadd.f32 %v2667_v49, %v9503_v35  ;;  %v7017_v55 = vadd.f32 %v3439_v51, %v9507_v36  ;;  %v2669_v57 = vpop.f32.mrb[54].mxu0  ;;  %v3441_v58 = vpop.f32.mrb[54].mxu1  ;;  %4600 = vmatprep.mubr.bf16.mxu0 %v3643_v37  ;;  %4986 = vmatprep.mubr.bf16.mxu1 %v3643_v37 }
 0x30f   : > { %v6954_v59 = vadd.f32 %v2669_v57, %v9495_v33  ;;  %v7018_v61 = vadd.f32 %v3441_v58, %v9499_v34  ;;  %v2671_v1 = vpop.f32.mrb[55].mxu0  ;;  %v3443_v2 = vpop.f32.mrb[55].mxu1  ;;  %4601 = vmatmul.mubr.bf16.gmra.mrb[112].mxu0 %v3642_v24  ;;  %4987 = vmatmul.mubr.bf16.gmra.mrb[112].mxu1 %v3642_v24  ;;  %v3570_v7 = vmax.f32 %v6952_v47, 0.0  ;;  %v3572_v8 = vmax.f32 %v7016_v48, 0.0 }
 0x310   : > { %v6955_v3 = vadd.f32 %v2671_v1, %v9503_v35  ;;  %v7019_v5 = vadd.f32 %v3443_v2, %v9507_v36  ;;  %v3571_v14 = vmax.f32 %v6953_v53, 0.0  ;;  %v3573_v15 = vmax.f32 %v7017_v55, 0.0 }
 0x311   : > { %v3574_v9 = vmax.f32 %v6954_v59, 0.0  ;;  %v3576_v12 = vmax.f32 %v7018_v61, 0.0 }
 0x312   : > { %v3575_v16 = vmax.f32 %v6955_v3, 0.0  ;;  %v3577_v18 = vmax.f32 %v7019_v5, 0.0 }
 0x313   : > { %v3646_v22 = vpack.c.bf16 %v3574_v9, %v3570_v7  ;;  %v9859_v23 = vpack.c.bf16 %v3576_v12, %v3572_v8 }
 0x314   : > { %v3647_v37 = vpack.c.bf16 %v3575_v16, %v3571_v14  ;;  %v9861_v41 = vpack.c.bf16 %v3577_v18, %v3573_v15  ;;  %v2675_v39 = vpop.f32.mrb[56].mxu0  ;;  %v3447_v24 = vpop.f32.mrb[56].mxu1 }
 0x315   : > { %v6956_v49 = vadd.f32 %v2675_v39, %v9495_v33  ;;  %v7020_v51 = vadd.f32 %v3447_v24, %v9499_v34  ;;  %v2677_v47 = vpop.f32.mrb[57].mxu0  ;;  %v3449_v48 = vpop.f32.mrb[57].mxu1 }
 0x316   : > { %v6957_v57 = vadd.f32 %v2677_v47, %v9503_v35  ;;  %v7021_v53 = vadd.f32 %v3449_v48, %v9507_v36  ;;  %v2679_v55 = vpop.f32.mrb[58].mxu0  ;;  %v3451_v58 = vpop.f32.mrb[58].mxu1  ;;  %4610 = vmatprep.mubr.bf16.mxu0 %v3647_v37  ;;  %4996 = vmatprep.mubr.bf16.mxu1 %v3647_v37 }
 0x317   : > { %v6958_v59 = vadd.f32 %v2679_v55, %v9495_v33  ;;  %v7022_v61 = vadd.f32 %v3451_v58, %v9499_v34  ;;  %v2681_v1 = vpop.f32.mrb[59].mxu0  ;;  %v3453_v2 = vpop.f32.mrb[59].mxu1  ;;  %4611 = vmatmul.mubr.bf16.gmra.mrb[116].mxu0 %v3646_v22  ;;  %4997 = vmatmul.mubr.bf16.gmra.mrb[116].mxu1 %v3646_v22  ;;  %v3578_v7 = vmax.f32 %v6956_v49, 0.0  ;;  %v3580_v8 = vmax.f32 %v7020_v51, 0.0 }
 0x318   : > { %v6959_v3 = vadd.f32 %v2681_v1, %v9503_v35  ;;  %v7023_v5 = vadd.f32 %v3453_v2, %v9507_v36  ;;  %v3579_v14 = vmax.f32 %v6957_v57, 0.0  ;;  %v3581_v15 = vmax.f32 %v7021_v53, 0.0 }
 0x319   : > { %v3582_v9 = vmax.f32 %v6958_v59, 0.0  ;;  %v3584_v12 = vmax.f32 %v7022_v61, 0.0 }
 0x31a   : > { %v3583_v16 = vmax.f32 %v6959_v3, 0.0  ;;  %v3585_v18 = vmax.f32 %v7023_v5, 0.0 }
 0x31b   : > { %v3650_v37 = vpack.c.bf16 %v3582_v9, %v3578_v7  ;;  %v9871_v39 = vpack.c.bf16 %v3584_v12, %v3580_v8 }
 0x31c   : > { %v3651_v24 = vpack.c.bf16 %v3583_v16, %v3579_v14  ;;  %v9873_v47 = vpack.c.bf16 %v3585_v18, %v3581_v15  ;;  %v2685_v48 = vpop.f32.mrb[60].mxu0  ;;  %v3457_v22 = vpop.f32.mrb[60].mxu1 }
 0x31d   : > { %v6960_v55 = vadd.f32 %v2685_v48, %v9495_v33  ;;  %v7024_v58 = vadd.f32 %v3457_v22, %v9499_v34  ;;  %v2687_v49 = vpop.f32.mrb[61].mxu0  ;;  %v3459_v51 = vpop.f32.mrb[61].mxu1 }
 0x31e   : > { %v6961_v59 = vadd.f32 %v2687_v49, %v9503_v35  ;;  %v7025_v57 = vadd.f32 %v3459_v51, %v9507_v36  ;;  %v2689_v53 = vpop.f32.mrb[62].mxu0  ;;  %v3461_v61 = vpop.f32.mrb[62].mxu1  ;;  %4620 = vmatprep.mubr.bf16.mxu0 %v3651_v24  ;;  %5006 = vmatprep.mubr.bf16.mxu1 %v3651_v24  ;;  %v8203_v51 = vld [vmem:[%s10316_s5 + $0xc8] sm:$0xff]  }
 0x31f   : > { %v6962_v1 = vadd.f32 %v2689_v53, %v9495_v33  ;;  %v7026_v2 = vadd.f32 %v3461_v61, %v9499_v34  ;;  %v2691_v3 = vpop.f32.mrb[63].mxu0  ;;  %v3463_v5 = vpop.f32.mrb[63].mxu1  ;;  %4621 = vmatmul.mubr.bf16.gmra.mrb[120].mxu0 %v3650_v37  ;;  %5007 = vmatmul.mubr.bf16.gmra.mrb[120].mxu1 %v3650_v37  ;;  %v3586_v9 = vmax.f32 %v6960_v55, 0.0  ;;  %v3588_v12 = vmax.f32 %v7024_v58, 0.0  ;;  %v8198_v37 = vld [vmem:[%s10316_s5] sm:$0xff]   ;;  %v8201_v58 = vld [vmem:[%s10316_s5 + $0x48] sm:$0xff]  }
 0x320   : > { %v6963_v7 = vadd.f32 %v2691_v3, %v9503_v35  ;;  %v7027_v8 = vadd.f32 %v3463_v5, %v9507_v36  ;;  %v3587_v16 = vmax.f32 %v6961_v59, 0.0  ;;  %v3589_v18 = vmax.f32 %v7025_v57, 0.0  ;;  %v8197_v35 = vld [vmem:[%s10316_s5 + $0x40] sm:$0xff]   ;;  %v8204_v59 = vld [vmem:[%s10316_s5 + $0x88] sm:$0xff]   ;;  %v8206_v57 = vld [vmem:[%s10316_s5 + $0x10] sm:$0xff]  }
 0x321   : > { %v3590_v14 = vmax.f32 %v6962_v1, 0.0  ;;  %v3592_v15 = vmax.f32 %v7026_v2, 0.0  ;;  %v8199_v36 = vld [vmem:[%s10316_s5 + $0xc0] sm:$0xff]   ;;  %6610 = vmatprep.subr.bf16.mxu0 %v8197_v35  ;;  %v8208_v53 = vld [vmem:[%s10316_s5 + $0x90] sm:$0xff]   ;;  %v8209_v61 = vld [vmem:[%s10316_s5 + $0x58] sm:$0xff]  }
 0x322   : > { %v3591_v48 = vmax.f32 %v6963_v7, 0.0  ;;  %v3593_v24 = vmax.f32 %v7027_v8, 0.0  ;;  %6722 = vmatprep.subr.bf16.mxu1 %v8199_v36  ;;  %v8200_v55 = vld [vmem:[%s10316_s5 + $0x80] sm:$0xff]   ;;  %v8210_v1 = vld [vmem:[%s10316_s5 + $0xd8] sm:$0xff]   ;;  %v8217_v8 = vld [vmem:[%s10316_s5 + $0x68] sm:$0xff]  }
 0x323   : > { %v3654_v22 = vpack.c.bf16 %v3590_v14, %v3586_v9  ;;  %v9883_v33 = vpack.c.bf16 %v3592_v15, %v3588_v12  ;;  %v8211_v2 = vld [vmem:[%s10316_s5 + $0x18] sm:$0xff]   ;;  %v8215_v5 = vld [vmem:[%s10316_s5 + $0x20] sm:$0xff]   ;;  %v8218_v9 = vld [vmem:[%s10316_s5 + $0xe8] sm:$0xff]  }
 0x324   : > { %v3655_v34 = vpack.c.bf16 %v3591_v48, %v3587_v16  ;;  %v9885_v49 = vpack.c.bf16 %v3593_v24, %v3589_v18  ;;  %v8212_v3 = vld [vmem:[%s10316_s5 + $0x98] sm:$0xff]   ;;  %v8216_v7 = vld [vmem:[%s10316_s5 + $0xa0] sm:$0xff]  }
 0x326   : > { %4630 = vmatprep.mubr.bf16.mxu0 %v3655_v34  ;;  %5016 = vmatprep.mubr.bf16.mxu1 %v3655_v34 }
 0x327   : > { %4631 = vmatmul.mubr.bf16.gmra.mrb[124].mxu0 %v3654_v22  ;;  %5017 = vmatmul.mubr.bf16.gmra.mrb[124].mxu1 %v3654_v22 }
 0x328   : > { %4673 = vmatprep.mubr.bf16.mxu0 %v9519_v0  ;;  %5059 = vmatprep.mubr.bf16.mxu1 %v9519_v0  ;;  %v8202_v0 = vld [vmem:[%s10316_s5 + $0x8] sm:$0xff]  }
 0x32f   : > { %4674 = vmatmul.mubr.bf16.vlgmr.msra.gmra.mrb[64].mxu0 %v9517_v62  ;;  %5060 = vmatmul.mubr.bf16.vlgmr.msra.gmra.mrb[64].mxu1 %v9517_v62  ;;  %v8205_v62 = vld [vmem:[%s10316_s5 + $0x50] sm:$0xff]  }
 0x330   : > { %4683 = vmatprep.mubr.bf16.mxu0 %v9555_v46  ;;  %5069 = vmatprep.mubr.bf16.mxu1 %v9555_v46  ;;  %v8207_v46 = vld [vmem:[%s10316_s5 + $0xd0] sm:$0xff]  }
 0x331   : > { %6611 = vmatpush3.bf16.msra.mxu0 %v8198_v37  ;;  %6723 = vmatpush3.bf16.msra.mxu1 %v8200_v55 }
 0x332   : > { %6612 = vmatprep.subr.bf16.mxu0 %v8201_v58  ;;  %6724 = vmatprep.subr.bf16.mxu1 %v8203_v51 }
 0x335   : > { %6613 = vmatpush3.bf16.msra.mxu0 %v8202_v0  ;;  %6725 = vmatpush3.bf16.msra.mxu1 %v8204_v59 }
 0x336   : > { %6614 = vmatprep.subr.bf16.mxu0 %v8205_v62  ;;  %6726 = vmatprep.subr.bf16.mxu1 %v8207_v46 }
 0x337   : > { %4684 = vmatmul.mubr.bf16.gmra.mrb[68].mxu0 %v9553_v44  ;;  %5070 = vmatmul.mubr.bf16.gmra.mrb[68].mxu1 %v9553_v44  ;;  %v8213_v44 = vld [vmem:[%s10316_s5 + $0x60] sm:$0xff]  }
 0x338   : > { %4693 = vmatprep.mubr.bf16.mxu0 %v9591_v21  ;;  %5079 = vmatprep.mubr.bf16.mxu1 %v9591_v21  ;;  %v8214_v21 = vld [vmem:[%s10316_s5 + $0xe0] sm:$0xff]  }
 0x339   : > { %6615 = vmatpush3.bf16.msra.mxu0 %v8206_v57  ;;  %6727 = vmatpush3.bf16.msra.mxu1 %v8208_v53 }
 0x33a   : > { %6616 = vmatprep.subr.bf16.mxu0 %v8209_v61  ;;  %6728 = vmatprep.subr.bf16.mxu1 %v8210_v1 }
 0x33d   : > { %6617 = vmatpush3.bf16.msra.mxu0 %v8211_v2  ;;  %6729 = vmatpush3.bf16.msra.mxu1 %v8212_v3 }
 0x33e   : > { %6618 = vmatprep.subr.bf16.mxu0 %v8213_v44  ;;  %6730 = vmatprep.subr.bf16.mxu1 %v8214_v21 }
 0x33f   : > { %4694 = vmatmul.mubr.bf16.gmra.mrb[72].mxu0 %v9589_v19  ;;  %5080 = vmatmul.mubr.bf16.gmra.mrb[72].mxu1 %v9589_v19  ;;  %v8219_v19 = vld [vmem:[%s10316_s5 + $0x28] sm:$0xff]  }
 0x340   : > { %4703 = vmatprep.mubr.bf16.mxu0 %v9627_v6  ;;  %5089 = vmatprep.mubr.bf16.mxu1 %v9627_v6  ;;  %v8221_v6 = vld [vmem:[%s10316_s5 + $0x70] sm:$0xff]  }
 0x341   : > { %6619 = vmatpush3.bf16.msra.mxu0 %v8215_v5  ;;  %6731 = vmatpush3.bf16.msra.mxu1 %v8216_v7 }
 0x342   : > { %6620 = vmatprep.subr.bf16.mxu0 %v8217_v8  ;;  %6732 = vmatprep.subr.bf16.mxu1 %v8218_v9 }
 0x345   : > { %6621 = vmatpush3.bf16.msra.mxu0 %v8219_v19 }
 0x346   : > { %6622 = vmatprep.subr.bf16.mxu0 %v8221_v6 }
 0x347   : > { %4704 = vmatmul.mubr.bf16.gmra.mrb[76].mxu0 %v9625_v4  ;;  %5090 = vmatmul.mubr.bf16.gmra.mrb[76].mxu1 %v9625_v4  ;;  %v8220_v4 = vld [vmem:[%s10316_s5 + $0xa8] sm:$0xff]  }
 0x348   : > { %4713 = vmatprep.mubr.bf16.mxu0 %v9663_v56  ;;  %5099 = vmatprep.mubr.bf16.mxu1 %v9663_v56  ;;  %v8223_v56 = vld [vmem:[%s10316_s5 + $0x30] sm:$0xff]  }
 0x349   : > { %6733 = vmatpush3.bf16.msra.mxu1 %v8220_v4  ;;  %6623 = vmatpush3.bf16.msra.mxu0 %v8223_v56 }
 0x34f   : > { %4714 = vmatmul.mubr.bf16.gmra.mrb[80].mxu0 %v9661_v54  ;;  %5100 = vmatmul.mubr.bf16.gmra.mrb[80].mxu1 %v9661_v54  ;;  %v8222_v54 = vld [vmem:[%s10316_s5 + $0xf0] sm:$0xff]  }
 0x350   : > { %4723 = vmatprep.mubr.bf16.mxu0 %v9699_v45  ;;  %5109 = vmatprep.mubr.bf16.mxu1 %v9699_v45  ;;  %v8225_v45 = vld [vmem:[%s10316_s5 + $0x78] sm:$0xff]  }
 0x351   : > { %6734 = vmatprep.subr.bf16.mxu1 %v8222_v54  ;;  %6624 = vmatprep.subr.bf16.mxu0 %v8225_v45 }
 0x357   : > { %4724 = vmatmul.mubr.bf16.gmra.mrb[84].mxu0 %v9697_v42  ;;  %5110 = vmatmul.mubr.bf16.gmra.mrb[84].mxu1 %v9697_v42  ;;  %v8224_v42 = vld [vmem:[%s10316_s5 + $0xb0] sm:$0xff]  }
 0x358   : > { %4733 = vmatprep.mubr.bf16.mxu0 %v9735_v30  ;;  %5119 = vmatprep.mubr.bf16.mxu1 %v9735_v30  ;;  %v8227_v30 = vld [vmem:[%s10316_s5 + $0x38] sm:$0xff]  }
 0x359   : > { %6735 = vmatpush3.bf16.msra.mxu1 %v8224_v42  ;;  %6625 = vmatpush3.bf16.msra.mxu0 %v8227_v30 }
 0x35f   : > { %4734 = vmatmul.mubr.bf16.gmra.mrb[88].mxu0 %v9733_v25  ;;  %5120 = vmatmul.mubr.bf16.gmra.mrb[88].mxu1 %v9733_v25  ;;  %v8226_v25 = vld [vmem:[%s10316_s5 + $0xf8] sm:$0xff]  }
 0x360   : > { %4743 = vmatprep.mubr.bf16.mxu0 %v9771_v20  ;;  %5129 = vmatprep.mubr.bf16.mxu1 %v9771_v20  ;;  %v3786_v20 = vld [vmem:[%s10315_s4] sm:$0xf] }
 0x361   : > { %6736 = vmatprep.subr.bf16.mxu1 %v8226_v25 }
 0x367   : > { %4744 = vmatmul.mubr.bf16.gmra.mrb[92].mxu0 %v9769_v17  ;;  %5130 = vmatmul.mubr.bf16.gmra.mrb[92].mxu1 %v9769_v17  ;;  %v8228_v17 = vld [vmem:[%s10316_s5 + $0xb8] sm:$0xff]  }
 0x368   : > { %4753 = vmatprep.mubr.bf16.mxu0 %v9801_v13  ;;  %5139 = vmatprep.mubr.bf16.mxu1 %v9801_v13  ;;  %v10055_v13 = vrot.slane %v3786_v20, %v883_v29 }
 0x369   : > { %6737 = vmatpush3.bf16.msra.mxu1 %v8228_v17 }
 0x36f   : > { %4754 = vmatmul.mubr.bf16.gmra.mrb[96].mxu0 %v9799_v11  ;;  %5140 = vmatmul.mubr.bf16.gmra.mrb[96].mxu1 %v9799_v11  ;;  %v10051_v11 = vrot.slane %v3786_v20, %v9486_v28 }
 0x370   : > { %4763 = vmatprep.mubr.bf16.mxu0 %v9813_v63  ;;  %5149 = vmatprep.mubr.bf16.mxu1 %v9813_v63  ;;  %v10063_v63 = vrot.slane %v3786_v20, %v887_v32 }
 0x377   : > { %4764 = vmatmul.mubr.bf16.gmra.mrb[100].mxu0 %v9811_v60  ;;  %5150 = vmatmul.mubr.bf16.gmra.mrb[100].mxu1 %v9811_v60  ;;  %v10059_v60 = vrot.slane %v3786_v20, %v879_v31 }
 0x378   : > { %4773 = vmatprep.mubr.bf16.mxu0 %v9825_v52  ;;  %5159 = vmatprep.mubr.bf16.mxu1 %v9825_v52 }
 0x37f   : > { %4774 = vmatmul.mubr.bf16.gmra.mrb[104].mxu0 %v9823_v50  ;;  %5160 = vmatmul.mubr.bf16.gmra.mrb[104].mxu1 %v9823_v50 }
 0x380   : > { %4783 = vmatprep.mubr.bf16.mxu0 %v9837_v43  ;;  %5169 = vmatprep.mubr.bf16.mxu1 %v9837_v43 }
 0x387   : > { %4784 = vmatmul.mubr.bf16.gmra.mrb[108].mxu0 %v9835_v40  ;;  %5170 = vmatmul.mubr.bf16.gmra.mrb[108].mxu1 %v9835_v40 }
 0x388   : > { %4793 = vmatprep.mubr.bf16.mxu0 %v9849_v38  ;;  %5179 = vmatprep.mubr.bf16.mxu1 %v9849_v38 }
 0x38f   : > { %4794 = vmatmul.mubr.bf16.gmra.mrb[112].mxu0 %v9847_v26  ;;  %5180 = vmatmul.mubr.bf16.gmra.mrb[112].mxu1 %v9847_v26 }
 0x390   : > { %4803 = vmatprep.mubr.bf16.mxu0 %v9861_v41  ;;  %5189 = vmatprep.mubr.bf16.mxu1 %v9861_v41 }
 0x397   : > { %4804 = vmatmul.mubr.bf16.gmra.mrb[116].mxu0 %v9859_v23  ;;  %5190 = vmatmul.mubr.bf16.gmra.mrb[116].mxu1 %v9859_v23 }
 0x398   : > { %4813 = vmatprep.mubr.bf16.mxu0 %v9873_v47  ;;  %5199 = vmatprep.mubr.bf16.mxu1 %v9873_v47 }
 0x39f   : > { %4814 = vmatmul.mubr.bf16.gmra.mrb[120].mxu0 %v9871_v39  ;;  %5200 = vmatmul.mubr.bf16.gmra.mrb[120].mxu1 %v9871_v39 }
 0x3a0   : > { %4823 = vmatprep.mubr.bf16.mxu0 %v9885_v49  ;;  %5209 = vmatprep.mubr.bf16.mxu1 %v9885_v49 }
 0x3a7   : > { %4824 = vmatmul.mubr.bf16.gmra.mrb[124].mxu0 %v9883_v33  ;;  %5210 = vmatmul.mubr.bf16.gmra.mrb[124].mxu1 %v9883_v33 }
 0x402   : > { %v4675_v50 = vpop.f32.mrb[64].mxu0  ;;  %v5061_v52 = vpop.f32.mrb[64].mxu1 }
 0x403   : > { %v7028_v40 = vadd.f32 %v4675_v50, %v10051_v11  ;;  %v7092_v43 = vadd.f32 %v5061_v52, %v10055_v13  ;;  %v4677_v26 = vpop.f32.mrb[65].mxu0  ;;  %v5063_v38 = vpop.f32.mrb[65].mxu1 }
 0x404   : > { %v7029_v23 = vadd.f32 %v4677_v26, %v10059_v60  ;;  %v7093_v29 = vadd.f32 %v5063_v38, %v10063_v63  ;;  %v4679_v41 = vpop.f32.mrb[66].mxu0  ;;  %v5065_v39 = vpop.f32.mrb[66].mxu1 }
 0x405   : > { %v7030_v31 = vadd.f32 %v4679_v41, %v10051_v11  ;;  %v7094_v47 = vadd.f32 %v5065_v39, %v10055_v13  ;;  %v4681_v32 = vpop.f32.mrb[67].mxu0  ;;  %v5067_v12 = vpop.f32.mrb[67].mxu1  ;;  %v5220_v16 = vmax.f32 %v7028_v40, 0.0  ;;  %v5222_v18 = vmax.f32 %v7092_v43, 0.0 }
 0x406   : > { %v7031_v14 = vadd.f32 %v4681_v32, %v10059_v60  ;;  %v7095_v15 = vadd.f32 %v5067_v12, %v10063_v63  ;;  %v5221_v22 = vmax.f32 %v7029_v23, 0.0  ;;  %v5223_v33 = vmax.f32 %v7093_v29, 0.0 }
 0x407   : > { %v5224_v48 = vmax.f32 %v7030_v31, 0.0  ;;  %v5226_v24 = vmax.f32 %v7094_v47, 0.0 }
 0x408   : > { %v5225_v34 = vmax.f32 %v7031_v14, 0.0  ;;  %v5227_v49 = vmax.f32 %v7095_v15, 0.0 }
 0x409   : > { %v5348_v35 = vpack.c.bf16 %v5224_v48, %v5220_v16  ;;  %v5350_v36 = vpack.c.bf16 %v5226_v24, %v5222_v18 }
 0x40a   : > { %v5349_v37 = vpack.c.bf16 %v5225_v34, %v5221_v22  ;;  %v5351_v55 = vpack.c.bf16 %v5227_v49, %v5223_v33  ;;  %v4685_v58 = vpop.f32.mrb[68].mxu0  ;;  %v5071_v51 = vpop.f32.mrb[68].mxu1 }
 0x40b   : > { %v7032_v0 = vadd.f32 %v4685_v58, %v10051_v11  ;;  %v7096_v59 = vadd.f32 %v5071_v51, %v10055_v13  ;;  %v4687_v62 = vpop.f32.mrb[69].mxu0  ;;  %v5073_v46 = vpop.f32.mrb[69].mxu1 }
 0x40c   : > { %v7033_v57 = vadd.f32 %v4687_v62, %v10059_v60  ;;  %v7097_v53 = vadd.f32 %v5073_v46, %v10063_v63  ;;  %v4689_v61 = vpop.f32.mrb[70].mxu0  ;;  %v5075_v1 = vpop.f32.mrb[70].mxu1  ;;  %5707 = vmatprep.mubr.bf16.mxu0 %v5349_v37  ;;  %5868 = vmatprep.mubr.bf16.mxu1 %v5351_v55 }
 0x40d   : > { %v7034_v2 = vadd.f32 %v4689_v61, %v10051_v11  ;;  %v7098_v3 = vadd.f32 %v5075_v1, %v10055_v13  ;;  %v4691_v44 = vpop.f32.mrb[71].mxu0  ;;  %v5077_v21 = vpop.f32.mrb[71].mxu1  ;;  %5708 = vmatmul.mubr.bf16.vlgmr.msra.gmra.mrb[128].mxu0 %v5348_v35  ;;  %5869 = vmatmul.mubr.bf16.vlgmr.msra.gmra.mrb[128].mxu1 %v5350_v36  ;;  %v5228_v8 = vmax.f32 %v7032_v0, 0.0  ;;  %v5230_v9 = vmax.f32 %v7096_v59, 0.0 }
 0x40e   : > { %v7035_v5 = vadd.f32 %v4691_v44, %v10059_v60  ;;  %v7099_v7 = vadd.f32 %v5077_v21, %v10063_v63  ;;  %v5229_v6 = vmax.f32 %v7033_v57, 0.0  ;;  %v5231_v54 = vmax.f32 %v7097_v53, 0.0 }
 0x40f   : > { %v5232_v19 = vmax.f32 %v7034_v2, 0.0  ;;  %v5234_v4 = vmax.f32 %v7098_v3, 0.0 }
 0x410   : > { %v5233_v56 = vmax.f32 %v7035_v5, 0.0  ;;  %v5235_v42 = vmax.f32 %v7099_v7, 0.0 }
 0x411   : > { %v5352_v45 = vpack.c.bf16 %v5232_v19, %v5228_v8  ;;  %v5354_v25 = vpack.c.bf16 %v5234_v4, %v5230_v9 }
 0x412   : > { %v5353_v30 = vpack.c.bf16 %v5233_v56, %v5229_v6  ;;  %v5355_v17 = vpack.c.bf16 %v5235_v42, %v5231_v54  ;;  %v4695_v20 = vpop.f32.mrb[72].mxu0  ;;  %v5081_v50 = vpop.f32.mrb[72].mxu1 }
 0x413   : > { %v7036_v52 = vadd.f32 %v4695_v20, %v10051_v11  ;;  %v7100_v40 = vadd.f32 %v5081_v50, %v10055_v13  ;;  %v4697_v43 = vpop.f32.mrb[73].mxu0  ;;  %v5083_v26 = vpop.f32.mrb[73].mxu1 }
 0x414   : > { %v7037_v38 = vadd.f32 %v4697_v43, %v10059_v60  ;;  %v7101_v23 = vadd.f32 %v5083_v26, %v10063_v63  ;;  %v4699_v29 = vpop.f32.mrb[74].mxu0  ;;  %v5085_v41 = vpop.f32.mrb[74].mxu1  ;;  %5715 = vmatprep.mubr.bf16.mxu0 %v5353_v30  ;;  %5876 = vmatprep.mubr.bf16.mxu1 %v5355_v17 }
 0x415   : > { %v7038_v39 = vadd.f32 %v4699_v29, %v10051_v11  ;;  %v7102_v31 = vadd.f32 %v5085_v41, %v10055_v13  ;;  %v4701_v47 = vpop.f32.mrb[75].mxu0  ;;  %v5087_v32 = vpop.f32.mrb[75].mxu1  ;;  %5716 = vmatmul.mubr.bf16.gmra.mrb[132].mxu0 %v5352_v45  ;;  %5877 = vmatmul.mubr.bf16.gmra.mrb[132].mxu1 %v5354_v25  ;;  %v5236_v15 = vmax.f32 %v7036_v52, 0.0  ;;  %v5238_v16 = vmax.f32 %v7100_v40, 0.0 }
 0x416   : > { %v7039_v12 = vadd.f32 %v4701_v47, %v10059_v60  ;;  %v7103_v14 = vadd.f32 %v5087_v32, %v10063_v63  ;;  %v5237_v24 = vmax.f32 %v7037_v38, 0.0  ;;  %v5239_v22 = vmax.f32 %v7101_v23, 0.0 }
 0x417   : > { %v5240_v18 = vmax.f32 %v7038_v39, 0.0  ;;  %v5242_v48 = vmax.f32 %v7102_v31, 0.0 }
 0x418   : > { %v5241_v33 = vmax.f32 %v7039_v12, 0.0  ;;  %v5243_v34 = vmax.f32 %v7103_v14, 0.0 }
 0x419   : > { %v5356_v49 = vpack.c.bf16 %v5240_v18, %v5236_v15  ;;  %v5358_v35 = vpack.c.bf16 %v5242_v48, %v5238_v16 }
 0x41a   : > { %v5357_v36 = vpack.c.bf16 %v5241_v33, %v5237_v24  ;;  %v5359_v37 = vpack.c.bf16 %v5243_v34, %v5239_v22  ;;  %v4705_v55 = vpop.f32.mrb[76].mxu0  ;;  %v5091_v58 = vpop.f32.mrb[76].mxu1 }
 0x41b   : > { %v7040_v51 = vadd.f32 %v4705_v55, %v10051_v11  ;;  %v7104_v0 = vadd.f32 %v5091_v58, %v10055_v13  ;;  %v4707_v59 = vpop.f32.mrb[77].mxu0  ;;  %v5093_v62 = vpop.f32.mrb[77].mxu1 }
 0x41c   : > { %v7041_v46 = vadd.f32 %v4707_v59, %v10059_v60  ;;  %v7105_v57 = vadd.f32 %v5093_v62, %v10063_v63  ;;  %v4709_v53 = vpop.f32.mrb[78].mxu0  ;;  %v5095_v61 = vpop.f32.mrb[78].mxu1  ;;  %5723 = vmatprep.mubr.bf16.mxu0 %v5357_v36  ;;  %5884 = vmatprep.mubr.bf16.mxu1 %v5359_v37 }
 0x41d   : > { %v7042_v1 = vadd.f32 %v4709_v53, %v10051_v11  ;;  %v7106_v2 = vadd.f32 %v5095_v61, %v10055_v13  ;;  %v4711_v3 = vpop.f32.mrb[79].mxu0  ;;  %v5097_v44 = vpop.f32.mrb[79].mxu1  ;;  %5724 = vmatmul.mubr.bf16.gmra.mrb[136].mxu0 %v5356_v49  ;;  %5885 = vmatmul.mubr.bf16.gmra.mrb[136].mxu1 %v5358_v35  ;;  %v5244_v7 = vmax.f32 %v7040_v51, 0.0  ;;  %v5246_v8 = vmax.f32 %v7104_v0, 0.0 }
 0x41e   : > { %v7043_v21 = vadd.f32 %v4711_v3, %v10059_v60  ;;  %v7107_v5 = vadd.f32 %v5097_v44, %v10063_v63  ;;  %v5245_v4 = vmax.f32 %v7041_v46, 0.0  ;;  %v5247_v6 = vmax.f32 %v7105_v57, 0.0 }
 0x41f   : > { %v5248_v9 = vmax.f32 %v7042_v1, 0.0  ;;  %v5250_v19 = vmax.f32 %v7106_v2, 0.0 }
 0x420   : > { %v5249_v54 = vmax.f32 %v7043_v21, 0.0  ;;  %v5251_v56 = vmax.f32 %v7107_v5, 0.0 }
 0x421   : > { %v5360_v42 = vpack.c.bf16 %v5248_v9, %v5244_v7  ;;  %v5362_v45 = vpack.c.bf16 %v5250_v19, %v5246_v8 }
 0x422   : > { %v5361_v25 = vpack.c.bf16 %v5249_v54, %v5245_v4  ;;  %v5363_v30 = vpack.c.bf16 %v5251_v56, %v5247_v6  ;;  %v4715_v17 = vpop.f32.mrb[80].mxu0  ;;  %v5101_v20 = vpop.f32.mrb[80].mxu1 }
 0x423   : > { %v7044_v50 = vadd.f32 %v4715_v17, %v10051_v11  ;;  %v7108_v52 = vadd.f32 %v5101_v20, %v10055_v13  ;;  %v4717_v40 = vpop.f32.mrb[81].mxu0  ;;  %v5103_v43 = vpop.f32.mrb[81].mxu1 }
 0x424   : > { %v7045_v26 = vadd.f32 %v4717_v40, %v10059_v60  ;;  %v7109_v38 = vadd.f32 %v5103_v43, %v10063_v63  ;;  %v4719_v23 = vpop.f32.mrb[82].mxu0  ;;  %v5105_v29 = vpop.f32.mrb[82].mxu1  ;;  %5731 = vmatprep.mubr.bf16.mxu0 %v5361_v25  ;;  %5892 = vmatprep.mubr.bf16.mxu1 %v5363_v30 }
 0x425   : > { %v7046_v41 = vadd.f32 %v4719_v23, %v10051_v11  ;;  %v7110_v39 = vadd.f32 %v5105_v29, %v10055_v13  ;;  %v4721_v31 = vpop.f32.mrb[83].mxu0  ;;  %v5107_v47 = vpop.f32.mrb[83].mxu1  ;;  %5732 = vmatmul.mubr.bf16.gmra.mrb[140].mxu0 %v5360_v42  ;;  %5893 = vmatmul.mubr.bf16.gmra.mrb[140].mxu1 %v5362_v45  ;;  %v5252_v14 = vmax.f32 %v7044_v50, 0.0  ;;  %v5254_v15 = vmax.f32 %v7108_v52, 0.0 }
 0x426   : > { %v7047_v32 = vadd.f32 %v4721_v31, %v10059_v60  ;;  %v7111_v12 = vadd.f32 %v5107_v47, %v10063_v63  ;;  %v5253_v48 = vmax.f32 %v7045_v26, 0.0  ;;  %v5255_v24 = vmax.f32 %v7109_v38, 0.0 }
 0x427   : > { %v5256_v16 = vmax.f32 %v7046_v41, 0.0  ;;  %v5258_v18 = vmax.f32 %v7110_v39, 0.0 }
 0x428   : > { %v5257_v22 = vmax.f32 %v7047_v32, 0.0  ;;  %v5259_v33 = vmax.f32 %v7111_v12, 0.0 }
 0x429   : > { %v5364_v34 = vpack.c.bf16 %v5256_v16, %v5252_v14  ;;  %v5366_v49 = vpack.c.bf16 %v5258_v18, %v5254_v15 }
 0x42a   : > { %v5365_v35 = vpack.c.bf16 %v5257_v22, %v5253_v48  ;;  %v5367_v36 = vpack.c.bf16 %v5259_v33, %v5255_v24  ;;  %v4725_v37 = vpop.f32.mrb[84].mxu0  ;;  %v5111_v55 = vpop.f32.mrb[84].mxu1 }
 0x42b   : > { %v7048_v58 = vadd.f32 %v4725_v37, %v10051_v11  ;;  %v7112_v51 = vadd.f32 %v5111_v55, %v10055_v13  ;;  %v4727_v0 = vpop.f32.mrb[85].mxu0  ;;  %v5113_v59 = vpop.f32.mrb[85].mxu1 }
 0x42c   : > { %v7049_v62 = vadd.f32 %v4727_v0, %v10059_v60  ;;  %v7113_v46 = vadd.f32 %v5113_v59, %v10063_v63  ;;  %v4729_v57 = vpop.f32.mrb[86].mxu0  ;;  %v5115_v53 = vpop.f32.mrb[86].mxu1  ;;  %5739 = vmatprep.mubr.bf16.mxu0 %v5365_v35  ;;  %5900 = vmatprep.mubr.bf16.mxu1 %v5367_v36 }
 0x42d   : > { %v7050_v61 = vadd.f32 %v4729_v57, %v10051_v11  ;;  %v7114_v1 = vadd.f32 %v5115_v53, %v10055_v13  ;;  %v4731_v2 = vpop.f32.mrb[87].mxu0  ;;  %v5117_v3 = vpop.f32.mrb[87].mxu1  ;;  %5740 = vmatmul.mubr.bf16.gmra.mrb[144].mxu0 %v5364_v34  ;;  %5901 = vmatmul.mubr.bf16.gmra.mrb[144].mxu1 %v5366_v49  ;;  %v5260_v5 = vmax.f32 %v7048_v58, 0.0  ;;  %v5262_v7 = vmax.f32 %v7112_v51, 0.0 }
 0x42e   : > { %v7051_v44 = vadd.f32 %v4731_v2, %v10059_v60  ;;  %v7115_v21 = vadd.f32 %v5117_v3, %v10063_v63  ;;  %v5261_v19 = vmax.f32 %v7049_v62, 0.0  ;;  %v5263_v4 = vmax.f32 %v7113_v46, 0.0 }
 0x42f   : > { %v5264_v8 = vmax.f32 %v7050_v61, 0.0  ;;  %v5266_v9 = vmax.f32 %v7114_v1, 0.0 }
 0x430   : > { %v5265_v6 = vmax.f32 %v7051_v44, 0.0  ;;  %v5267_v54 = vmax.f32 %v7115_v21, 0.0 }
 0x431   : > { %v5368_v56 = vpack.c.bf16 %v5264_v8, %v5260_v5  ;;  %v5370_v42 = vpack.c.bf16 %v5266_v9, %v5262_v7 }
 0x432   : > { %v5369_v45 = vpack.c.bf16 %v5265_v6, %v5261_v19  ;;  %v5371_v25 = vpack.c.bf16 %v5267_v54, %v5263_v4  ;;  %v4735_v30 = vpop.f32.mrb[88].mxu0  ;;  %v5121_v17 = vpop.f32.mrb[88].mxu1 }
 0x433   : > { %v7052_v20 = vadd.f32 %v4735_v30, %v10051_v11  ;;  %v7116_v50 = vadd.f32 %v5121_v17, %v10055_v13  ;;  %v4737_v52 = vpop.f32.mrb[89].mxu0  ;;  %v5123_v40 = vpop.f32.mrb[89].mxu1 }
 0x434   : > { %v7053_v43 = vadd.f32 %v4737_v52, %v10059_v60  ;;  %v7117_v26 = vadd.f32 %v5123_v40, %v10063_v63  ;;  %v4739_v38 = vpop.f32.mrb[90].mxu0  ;;  %v5125_v23 = vpop.f32.mrb[90].mxu1  ;;  %5747 = vmatprep.mubr.bf16.mxu0 %v5369_v45  ;;  %5908 = vmatprep.mubr.bf16.mxu1 %v5371_v25 }
 0x435   : > { %v7054_v29 = vadd.f32 %v4739_v38, %v10051_v11  ;;  %v7118_v41 = vadd.f32 %v5125_v23, %v10055_v13  ;;  %v4741_v39 = vpop.f32.mrb[91].mxu0  ;;  %v5127_v31 = vpop.f32.mrb[91].mxu1  ;;  %5748 = vmatmul.mubr.bf16.gmra.mrb[148].mxu0 %v5368_v56  ;;  %5909 = vmatmul.mubr.bf16.gmra.mrb[148].mxu1 %v5370_v42  ;;  %v5268_v12 = vmax.f32 %v7052_v20, 0.0  ;;  %v5270_v14 = vmax.f32 %v7116_v50, 0.0 }
 0x436   : > { %v7055_v47 = vadd.f32 %v4741_v39, %v10059_v60  ;;  %v7119_v32 = vadd.f32 %v5127_v31, %v10063_v63  ;;  %v5269_v18 = vmax.f32 %v7053_v43, 0.0  ;;  %v5271_v48 = vmax.f32 %v7117_v26, 0.0 }
 0x437   : > { %v5272_v15 = vmax.f32 %v7054_v29, 0.0  ;;  %v5274_v16 = vmax.f32 %v7118_v41, 0.0 }
 0x438   : > { %v5273_v24 = vmax.f32 %v7055_v47, 0.0  ;;  %v5275_v22 = vmax.f32 %v7119_v32, 0.0 }
 0x439   : > { %v5372_v33 = vpack.c.bf16 %v5272_v15, %v5268_v12  ;;  %v5374_v34 = vpack.c.bf16 %v5274_v16, %v5270_v14 }
 0x43a   : > { %v5373_v49 = vpack.c.bf16 %v5273_v24, %v5269_v18  ;;  %v5375_v35 = vpack.c.bf16 %v5275_v22, %v5271_v48  ;;  %v4745_v36 = vpop.f32.mrb[92].mxu0  ;;  %v5131_v37 = vpop.f32.mrb[92].mxu1 }
 0x43b   : > { %v7056_v55 = vadd.f32 %v4745_v36, %v10051_v11  ;;  %v7120_v58 = vadd.f32 %v5131_v37, %v10055_v13  ;;  %v4747_v51 = vpop.f32.mrb[93].mxu0  ;;  %v5133_v0 = vpop.f32.mrb[93].mxu1 }
 0x43c   : > { %v7057_v59 = vadd.f32 %v4747_v51, %v10059_v60  ;;  %v7121_v62 = vadd.f32 %v5133_v0, %v10063_v63  ;;  %v4749_v46 = vpop.f32.mrb[94].mxu0  ;;  %v5135_v57 = vpop.f32.mrb[94].mxu1  ;;  %5755 = vmatprep.mubr.bf16.mxu0 %v5373_v49  ;;  %5916 = vmatprep.mubr.bf16.mxu1 %v5375_v35 }
 0x43d   : > { %v7058_v53 = vadd.f32 %v4749_v46, %v10051_v11  ;;  %v7122_v61 = vadd.f32 %v5135_v57, %v10055_v13  ;;  %v4751_v1 = vpop.f32.mrb[95].mxu0  ;;  %v5137_v2 = vpop.f32.mrb[95].mxu1  ;;  %5756 = vmatmul.mubr.bf16.gmra.mrb[152].mxu0 %v5372_v33  ;;  %5917 = vmatmul.mubr.bf16.gmra.mrb[152].mxu1 %v5374_v34  ;;  %v5276_v21 = vmax.f32 %v7056_v55, 0.0  ;;  %v5278_v5 = vmax.f32 %v7120_v58, 0.0 }
 0x43e   : > { %v7059_v3 = vadd.f32 %v4751_v1, %v10059_v60  ;;  %v7123_v44 = vadd.f32 %v5137_v2, %v10063_v63  ;;  %v5277_v9 = vmax.f32 %v7057_v59, 0.0  ;;  %v5279_v19 = vmax.f32 %v7121_v62, 0.0 }
 0x43f   : > { %v5280_v7 = vmax.f32 %v7058_v53, 0.0  ;;  %v5282_v8 = vmax.f32 %v7122_v61, 0.0 }
 0x440   : > { %v5281_v4 = vmax.f32 %v7059_v3, 0.0  ;;  %v5283_v6 = vmax.f32 %v7123_v44, 0.0 }
 0x441   : > { %v5376_v54 = vpack.c.bf16 %v5280_v7, %v5276_v21  ;;  %v5378_v56 = vpack.c.bf16 %v5282_v8, %v5278_v5 }
 0x442   : > { %v5377_v42 = vpack.c.bf16 %v5281_v4, %v5277_v9  ;;  %v5379_v45 = vpack.c.bf16 %v5283_v6, %v5279_v19  ;;  %v4755_v25 = vpop.f32.mrb[96].mxu0  ;;  %v5141_v30 = vpop.f32.mrb[96].mxu1 }
 0x443   : > { %v7060_v17 = vadd.f32 %v4755_v25, %v10051_v11  ;;  %v7124_v20 = vadd.f32 %v5141_v30, %v10055_v13  ;;  %v4757_v50 = vpop.f32.mrb[97].mxu0  ;;  %v5143_v52 = vpop.f32.mrb[97].mxu1 }
 0x444   : > { %v7061_v40 = vadd.f32 %v4757_v50, %v10059_v60  ;;  %v7125_v43 = vadd.f32 %v5143_v52, %v10063_v63  ;;  %v4759_v26 = vpop.f32.mrb[98].mxu0  ;;  %v5145_v38 = vpop.f32.mrb[98].mxu1  ;;  %5763 = vmatprep.mubr.bf16.mxu0 %v5377_v42  ;;  %5924 = vmatprep.mubr.bf16.mxu1 %v5379_v45 }
 0x445   : > { %v7062_v23 = vadd.f32 %v4759_v26, %v10051_v11  ;;  %v7126_v29 = vadd.f32 %v5145_v38, %v10055_v13  ;;  %v4761_v41 = vpop.f32.mrb[99].mxu0  ;;  %v5147_v39 = vpop.f32.mrb[99].mxu1  ;;  %5764 = vmatmul.mubr.bf16.gmra.mrb[156].mxu0 %v5376_v54  ;;  %5925 = vmatmul.mubr.bf16.gmra.mrb[156].mxu1 %v5378_v56  ;;  %v5284_v32 = vmax.f32 %v7060_v17, 0.0  ;;  %v5286_v12 = vmax.f32 %v7124_v20, 0.0 }
 0x446   : > { %v7063_v31 = vadd.f32 %v4761_v41, %v10059_v60  ;;  %v7127_v47 = vadd.f32 %v5147_v39, %v10063_v63  ;;  %v5285_v16 = vmax.f32 %v7061_v40, 0.0  ;;  %v5287_v18 = vmax.f32 %v7125_v43, 0.0 }
 0x447   : > { %v5288_v14 = vmax.f32 %v7062_v23, 0.0  ;;  %v5290_v15 = vmax.f32 %v7126_v29, 0.0 }
 0x448   : > { %v5289_v48 = vmax.f32 %v7063_v31, 0.0  ;;  %v5291_v24 = vmax.f32 %v7127_v47, 0.0 }
 0x449   : > { %v5380_v22 = vpack.c.bf16 %v5288_v14, %v5284_v32  ;;  %v5382_v33 = vpack.c.bf16 %v5290_v15, %v5286_v12 }
 0x44a   : > { %v5381_v34 = vpack.c.bf16 %v5289_v48, %v5285_v16  ;;  %v5383_v49 = vpack.c.bf16 %v5291_v24, %v5287_v18  ;;  %v4765_v35 = vpop.f32.mrb[100].mxu0  ;;  %v5151_v36 = vpop.f32.mrb[100].mxu1 }
 0x44b   : > { %v7064_v37 = vadd.f32 %v4765_v35, %v10051_v11  ;;  %v7128_v55 = vadd.f32 %v5151_v36, %v10055_v13  ;;  %v4767_v58 = vpop.f32.mrb[101].mxu0  ;;  %v5153_v51 = vpop.f32.mrb[101].mxu1 }
 0x44c   : > { %v7065_v0 = vadd.f32 %v4767_v58, %v10059_v60  ;;  %v7129_v59 = vadd.f32 %v5153_v51, %v10063_v63  ;;  %v4769_v62 = vpop.f32.mrb[102].mxu0  ;;  %v5155_v46 = vpop.f32.mrb[102].mxu1  ;;  %5771 = vmatprep.mubr.bf16.mxu0 %v5381_v34  ;;  %5932 = vmatprep.mubr.bf16.mxu1 %v5383_v49 }
 0x44d   : > { %v7066_v57 = vadd.f32 %v4769_v62, %v10051_v11  ;;  %v7130_v53 = vadd.f32 %v5155_v46, %v10055_v13  ;;  %v4771_v61 = vpop.f32.mrb[103].mxu0  ;;  %v5157_v1 = vpop.f32.mrb[103].mxu1  ;;  %5772 = vmatmul.mubr.bf16.gmra.mrb[160].mxu0 %v5380_v22  ;;  %5933 = vmatmul.mubr.bf16.gmra.mrb[160].mxu1 %v5382_v33  ;;  %v5292_v44 = vmax.f32 %v7064_v37, 0.0  ;;  %v5294_v21 = vmax.f32 %v7128_v55, 0.0 }
 0x44e   : > { %v7067_v2 = vadd.f32 %v4771_v61, %v10059_v60  ;;  %v7131_v3 = vadd.f32 %v5157_v1, %v10063_v63  ;;  %v5293_v8 = vmax.f32 %v7065_v0, 0.0  ;;  %v5295_v9 = vmax.f32 %v7129_v59, 0.0 }
 0x44f   : > { %v5296_v5 = vmax.f32 %v7066_v57, 0.0  ;;  %v5298_v7 = vmax.f32 %v7130_v53, 0.0 }
 0x450   : > { %v5297_v19 = vmax.f32 %v7067_v2, 0.0  ;;  %v5299_v4 = vmax.f32 %v7131_v3, 0.0 }
 0x451   : > { %v5384_v6 = vpack.c.bf16 %v5296_v5, %v5292_v44  ;;  %v5386_v54 = vpack.c.bf16 %v5298_v7, %v5294_v21 }
 0x452   : > { %v5385_v56 = vpack.c.bf16 %v5297_v19, %v5293_v8  ;;  %v5387_v42 = vpack.c.bf16 %v5299_v4, %v5295_v9  ;;  %v4775_v45 = vpop.f32.mrb[104].mxu0  ;;  %v5161_v25 = vpop.f32.mrb[104].mxu1 }
 0x453   : > { %v7068_v30 = vadd.f32 %v4775_v45, %v10051_v11  ;;  %v7132_v17 = vadd.f32 %v5161_v25, %v10055_v13  ;;  %v4777_v20 = vpop.f32.mrb[105].mxu0  ;;  %v5163_v50 = vpop.f32.mrb[105].mxu1 }
 0x454   : > { %v7069_v52 = vadd.f32 %v4777_v20, %v10059_v60  ;;  %v7133_v40 = vadd.f32 %v5163_v50, %v10063_v63  ;;  %v4779_v43 = vpop.f32.mrb[106].mxu0  ;;  %v5165_v26 = vpop.f32.mrb[106].mxu1  ;;  %5779 = vmatprep.mubr.bf16.mxu0 %v5385_v56  ;;  %5940 = vmatprep.mubr.bf16.mxu1 %v5387_v42 }
 0x455   : > { %v7070_v38 = vadd.f32 %v4779_v43, %v10051_v11  ;;  %v7134_v23 = vadd.f32 %v5165_v26, %v10055_v13  ;;  %v4781_v29 = vpop.f32.mrb[107].mxu0  ;;  %v5167_v41 = vpop.f32.mrb[107].mxu1  ;;  %5780 = vmatmul.mubr.bf16.gmra.mrb[164].mxu0 %v5384_v6  ;;  %5941 = vmatmul.mubr.bf16.gmra.mrb[164].mxu1 %v5386_v54  ;;  %v5300_v47 = vmax.f32 %v7068_v30, 0.0  ;;  %v5302_v32 = vmax.f32 %v7132_v17, 0.0 }
 0x456   : > { %v7071_v39 = vadd.f32 %v4781_v29, %v10059_v60  ;;  %v7135_v31 = vadd.f32 %v5167_v41, %v10063_v63  ;;  %v5301_v15 = vmax.f32 %v7069_v52, 0.0  ;;  %v5303_v16 = vmax.f32 %v7133_v40, 0.0 }
 0x457   : > { %v5304_v12 = vmax.f32 %v7070_v38, 0.0  ;;  %v5306_v14 = vmax.f32 %v7134_v23, 0.0 }
 0x458   : > { %v5305_v18 = vmax.f32 %v7071_v39, 0.0  ;;  %v5307_v48 = vmax.f32 %v7135_v31, 0.0 }
 0x459   : > { %v5388_v24 = vpack.c.bf16 %v5304_v12, %v5300_v47  ;;  %v5390_v22 = vpack.c.bf16 %v5306_v14, %v5302_v32 }
 0x45a   : > { %v5389_v33 = vpack.c.bf16 %v5305_v18, %v5301_v15  ;;  %v5391_v34 = vpack.c.bf16 %v5307_v48, %v5303_v16  ;;  %v4785_v49 = vpop.f32.mrb[108].mxu0  ;;  %v5171_v35 = vpop.f32.mrb[108].mxu1 }
 0x45b   : > { %v7072_v36 = vadd.f32 %v4785_v49, %v10051_v11  ;;  %v7136_v37 = vadd.f32 %v5171_v35, %v10055_v13  ;;  %v4787_v55 = vpop.f32.mrb[109].mxu0  ;;  %v5173_v58 = vpop.f32.mrb[109].mxu1 }
 0x45c   : > { %v7073_v51 = vadd.f32 %v4787_v55, %v10059_v60  ;;  %v7137_v0 = vadd.f32 %v5173_v58, %v10063_v63  ;;  %v4789_v59 = vpop.f32.mrb[110].mxu0  ;;  %v5175_v62 = vpop.f32.mrb[110].mxu1  ;;  %5787 = vmatprep.mubr.bf16.mxu0 %v5389_v33  ;;  %5948 = vmatprep.mubr.bf16.mxu1 %v5391_v34 }
 0x45d   : > { %v7074_v46 = vadd.f32 %v4789_v59, %v10051_v11  ;;  %v7138_v57 = vadd.f32 %v5175_v62, %v10055_v13  ;;  %v4791_v53 = vpop.f32.mrb[111].mxu0  ;;  %v5177_v61 = vpop.f32.mrb[111].mxu1  ;;  %5788 = vmatmul.mubr.bf16.gmra.mrb[168].mxu0 %v5388_v24  ;;  %5949 = vmatmul.mubr.bf16.gmra.mrb[168].mxu1 %v5390_v22  ;;  %v5308_v3 = vmax.f32 %v7072_v36, 0.0  ;;  %v5310_v44 = vmax.f32 %v7136_v37, 0.0 }
 0x45e   : > { %v7075_v1 = vadd.f32 %v4791_v53, %v10059_v60  ;;  %v7139_v2 = vadd.f32 %v5177_v61, %v10063_v63  ;;  %v5309_v7 = vmax.f32 %v7073_v51, 0.0  ;;  %v5311_v8 = vmax.f32 %v7137_v0, 0.0 }
 0x45f   : > { %v5312_v21 = vmax.f32 %v7074_v46, 0.0  ;;  %v5314_v5 = vmax.f32 %v7138_v57, 0.0 }
 0x460   : > { %v5313_v9 = vmax.f32 %v7075_v1, 0.0  ;;  %v5315_v19 = vmax.f32 %v7139_v2, 0.0 }
 0x461   : > { %v5392_v4 = vpack.c.bf16 %v5312_v21, %v5308_v3  ;;  %v5394_v6 = vpack.c.bf16 %v5314_v5, %v5310_v44 }
 0x462   : > { %v5393_v54 = vpack.c.bf16 %v5313_v9, %v5309_v7  ;;  %v5395_v56 = vpack.c.bf16 %v5315_v19, %v5311_v8  ;;  %v4795_v42 = vpop.f32.mrb[112].mxu0  ;;  %v5181_v45 = vpop.f32.mrb[112].mxu1 }
 0x463   : > { %v7076_v25 = vadd.f32 %v4795_v42, %v10051_v11  ;;  %v7140_v30 = vadd.f32 %v5181_v45, %v10055_v13  ;;  %v4797_v17 = vpop.f32.mrb[113].mxu0  ;;  %v5183_v20 = vpop.f32.mrb[113].mxu1 }
 0x464   : > { %v7077_v50 = vadd.f32 %v4797_v17, %v10059_v60  ;;  %v7141_v52 = vadd.f32 %v5183_v20, %v10063_v63  ;;  %v4799_v40 = vpop.f32.mrb[114].mxu0  ;;  %v5185_v43 = vpop.f32.mrb[114].mxu1  ;;  %5795 = vmatprep.mubr.bf16.mxu0 %v5393_v54  ;;  %5956 = vmatprep.mubr.bf16.mxu1 %v5395_v56 }
 0x465   : > { %v7078_v26 = vadd.f32 %v4799_v40, %v10051_v11  ;;  %v7142_v38 = vadd.f32 %v5185_v43, %v10055_v13  ;;  %v4801_v23 = vpop.f32.mrb[115].mxu0  ;;  %v5187_v29 = vpop.f32.mrb[115].mxu1  ;;  %5796 = vmatmul.mubr.bf16.gmra.mrb[172].mxu0 %v5392_v4  ;;  %5957 = vmatmul.mubr.bf16.gmra.mrb[172].mxu1 %v5394_v6  ;;  %v5316_v31 = vmax.f32 %v7076_v25, 0.0  ;;  %v5318_v47 = vmax.f32 %v7140_v30, 0.0 }
 0x466   : > { %v7079_v41 = vadd.f32 %v4801_v23, %v10059_v60  ;;  %v7143_v39 = vadd.f32 %v5187_v29, %v10063_v63  ;;  %v5317_v14 = vmax.f32 %v7077_v50, 0.0  ;;  %v5319_v15 = vmax.f32 %v7141_v52, 0.0 }
 0x467   : > { %v5320_v32 = vmax.f32 %v7078_v26, 0.0  ;;  %v5322_v12 = vmax.f32 %v7142_v38, 0.0 }
 0x468   : > { %v5321_v16 = vmax.f32 %v7079_v41, 0.0  ;;  %v5323_v18 = vmax.f32 %v7143_v39, 0.0 }
 0x469   : > { %v5396_v48 = vpack.c.bf16 %v5320_v32, %v5316_v31  ;;  %v5398_v24 = vpack.c.bf16 %v5322_v12, %v5318_v47 }
 0x46a   : > { %v5397_v22 = vpack.c.bf16 %v5321_v16, %v5317_v14  ;;  %v5399_v33 = vpack.c.bf16 %v5323_v18, %v5319_v15  ;;  %v4805_v34 = vpop.f32.mrb[116].mxu0  ;;  %v5191_v49 = vpop.f32.mrb[116].mxu1 }
 0x46b   : > { %v7080_v35 = vadd.f32 %v4805_v34, %v10051_v11  ;;  %v7144_v36 = vadd.f32 %v5191_v49, %v10055_v13  ;;  %v4807_v37 = vpop.f32.mrb[117].mxu0  ;;  %v5193_v55 = vpop.f32.mrb[117].mxu1 }
 0x46c   : > { %v7081_v58 = vadd.f32 %v4807_v37, %v10059_v60  ;;  %v7145_v51 = vadd.f32 %v5193_v55, %v10063_v63  ;;  %v4809_v0 = vpop.f32.mrb[118].mxu0  ;;  %v5195_v59 = vpop.f32.mrb[118].mxu1  ;;  %5803 = vmatprep.mubr.bf16.mxu0 %v5397_v22  ;;  %5964 = vmatprep.mubr.bf16.mxu1 %v5399_v33 }
 0x46d   : > { %v7082_v62 = vadd.f32 %v4809_v0, %v10051_v11  ;;  %v7146_v46 = vadd.f32 %v5195_v59, %v10055_v13  ;;  %v4811_v57 = vpop.f32.mrb[119].mxu0  ;;  %v5197_v53 = vpop.f32.mrb[119].mxu1  ;;  %5804 = vmatmul.mubr.bf16.gmra.mrb[176].mxu0 %v5396_v48  ;;  %5965 = vmatmul.mubr.bf16.gmra.mrb[176].mxu1 %v5398_v24  ;;  %v5324_v2 = vmax.f32 %v7080_v35, 0.0  ;;  %v5326_v3 = vmax.f32 %v7144_v36, 0.0 }
 0x46e   : > { %v7083_v61 = vadd.f32 %v4811_v57, %v10059_v60  ;;  %v7147_v1 = vadd.f32 %v5197_v53, %v10063_v63  ;;  %v5325_v5 = vmax.f32 %v7081_v58, 0.0  ;;  %v5327_v7 = vmax.f32 %v7145_v51, 0.0 }
 0x46f   : > { %v5328_v44 = vmax.f32 %v7082_v62, 0.0  ;;  %v5330_v21 = vmax.f32 %v7146_v46, 0.0 }
 0x470   : > { %v5329_v8 = vmax.f32 %v7083_v61, 0.0  ;;  %v5331_v9 = vmax.f32 %v7147_v1, 0.0 }
 0x471   : > { %v5400_v19 = vpack.c.bf16 %v5328_v44, %v5324_v2  ;;  %v5402_v4 = vpack.c.bf16 %v5330_v21, %v5326_v3 }
 0x472   : > { %v5401_v6 = vpack.c.bf16 %v5329_v8, %v5325_v5  ;;  %v5403_v54 = vpack.c.bf16 %v5331_v9, %v5327_v7  ;;  %v4815_v56 = vpop.f32.mrb[120].mxu0  ;;  %v5201_v42 = vpop.f32.mrb[120].mxu1 }
 0x473   : > { %v7084_v45 = vadd.f32 %v4815_v56, %v10051_v11  ;;  %v7148_v25 = vadd.f32 %v5201_v42, %v10055_v13  ;;  %v4817_v30 = vpop.f32.mrb[121].mxu0  ;;  %v5203_v17 = vpop.f32.mrb[121].mxu1 }
 0x474   : > { %v7085_v20 = vadd.f32 %v4817_v30, %v10059_v60  ;;  %v7149_v50 = vadd.f32 %v5203_v17, %v10063_v63  ;;  %v4819_v52 = vpop.f32.mrb[122].mxu0  ;;  %v5205_v40 = vpop.f32.mrb[122].mxu1  ;;  %5811 = vmatprep.mubr.bf16.mxu0 %v5401_v6  ;;  %5972 = vmatprep.mubr.bf16.mxu1 %v5403_v54 }
 0x475   : > { %v7086_v43 = vadd.f32 %v4819_v52, %v10051_v11  ;;  %v7150_v26 = vadd.f32 %v5205_v40, %v10055_v13  ;;  %v4821_v38 = vpop.f32.mrb[123].mxu0  ;;  %v5207_v23 = vpop.f32.mrb[123].mxu1  ;;  %5812 = vmatmul.mubr.bf16.gmra.mrb[180].mxu0 %v5400_v19  ;;  %5973 = vmatmul.mubr.bf16.gmra.mrb[180].mxu1 %v5402_v4  ;;  %v5332_v39 = vmax.f32 %v7084_v45, 0.0  ;;  %v5334_v31 = vmax.f32 %v7148_v25, 0.0 }
 0x476   : > { %v7087_v29 = vadd.f32 %v4821_v38, %v10059_v60  ;;  %v7151_v41 = vadd.f32 %v5207_v23, %v10063_v63  ;;  %v5333_v12 = vmax.f32 %v7085_v20, 0.0  ;;  %v5335_v14 = vmax.f32 %v7149_v50, 0.0 }
 0x477   : > { %v5336_v47 = vmax.f32 %v7086_v43, 0.0  ;;  %v5338_v32 = vmax.f32 %v7150_v26, 0.0  ;;  %v10203_v26 = vld [vmem:[%s10318_s7] sm:$0x1] }
 0x478   : > { %v5337_v15 = vmax.f32 %v7087_v29, 0.0  ;;  %v5339_v16 = vmax.f32 %v7151_v41, 0.0 }
 0x479   : > { %v5404_v18 = vpack.c.bf16 %v5336_v47, %v5332_v39  ;;  %v5406_v48 = vpack.c.bf16 %v5338_v32, %v5334_v31 }
 0x47a   : > { %v5405_v24 = vpack.c.bf16 %v5337_v15, %v5333_v12  ;;  %v5407_v22 = vpack.c.bf16 %v5339_v16, %v5335_v14  ;;  %v4825_v33 = vpop.f32.mrb[124].mxu0  ;;  %v5211_v34 = vpop.f32.mrb[124].mxu1 }
 0x47b   : > { %v7088_v49 = vadd.f32 %v4825_v33, %v10051_v11  ;;  %v7152_v35 = vadd.f32 %v5211_v34, %v10055_v13  ;;  %v4827_v36 = vpop.f32.mrb[125].mxu0  ;;  %v5213_v37 = vpop.f32.mrb[125].mxu1 }
 0x47c   : > { %v7089_v55 = vadd.f32 %v4827_v36, %v10059_v60  ;;  %v7153_v58 = vadd.f32 %v5213_v37, %v10063_v63  ;;  %v4829_v51 = vpop.f32.mrb[126].mxu0  ;;  %v5215_v0 = vpop.f32.mrb[126].mxu1  ;;  %5819 = vmatprep.mubr.bf16.mxu0 %v5405_v24  ;;  %5980 = vmatprep.mubr.bf16.mxu1 %v5407_v22 }
 0x47d   : > { %v7090_v59 = vadd.f32 %v4829_v51, %v10051_v11  ;;  %v7154_v62 = vadd.f32 %v5215_v0, %v10055_v13  ;;  %v4831_v46 = vpop.f32.mrb[127].mxu0  ;;  %v5217_v57 = vpop.f32.mrb[127].mxu1  ;;  %5820 = vmatmul.mubr.bf16.gmra.mrb[184].mxu0 %v5404_v18  ;;  %5981 = vmatmul.mubr.bf16.gmra.mrb[184].mxu1 %v5406_v48  ;;  %v5340_v1 = vmax.f32 %v7088_v49, 0.0  ;;  %v5342_v2 = vmax.f32 %v7152_v35, 0.0  ;;  %v6030_v35 = vld [vmem:[#allocation2] sm:$0x1] }
 0x47e   : > { %v7091_v53 = vadd.f32 %v4831_v46, %v10059_v60  ;;  %v7155_v61 = vadd.f32 %v5217_v57, %v10063_v63  ;;  %v5341_v21 = vmax.f32 %v7089_v55, 0.0  ;;  %v5343_v5 = vmax.f32 %v7153_v58, 0.0  ;;  %v10196_v63 = vld [vmem:[%s10317_s6] ss:$0 sm:$0xff]  ;;  %6033 = vperm.xlu0 %7710, %v6030_v35  }
 0x47f   : > { %v5344_v3 = vmax.f32 %v7090_v59, 0.0  ;;  %v5346_v44 = vmax.f32 %v7154_v62, 0.0 }
 0x480   : > { %v5345_v7 = vmax.f32 %v7091_v53, 0.0  ;;  %v5347_v8 = vmax.f32 %v7155_v61, 0.0 }
 0x481   : > { %v5408_v9 = vpack.c.bf16 %v5344_v3, %v5340_v1  ;;  %v5410_v11 = vpack.c.bf16 %v5346_v44, %v5342_v2 }
 0x482   : > { %v5409_v19 = vpack.c.bf16 %v5345_v7, %v5341_v21  ;;  %v5411_v13 = vpack.c.bf16 %v5347_v8, %v5343_v5 }
 0x484   : > { %5827 = vmatprep.mubr.bf16.mxu0 %v5409_v19  ;;  %5988 = vmatprep.mubr.bf16.mxu1 %v5411_v13 }
 0x485   : > { %5828 = vmatmul.mubr.bf16.gmra.mrb[188].mxu0 %v5408_v9  ;;  %5989 = vmatmul.mubr.bf16.gmra.mrb[188].mxu1 %v5410_v11 }
 0x486   : > { %6866 = vmatprep.mubr.f32.mxu0 %v10203_v26 }
 0x4e0   : > { %v6626_v4 = vpop.f32.mrb[128].mxu0  ;;  %v6738_v60 = vpop.f32.mrb[128].mxu1 }
 0x4e1   : > { %v6627_v6 = vpop.f32.mrb[129].mxu0  ;;  %v6739_v54 = vpop.f32.mrb[129].mxu1 }
 0x4e2   : > { %v6628_v56 = vadd.f32 %v6627_v6, %v6626_v4  ;;  %v6740_v42 = vadd.f32 %v6739_v54, %v6738_v60  ;;  %v6629_v45 = vpop.f32.mrb[130].mxu0  ;;  %v6741_v25 = vpop.f32.mrb[130].mxu1 }
 0x4e3   : > { %v6630_v30 = vpop.f32.mrb[131].mxu0  ;;  %v6742_v17 = vpop.f32.mrb[131].mxu1 }
 0x4e4   : > { %v5710_v20 = vadd.f32 %v6628_v56, %v10196_v63  ;;  %v6631_v50 = vadd.f32 %v6630_v30, %v6629_v45  ;;  %v6743_v52 = vadd.f32 %v6742_v17, %v6741_v25 }
 0x4e6   : > { %v5871_v40 = vadd.f32 %v6740_v42, %v5710_v20  ;;  %v5713_v43 = vadd.f32 %v6631_v50, %v10196_v63 }
 0x4e8   : > { %v5874_v38 = vadd.f32 %v6743_v52, %v5713_v43  ;;  %v6632_v23 = vpop.f32.mrb[132].mxu0  ;;  %v6744_v29 = vpop.f32.mrb[132].mxu1  ;;  %v5997_v31 = vmax.f32 %v5871_v40, 0.0 }
 0x4e9   : > { %v6633_v41 = vpop.f32.mrb[133].mxu0  ;;  %v6745_v39 = vpop.f32.mrb[133].mxu1 }
 0x4ea   : > { %v5998_v47 = vmax.f32 %v5874_v38, 0.0  ;;  %v6634_v32 = vadd.f32 %v6633_v41, %v6632_v23  ;;  %v6746_v12 = vadd.f32 %v6745_v39, %v6744_v29  ;;  %v6635_v14 = vpop.f32.mrb[134].mxu0  ;;  %v6747_v15 = vpop.f32.mrb[134].mxu1 }
 0x4eb   : > { %v6636_v16 = vpop.f32.mrb[135].mxu0  ;;  %v6748_v18 = vpop.f32.mrb[135].mxu1 }
 0x4ec   : > { %v10206_v48 = vpack.c.bf16 %v5998_v47, %v5997_v31  ;;  %v5718_v24 = vadd.f32 %v6634_v32, %v10196_v63  ;;  %v6637_v22 = vadd.f32 %v6636_v16, %v6635_v14  ;;  %v6749_v33 = vadd.f32 %v6748_v18, %v6747_v15 }
 0x4ee   : > { %v5879_v34 = vadd.f32 %v6746_v12, %v5718_v24  ;;  %v5721_v49 = vadd.f32 %v6637_v22, %v10196_v63 }
 0x4f0   : > { %v5882_v36 = vadd.f32 %v6749_v33, %v5721_v49  ;;  %v6638_v37 = vpop.f32.mrb[136].mxu0  ;;  %v6750_v55 = vpop.f32.mrb[136].mxu1  ;;  %v5999_v0 = vmax.f32 %v5879_v34, 0.0 }
 0x4f1   : > { %v6639_v58 = vpop.f32.mrb[137].mxu0  ;;  %v6751_v51 = vpop.f32.mrb[137].mxu1 }
 0x4f2   : > { %v6000_v59 = vmax.f32 %v5882_v36, 0.0  ;;  %v6640_v62 = vadd.f32 %v6639_v58, %v6638_v37  ;;  %v6752_v46 = vadd.f32 %v6751_v51, %v6750_v55  ;;  %v6641_v57 = vpop.f32.mrb[138].mxu0  ;;  %v6753_v53 = vpop.f32.mrb[138].mxu1 }
 0x4f3   : > { %v6642_v61 = vpop.f32.mrb[139].mxu0  ;;  %v6754_v1 = vpop.f32.mrb[139].mxu1 }
 0x4f4   : > { %v10210_v2 = vpack.c.bf16 %v6000_v59, %v5999_v0  ;;  %v5726_v3 = vadd.f32 %v6640_v62, %v10196_v63  ;;  %v6643_v44 = vadd.f32 %v6642_v61, %v6641_v57  ;;  %v6755_v21 = vadd.f32 %v6754_v1, %v6753_v53 }
 0x4f6   : > { %v5887_v5 = vadd.f32 %v6752_v46, %v5726_v3  ;;  %v5729_v7 = vadd.f32 %v6643_v44, %v10196_v63 }
 0x4f8   : > { %v5890_v8 = vadd.f32 %v6755_v21, %v5729_v7  ;;  %v6644_v9 = vpop.f32.mrb[140].mxu0  ;;  %v6756_v11 = vpop.f32.mrb[140].mxu1  ;;  %v6001_v4 = vmax.f32 %v5887_v5, 0.0 }
 0x4f9   : > { %v6645_v19 = vpop.f32.mrb[141].mxu0  ;;  %v6757_v13 = vpop.f32.mrb[141].mxu1 }
 0x4fa   : > { %v6002_v60 = vmax.f32 %v5890_v8, 0.0  ;;  %v6646_v6 = vadd.f32 %v6645_v19, %v6644_v9  ;;  %v6758_v54 = vadd.f32 %v6757_v13, %v6756_v11  ;;  %v6647_v56 = vpop.f32.mrb[142].mxu0  ;;  %v6759_v42 = vpop.f32.mrb[142].mxu1 }
 0x4fb   : > { %v6648_v45 = vpop.f32.mrb[143].mxu0  ;;  %v6760_v25 = vpop.f32.mrb[143].mxu1 }
 0x4fc   : > { %v10214_v30 = vpack.c.bf16 %v6002_v60, %v6001_v4  ;;  %v5734_v17 = vadd.f32 %v6646_v6, %v10196_v63  ;;  %v6649_v20 = vadd.f32 %v6648_v45, %v6647_v56  ;;  %v6761_v50 = vadd.f32 %v6760_v25, %v6759_v42 }
 0x4fe   : > { %v5895_v52 = vadd.f32 %v6758_v54, %v5734_v17  ;;  %v5737_v40 = vadd.f32 %v6649_v20, %v10196_v63 }
 0x500   : > { %v5898_v43 = vadd.f32 %v6761_v50, %v5737_v40  ;;  %v6650_v38 = vpop.f32.mrb[144].mxu0  ;;  %v6762_v23 = vpop.f32.mrb[144].mxu1  ;;  %v6003_v39 = vmax.f32 %v5895_v52, 0.0 }
 0x501   : > { %v6651_v29 = vpop.f32.mrb[145].mxu0  ;;  %v6763_v41 = vpop.f32.mrb[145].mxu1 }
 0x502   : > { %v6004_v31 = vmax.f32 %v5898_v43, 0.0  ;;  %v6652_v47 = vadd.f32 %v6651_v29, %v6650_v38  ;;  %v6764_v32 = vadd.f32 %v6763_v41, %v6762_v23  ;;  %v6653_v12 = vpop.f32.mrb[146].mxu0  ;;  %v6765_v14 = vpop.f32.mrb[146].mxu1 }
 0x503   : > { %v6654_v15 = vpop.f32.mrb[147].mxu0  ;;  %v6766_v16 = vpop.f32.mrb[147].mxu1 }
 0x504   : > { %v10218_v18 = vpack.c.bf16 %v6004_v31, %v6003_v39  ;;  %v5742_v24 = vadd.f32 %v6652_v47, %v10196_v63  ;;  %v6655_v22 = vadd.f32 %v6654_v15, %v6653_v12  ;;  %v6767_v33 = vadd.f32 %v6766_v16, %v6765_v14 }
 0x506   : > { %v5903_v34 = vadd.f32 %v6764_v32, %v5742_v24  ;;  %v5745_v49 = vadd.f32 %v6655_v22, %v10196_v63 }
 0x508   : > { %v5906_v35 = vadd.f32 %v6767_v33, %v5745_v49  ;;  %v6656_v36 = vpop.f32.mrb[148].mxu0  ;;  %v6768_v37 = vpop.f32.mrb[148].mxu1  ;;  %v6005_v51 = vmax.f32 %v5903_v34, 0.0 }
 0x509   : > { %v6657_v55 = vpop.f32.mrb[149].mxu0  ;;  %v6769_v58 = vpop.f32.mrb[149].mxu1 }
 0x50a   : > { %v6006_v0 = vmax.f32 %v5906_v35, 0.0  ;;  %v6658_v59 = vadd.f32 %v6657_v55, %v6656_v36  ;;  %v6770_v62 = vadd.f32 %v6769_v58, %v6768_v37  ;;  %v6659_v46 = vpop.f32.mrb[150].mxu0  ;;  %v6771_v57 = vpop.f32.mrb[150].mxu1 }
 0x50b   : > { %v6660_v53 = vpop.f32.mrb[151].mxu0  ;;  %v6772_v61 = vpop.f32.mrb[151].mxu1 }
 0x50c   : > { %v10222_v1 = vpack.c.bf16 %v6006_v0, %v6005_v51  ;;  %v5750_v3 = vadd.f32 %v6658_v59, %v10196_v63  ;;  %v6661_v44 = vadd.f32 %v6660_v53, %v6659_v46  ;;  %v6773_v21 = vadd.f32 %v6772_v61, %v6771_v57 }
 0x50e   : > { %v5911_v5 = vadd.f32 %v6770_v62, %v5750_v3  ;;  %v5753_v7 = vadd.f32 %v6661_v44, %v10196_v63 }
 0x510   : > { %v5914_v8 = vadd.f32 %v6773_v21, %v5753_v7  ;;  %v6662_v9 = vpop.f32.mrb[152].mxu0  ;;  %v6774_v11 = vpop.f32.mrb[152].mxu1  ;;  %v6007_v4 = vmax.f32 %v5911_v5, 0.0 }
 0x511   : > { %v6663_v19 = vpop.f32.mrb[153].mxu0  ;;  %v6775_v13 = vpop.f32.mrb[153].mxu1 }
 0x512   : > { %v6008_v60 = vmax.f32 %v5914_v8, 0.0  ;;  %v6664_v6 = vadd.f32 %v6663_v19, %v6662_v9  ;;  %v6776_v54 = vadd.f32 %v6775_v13, %v6774_v11  ;;  %v6665_v56 = vpop.f32.mrb[154].mxu0  ;;  %v6777_v42 = vpop.f32.mrb[154].mxu1 }
 0x513   : > { %v6666_v45 = vpop.f32.mrb[155].mxu0  ;;  %v6778_v25 = vpop.f32.mrb[155].mxu1 }
 0x514   : > { %v10226_v17 = vpack.c.bf16 %v6008_v60, %v6007_v4  ;;  %v5758_v20 = vadd.f32 %v6664_v6, %v10196_v63  ;;  %v6667_v50 = vadd.f32 %v6666_v45, %v6665_v56  ;;  %v6779_v52 = vadd.f32 %v6778_v25, %v6777_v42 }
 0x516   : > { %v5919_v40 = vadd.f32 %v6776_v54, %v5758_v20  ;;  %v5761_v43 = vadd.f32 %v6667_v50, %v10196_v63 }
 0x518   : > { %v5922_v38 = vadd.f32 %v6779_v52, %v5761_v43  ;;  %v6668_v23 = vpop.f32.mrb[156].mxu0  ;;  %v6780_v29 = vpop.f32.mrb[156].mxu1  ;;  %v6009_v31 = vmax.f32 %v5919_v40, 0.0 }
 0x519   : > { %v6669_v41 = vpop.f32.mrb[157].mxu0  ;;  %v6781_v39 = vpop.f32.mrb[157].mxu1 }
 0x51a   : > { %v6010_v47 = vmax.f32 %v5922_v38, 0.0  ;;  %v6670_v32 = vadd.f32 %v6669_v41, %v6668_v23  ;;  %v6782_v12 = vadd.f32 %v6781_v39, %v6780_v29  ;;  %v6671_v14 = vpop.f32.mrb[158].mxu0  ;;  %v6783_v15 = vpop.f32.mrb[158].mxu1 }
 0x51b   : > { %v6672_v16 = vpop.f32.mrb[159].mxu0  ;;  %v6784_v24 = vpop.f32.mrb[159].mxu1 }
 0x51c   : > { %v10230_v22 = vpack.c.bf16 %v6010_v47, %v6009_v31  ;;  %v5766_v33 = vadd.f32 %v6670_v32, %v10196_v63  ;;  %v6673_v34 = vadd.f32 %v6672_v16, %v6671_v14  ;;  %v6785_v49 = vadd.f32 %v6784_v24, %v6783_v15 }
 0x51e   : > { %v5927_v35 = vadd.f32 %v6782_v12, %v5766_v33  ;;  %v5769_v36 = vadd.f32 %v6673_v34, %v10196_v63 }
 0x520   : > { %v5930_v37 = vadd.f32 %v6785_v49, %v5769_v36  ;;  %v6674_v55 = vpop.f32.mrb[160].mxu0  ;;  %v6786_v58 = vpop.f32.mrb[160].mxu1  ;;  %v6011_v59 = vmax.f32 %v5927_v35, 0.0 }
 0x521   : > { %v6675_v51 = vpop.f32.mrb[161].mxu0  ;;  %v6787_v0 = vpop.f32.mrb[161].mxu1 }
 0x522   : > { %v6012_v62 = vmax.f32 %v5930_v37, 0.0  ;;  %v6676_v46 = vadd.f32 %v6675_v51, %v6674_v55  ;;  %v6788_v57 = vadd.f32 %v6787_v0, %v6786_v58  ;;  %v6677_v53 = vpop.f32.mrb[162].mxu0  ;;  %v6789_v61 = vpop.f32.mrb[162].mxu1 }
 0x523   : > { %v6678_v3 = vpop.f32.mrb[163].mxu0  ;;  %v6790_v44 = vpop.f32.mrb[163].mxu1 }
 0x524   : > { %v10234_v21 = vpack.c.bf16 %v6012_v62, %v6011_v59  ;;  %v5774_v5 = vadd.f32 %v6676_v46, %v10196_v63  ;;  %v6679_v7 = vadd.f32 %v6678_v3, %v6677_v53  ;;  %v6791_v8 = vadd.f32 %v6790_v44, %v6789_v61 }
 0x526   : > { %v5935_v9 = vadd.f32 %v6788_v57, %v5774_v5  ;;  %v5777_v11 = vadd.f32 %v6679_v7, %v10196_v63 }
 0x528   : > { %v5938_v19 = vadd.f32 %v6791_v8, %v5777_v11  ;;  %v6680_v13 = vpop.f32.mrb[164].mxu0  ;;  %v6792_v4 = vpop.f32.mrb[164].mxu1  ;;  %v6013_v54 = vmax.f32 %v5935_v9, 0.0 }
 0x529   : > { %v6681_v60 = vpop.f32.mrb[165].mxu0  ;;  %v6793_v6 = vpop.f32.mrb[165].mxu1 }
 0x52a   : > { %v6014_v56 = vmax.f32 %v5938_v19, 0.0  ;;  %v6682_v42 = vadd.f32 %v6681_v60, %v6680_v13  ;;  %v6794_v45 = vadd.f32 %v6793_v6, %v6792_v4  ;;  %v6683_v25 = vpop.f32.mrb[166].mxu0  ;;  %v6795_v20 = vpop.f32.mrb[166].mxu1 }
 0x52b   : > { %v6684_v50 = vpop.f32.mrb[167].mxu0  ;;  %v6796_v52 = vpop.f32.mrb[167].mxu1 }
 0x52c   : > { %v5782_v40 = vadd.f32 %v6682_v42, %v10196_v63  ;;  %v6685_v43 = vadd.f32 %v6684_v50, %v6683_v25  ;;  %v6797_v38 = vadd.f32 %v6796_v52, %v6795_v20  ;;  %v6868_v23 = vpack.c.bf16 %v6014_v56, %v6013_v54 }
 0x52e   : > { %v5943_v29 = vadd.f32 %v6794_v45, %v5782_v40  ;;  %v5785_v41 = vadd.f32 %v6685_v43, %v10196_v63  ;;  %6869 = vmatprep.subr.bf16.mxu0 %v6868_v23 }
 0x52f   : > { %6871 = vmatpush3.bf16.xpose.msra.mxu0 %v10206_v48 }
 0x530   : > { %v5946_v39 = vadd.f32 %v6797_v38, %v5785_v41  ;;  %v6686_v31 = vpop.f32.mrb[168].mxu0  ;;  %v6798_v47 = vpop.f32.mrb[168].mxu1  ;;  %v6015_v14 = vmax.f32 %v5943_v29, 0.0 }
 0x531   : > { %v6687_v32 = vpop.f32.mrb[169].mxu0  ;;  %v6799_v12 = vpop.f32.mrb[169].mxu1 }
 0x532   : > { %v6016_v15 = vmax.f32 %v5946_v39, 0.0  ;;  %v6688_v16 = vadd.f32 %v6687_v32, %v6686_v31  ;;  %v6800_v24 = vadd.f32 %v6799_v12, %v6798_v47  ;;  %v6689_v33 = vpop.f32.mrb[170].mxu0  ;;  %v6801_v34 = vpop.f32.mrb[170].mxu1 }
 0x533   : > { %v6690_v49 = vpop.f32.mrb[171].mxu0  ;;  %v6802_v35 = vpop.f32.mrb[171].mxu1 }
 0x534   : > { %v5790_v36 = vadd.f32 %v6688_v16, %v10196_v63  ;;  %v6691_v37 = vadd.f32 %v6690_v49, %v6689_v33  ;;  %v6803_v55 = vadd.f32 %v6802_v35, %v6801_v34  ;;  %v6872_v58 = vpack.c.bf16 %v6016_v15, %v6015_v14 }
 0x536   : > { %v5951_v51 = vadd.f32 %v6800_v24, %v5790_v36  ;;  %v5793_v48 = vadd.f32 %v6691_v37, %v10196_v63  ;;  %6873 = vmatprep.subr.bf16.mxu0 %v6872_v58 }
 0x537   : > { %6875 = vmatpush3.bf16.xpose.msra.mxu0 %v10210_v2 }
 0x538   : > { %v5954_v0 = vadd.f32 %v6803_v55, %v5793_v48  ;;  %v6692_v59 = vpop.f32.mrb[172].mxu0  ;;  %v6804_v62 = vpop.f32.mrb[172].mxu1  ;;  %v6017_v53 = vmax.f32 %v5951_v51, 0.0 }
 0x539   : > { %v6693_v46 = vpop.f32.mrb[173].mxu0  ;;  %v6805_v57 = vpop.f32.mrb[173].mxu1 }
 0x53a   : > { %v6018_v61 = vmax.f32 %v5954_v0, 0.0  ;;  %v6694_v3 = vadd.f32 %v6693_v46, %v6692_v59  ;;  %v6806_v44 = vadd.f32 %v6805_v57, %v6804_v62  ;;  %v6695_v5 = vpop.f32.mrb[174].mxu0  ;;  %v6807_v7 = vpop.f32.mrb[174].mxu1 }
 0x53b   : > { %v6696_v8 = vpop.f32.mrb[175].mxu0  ;;  %v6808_v9 = vpop.f32.mrb[175].mxu1 }
 0x53c   : > { %v5798_v11 = vadd.f32 %v6694_v3, %v10196_v63  ;;  %v6697_v19 = vadd.f32 %v6696_v8, %v6695_v5  ;;  %v6809_v13 = vadd.f32 %v6808_v9, %v6807_v7  ;;  %v6876_v4 = vpack.c.bf16 %v6018_v61, %v6017_v53 }
 0x53e   : > { %v5959_v60 = vadd.f32 %v6806_v44, %v5798_v11  ;;  %v5801_v2 = vadd.f32 %v6697_v19, %v10196_v63  ;;  %6877 = vmatprep.subr.bf16.mxu0 %v6876_v4 }
 0x53f   : > { %6879 = vmatpush3.bf16.xpose.msra.mxu0 %v10214_v30 }
 0x540   : > { %v5962_v6 = vadd.f32 %v6809_v13, %v5801_v2  ;;  %v6698_v54 = vpop.f32.mrb[176].mxu0  ;;  %v6810_v56 = vpop.f32.mrb[176].mxu1  ;;  %v6019_v25 = vmax.f32 %v5959_v60, 0.0 }
 0x541   : > { %v6699_v42 = vpop.f32.mrb[177].mxu0  ;;  %v6811_v45 = vpop.f32.mrb[177].mxu1 }
 0x542   : > { %v6020_v20 = vmax.f32 %v5962_v6, 0.0  ;;  %v6700_v50 = vadd.f32 %v6699_v42, %v6698_v54  ;;  %v6812_v52 = vadd.f32 %v6811_v45, %v6810_v56  ;;  %v6701_v40 = vpop.f32.mrb[178].mxu0  ;;  %v6813_v43 = vpop.f32.mrb[178].mxu1 }
 0x543   : > { %v6702_v38 = vpop.f32.mrb[179].mxu0  ;;  %v6814_v23 = vpop.f32.mrb[179].mxu1 }
 0x544   : > { %v5806_v29 = vadd.f32 %v6700_v50, %v10196_v63  ;;  %v6703_v41 = vadd.f32 %v6702_v38, %v6701_v40  ;;  %v6815_v39 = vadd.f32 %v6814_v23, %v6813_v43  ;;  %v6880_v31 = vpack.c.bf16 %v6020_v20, %v6019_v25 }
 0x546   : > { %v5967_v47 = vadd.f32 %v6812_v52, %v5806_v29  ;;  %v5809_v30 = vadd.f32 %v6703_v41, %v10196_v63  ;;  %6881 = vmatprep.subr.bf16.mxu0 %v6880_v31 }
 0x547   : > { %6883 = vmatpush3.bf16.xpose.msra.mxu0 %v10218_v18 }
 0x548   : > { %v5970_v32 = vadd.f32 %v6815_v39, %v5809_v30  ;;  %v6704_v12 = vpop.f32.mrb[180].mxu0  ;;  %v6816_v14 = vpop.f32.mrb[180].mxu1  ;;  %v6021_v24 = vmax.f32 %v5967_v47, 0.0 }
 0x549   : > { %v6705_v15 = vpop.f32.mrb[181].mxu0  ;;  %v6817_v16 = vpop.f32.mrb[181].mxu1 }
 0x54a   : > { %v6022_v33 = vmax.f32 %v5970_v32, 0.0  ;;  %v6706_v34 = vadd.f32 %v6705_v15, %v6704_v12  ;;  %v6818_v49 = vadd.f32 %v6817_v16, %v6816_v14  ;;  %v6707_v35 = vpop.f32.mrb[182].mxu0  ;;  %v6819_v36 = vpop.f32.mrb[182].mxu1 }
 0x54b   : > { %v6708_v37 = vpop.f32.mrb[183].mxu0  ;;  %v6820_v55 = vpop.f32.mrb[183].mxu1 }
 0x54c   : > { %v5814_v58 = vadd.f32 %v6706_v34, %v10196_v63  ;;  %v6709_v51 = vadd.f32 %v6708_v37, %v6707_v35  ;;  %v6821_v48 = vadd.f32 %v6820_v55, %v6819_v36  ;;  %v6884_v0 = vpack.c.bf16 %v6022_v33, %v6021_v24  ;;  %v6034_v16 = vpop.permute.xlu0 %6033 }
 0x54d   : > { %v8294_v24 = vmov 1966171168   ;;  %v6039_v34 = vrot.slane %v6034_v16, %v9486_v28 }
 0x54e   : > { %v5975_v59 = vadd.f32 %v6818_v49, %v5814_v58  ;;  %v5817_v18 = vadd.f32 %v6709_v51, %v10196_v63  ;;  %6885 = vmatprep.subr.bf16.mxu0 %v6884_v0  ;;  %v6115_v33 = vunpack.c.l.s4 %v8294_v24 }
 0x54f   : > { %6887 = vmatpush3.bf16.xpose.msra.mxu0 %v10222_v1 }
 0x550   : > { %v5978_v62 = vadd.f32 %v6821_v48, %v5817_v18  ;;  %v6710_v46 = vpop.f32.mrb[184].mxu0  ;;  %v6822_v57 = vpop.f32.mrb[184].mxu1  ;;  %v6023_v3 = vmax.f32 %v5975_v59, 0.0 }
 0x551   : > { %v6711_v53 = vpop.f32.mrb[185].mxu0  ;;  %v6823_v61 = vpop.f32.mrb[185].mxu1 }
 0x552   : > { %v6024_v44 = vmax.f32 %v5978_v62, 0.0  ;;  %v6712_v5 = vadd.f32 %v6711_v53, %v6710_v46  ;;  %v6824_v7 = vadd.f32 %v6823_v61, %v6822_v57  ;;  %v6713_v8 = vpop.f32.mrb[186].mxu0  ;;  %v6825_v9 = vpop.f32.mrb[186].mxu1 }
 0x553   : > { %v6714_v11 = vpop.f32.mrb[187].mxu0  ;;  %v6826_v19 = vpop.f32.mrb[187].mxu1 }
 0x554   : > { %v5822_v13 = vadd.f32 %v6712_v5, %v10196_v63  ;;  %v6715_v4 = vadd.f32 %v6714_v11, %v6713_v8  ;;  %v6827_v60 = vadd.f32 %v6826_v19, %v6825_v9  ;;  %v6888_v2 = vpack.c.bf16 %v6024_v44, %v6023_v3 }
 0x556   : > { %v5983_v6 = vadd.f32 %v6824_v7, %v5822_v13  ;;  %v5825_v1 = vadd.f32 %v6715_v4, %v10196_v63  ;;  %6889 = vmatprep.subr.bf16.mxu0 %v6888_v2 }
 0x557   : > { %6891 = vmatpush3.bf16.xpose.msra.mxu0 %v10226_v17 }
 0x558   : > { %v5986_v54 = vadd.f32 %v6827_v60, %v5825_v1  ;;  %v6716_v56 = vpop.f32.mrb[188].mxu0  ;;  %v6828_v42 = vpop.f32.mrb[188].mxu1  ;;  %v6025_v20 = vmax.f32 %v5983_v6, 0.0 }
 0x559   : > { %v6717_v45 = vpop.f32.mrb[189].mxu0  ;;  %v6829_v25 = vpop.f32.mrb[189].mxu1 }
 0x55a   : > { %v6026_v50 = vmax.f32 %v5986_v54, 0.0  ;;  %v6718_v52 = vadd.f32 %v6717_v45, %v6716_v56  ;;  %v6830_v40 = vadd.f32 %v6829_v25, %v6828_v42  ;;  %v6719_v43 = vpop.f32.mrb[190].mxu0  ;;  %v6831_v38 = vpop.f32.mrb[190].mxu1 }
 0x55b   : > { %v6720_v23 = vpop.f32.mrb[191].mxu0  ;;  %v6832_v29 = vpop.f32.mrb[191].mxu1 }
 0x55c   : > { %v5830_v41 = vadd.f32 %v6718_v52, %v10196_v63  ;;  %v6721_v39 = vadd.f32 %v6720_v23, %v6719_v43  ;;  %v6833_v31 = vadd.f32 %v6832_v29, %v6831_v38  ;;  %v6892_v47 = vpack.c.bf16 %v6026_v50, %v6025_v20 }
 0x55e   : > { %v5991_v17 = vadd.f32 %v6830_v40, %v5830_v41  ;;  %v5833_v30 = vadd.f32 %v6721_v39, %v10196_v63  ;;  %6893 = vmatprep.subr.bf16.mxu0 %v6892_v47  ;;  %v6116_v63 = vunpack.c.0.s8 %v6115_v33 }
 0x55f   : > { %6895 = vmatpush3.bf16.xpose.msra.mxu0 %v10230_v22 }
 0x560   : > { %v5994_v32 = vadd.f32 %v6833_v31, %v5833_v30  ;;  %v6027_v12 = vmax.f32 %v5991_v17, 0.0  ;;  %v6119_v37 = vsub.s32 %v6116_v63, %v9483_v10 }
 0x562   : > { %v6028_v14 = vmax.f32 %v5994_v32, 0.0 }
 0x564   : > { %v6896_v15 = vpack.c.bf16 %v6028_v14, %v6027_v12 }
 0x566   : > { %6897 = vmatprep.subr.bf16.mxu0 %v6896_v15 }
 0x567   : > { %6899 = vmatpush3.bf16.xpose.msra.mxu0 %v10234_v21 }
 0x56e   : > { %6867 = vmatmul.mubr.f32.vlgmr.msra.gmra.mrb[192].mxu0 %v10203_v26 }
 0x641   : > { %v6106_v49 = vpop.f32.mrb[192].mxu0 }
 0x642   : > { %v6107_v22 = vadd.f32 %v6106_v49, %v6039_v34  ;;  %v6108_v35 = vpop.f32.mrb[193].mxu0 }
 0x643   : > { %v6109_v36 = vadd.f32 %v6108_v35, %v6039_v34 }
 0x645   : > { %v6113_v55 = vcombine.low %v6107_v22, %v6109_v36 }
 0x647   : > { %v6120_v26 = vrot.slane %v6113_v55, %v6119_v37 }
 0x649   : > { %v6127_v21 = vrot.slane %v6120_v26, %v6119_v37 }
 0x64b   : > { %6133 = vst.msk [vmem:[%s330_s15] sm:$0x3] %vm6131_vm1, %v6127_v21 }
 0x64c   : > { %8242 = shalt.err (!%p8239_p3)
}
 0x64d   : > { %s8243_s28 = scalar_lea.hbm %s10269_s8, 32  ;;  %s8247_s10 = scalar_lea.hbm %s10320_s9, 64 }
 0x64e   : > { %p8244_p4 = scmp.ne.s32.totalorder %s10269_s8, %s8243_s28  ;;  %p8248_p9 = scmp.lt.u32.totalorder %s10269_s8, %s10320_s9 }
 0x64f   : > { %p8249_p10 = scmp.lt.u32.totalorder %s8247_s10, %s8243_s28  ;;  %p8251_p12 = scmp.lt.u32.totalorder %s8243_s28, %s10269_s8 }
 0x650   : > { %p8245_p7 = pnand %p8244_p4, %p8386_p5 }
 0x651   : > { %p8250_p11 = por %p8249_p10, %p8248_p9 }
 0x652   : > { %p8246_p8 = pneg %p8245_p7 }
 0x653   : > { %p8252_p13 = por %p8251_p12, %p8250_p11 }
 0x655   : > { %p8253_p0 = pnand %p8252_p13, %p8246_p8 }
 0x657   : > { %8256 = shalt.err (!%p8253_p0)
}
 0x658   : > { %7669 = dma.vmem_to_hbm [thread:$0]  (%p8386_p5), %s10271_s17, 32, %s10269_s8, %s6135_s22  }
 0x659 PF: > { %p7675_p1 = scmp.ge.s32.totalorder %s8291_s14, 2  ;;  %s6161_s18 = sand.u32 1, %s8279_s11  }
 0x65a   : > { %s6162_s25 = scalar_lea.sflag [#allocation4], %s6161_s18 }
 0x65b   : > { %p7672_p2 = pnand %p7675_p1, %p8390_p6 }
 0x65d   : > { %8274 = dma.done.wait (!%p7672_p2), %s6162_s25, 32  }
 0x65e   : > { %8276 = vsyncadd (!%p7672_p2), %s6162_s25, 4294967264  ;;  %p21_p3 = scmp.ge.s32.totalorder %s8372_s16, 4   ;;  %s10323_s11 = smov %s8283_s12 }
 0x65f   : > { %s10324_s12 = smov %s8287_s13  ;;  %s10325_s13 = smov %s8384_s19 }
 0x660   : > { %s10326_s14 = smov %s8372_s16  ;;  %23 = sbr.rel (!%p21_p3) target bundleno = 6 (0x6), region = 91 }
 0x667   :  { %6167 = vsyncpa [#allocation4], 1 }
 0x668   :  { %6169 = vsyncpa [#allocation4 + $0x1], 1 }

// kernel: tpu_custom_call.1
= control target key start
LH: loop header
LB: loop body
LE: loop exit
PB: predicated region body
PF: predicated region fallthrough
CT: control target
= control target key end

     0   :  { %s10311_s0 = inlined_call_operand.vmem [shape: f32[512,784], index: 0, kind: input, shape index: {}]   ;;  %s10312_s1 = inlined_call_operand.vmem [shape: bf16[784,512], index: 1, kind: input, shape index: {}]   ;;  %s10313_s2 = inlined_call_operand.vmem [shape: f32[1,512], index: 2, kind: input, shape index: {}]   ;;  %s10314_s3 = inlined_call_operand.vmem [shape: bf16[512,512], index: 3, kind: input, shape index: {}]   ;;  %s10315_s4 = inlined_call_operand.vmem [shape: f32[1,512], index: 4, kind: input, shape index: {}]   ;;  %s10316_s5 = inlined_call_operand.vmem [shape: bf16[512,128], index: 5, kind: input, shape index: {}]   ;;  %s10317_s6 = inlined_call_operand.vmem [shape: f32[1,128], index: 6, kind: input, shape index: {}]   ;;  %s10318_s7 = inlined_call_operand.vmem [shape: f32[1,128], index: 7, kind: input, shape index: {}]   ;;  %s10319_s8 = inlined_call_operand.<no memory space> [shape: f32[1,1], index: 8, kind: input, shape index: {}]   ;;  %s10320_s9 = inlined_call_operand.hbm [shape: f32[2,1,256], index: 9, kind: output, shape index: {}]  }
   0x1   :  { %v14_v0 = vstv %s10319_s8 }
   0x2   :  { %15 = vst [vmem:[#allocation2] sm:$0x1] %v14_v0 }
   0x3   :  { %16 = vsyncpa [#allocation4], 0 }
   0x4   :  { %18 = vsyncpa [#allocation4 + $0x1], 0  ;;  %s8349_s11 = smov 0   ;;  %s8351_s12 = smov 0  }
   0x5   :  { %s8353_s13 = smov 0   ;;  %s8355_s14 = smov 0  }
   0x6 LB: > { %s6207_s8 = sadd.s32 4294967295, %s8291_s14   ;;  %s6208_s15 = sadd.s32 4294967294, %s8291_s14   ;;  %s8291_s14 = sphi %s8355_s14, %s10326_s14   ;;  %s8287_s13 = sphi %s8353_s13, %s10325_s13   ;;  %s8283_s12 = sphi %s8351_s12, %s10324_s12   ;;  %s8279_s11 = sphi %s8349_s11, %s10323_s11  }
   0x7   : > { %s8372_s16 = sadd.s32 1, %s8291_s14   ;;  %s225_s17 = sadd.s32 1, %s8287_s13 }
   0x8   : > { %s222_s18 = ssub.s32 %s8291_s14, %s8372_s16  ;;  %p235_p0 = scmp.ne.s32.totalorder %s8287_s13, %s8283_s12 }
   0x9   : > { %p223_p1 = scmp.eq.s32.totalorder %s222_s18, 0  ;;  %p236_p2 = scmp.eq.s32.totalorder %s6207_s8, 1 }
   0xa   : > { %p241_p3 = scmp.ne.s32.totalorder %s8283_s12, %s8279_s11  ;;  %p242_p4 = scmp.eq.s32.totalorder %s6208_s15, 1 }
   0xb   : > { %s8384_s19 = scalar_select %p223_p1, %s8287_s13, %s225_s17  }
   0xc   : > { %p8386_p5 = por %p236_p2, %p235_p0  ;;  %p8390_p6 = por %p242_p4, %p241_p3 }
   0xd   : > { %p6211_p7 = scmp.ge.s32.totalorder %s8291_s14, 1  ;;  %p294_p8 = scmp.lt.s32.totalorder %s8291_s14, 3 }
   0xf   : > { %p295_p9 = pnand %p6211_p7, %p294_p8 }
  0x10   : > { %v7711_v1 = vld [vmem:[%s10312_s1 + $0x4] ss:$16 sps:$4 sm:$0xff] (!%p295_p9)   ;;  %v7713_v2 = vld [vmem:[%s10312_s1 + $0xc] ss:$16 sps:$4 sm:$0xff] (!%p295_p9)   ;;  %v7715_v3 = vld [vmem:[%s10312_s1] ss:$16 sps:$4 sm:$0xff] (!%p295_p9)  }
  0x11   : > { %298 = sbr.rel (%p295_p9) target bundleno = 1625 (0x659), region = 56  ;;  %1922 = vmatprep.subr.bf16.mxu0 (!%p295_p9), %v7711_v1  ;;  %v7716_v4 = vld [vmem:[%s10312_s1 + $0x8] ss:$16 sps:$4 sm:$0xff] (!%p295_p9)   ;;  %2694 = vmatprep.subr.bf16.mxu1 (!%p295_p9), %v7713_v2  ;;  %v7717_v5 = vld [vmem:[%s10312_s1 + $0x24] ss:$16 sps:$4 sm:$0xff] (!%p295_p9)   ;;  %s8485_s28 = sshll.u32 (!%p295_p9), %s6207_s8, 5 }
  0x12   : > { %1923 = vmatpush1.bf16.msra.mxu0 (!%p295_p9), %v7715_v3  ;;  %2695 = vmatpush1.bf16.msra.mxu1 (!%p295_p9), %v7716_v4  ;;  %v7719_v6 = vld [vmem:[%s10312_s1 + $0x2c] ss:$16 sps:$4 sm:$0xff] (!%p295_p9)   ;;  %v7721_v7 = vld [vmem:[%s10312_s1 + $0x20] ss:$16 sps:$4 sm:$0xff] (!%p295_p9)   ;;  %v7722_v8 = vld [vmem:[%s10312_s1 + $0x28] ss:$16 sps:$4 sm:$0xff] (!%p295_p9)   ;;  %s10269_s8 = scalar_lea.hbm (!%p295_p9), %s10320_s9, %s8485_s28 }
  0x13   : > { %1924 = vmatprep.subr.bf16.mxu0 (!%p295_p9), %v7717_v5  ;;  %2696 = vmatprep.subr.bf16.mxu1 (!%p295_p9), %v7719_v6  ;;  %v7723_v9 = vld [vmem:[%s10312_s1 + $0x44] ss:$16 sps:$4 sm:$0xff] (!%p295_p9)   ;;  %v7725_v10 = vld [vmem:[%s10312_s1 + $0x4c] ss:$16 sps:$4 sm:$0xff] (!%p295_p9)   ;;  %v7727_v11 = vld [vmem:[%s10312_s1 + $0x40] ss:$16 sps:$4 sm:$0xff] (!%p295_p9)  }
  0x14   : > { %v7728_v12 = vld [vmem:[%s10312_s1 + $0x48] ss:$16 sps:$4 sm:$0xff] (!%p295_p9)   ;;  %v7729_v13 = vld [vmem:[%s10312_s1 + $0x64] ss:$16 sps:$4 sm:$0xff] (!%p295_p9)   ;;  %v7731_v14 = vld [vmem:[%s10312_s1 + $0x6c] ss:$16 sps:$4 sm:$0xff] (!%p295_p9)  }
  0x15   : > { %v7733_v15 = vld [vmem:[%s10312_s1 + $0x60] ss:$16 sps:$4 sm:$0xff] (!%p295_p9)   ;;  %v7734_v16 = vld [vmem:[%s10312_s1 + $0x68] ss:$16 sps:$4 sm:$0xff] (!%p295_p9)   ;;  %v7735_v17 = vld [vmem:[%s10312_s1 + $0x84] ss:$16 sps:$4 sm:$0xff] (!%p295_p9)  }
  0x16   : > { %1925 = vmatpush1.bf16.msra.mxu0 (!%p295_p9), %v7721_v7  ;;  %2697 = vmatpush1.bf16.msra.mxu1 (!%p295_p9), %v7722_v8  ;;  %v7737_v18 = vld [vmem:[%s10312_s1 + $0x8c] ss:$16 sps:$4 sm:$0xff] (!%p295_p9)   ;;  %v7739_v19 = vld [vmem:[%s10312_s1 + $0x80] ss:$16 sps:$4 sm:$0xff] (!%p295_p9)   ;;  %v7740_v20 = vld [vmem:[%s10312_s1 + $0x88] ss:$16 sps:$4 sm:$0xff] (!%p295_p9)  }
  0x17   : > { %1926 = vmatprep.subr.bf16.mxu0 (!%p295_p9), %v7723_v9  ;;  %2698 = vmatprep.subr.bf16.mxu1 (!%p295_p9), %v7725_v10  ;;  %v7741_v21 = vld [vmem:[%s10312_s1 + $0xa4] ss:$16 sps:$4 sm:$0xff] (!%p295_p9)   ;;  %v7743_v22 = vld [vmem:[%s10312_s1 + $0xac] ss:$16 sps:$4 sm:$0xff] (!%p295_p9)   ;;  %v7745_v23 = vld [vmem:[%s10312_s1 + $0xa0] ss:$16 sps:$4 sm:$0xff] (!%p295_p9)  }
  0x18   : > { %v7746_v24 = vld [vmem:[%s10312_s1 + $0xa8] ss:$16 sps:$4 sm:$0xff]   ;;  %v7747_v25 = vld [vmem:[%s10312_s1 + $0xc4] ss:$16 sps:$4 sm:$0xff]   ;;  %v7749_v26 = vld [vmem:[%s10312_s1 + $0xcc] ss:$16 sps:$4 sm:$0xff]  }
  0x19   : > { %v7751_v27 = vld [vmem:[%s10312_s1 + $0xc0] ss:$16 sps:$4 sm:$0xff]   ;;  %v7752_v28 = vld [vmem:[%s10312_s1 + $0xc8] ss:$16 sps:$4 sm:$0xff]   ;;  %v7753_v29 = vld [vmem:[%s10312_s1 + $0xe4] ss:$16 sps:$4 sm:$0xff]  }
  0x1a   : > { %1927 = vmatpush1.bf16.msra.mxu0 %v7727_v11  ;;  %2699 = vmatpush1.bf16.msra.mxu1 %v7728_v12  ;;  %v7755_v30 = vld [vmem:[%s10312_s1 + $0xec] ss:$16 sps:$4 sm:$0xff]   ;;  %v7757_v31 = vld [vmem:[%s10312_s1 + $0xe0] ss:$16 sps:$4 sm:$0xff]   ;;  %p332_p10 = scmp.lt.s32.totalorder %s8485_s28, 63  ;;  %vm1873_vm0 = vcmask 130048  }
  0x1b   : > { %1928 = vmatprep.subr.bf16.mxu0 %v7729_v13  ;;  %2700 = vmatprep.subr.bf16.mxu1 %v7731_v14  ;;  %v7758_v32 = vld [vmem:[%s10312_s1 + $0xe8] ss:$16 sps:$4 sm:$0xff]   ;;  %v7759_v33 = vld [vmem:[%s10312_s1 + $0x104] ss:$16 sps:$4 sm:$0xff]   ;;  %v7761_v34 = vld [vmem:[%s10312_s1 + $0x10c] ss:$16 sps:$4 sm:$0xff]  }
  0x1c   : > { %v7763_v35 = vld [vmem:[%s10312_s1 + $0x100] ss:$16 sps:$4 sm:$0xff]   ;;  %v7764_v36 = vld [vmem:[%s10312_s1 + $0x108] ss:$16 sps:$4 sm:$0xff]   ;;  %s333_s30 = scalar_select %p332_p10, %s8485_s28, 63 }
  0x1d   : > { %v7765_v37 = vld [vmem:[%s10312_s1 + $0x124] ss:$16 sps:$4 sm:$0xff]   ;;  %v7767_v38 = vld [vmem:[%s10312_s1 + $0x12c] ss:$16 sps:$4 sm:$0xff]   ;;  %v7769_v39 = vld [vmem:[%s10312_s1 + $0x120] ss:$16 sps:$4 sm:$0xff]  }
  0x1e   : > { %1929 = vmatpush1.bf16.msra.mxu0 %v7733_v15  ;;  %2701 = vmatpush1.bf16.msra.mxu1 %v7734_v16  ;;  %s7668_s23 = smul.u32 56, %s333_s30  ;;  %v7770_v40 = vld [vmem:[%s10312_s1 + $0x128] ss:$16 sps:$4 sm:$0xff]   ;;  %v7771_v41 = vld [vmem:[%s10312_s1 + $0x144] ss:$16 sps:$4 sm:$0xff]   ;;  %s8295_s26 = smov [#allocation3]  }
  0x1f   : > { %1930 = vmatprep.subr.bf16.mxu0 %v7735_v17  ;;  %2702 = vmatprep.subr.bf16.mxu1 %v7737_v18  ;;  %v7773_v42 = vld [vmem:[%s10312_s1 + $0x14c] ss:$16 sps:$4 sm:$0xff]   ;;  %v7775_v43 = vld [vmem:[%s10312_s1 + $0x140] ss:$16 sps:$4 sm:$0xff]   ;;  %v7776_v44 = vld [vmem:[%s10312_s1 + $0x148] ss:$16 sps:$4 sm:$0xff]  }
  0x20   : > { %s8537_s24 = scalar_lea.vmem %s10311_s0, %s7668_s23  ;;  %v7777_v45 = vld [vmem:[%s10312_s1 + $0x164] ss:$16 sps:$4 sm:$0xff]   ;;  %v7779_v46 = vld [vmem:[%s10312_s1 + $0x16c] ss:$16 sps:$4 sm:$0xff]   ;;  %v7781_v49 = vld [vmem:[%s10312_s1 + $0x160] ss:$16 sps:$4 sm:$0xff]  }
  0x21   : > { %v340_v47 = vld [vmem:[%s8537_s24 + $0x8] sm:$0xff]  ;;  %v347_v48 = vld [vmem:[%s8537_s24 + $0x40] sm:$0xff]  ;;  %v346_v5 = vld [vmem:[%s8537_s24 + $0x38] sm:$0xff]  ;;  %s328_s23 = sand.u32 1, %s8283_s12   ;;  %s8233_s27 = sshll.u32 %s8295_s26, 4  ;;  %s8234_s27 = int_to_ptr.vmem [resolvable:$false] %s8233_s27 }
  0x22   : > { %1931 = vmatpush1.bf16.msra.mxu0 %v7739_v19  ;;  %2703 = vmatpush1.bf16.msra.mxu1 %v7740_v20  ;;  %v7782_v50 = vld [vmem:[%s10312_s1 + $0x168] ss:$16 sps:$4 sm:$0xff]   ;;  %v564_v51 = vpack.c.bf16 %v347_v48, %v340_v47  ;;  %v7783_v52 = vld [vmem:[%s10312_s1 + $0x184] ss:$16 sps:$4 sm:$0xff]   ;;  %v7785_v53 = vld [vmem:[%s10312_s1 + $0x18c] ss:$16 sps:$4 sm:$0xff]  }
  0x23   : > { %1932 = vmatprep.subr.bf16.mxu0 %v7741_v21  ;;  %2704 = vmatprep.subr.bf16.mxu1 %v7743_v22  ;;  %v7787_v54 = vld [vmem:[%s10312_s1 + $0x180] ss:$16 sps:$4 sm:$0xff]   ;;  %v7788_v55 = vld [vmem:[%s10312_s1 + $0x188] ss:$16 sps:$4 sm:$0xff]   ;;  %v7789_v56 = vld [vmem:[%s10312_s1 + $0x1a4] ss:$16 sps:$4 sm:$0xff]  }
  0x24   : > { %1954 = vmatprep.mubr.bf16.mxu0 %v564_v51  ;;  %2726 = vmatprep.mubr.bf16.mxu1 %v564_v51  ;;  %v7791_v57 = vld [vmem:[%s10312_s1 + $0x1ac] ss:$16 sps:$4 sm:$0xff]   ;;  %v7793_v58 = vld [vmem:[%s10312_s1 + $0x1a0] ss:$16 sps:$4 sm:$0xff]   ;;  %v7794_v59 = vld [vmem:[%s10312_s1 + $0x1a8] ss:$16 sps:$4 sm:$0xff]  }
  0x25   : > { %v7795_v60 = vld [vmem:[%s10312_s1 + $0x1c4] ss:$16 sps:$4 sm:$0xff]   ;;  %v7797_v61 = vld [vmem:[%s10312_s1 + $0x1cc] ss:$16 sps:$4 sm:$0xff]   ;;  %v7799_v62 = vld [vmem:[%s10312_s1 + $0x1c0] ss:$16 sps:$4 sm:$0xff]  }
  0x26   : > { %1933 = vmatpush1.bf16.msra.mxu0 %v7745_v23  ;;  %2705 = vmatpush1.bf16.msra.mxu1 %v7746_v24  ;;  %v7800_v63 = vld [vmem:[%s10312_s1 + $0x1c8] ss:$16 sps:$4 sm:$0xff]   ;;  %v7801_v0 = vld [vmem:[%s10312_s1 + $0x1e4] ss:$16 sps:$4 sm:$0xff]   ;;  %v7803_v1 = vld [vmem:[%s10312_s1 + $0x1ec] ss:$16 sps:$4 sm:$0xff]  }
  0x27   : > { %1934 = vmatprep.subr.bf16.mxu0 %v7747_v25  ;;  %2706 = vmatprep.subr.bf16.mxu1 %v7749_v26  ;;  %v7805_v2 = vld [vmem:[%s10312_s1 + $0x1e0] ss:$16 sps:$4 sm:$0xff]   ;;  %v7806_v3 = vld [vmem:[%s10312_s1 + $0x1e8] ss:$16 sps:$4 sm:$0xff]   ;;  %v7809_v8 = vld [vmem:[%s10312_s1 + $0x204] ss:$16 sps:$4 sm:$0xff]  }
  0x28   : > { %v339_v4 = vld [vmem:[%s8537_s24] sm:$0xff]  ;;  %v354_v6 = vld [vmem:[%s8537_s24 + $0x78] sm:$0xff]  ;;  %v361_v7 = vld [vmem:[%s8537_s24 + $0xb0] sm:$0xff]  ;;  %s6212_s10 = sshll.u32 %s328_s23, 1  ;;  %s6135_s22 = scalar_lea.sflag [#allocation4], %s328_s23 }
  0x29   : > { %v7812_v9 = vld [vmem:[%s10312_s1 + $0x20c] ss:$16 sps:$4 sm:$0xff]   ;;  %v563_v10 = vpack.c.bf16 %v346_v5, %v339_v4  ;;  %v571_v11 = vpack.c.bf16 %v361_v7, %v354_v6  ;;  %v7807_v12 = vld [vmem:[%s10312_s1 + $0x200] ss:$16 sps:$4 sm:$0xff]   ;;  %v7810_v13 = vld [vmem:[%s10312_s1 + $0x208] ss:$16 sps:$4 sm:$0xff]  }
  0x2a   : > { %1935 = vmatpush1.bf16.msra.mxu0 %v7751_v27  ;;  %2707 = vmatpush1.bf16.msra.mxu1 %v7752_v28  ;;  %v353_v14 = vld [vmem:[%s8537_s24 + $0x70] sm:$0xff]  ;;  %v7818_v16 = vld [vmem:[%s10312_s1 + $0x22c] ss:$16 sps:$4 sm:$0xff]   ;;  %v375_v19 = vld [vmem:[%s8537_s24 + $0x120] sm:$0xff]  ;;  %s330_s15 = scalar_lea.vmem [#allocation3], %s6212_s10  ;;  %s8235_s29 = scalar_lea.vmem %s8234_s27, 64 }
  0x2b   : > { %1936 = vmatprep.subr.bf16.mxu0 %v7753_v29  ;;  %2708 = vmatprep.subr.bf16.mxu1 %v7755_v30  ;;  %v7815_v15 = vld [vmem:[%s10312_s1 + $0x224] ss:$16 sps:$4 sm:$0xff]   ;;  %v360_v17 = vld [vmem:[%s8537_s24 + $0xa8] sm:$0xff]  ;;  %v7813_v20 = vld [vmem:[%s10312_s1 + $0x220] ss:$16 sps:$4 sm:$0xff]   ;;  %s6149_s17 = sshll.u32 %s330_s15, 4  ;;  %s10271_s17 = int_to_ptr.vmem [resolvable:$true] %s6149_s17 }
  0x2c   : > { %v368_v18 = vld [vmem:[%s8537_s24 + $0xe8] sm:$0xff]  ;;  %v7821_v22 = vld [vmem:[%s10312_s1 + $0x244] ss:$16 sps:$4 sm:$0xff]   ;;  %v570_v24 = vpack.c.bf16 %v360_v17, %v353_v14  ;;  %v7819_v26 = vld [vmem:[%s10312_s1 + $0x240] ss:$16 sps:$4 sm:$0xff]   ;;  %s8229_s25 = scalar_lea.vmem %s10271_s17, 32  ;;  %p8236_p0 = scmp.lt.s32.totalorder %s10271_s17, %s8234_s27 }
  0x2d   : > { %v7816_v21 = vld [vmem:[%s10312_s1 + $0x228] ss:$16 sps:$4 sm:$0xff]   ;;  %v7824_v23 = vld [vmem:[%s10312_s1 + $0x24c] ss:$16 sps:$4 sm:$0xff]   ;;  %v578_v25 = vpack.c.bf16 %v375_v19, %v368_v18  ;;  %v367_v28 = vld [vmem:[%s8537_s24 + $0xe0] sm:$0xff]  ;;  %p8230_p11 = scmp.ne.s32.totalorder %s10271_s17, %s8229_s25  ;;  %p8237_p1 = scmp.lt.s32.totalorder %s8235_s29, %s8229_s25 }
  0x2e   : > { %1937 = vmatpush1.bf16.msra.mxu0 %v7757_v31  ;;  %2709 = vmatpush1.bf16.msra.mxu1 %v7758_v32  ;;  %v7822_v27 = vld [vmem:[%s10312_s1 + $0x248] ss:$16 sps:$4 sm:$0xff]   ;;  %v7827_v30 = vld [vmem:[%s10312_s1 + $0x264] ss:$16 sps:$4 sm:$0xff]   ;;  %v7830_v31 = vld [vmem:[%s10312_s1 + $0x26c] ss:$16 sps:$4 sm:$0xff]  }
  0x2f   : > { %1938 = vmatprep.subr.bf16.mxu0 %v7759_v33  ;;  %2710 = vmatprep.subr.bf16.mxu1 %v7761_v34  ;;  %v374_v29 = vld [vmem:[%s8537_s24 + $0x118] sm:$0xff]  ;;  %v389_v33 = vld [vmem:[%s8537_s24 + $0x190] sm:$0xff]  ;;  %v403_v47 = vld [vmem:[%s8537_s24 + $0x200] sm:$0xff]  ;;  %p8231_p12 = pnand %p8230_p11, %p8386_p5  ;;  %p8238_p2 = por %p8237_p1, %p8236_p0 }
  0x30   : > { %v382_v32 = vld [vmem:[%s8537_s24 + $0x158] sm:$0xff]  ;;  %v7825_v34 = vld [vmem:[%s10312_s1 + $0x260] ss:$16 sps:$4 sm:$0xff]   ;;  %v7863_v6 = vld [vmem:[%s10312_s1 + $0x324] ss:$16 sps:$4 sm:$0xff]  }
  0x31   : > { %v7837_v48 = vld [vmem:[%s10312_s1 + $0x2a0] ss:$16 sps:$4 sm:$0xff]   ;;  %v7848_v51 = vld [vmem:[%s10312_s1 + $0x2cc] ss:$16 sps:$4 sm:$0xff]   ;;  %v7858_v5 = vld [vmem:[%s10312_s1 + $0x308] ss:$16 sps:$4 sm:$0xff]   ;;  %p8232_p13 = pneg %p8231_p12 }
  0x32   : > { %1939 = vmatpush1.bf16.msra.mxu0 %v7763_v35  ;;  %2711 = vmatpush1.bf16.msra.mxu1 %v7764_v36  ;;  %v7828_v35 = vld [vmem:[%s10312_s1 + $0x268] ss:$16 sps:$4 sm:$0xff]   ;;  %v7833_v36 = vld [vmem:[%s10312_s1 + $0x284] ss:$16 sps:$4 sm:$0xff]   ;;  %v7855_v4 = vld [vmem:[%s10312_s1 + $0x300] ss:$16 sps:$4 sm:$0xff]  }
  0x33   : > { %1940 = vmatprep.subr.bf16.mxu0 %v7765_v37  ;;  %2712 = vmatprep.subr.bf16.mxu1 %v7767_v38  ;;  %v7836_v37 = vld [vmem:[%s10312_s1 + $0x28c] ss:$16 sps:$4 sm:$0xff]   ;;  %v577_v38 = vpack.c.bf16 %v374_v29, %v367_v28  ;;  %v7869_v14 = vld [vmem:[%s10312_s1 + $0x344] ss:$16 sps:$4 sm:$0xff]   ;;  %v7867_v18 = vld [vmem:[%s10312_s1 + $0x340] ss:$16 sps:$4 sm:$0xff]   ;;  %p8239_p3 = pnand %p8238_p2, %p8232_p13 }
  0x34   : > { %v7866_v7 = vld [vmem:[%s10312_s1 + $0x32c] ss:$16 sps:$4 sm:$0xff]   ;;  %v7870_v19 = vld [vmem:[%s10312_s1 + $0x348] ss:$16 sps:$4 sm:$0xff]   ;;  %v7881_v28 = vld [vmem:[%s10312_s1 + $0x384] ss:$16 sps:$4 sm:$0xff]  }
  0x35   : > { %v7884_v29 = vld [vmem:[%s10312_s1 + $0x38c] ss:$16 sps:$4 sm:$0xff]  }
  0x36   : > { %1941 = vmatpush1.bf16.msra.mxu0 %v7769_v39  ;;  %2713 = vmatpush1.bf16.msra.mxu1 %v7770_v40  ;;  %v585_v39 = vpack.c.bf16 %v389_v33, %v382_v32  ;;  %v7831_v40 = vld [vmem:[%s10312_s1 + $0x280] ss:$16 sps:$4 sm:$0xff]   ;;  %v7882_v33 = vld [vmem:[%s10312_s1 + $0x388] ss:$16 sps:$4 sm:$0xff]  }
  0x37   : > { %1942 = vmatprep.subr.bf16.mxu0 %v7771_v41  ;;  %2714 = vmatprep.subr.bf16.mxu1 %v7773_v42  ;;  %v7834_v41 = vld [vmem:[%s10312_s1 + $0x288] ss:$16 sps:$4 sm:$0xff]   ;;  %v381_v42 = vld [vmem:[%s8537_s24 + $0x150] sm:$0xff] }
  0x38   : > { %v7879_v32 = vld [vmem:[%s10312_s1 + $0x380] ss:$16 sps:$4 sm:$0xff]  }
  0x3a   : > { %1943 = vmatpush1.bf16.msra.mxu0 %v7775_v43  ;;  %2715 = vmatpush1.bf16.msra.mxu1 %v7776_v44  ;;  %v388_v43 = vld [vmem:[%s8537_s24 + $0x188] sm:$0xff]  ;;  %v7839_v44 = vld [vmem:[%s10312_s1 + $0x2a4] ss:$16 sps:$4 sm:$0xff]  }
  0x3b   : > { %1944 = vmatprep.subr.bf16.mxu0 %v7777_v45  ;;  %2716 = vmatprep.subr.bf16.mxu1 %v7779_v46  ;;  %v7842_v45 = vld [vmem:[%s10312_s1 + $0x2ac] ss:$16 sps:$4 sm:$0xff]  }
  0x3c   : > { %v396_v46 = vld [vmem:[%s8537_s24 + $0x1c8] sm:$0xff] }
  0x3e   : > { %1945 = vmatpush1.bf16.msra.mxu0 %v7781_v49  ;;  %2717 = vmatpush1.bf16.msra.mxu1 %v7782_v50  ;;  %v7840_v49 = vld [vmem:[%s10312_s1 + $0x2a8] ss:$16 sps:$4 sm:$0xff]   ;;  %v7845_v50 = vld [vmem:[%s10312_s1 + $0x2c4] ss:$16 sps:$4 sm:$0xff]  }
  0x3f   : > { %1946 = vmatprep.subr.bf16.mxu0 %v7783_v52  ;;  %2718 = vmatprep.subr.bf16.mxu1 %v7785_v53  ;;  %v584_v52 = vpack.c.bf16 %v388_v43, %v381_v42  ;;  %v592_v53 = vpack.c.bf16 %v403_v47, %v396_v46  ;;  %v7893_v42 = vld [vmem:[%s10312_s1 + $0x3c4] ss:$16 sps:$4 sm:$0xff]   ;;  %v7896_v43 = vld [vmem:[%s10312_s1 + $0x3cc] ss:$16 sps:$4 sm:$0xff]   ;;  %v7894_v46 = vld [vmem:[%s10312_s1 + $0x3c8] ss:$16 sps:$4 sm:$0xff]  }
  0x42   : > { %1947 = vmatpush1.bf16.msra.mxu0 %v7787_v54  ;;  %2719 = vmatpush1.bf16.msra.mxu1 %v7788_v55  ;;  %v7843_v54 = vld [vmem:[%s10312_s1 + $0x2c0] ss:$16 sps:$4 sm:$0xff]   ;;  %v7846_v55 = vld [vmem:[%s10312_s1 + $0x2c8] ss:$16 sps:$4 sm:$0xff]  }
  0x43   : > { %1948 = vmatprep.subr.bf16.mxu0 %v7789_v56  ;;  %2720 = vmatprep.subr.bf16.mxu1 %v7791_v57  ;;  %v7851_v56 = vld [vmem:[%s10312_s1 + $0x2e4] ss:$16 sps:$4 sm:$0xff]   ;;  %v7854_v57 = vld [vmem:[%s10312_s1 + $0x2ec] ss:$16 sps:$4 sm:$0xff]  }
  0x46   : > { %1949 = vmatpush1.bf16.msra.mxu0 %v7793_v58  ;;  %2721 = vmatpush1.bf16.msra.mxu1 %v7794_v59  ;;  %v395_v58 = vld [vmem:[%s8537_s24 + $0x1c0] sm:$0xff]  ;;  %v402_v59 = vld [vmem:[%s8537_s24 + $0x1f8] sm:$0xff] }
  0x47   : > { %1950 = vmatprep.subr.bf16.mxu0 %v7795_v60  ;;  %2722 = vmatprep.subr.bf16.mxu1 %v7797_v61  ;;  %v410_v60 = vld [vmem:[%s8537_s24 + $0x238] sm:$0xff]  ;;  %v417_v61 = vld [vmem:[%s8537_s24 + $0x270] sm:$0xff] }
  0x4a   : > { %1951 = vmatpush1.bf16.msra.mxu0 %v7799_v62  ;;  %2723 = vmatpush1.bf16.msra.mxu1 %v7800_v63  ;;  %v7849_v62 = vld [vmem:[%s10312_s1 + $0x2e0] ss:$16 sps:$4 sm:$0xff]   ;;  %v7852_v63 = vld [vmem:[%s10312_s1 + $0x2e8] ss:$16 sps:$4 sm:$0xff]  }
  0x4b   : > { %1952 = vmatprep.subr.bf16.mxu0 %v7801_v0  ;;  %2724 = vmatprep.subr.bf16.mxu1 %v7803_v1  ;;  %v7857_v0 = vld [vmem:[%s10312_s1 + $0x304] ss:$16 sps:$4 sm:$0xff]   ;;  %v7860_v1 = vld [vmem:[%s10312_s1 + $0x30c] ss:$16 sps:$4 sm:$0xff]  }
  0x4e   : > { %1953 = vmatpush1.bf16.msra.mxu0 %v7805_v2  ;;  %2725 = vmatpush1.bf16.msra.mxu1 %v7806_v3  ;;  %v591_v2 = vpack.c.bf16 %v402_v59, %v395_v58  ;;  %v599_v3 = vpack.c.bf16 %v417_v61, %v410_v60  ;;  %v7905_v58 = vld [vmem:[%s10312_s1 + $0x404] ss:$16 sps:$4 sm:$0xff]   ;;  %v7908_v59 = vld [vmem:[%s10312_s1 + $0x40c] ss:$16 sps:$4 sm:$0xff]  }
  0x4f   : > { %2115 = vmatprep.subr.bf16.mxu0 %v7809_v8  ;;  %2887 = vmatprep.subr.bf16.mxu1 %v7812_v9  ;;  %v409_v8 = vld [vmem:[%s8537_s24 + $0x230] sm:$0xff]  ;;  %v416_v9 = vld [vmem:[%s8537_s24 + $0x268] sm:$0xff] }
  0x50   : > { %v465_v60 = vld [vmem:[%s8537_s24 + $0x3f0] sm:$0xff]  ;;  %v472_v61 = vld [vmem:[%s8537_s24 + $0x428] sm:$0xff] }
  0x51   : > { %1955 = vmatmul.mubr.bf16.vlgmr.msra.gmra.mrb[0].mxu0 %v563_v10  ;;  %2727 = vmatmul.mubr.bf16.vlgmr.msra.gmra.mrb[0].mxu1 %v563_v10  ;;  %v424_v10 = vld [vmem:[%s8537_s24 + $0x2a8] sm:$0xff] }
  0x52   : > { %1964 = vmatprep.mubr.bf16.mxu0 %v571_v11  ;;  %2736 = vmatprep.mubr.bf16.mxu1 %v571_v11  ;;  %v431_v11 = vld [vmem:[%s8537_s24 + $0x2e0] sm:$0xff] }
  0x53   : > { %2116 = vmatpush1.bf16.msra.mxu0 %v7807_v12  ;;  %2888 = vmatpush1.bf16.msra.mxu1 %v7810_v13  ;;  %v7861_v12 = vld [vmem:[%s10312_s1 + $0x320] ss:$16 sps:$4 sm:$0xff]   ;;  %v7864_v13 = vld [vmem:[%s10312_s1 + $0x328] ss:$16 sps:$4 sm:$0xff]   ;;  %v606_v17 = vpack.c.bf16 %v431_v11, %v424_v10 }
  0x54   : > { %2117 = vmatprep.subr.bf16.mxu0 %v7815_v15  ;;  %2889 = vmatprep.subr.bf16.mxu1 %v7818_v16  ;;  %v7872_v15 = vld [vmem:[%s10312_s1 + $0x34c] ss:$16 sps:$4 sm:$0xff]   ;;  %v598_v16 = vpack.c.bf16 %v416_v9, %v409_v8  ;;  %v493_v8 = vld [vmem:[%s8537_s24 + $0x4d0] sm:$0xff]  ;;  %v515_v11 = vld [vmem:[%s8537_s24 + $0x580] sm:$0xff] }
  0x55   : > { %v500_v9 = vld [vmem:[%s8537_s24 + $0x508] sm:$0xff] }
  0x56   : > { %v508_v10 = vld [vmem:[%s8537_s24 + $0x548] sm:$0xff] }
  0x57   : > { %2118 = vmatpush1.bf16.msra.mxu0 %v7813_v20  ;;  %2890 = vmatpush1.bf16.msra.mxu1 %v7816_v21  ;;  %v7875_v20 = vld [vmem:[%s10312_s1 + $0x364] ss:$16 sps:$4 sm:$0xff]   ;;  %v7878_v21 = vld [vmem:[%s10312_s1 + $0x36c] ss:$16 sps:$4 sm:$0xff]  }
  0x58   : > { %2119 = vmatprep.subr.bf16.mxu0 %v7821_v22  ;;  %2891 = vmatprep.subr.bf16.mxu1 %v7824_v23  ;;  %v423_v22 = vld [vmem:[%s8537_s24 + $0x2a0] sm:$0xff]  ;;  %v430_v23 = vld [vmem:[%s8537_s24 + $0x2d8] sm:$0xff] }
  0x59   : > { %1965 = vmatmul.mubr.bf16.gmra.mrb[4].mxu0 %v570_v24  ;;  %2737 = vmatmul.mubr.bf16.gmra.mrb[4].mxu1 %v570_v24  ;;  %v438_v24 = vld [vmem:[%s8537_s24 + $0x318] sm:$0xff] }
  0x5a   : > { %1974 = vmatprep.mubr.bf16.mxu0 %v578_v25  ;;  %2746 = vmatprep.mubr.bf16.mxu1 %v578_v25  ;;  %v445_v25 = vld [vmem:[%s8537_s24 + $0x350] sm:$0xff] }
  0x5b   : > { %2120 = vmatpush1.bf16.msra.mxu0 %v7819_v26  ;;  %2892 = vmatpush1.bf16.msra.mxu1 %v7822_v27  ;;  %v7873_v26 = vld [vmem:[%s10312_s1 + $0x360] ss:$16 sps:$4 sm:$0xff]   ;;  %v7876_v27 = vld [vmem:[%s10312_s1 + $0x368] ss:$16 sps:$4 sm:$0xff]  }
  0x5c   : > { %2121 = vmatprep.subr.bf16.mxu0 %v7827_v30  ;;  %2893 = vmatprep.subr.bf16.mxu1 %v7830_v31  ;;  %v605_v30 = vpack.c.bf16 %v430_v23, %v423_v22  ;;  %v613_v31 = vpack.c.bf16 %v445_v25, %v438_v24  ;;  %v536_v22 = vld [vmem:[%s8537_s24 + $0x628] sm:$0xff]  ;;  %v543_v23 = vld [vmem:[%s8537_s24 + $0x660] sm:$0xff] }
  0x5d   : > { %v662_v25 = vpack.c.bf16 %v543_v23, %v536_v22  ;;  %v7942_v22 = vld [vmem:[%s10312_s1 + $0x4c8] ss:$16 sps:$4 sm:$0xff]  }
  0x5f   : > { %2122 = vmatpush1.bf16.msra.mxu0 %v7825_v34  ;;  %2894 = vmatpush1.bf16.msra.mxu1 %v7828_v35  ;;  %v437_v34 = vld [vmem:[%s8537_s24 + $0x310] sm:$0xff] }
  0x60   : > { %2123 = vmatprep.subr.bf16.mxu0 %v7833_v36  ;;  %2895 = vmatprep.subr.bf16.mxu1 %v7836_v37  ;;  %v7887_v35 = vld [vmem:[%s10312_s1 + $0x3a4] ss:$16 sps:$4 sm:$0xff]   ;;  %v7890_v36 = vld [vmem:[%s10312_s1 + $0x3ac] ss:$16 sps:$4 sm:$0xff]  }
  0x61   : > { %1975 = vmatmul.mubr.bf16.gmra.mrb[8].mxu0 %v577_v38  ;;  %2747 = vmatmul.mubr.bf16.gmra.mrb[8].mxu1 %v577_v38  ;;  %v444_v37 = vld [vmem:[%s8537_s24 + $0x348] sm:$0xff] }
  0x62   : > { %1984 = vmatprep.mubr.bf16.mxu0 %v585_v39  ;;  %2756 = vmatprep.mubr.bf16.mxu1 %v585_v39  ;;  %v452_v38 = vld [vmem:[%s8537_s24 + $0x388] sm:$0xff]  ;;  %v459_v39 = vld [vmem:[%s8537_s24 + $0x3c0] sm:$0xff] }
  0x63   : > { %2124 = vmatpush1.bf16.msra.mxu0 %v7831_v40  ;;  %2896 = vmatpush1.bf16.msra.mxu1 %v7834_v41  ;;  %v7885_v40 = vld [vmem:[%s10312_s1 + $0x3a0] ss:$16 sps:$4 sm:$0xff]   ;;  %v7888_v41 = vld [vmem:[%s10312_s1 + $0x3a8] ss:$16 sps:$4 sm:$0xff]   ;;  %v620_v47 = vpack.c.bf16 %v459_v39, %v452_v38 }
  0x64   : > { %2125 = vmatprep.subr.bf16.mxu0 %v7839_v44  ;;  %2897 = vmatprep.subr.bf16.mxu1 %v7842_v45  ;;  %v612_v44 = vpack.c.bf16 %v444_v37, %v437_v34  ;;  %v7891_v45 = vld [vmem:[%s10312_s1 + $0x3c0] ss:$16 sps:$4 sm:$0xff]   ;;  %v342_v34 = vld [vmem:[%s8537_s24 + $0x18] sm:$0xff]  ;;  %v348_v39 = vld [vmem:[%s8537_s24 + $0x48] sm:$0xff] }
  0x65   : > { %v341_v38 = vld [vmem:[%s8537_s24 + $0x10] sm:$0xff] }
  0x67   : > { %2126 = vmatpush1.bf16.msra.mxu0 %v7837_v48  ;;  %2898 = vmatpush1.bf16.msra.mxu1 %v7840_v49  ;;  %v7899_v48 = vld [vmem:[%s10312_s1 + $0x3e4] ss:$16 sps:$4 sm:$0xff]   ;;  %v7902_v49 = vld [vmem:[%s10312_s1 + $0x3ec] ss:$16 sps:$4 sm:$0xff]  }
  0x68   : > { %2127 = vmatprep.subr.bf16.mxu0 %v7845_v50  ;;  %2899 = vmatprep.subr.bf16.mxu1 %v7848_v51  ;;  %v451_v50 = vld [vmem:[%s8537_s24 + $0x380] sm:$0xff]  ;;  %v458_v51 = vld [vmem:[%s8537_s24 + $0x3b8] sm:$0xff] }
  0x69   : > { %1985 = vmatmul.mubr.bf16.gmra.mrb[12].mxu0 %v584_v52  ;;  %2757 = vmatmul.mubr.bf16.gmra.mrb[12].mxu1 %v584_v52  ;;  %v466_v52 = vld [vmem:[%s8537_s24 + $0x3f8] sm:$0xff] }
  0x6a   : > { %1994 = vmatprep.mubr.bf16.mxu0 %v592_v53  ;;  %2766 = vmatprep.mubr.bf16.mxu1 %v592_v53  ;;  %v473_v53 = vld [vmem:[%s8537_s24 + $0x430] sm:$0xff] }
  0x6b   : > { %2128 = vmatpush1.bf16.msra.mxu0 %v7843_v54  ;;  %2900 = vmatpush1.bf16.msra.mxu1 %v7846_v55  ;;  %v7897_v54 = vld [vmem:[%s10312_s1 + $0x3e0] ss:$16 sps:$4 sm:$0xff]   ;;  %v7900_v55 = vld [vmem:[%s10312_s1 + $0x3e8] ss:$16 sps:$4 sm:$0xff]  }
  0x6c   : > { %2129 = vmatprep.subr.bf16.mxu0 %v7851_v56  ;;  %2901 = vmatprep.subr.bf16.mxu1 %v7854_v57  ;;  %v619_v56 = vpack.c.bf16 %v458_v51, %v451_v50  ;;  %v627_v57 = vpack.c.bf16 %v473_v53, %v466_v52  ;;  %v370_v50 = vld [vmem:[%s8537_s24 + $0xf8] sm:$0xff]  ;;  %v377_v51 = vld [vmem:[%s8537_s24 + $0x130] sm:$0xff] }
  0x6d   : > { %v7909_v52 = vld [vmem:[%s10312_s1 + $0x420] ss:$16 sps:$4 sm:$0xff]   ;;  %v7912_v53 = vld [vmem:[%s10312_s1 + $0x428] ss:$16 sps:$4 sm:$0xff]  }
  0x6f   : > { %2130 = vmatpush1.bf16.msra.mxu0 %v7849_v62  ;;  %2902 = vmatpush1.bf16.msra.mxu1 %v7852_v63  ;;  %v480_v62 = vld [vmem:[%s8537_s24 + $0x468] sm:$0xff]  ;;  %v487_v63 = vld [vmem:[%s8537_s24 + $0x4a0] sm:$0xff] }
  0x70   : > { %2131 = vmatprep.subr.bf16.mxu0 %v7857_v0  ;;  %2903 = vmatprep.subr.bf16.mxu1 %v7860_v1  ;;  %v626_v0 = vpack.c.bf16 %v472_v61, %v465_v60  ;;  %v634_v1 = vpack.c.bf16 %v487_v63, %v480_v62  ;;  %v7923_v60 = vld [vmem:[%s10312_s1 + $0x464] ss:$16 sps:$4 sm:$0xff]   ;;  %v7926_v61 = vld [vmem:[%s10312_s1 + $0x46c] ss:$16 sps:$4 sm:$0xff]  }
  0x71   : > { %1995 = vmatmul.mubr.bf16.gmra.mrb[16].mxu0 %v591_v2  ;;  %2767 = vmatmul.mubr.bf16.gmra.mrb[16].mxu1 %v591_v2  ;;  %v479_v2 = vld [vmem:[%s8537_s24 + $0x460] sm:$0xff]  ;;  %v369_v62 = vld [vmem:[%s8537_s24 + $0xf0] sm:$0xff]  ;;  %v376_v63 = vld [vmem:[%s8537_s24 + $0x128] sm:$0xff] }
  0x72   : > { %2004 = vmatprep.mubr.bf16.mxu0 %v599_v3  ;;  %2776 = vmatprep.mubr.bf16.mxu1 %v599_v3  ;;  %v486_v3 = vld [vmem:[%s8537_s24 + $0x498] sm:$0xff] }
  0x73   : > { %2132 = vmatpush1.bf16.msra.mxu0 %v7855_v4  ;;  %2904 = vmatpush1.bf16.msra.mxu1 %v7858_v5  ;;  %v494_v4 = vld [vmem:[%s8537_s24 + $0x4d8] sm:$0xff]  ;;  %v501_v5 = vld [vmem:[%s8537_s24 + $0x510] sm:$0xff] }
  0x74   : > { %2133 = vmatprep.subr.bf16.mxu0 %v7863_v6  ;;  %2905 = vmatprep.subr.bf16.mxu1 %v7866_v7  ;;  %v633_v6 = vpack.c.bf16 %v486_v3, %v479_v2  ;;  %v641_v7 = vpack.c.bf16 %v501_v5, %v494_v4  ;;  %v7921_v2 = vld [vmem:[%s10312_s1 + $0x460] ss:$16 sps:$4 sm:$0xff]   ;;  %v7924_v3 = vld [vmem:[%s10312_s1 + $0x468] ss:$16 sps:$4 sm:$0xff]   ;;  %v7929_v4 = vld [vmem:[%s10312_s1 + $0x484] ss:$16 sps:$4 sm:$0xff]  }
  0x75   : > { %v7932_v5 = vld [vmem:[%s10312_s1 + $0x48c] ss:$16 sps:$4 sm:$0xff]  }
  0x77   : > { %2134 = vmatpush1.bf16.msra.mxu0 %v7861_v12  ;;  %2906 = vmatpush1.bf16.msra.mxu1 %v7864_v13  ;;  %v640_v12 = vpack.c.bf16 %v500_v9, %v493_v8  ;;  %v648_v13 = vpack.c.bf16 %v515_v11, %v508_v10  ;;  %v7930_v8 = vld [vmem:[%s10312_s1 + $0x488] ss:$16 sps:$4 sm:$0xff]   ;;  %v7935_v10 = vld [vmem:[%s10312_s1 + $0x4a4] ss:$16 sps:$4 sm:$0xff]   ;;  %v7938_v11 = vld [vmem:[%s10312_s1 + $0x4ac] ss:$16 sps:$4 sm:$0xff]  }
  0x78   : > { %2135 = vmatprep.subr.bf16.mxu0 %v7869_v14  ;;  %2907 = vmatprep.subr.bf16.mxu1 %v7872_v15  ;;  %v507_v14 = vld [vmem:[%s8537_s24 + $0x540] sm:$0xff]  ;;  %v514_v15 = vld [vmem:[%s8537_s24 + $0x578] sm:$0xff] }
  0x79   : > { %2005 = vmatmul.mubr.bf16.gmra.mrb[20].mxu0 %v598_v16  ;;  %2777 = vmatmul.mubr.bf16.gmra.mrb[20].mxu1 %v598_v16  ;;  %v522_v16 = vld [vmem:[%s8537_s24 + $0x5b8] sm:$0xff] }
  0x7a   : > { %2014 = vmatprep.mubr.bf16.mxu0 %v606_v17  ;;  %2786 = vmatprep.mubr.bf16.mxu1 %v606_v17  ;;  %v529_v17 = vld [vmem:[%s8537_s24 + $0x5f0] sm:$0xff] }
  0x7b   : > { %2136 = vmatpush1.bf16.msra.mxu0 %v7867_v18  ;;  %2908 = vmatpush1.bf16.msra.mxu1 %v7870_v19  ;;  %v647_v18 = vpack.c.bf16 %v514_v15, %v507_v14  ;;  %v655_v19 = vpack.c.bf16 %v529_v17, %v522_v16  ;;  %v398_v14 = vld [vmem:[%s8537_s24 + $0x1d8] sm:$0xff]  ;;  %v405_v15 = vld [vmem:[%s8537_s24 + $0x210] sm:$0xff] }
  0x7c   : > { %2137 = vmatprep.subr.bf16.mxu0 %v7875_v20  ;;  %2909 = vmatprep.subr.bf16.mxu1 %v7878_v21  ;;  %v521_v20 = vld [vmem:[%s8537_s24 + $0x5b0] sm:$0xff]  ;;  %v528_v21 = vld [vmem:[%s8537_s24 + $0x5e8] sm:$0xff]  ;;  %v594_v23 = vpack.c.bf16 %v405_v15, %v398_v14 }
  0x7d   : > { %v654_v24 = vpack.c.bf16 %v528_v21, %v521_v20  ;;  %v7933_v16 = vld [vmem:[%s10312_s1 + $0x4a0] ss:$16 sps:$4 sm:$0xff]   ;;  %v7936_v17 = vld [vmem:[%s10312_s1 + $0x4a8] ss:$16 sps:$4 sm:$0xff]  }
  0x7e   : > { %v7939_v21 = vld [vmem:[%s10312_s1 + $0x4c0] ss:$16 sps:$4 sm:$0xff]   ;;  %v7990_v15 = vld [vmem:[%s10312_s1 + $0x5c8] ss:$16 sps:$4 sm:$0xff]  }
  0x7f   : > { %2138 = vmatpush1.bf16.msra.mxu0 %v7873_v26  ;;  %2910 = vmatpush1.bf16.msra.mxu1 %v7876_v27  ;;  %v535_v26 = vld [vmem:[%s8537_s24 + $0x620] sm:$0xff]  ;;  %v542_v27 = vld [vmem:[%s8537_s24 + $0x658] sm:$0xff] }
  0x80   : > { %2139 = vmatprep.subr.bf16.mxu0 %v7881_v28  ;;  %2911 = vmatprep.subr.bf16.mxu1 %v7884_v29  ;;  %v550_v28 = vld [vmem:[%s8537_s24 + $0x698] sm:$0xff]  ;;  %v557_v29 = vld [vmem:[%s8537_s24 + $0x6d0] sm:$0xff] }
  0x81   : > { %2015 = vmatmul.mubr.bf16.gmra.mrb[24].mxu0 %v605_v30  ;;  %2787 = vmatmul.mubr.bf16.gmra.mrb[24].mxu1 %v605_v30  ;;  %v661_v30 = vpack.c.bf16 %v542_v27, %v535_v26  ;;  %v397_v26 = vld [vmem:[%s8537_s24 + $0x1d0] sm:$0xff]  ;;  %v404_v27 = vld [vmem:[%s8537_s24 + $0x208] sm:$0xff] }
  0x82   : > { %2024 = vmatprep.mubr.bf16.mxu0 %v613_v31  ;;  %2796 = vmatprep.mubr.bf16.mxu1 %v613_v31  ;;  %v669_v31 = vpack.c.bf16 %v557_v29, %v550_v28  ;;  %v412_v28 = vld [vmem:[%s8537_s24 + $0x248] sm:$0xff]  ;;  %v419_v29 = vld [vmem:[%s8537_s24 + $0x280] sm:$0xff] }
  0x83   : > { %2140 = vmatpush1.bf16.msra.mxu0 %v7879_v32  ;;  %2912 = vmatpush1.bf16.msra.mxu1 %v7882_v33  ;;  %v549_v32 = vld [vmem:[%s8537_s24 + $0x690] sm:$0xff]  ;;  %v556_v33 = vld [vmem:[%s8537_s24 + $0x6c8] sm:$0xff] }
  0x84   : > { %2141 = vmatprep.subr.bf16.mxu0 %v7887_v35  ;;  %2913 = vmatprep.subr.bf16.mxu1 %v7890_v36  ;;  %v349_v35 = vld [vmem:[%s8537_s24 + $0x50] sm:$0xff]  ;;  %v668_v36 = vpack.c.bf16 %v556_v33, %v549_v32  ;;  %v7956_v33 = vld [vmem:[%s10312_s1 + $0x50c] ss:$16 sps:$4 sm:$0xff]  }
  0x85   : > { %v566_v37 = vpack.c.bf16 %v349_v35, %v342_v34  ;;  %v7953_v32 = vld [vmem:[%s10312_s1 + $0x504] ss:$16 sps:$4 sm:$0xff]   ;;  %v593_v34 = vpack.c.bf16 %v404_v27, %v397_v26  ;;  %v7951_v35 = vld [vmem:[%s10312_s1 + $0x500] ss:$16 sps:$4 sm:$0xff]  }
  0x86   : > { %v7987_v14 = vld [vmem:[%s10312_s1 + $0x5c0] ss:$16 sps:$4 sm:$0xff]   ;;  %v8001_v26 = vld [vmem:[%s10312_s1 + $0x604] ss:$16 sps:$4 sm:$0xff]  }
  0x87   : > { %2142 = vmatpush1.bf16.msra.mxu0 %v7885_v40  ;;  %2914 = vmatpush1.bf16.msra.mxu1 %v7888_v41  ;;  %v356_v40 = vld [vmem:[%s8537_s24 + $0x88] sm:$0xff]  ;;  %v363_v41 = vld [vmem:[%s8537_s24 + $0xc0] sm:$0xff] }
  0x88   : > { %2143 = vmatprep.subr.bf16.mxu0 %v7893_v42  ;;  %2915 = vmatprep.subr.bf16.mxu1 %v7896_v43  ;;  %v565_v42 = vpack.c.bf16 %v348_v39, %v341_v38  ;;  %v7903_v43 = vld [vmem:[%s10312_s1 + $0x400] ss:$16 sps:$4 sm:$0xff]   ;;  %v7959_v38 = vld [vmem:[%s10312_s1 + $0x524] ss:$16 sps:$4 sm:$0xff]   ;;  %v7962_v39 = vld [vmem:[%s10312_s1 + $0x52c] ss:$16 sps:$4 sm:$0xff]  }
  0x89   : > { %2025 = vmatmul.mubr.bf16.gmra.mrb[28].mxu0 %v612_v44  ;;  %2797 = vmatmul.mubr.bf16.gmra.mrb[28].mxu1 %v612_v44  ;;  %v7906_v44 = vld [vmem:[%s10312_s1 + $0x408] ss:$16 sps:$4 sm:$0xff]   ;;  %v467_v27 = vld [vmem:[%s8537_s24 + $0x400] sm:$0xff] }
  0x8a   : > { %2034 = vmatprep.mubr.bf16.mxu0 %v620_v47  ;;  %2806 = vmatprep.mubr.bf16.mxu1 %v620_v47  ;;  %v7914_v47 = vld [vmem:[%s10312_s1 + $0x42c] ss:$16 sps:$4 sm:$0xff]  }
  0x8b   : > { %2144 = vmatpush1.bf16.msra.mxu0 %v7891_v45  ;;  %2916 = vmatpush1.bf16.msra.mxu1 %v7894_v46  ;;  %v573_v45 = vpack.c.bf16 %v363_v41, %v356_v40  ;;  %v7911_v46 = vld [vmem:[%s10312_s1 + $0x424] ss:$16 sps:$4 sm:$0xff]   ;;  %v418_v41 = vld [vmem:[%s8537_s24 + $0x278] sm:$0xff] }
  0x8c   : > { %2145 = vmatprep.subr.bf16.mxu0 %v7899_v48  ;;  %2917 = vmatprep.subr.bf16.mxu1 %v7902_v49  ;;  %v355_v48 = vld [vmem:[%s8537_s24 + $0x80] sm:$0xff]  ;;  %v362_v49 = vld [vmem:[%s8537_s24 + $0xb8] sm:$0xff] }
  0x8d   : > { %v411_v40 = vld [vmem:[%s8537_s24 + $0x240] sm:$0xff] }
  0x8f   : > { %2146 = vmatpush1.bf16.msra.mxu0 %v7897_v54  ;;  %2918 = vmatpush1.bf16.msra.mxu1 %v7900_v55  ;;  %v7917_v54 = vld [vmem:[%s10312_s1 + $0x444] ss:$16 sps:$4 sm:$0xff]   ;;  %v7920_v55 = vld [vmem:[%s10312_s1 + $0x44c] ss:$16 sps:$4 sm:$0xff]  }
  0x90   : > { %2308 = vmatprep.subr.bf16.mxu0 %v7905_v58  ;;  %3080 = vmatprep.subr.bf16.mxu1 %v7908_v59  ;;  %v7918_v58 = vld [vmem:[%s10312_s1 + $0x448] ss:$16 sps:$4 sm:$0xff]   ;;  %v580_v59 = vpack.c.bf16 %v377_v51, %v370_v50 }
  0x91   : > { %2035 = vmatmul.mubr.bf16.gmra.mrb[32].mxu0 %v619_v56  ;;  %2807 = vmatmul.mubr.bf16.gmra.mrb[32].mxu1 %v619_v56  ;;  %v572_v56 = vpack.c.bf16 %v362_v49, %v355_v48  ;;  %v600_v48 = vpack.c.bf16 %v418_v41, %v411_v40  ;;  %v7963_v49 = vld [vmem:[%s10312_s1 + $0x540] ss:$16 sps:$4 sm:$0xff]   ;;  %v7966_v50 = vld [vmem:[%s10312_s1 + $0x548] ss:$16 sps:$4 sm:$0xff]  }
  0x92   : > { %2044 = vmatprep.mubr.bf16.mxu0 %v627_v57  ;;  %2816 = vmatprep.mubr.bf16.mxu1 %v627_v57  ;;  %v7915_v57 = vld [vmem:[%s10312_s1 + $0x440] ss:$16 sps:$4 sm:$0xff]   ;;  %v502_v40 = vld [vmem:[%s8537_s24 + $0x518] sm:$0xff] }
  0x93   : > { %v510_v41 = vld [vmem:[%s8537_s24 + $0x558] sm:$0xff] }
  0x99   : > { %2045 = vmatmul.mubr.bf16.gmra.mrb[36].mxu0 %v626_v0  ;;  %2817 = vmatmul.mubr.bf16.gmra.mrb[36].mxu1 %v626_v0  ;;  %v384_v0 = vld [vmem:[%s8537_s24 + $0x168] sm:$0xff] }
  0x9a   : > { %2054 = vmatprep.mubr.bf16.mxu0 %v634_v1  ;;  %2826 = vmatprep.mubr.bf16.mxu1 %v634_v1  ;;  %v391_v1 = vld [vmem:[%s8537_s24 + $0x1a0] sm:$0xff] }
  0x9b   : > { %v587_v9 = vpack.c.bf16 %v391_v1, %v384_v0  ;;  %v7978_v0 = vld [vmem:[%s10312_s1 + $0x588] ss:$16 sps:$4 sm:$0xff]  }
  0xa1   : > { %2055 = vmatmul.mubr.bf16.gmra.mrb[40].mxu0 %v633_v6  ;;  %2827 = vmatmul.mubr.bf16.gmra.mrb[40].mxu1 %v633_v6  ;;  %v579_v6 = vpack.c.bf16 %v376_v63, %v369_v62  ;;  %v7975_v63 = vld [vmem:[%s10312_s1 + $0x580] ss:$16 sps:$4 sm:$0xff]  }
  0xa2   : > { %2064 = vmatprep.mubr.bf16.mxu0 %v641_v7  ;;  %2836 = vmatprep.mubr.bf16.mxu1 %v641_v7  ;;  %v7927_v7 = vld [vmem:[%s10312_s1 + $0x480] ss:$16 sps:$4 sm:$0xff]  }
  0xa9   : > { %2065 = vmatmul.mubr.bf16.gmra.mrb[44].mxu0 %v640_v12  ;;  %2837 = vmatmul.mubr.bf16.gmra.mrb[44].mxu1 %v640_v12  ;;  %v383_v12 = vld [vmem:[%s8537_s24 + $0x160] sm:$0xff] }
  0xaa   : > { %2074 = vmatprep.mubr.bf16.mxu0 %v648_v13  ;;  %2846 = vmatprep.mubr.bf16.mxu1 %v648_v13  ;;  %v390_v13 = vld [vmem:[%s8537_s24 + $0x198] sm:$0xff] }
  0xab   : > { %v586_v20 = vpack.c.bf16 %v390_v13, %v383_v12 }
  0xb1   : > { %2075 = vmatmul.mubr.bf16.gmra.mrb[48].mxu0 %v647_v18  ;;  %2847 = vmatmul.mubr.bf16.gmra.mrb[48].mxu1 %v647_v18  ;;  %v7941_v18 = vld [vmem:[%s10312_s1 + $0x4c4] ss:$16 sps:$4 sm:$0xff]  }
  0xb2   : > { %2084 = vmatprep.mubr.bf16.mxu0 %v655_v19  ;;  %2856 = vmatprep.mubr.bf16.mxu1 %v655_v19  ;;  %v7944_v19 = vld [vmem:[%s10312_s1 + $0x4cc] ss:$16 sps:$4 sm:$0xff]  }
  0xb9   : > { %2085 = vmatmul.mubr.bf16.gmra.mrb[52].mxu0 %v654_v24  ;;  %2857 = vmatmul.mubr.bf16.gmra.mrb[52].mxu1 %v654_v24  ;;  %v7947_v24 = vld [vmem:[%s10312_s1 + $0x4e4] ss:$16 sps:$4 sm:$0xff]  }
  0xba   : > { %2094 = vmatprep.mubr.bf16.mxu0 %v662_v25  ;;  %2866 = vmatprep.mubr.bf16.mxu1 %v662_v25  ;;  %v7950_v25 = vld [vmem:[%s10312_s1 + $0x4ec] ss:$16 sps:$4 sm:$0xff]  }
  0xc1   : > { %2095 = vmatmul.mubr.bf16.gmra.mrb[56].mxu0 %v661_v30  ;;  %2867 = vmatmul.mubr.bf16.gmra.mrb[56].mxu1 %v661_v30  ;;  %v7945_v30 = vld [vmem:[%s10312_s1 + $0x4e0] ss:$16 sps:$4 sm:$0xff]  }
  0xc2   : > { %2104 = vmatprep.mubr.bf16.mxu0 %v669_v31  ;;  %2876 = vmatprep.mubr.bf16.mxu1 %v669_v31  ;;  %v7948_v31 = vld [vmem:[%s10312_s1 + $0x4e8] ss:$16 sps:$4 sm:$0xff]  }
  0xc9   : > { %2105 = vmatmul.mubr.bf16.gmra.mrb[60].mxu0 %v668_v36  ;;  %2877 = vmatmul.mubr.bf16.gmra.mrb[60].mxu1 %v668_v36  ;;  %v7954_v36 = vld [vmem:[%s10312_s1 + $0x508] ss:$16 sps:$4 sm:$0xff]  }
  0xca   : > { %2147 = vmatprep.mubr.bf16.mxu0 %v566_v37  ;;  %2919 = vmatprep.mubr.bf16.mxu1 %v566_v37  ;;  %v601_v37 = vpack.c.bf16 %v419_v29, %v412_v28  ;;  %v474_v28 = vld [vmem:[%s8537_s24 + $0x438] sm:$0xff] }
  0xcb   : > { %v482_v29 = vld [vmem:[%s8537_s24 + $0x478] sm:$0xff] }
  0xd1   : > { %2148 = vmatmul.mubr.bf16.vlgmr.msra.gmra.mrb[0].mxu0 %v565_v42  ;;  %2920 = vmatmul.mubr.bf16.vlgmr.msra.gmra.mrb[0].mxu1 %v565_v42  ;;  %v426_v42 = vld [vmem:[%s8537_s24 + $0x2b8] sm:$0xff] }
  0xd2   : > { %2157 = vmatprep.mubr.bf16.mxu0 %v573_v45  ;;  %2929 = vmatprep.mubr.bf16.mxu1 %v573_v45  ;;  %v7960_v45 = vld [vmem:[%s10312_s1 + $0x528] ss:$16 sps:$4 sm:$0xff]  }
  0xd3   : > { %2309 = vmatpush1.bf16.msra.mxu0 %v7903_v43  ;;  %3081 = vmatpush1.bf16.msra.mxu1 %v7906_v44  ;;  %v433_v43 = vld [vmem:[%s8537_s24 + $0x2f0] sm:$0xff] }
  0xd4   : > { %2310 = vmatprep.subr.bf16.mxu0 %v7911_v46  ;;  %3082 = vmatprep.subr.bf16.mxu1 %v7914_v47  ;;  %v7957_v44 = vld [vmem:[%s10312_s1 + $0x520] ss:$16 sps:$4 sm:$0xff]   ;;  %v7965_v46 = vld [vmem:[%s10312_s1 + $0x544] ss:$16 sps:$4 sm:$0xff]   ;;  %v7968_v47 = vld [vmem:[%s10312_s1 + $0x54c] ss:$16 sps:$4 sm:$0xff]   ;;  %v608_v51 = vpack.c.bf16 %v433_v43, %v426_v42 }
  0xd5   : > { %v517_v42 = vld [vmem:[%s8537_s24 + $0x590] sm:$0xff] }
  0xd7   : > { %2311 = vmatpush1.bf16.msra.mxu0 %v7909_v52  ;;  %3083 = vmatpush1.bf16.msra.mxu1 %v7912_v53  ;;  %v7971_v52 = vld [vmem:[%s10312_s1 + $0x564] ss:$16 sps:$4 sm:$0xff]   ;;  %v7974_v53 = vld [vmem:[%s10312_s1 + $0x56c] ss:$16 sps:$4 sm:$0xff]  }
  0xd8   : > { %2312 = vmatprep.subr.bf16.mxu0 %v7917_v54  ;;  %3084 = vmatprep.subr.bf16.mxu1 %v7920_v55  ;;  %v425_v54 = vld [vmem:[%s8537_s24 + $0x2b0] sm:$0xff]  ;;  %v432_v55 = vld [vmem:[%s8537_s24 + $0x2e8] sm:$0xff] }
  0xd9   : > { %2158 = vmatmul.mubr.bf16.gmra.mrb[4].mxu0 %v572_v56  ;;  %2930 = vmatmul.mubr.bf16.gmra.mrb[4].mxu1 %v572_v56  ;;  %v440_v56 = vld [vmem:[%s8537_s24 + $0x328] sm:$0xff]  ;;  %v607_v62 = vpack.c.bf16 %v432_v55, %v425_v54  ;;  %v545_v54 = vld [vmem:[%s8537_s24 + $0x670] sm:$0xff] }
  0xda   : > { %2167 = vmatprep.mubr.bf16.mxu0 %v580_v59  ;;  %2939 = vmatprep.mubr.bf16.mxu1 %v580_v59  ;;  %v7972_v59 = vld [vmem:[%s10312_s1 + $0x568] ss:$16 sps:$4 sm:$0xff]  }
  0xdb   : > { %2313 = vmatpush1.bf16.msra.mxu0 %v7915_v57  ;;  %3085 = vmatpush1.bf16.msra.mxu1 %v7918_v58  ;;  %v447_v57 = vld [vmem:[%s8537_s24 + $0x360] sm:$0xff] }
  0xdc   : > { %2314 = vmatprep.subr.bf16.mxu0 %v7923_v60  ;;  %3086 = vmatprep.subr.bf16.mxu1 %v7926_v61  ;;  %v7969_v58 = vld [vmem:[%s10312_s1 + $0x560] ss:$16 sps:$4 sm:$0xff]   ;;  %v7977_v60 = vld [vmem:[%s10312_s1 + $0x584] ss:$16 sps:$4 sm:$0xff]   ;;  %v7980_v61 = vld [vmem:[%s10312_s1 + $0x58c] ss:$16 sps:$4 sm:$0xff]   ;;  %v615_v1 = vpack.c.bf16 %v447_v57, %v440_v56 }
  0xdd   : > { %v537_v57 = vld [vmem:[%s8537_s24 + $0x630] sm:$0xff] }
  0xdf   : > { %2315 = vmatpush1.bf16.msra.mxu0 %v7921_v2  ;;  %3087 = vmatpush1.bf16.msra.mxu1 %v7924_v3  ;;  %v7983_v2 = vld [vmem:[%s10312_s1 + $0x5a4] ss:$16 sps:$4 sm:$0xff]   ;;  %v7986_v3 = vld [vmem:[%s10312_s1 + $0x5ac] ss:$16 sps:$4 sm:$0xff]  }
  0xe0   : > { %2316 = vmatprep.subr.bf16.mxu0 %v7929_v4  ;;  %3088 = vmatprep.subr.bf16.mxu1 %v7932_v5  ;;  %v439_v4 = vld [vmem:[%s8537_s24 + $0x320] sm:$0xff]  ;;  %v446_v5 = vld [vmem:[%s8537_s24 + $0x358] sm:$0xff] }
  0xe1   : > { %2168 = vmatmul.mubr.bf16.gmra.mrb[8].mxu0 %v579_v6  ;;  %2940 = vmatmul.mubr.bf16.gmra.mrb[8].mxu1 %v579_v6  ;;  %v454_v6 = vld [vmem:[%s8537_s24 + $0x398] sm:$0xff]  ;;  %v614_v12 = vpack.c.bf16 %v446_v5, %v439_v4 }
  0xe2   : > { %2177 = vmatprep.mubr.bf16.mxu0 %v587_v9  ;;  %2949 = vmatprep.mubr.bf16.mxu1 %v587_v9  ;;  %v7984_v9 = vld [vmem:[%s10312_s1 + $0x5a8] ss:$16 sps:$4 sm:$0xff]   ;;  %v8004_v5 = vld [vmem:[%s10312_s1 + $0x60c] ss:$16 sps:$4 sm:$0xff]  }
  0xe3   : > { %2317 = vmatpush1.bf16.msra.mxu0 %v7927_v7  ;;  %3089 = vmatpush1.bf16.msra.mxu1 %v7930_v8  ;;  %v461_v7 = vld [vmem:[%s8537_s24 + $0x3d0] sm:$0xff] }
  0xe4   : > { %2318 = vmatprep.subr.bf16.mxu0 %v7935_v10  ;;  %3090 = vmatprep.subr.bf16.mxu1 %v7938_v11  ;;  %v7981_v8 = vld [vmem:[%s10312_s1 + $0x5a0] ss:$16 sps:$4 sm:$0xff]   ;;  %v7989_v10 = vld [vmem:[%s10312_s1 + $0x5c4] ss:$16 sps:$4 sm:$0xff]   ;;  %v7992_v11 = vld [vmem:[%s10312_s1 + $0x5cc] ss:$16 sps:$4 sm:$0xff]   ;;  %v622_v13 = vpack.c.bf16 %v461_v7, %v454_v6 }
  0xe5   : > { %v343_v6 = vld [vmem:[%s8537_s24 + $0x20] sm:$0xff]  ;;  %v350_v7 = vld [vmem:[%s8537_s24 + $0x58] sm:$0xff] }
  0xe7   : > { %2319 = vmatpush1.bf16.msra.mxu0 %v7933_v16  ;;  %3091 = vmatpush1.bf16.msra.mxu1 %v7936_v17  ;;  %v7995_v16 = vld [vmem:[%s10312_s1 + $0x5e4] ss:$16 sps:$4 sm:$0xff]   ;;  %v7998_v17 = vld [vmem:[%s10312_s1 + $0x5ec] ss:$16 sps:$4 sm:$0xff]  }
  0xe8   : > { %2320 = vmatprep.subr.bf16.mxu0 %v7941_v18  ;;  %3092 = vmatprep.subr.bf16.mxu1 %v7944_v19  ;;  %v453_v18 = vld [vmem:[%s8537_s24 + $0x390] sm:$0xff]  ;;  %v460_v19 = vld [vmem:[%s8537_s24 + $0x3c8] sm:$0xff] }
  0xe9   : > { %2178 = vmatmul.mubr.bf16.gmra.mrb[12].mxu0 %v586_v20  ;;  %2950 = vmatmul.mubr.bf16.gmra.mrb[12].mxu1 %v586_v20  ;;  %v468_v20 = vld [vmem:[%s8537_s24 + $0x408] sm:$0xff] }
  0xea   : > { %2187 = vmatprep.mubr.bf16.mxu0 %v594_v23  ;;  %2959 = vmatprep.mubr.bf16.mxu1 %v594_v23  ;;  %v7996_v23 = vld [vmem:[%s10312_s1 + $0x5e8] ss:$16 sps:$4 sm:$0xff]  }
  0xeb   : > { %2321 = vmatpush1.bf16.msra.mxu0 %v7939_v21  ;;  %3093 = vmatpush1.bf16.msra.mxu1 %v7942_v22  ;;  %v475_v21 = vld [vmem:[%s8537_s24 + $0x440] sm:$0xff] }
  0xec   : > { %2322 = vmatprep.subr.bf16.mxu0 %v7947_v24  ;;  %3094 = vmatprep.subr.bf16.mxu1 %v7950_v25  ;;  %v7993_v22 = vld [vmem:[%s10312_s1 + $0x5e0] ss:$16 sps:$4 sm:$0xff]   ;;  %v621_v24 = vpack.c.bf16 %v460_v19, %v453_v18  ;;  %v629_v25 = vpack.c.bf16 %v475_v21, %v468_v20 }
  0xed   : > { %v379_v18 = vld [vmem:[%s8537_s24 + $0x140] sm:$0xff] }
  0xee   : > { %v371_v21 = vld [vmem:[%s8537_s24 + $0x100] sm:$0xff] }
  0xef   : > { %2323 = vmatpush1.bf16.msra.mxu0 %v7945_v30  ;;  %3095 = vmatpush1.bf16.msra.mxu1 %v7948_v31  ;;  %v489_v30 = vld [vmem:[%s8537_s24 + $0x4b0] sm:$0xff]  ;;  %v628_v31 = vpack.c.bf16 %v474_v28, %v467_v27  ;;  %v392_v28 = vld [vmem:[%s8537_s24 + $0x1a8] sm:$0xff] }
  0xf0   : > { %2324 = vmatprep.subr.bf16.mxu0 %v7953_v32  ;;  %3096 = vmatprep.subr.bf16.mxu1 %v7956_v33  ;;  %v636_v32 = vpack.c.bf16 %v489_v30, %v482_v29  ;;  %v481_v33 = vld [vmem:[%s8537_s24 + $0x470] sm:$0xff]  ;;  %v400_v29 = vld [vmem:[%s8537_s24 + $0x1e8] sm:$0xff]  ;;  %v407_v30 = vld [vmem:[%s8537_s24 + $0x220] sm:$0xff] }
  0xf1   : > { %2188 = vmatmul.mubr.bf16.gmra.mrb[16].mxu0 %v593_v34  ;;  %2960 = vmatmul.mubr.bf16.gmra.mrb[16].mxu1 %v593_v34  ;;  %v488_v34 = vld [vmem:[%s8537_s24 + $0x4a8] sm:$0xff]  ;;  %v385_v27 = vld [vmem:[%s8537_s24 + $0x170] sm:$0xff] }
  0xf2   : > { %2197 = vmatprep.mubr.bf16.mxu0 %v601_v37  ;;  %2969 = vmatprep.mubr.bf16.mxu1 %v601_v37  ;;  %v635_v37 = vpack.c.bf16 %v488_v34, %v481_v33  ;;  %v399_v33 = vld [vmem:[%s8537_s24 + $0x1e0] sm:$0xff]  ;;  %v406_v34 = vld [vmem:[%s8537_s24 + $0x218] sm:$0xff] }
  0xf3   : > { %2325 = vmatpush1.bf16.msra.mxu0 %v7951_v35  ;;  %3097 = vmatpush1.bf16.msra.mxu1 %v7954_v36  ;;  %v496_v35 = vld [vmem:[%s8537_s24 + $0x4e8] sm:$0xff]  ;;  %v503_v36 = vld [vmem:[%s8537_s24 + $0x520] sm:$0xff] }
  0xf4   : > { %2326 = vmatprep.subr.bf16.mxu0 %v7959_v38  ;;  %3098 = vmatprep.subr.bf16.mxu1 %v7962_v39  ;;  %v643_v38 = vpack.c.bf16 %v503_v36, %v496_v35  ;;  %v495_v39 = vld [vmem:[%s8537_s24 + $0x4e0] sm:$0xff]  ;;  %v414_v35 = vld [vmem:[%s8537_s24 + $0x258] sm:$0xff]  ;;  %v421_v36 = vld [vmem:[%s8537_s24 + $0x290] sm:$0xff] }
  0xf5   : > { %v642_v43 = vpack.c.bf16 %v502_v40, %v495_v39  ;;  %v413_v39 = vld [vmem:[%s8537_s24 + $0x250] sm:$0xff]  ;;  %v420_v40 = vld [vmem:[%s8537_s24 + $0x288] sm:$0xff] }
  0xf7   : > { %2327 = vmatpush1.bf16.msra.mxu0 %v7957_v44  ;;  %3099 = vmatpush1.bf16.msra.mxu1 %v7960_v45  ;;  %v650_v44 = vpack.c.bf16 %v517_v42, %v510_v41  ;;  %v509_v45 = vld [vmem:[%s8537_s24 + $0x550] sm:$0xff]  ;;  %v428_v41 = vld [vmem:[%s8537_s24 + $0x2c8] sm:$0xff]  ;;  %v435_v42 = vld [vmem:[%s8537_s24 + $0x300] sm:$0xff] }
  0xf8   : > { %2328 = vmatprep.subr.bf16.mxu0 %v7965_v46  ;;  %3100 = vmatprep.subr.bf16.mxu1 %v7968_v47  ;;  %v516_v46 = vld [vmem:[%s8537_s24 + $0x588] sm:$0xff] }
  0xf9   : > { %2198 = vmatmul.mubr.bf16.gmra.mrb[20].mxu0 %v600_v48  ;;  %2970 = vmatmul.mubr.bf16.gmra.mrb[20].mxu1 %v600_v48  ;;  %v524_v47 = vld [vmem:[%s8537_s24 + $0x5c8] sm:$0xff]  ;;  %v531_v48 = vld [vmem:[%s8537_s24 + $0x600] sm:$0xff] }
  0xfa   : > { %2207 = vmatprep.mubr.bf16.mxu0 %v608_v51  ;;  %2979 = vmatprep.mubr.bf16.mxu1 %v608_v51  ;;  %v523_v51 = vld [vmem:[%s8537_s24 + $0x5c0] sm:$0xff] }
  0xfb   : > { %2329 = vmatpush1.bf16.msra.mxu0 %v7963_v49  ;;  %3101 = vmatpush1.bf16.msra.mxu1 %v7966_v50  ;;  %v649_v49 = vpack.c.bf16 %v516_v46, %v509_v45  ;;  %v657_v50 = vpack.c.bf16 %v531_v48, %v524_v47  ;;  %v427_v45 = vld [vmem:[%s8537_s24 + $0x2c0] sm:$0xff]  ;;  %v434_v46 = vld [vmem:[%s8537_s24 + $0x2f8] sm:$0xff]  ;;  %v449_v48 = vld [vmem:[%s8537_s24 + $0x370] sm:$0xff] }
  0xfc   : > { %2330 = vmatprep.subr.bf16.mxu0 %v7971_v52  ;;  %3102 = vmatprep.subr.bf16.mxu1 %v7974_v53  ;;  %v530_v52 = vld [vmem:[%s8537_s24 + $0x5f8] sm:$0xff] }
  0xfd   : > { %v538_v53 = vld [vmem:[%s8537_s24 + $0x638] sm:$0xff]  ;;  %v656_v55 = vpack.c.bf16 %v530_v52, %v523_v51  ;;  %v441_v51 = vld [vmem:[%s8537_s24 + $0x330] sm:$0xff]  ;;  %v448_v52 = vld [vmem:[%s8537_s24 + $0x368] sm:$0xff] }
  0xfe   : > { %v664_v56 = vpack.c.bf16 %v545_v54, %v538_v53  ;;  %v442_v47 = vld [vmem:[%s8537_s24 + $0x338] sm:$0xff]  ;;  %v456_v53 = vld [vmem:[%s8537_s24 + $0x3a8] sm:$0xff]  ;;  %v463_v54 = vld [vmem:[%s8537_s24 + $0x3e0] sm:$0xff] }
  0xff   : > { %2331 = vmatpush1.bf16.msra.mxu0 %v7969_v58  ;;  %3103 = vmatpush1.bf16.msra.mxu1 %v7972_v59  ;;  %v544_v58 = vld [vmem:[%s8537_s24 + $0x668] sm:$0xff] }
 0x100   : > { %2332 = vmatprep.subr.bf16.mxu0 %v7977_v60  ;;  %3104 = vmatprep.subr.bf16.mxu1 %v7980_v61  ;;  %v552_v59 = vld [vmem:[%s8537_s24 + $0x6a8] sm:$0xff]  ;;  %v559_v60 = vld [vmem:[%s8537_s24 + $0x6e0] sm:$0xff]  ;;  %v663_v61 = vpack.c.bf16 %v544_v58, %v537_v57  ;;  %v462_v58 = vld [vmem:[%s8537_s24 + $0x3d8] sm:$0xff] }
 0x101   : > { %2208 = vmatmul.mubr.bf16.gmra.mrb[24].mxu0 %v607_v62  ;;  %2980 = vmatmul.mubr.bf16.gmra.mrb[24].mxu1 %v607_v62  ;;  %v671_v62 = vpack.c.bf16 %v559_v60, %v552_v59  ;;  %v455_v57 = vld [vmem:[%s8537_s24 + $0x3a0] sm:$0xff]  ;;  %v470_v59 = vld [vmem:[%s8537_s24 + $0x418] sm:$0xff]  ;;  %v477_v60 = vld [vmem:[%s8537_s24 + $0x450] sm:$0xff] }
 0x102   : > { %2217 = vmatprep.mubr.bf16.mxu0 %v615_v1  ;;  %2989 = vmatprep.mubr.bf16.mxu1 %v615_v1  ;;  %v344_v1 = vld [vmem:[%s8537_s24 + $0x28] sm:$0xff] }
 0x103   : > { %2333 = vmatpush1.bf16.msra.mxu0 %v7975_v63  ;;  %3105 = vmatpush1.bf16.msra.mxu1 %v7978_v0  ;;  %v551_v63 = vld [vmem:[%s8537_s24 + $0x6a0] sm:$0xff]  ;;  %v558_v0 = vld [vmem:[%s8537_s24 + $0x6d8] sm:$0xff] }
 0x104   : > { %2334 = vmatprep.subr.bf16.mxu0 %v7983_v2  ;;  %3106 = vmatprep.subr.bf16.mxu1 %v7986_v3  ;;  %v351_v2 = vld [vmem:[%s8537_s24 + $0x60] sm:$0xff]  ;;  %v670_v3 = vpack.c.bf16 %v558_v0, %v551_v63  ;;  %v469_v63 = vld [vmem:[%s8537_s24 + $0x410] sm:$0xff]  ;;  %v476_v0 = vld [vmem:[%s8537_s24 + $0x448] sm:$0xff] }
 0x105   : > { %v568_v4 = vpack.c.bf16 %v351_v2, %v344_v1  ;;  %v484_v1 = vld [vmem:[%s8537_s24 + $0x488] sm:$0xff]  ;;  %v491_v2 = vld [vmem:[%s8537_s24 + $0x4c0] sm:$0xff] }
 0x107   : > { %2335 = vmatpush1.bf16.msra.mxu0 %v7981_v8  ;;  %3107 = vmatpush1.bf16.msra.mxu1 %v7984_v9  ;;  %v358_v8 = vld [vmem:[%s8537_s24 + $0x98] sm:$0xff]  ;;  %v365_v9 = vld [vmem:[%s8537_s24 + $0xd0] sm:$0xff] }
 0x108   : > { %2336 = vmatprep.subr.bf16.mxu0 %v7989_v10  ;;  %3108 = vmatprep.subr.bf16.mxu1 %v7992_v11  ;;  %v8293_v10 = vmov 0   ;;  %v567_v11 = vpack.c.bf16 %v350_v7, %v343_v6  ;;  %v490_v6 = vld [vmem:[%s8537_s24 + $0x4b8] sm:$0xff] }
 0x109   : > { %2218 = vmatmul.mubr.bf16.gmra.mrb[28].mxu0 %v614_v12  ;;  %2990 = vmatmul.mubr.bf16.gmra.mrb[28].mxu1 %v614_v12  ;;  %v575_v12 = vpack.c.bf16 %v365_v9, %v358_v8  ;;  %v498_v7 = vld [vmem:[%s8537_s24 + $0x4f8] sm:$0xff]  ;;  %v505_v8 = vld [vmem:[%s8537_s24 + $0x530] sm:$0xff] }
 0x10a   : > { %2227 = vmatprep.mubr.bf16.mxu0 %v622_v13  ;;  %2999 = vmatprep.mubr.bf16.mxu1 %v622_v13  ;;  %v7999_v13 = vld [vmem:[%s10312_s1 + $0x600] ss:$16 sps:$4 sm:$0xff]  }
 0x10b   : > { %2337 = vmatpush1.bf16.msra.mxu0 %v7987_v14  ;;  %3109 = vmatpush1.bf16.msra.mxu1 %v7990_v15  ;;  %v8002_v14 = vld [vmem:[%s10312_s1 + $0x608] ss:$16 sps:$4 sm:$0xff]   ;;  %v357_v15 = vld [vmem:[%s8537_s24 + $0x90] sm:$0xff] }
 0x10c   : > { %2338 = vmatprep.subr.bf16.mxu0 %v7995_v16  ;;  %3110 = vmatprep.subr.bf16.mxu1 %v7998_v17  ;;  %v364_v16 = vld [vmem:[%s8537_s24 + $0xc8] sm:$0xff] }
 0x10d   : > { %7710 = vset.pattern.permute.xlu0 %v8293_v10  ;;  %v372_v17 = vld [vmem:[%s8537_s24 + $0x108] sm:$0xff]  ;;  %v574_v19 = vpack.c.bf16 %v364_v16, %v357_v15  ;;  %v519_v15 = vld [vmem:[%s8537_s24 + $0x5a0] sm:$0xff] }
 0x10e   : > { %v582_v20 = vpack.c.bf16 %v379_v18, %v372_v17  ;;  %v511_v18 = vld [vmem:[%s8537_s24 + $0x560] sm:$0xff] }
 0x10f   : > { %2339 = vmatpush1.bf16.msra.mxu0 %v7993_v22  ;;  %3111 = vmatpush1.bf16.msra.mxu1 %v7996_v23  ;;  %v378_v22 = vld [vmem:[%s8537_s24 + $0x138] sm:$0xff] }
 0x110   : > { %2501 = vmatprep.subr.bf16.mxu0 %v8001_v26  ;;  %3273 = vmatprep.subr.bf16.mxu1 %v8004_v5  ;;  %v386_v23 = vld [vmem:[%s8537_s24 + $0x178] sm:$0xff]  ;;  %v483_v5 = vld [vmem:[%s8537_s24 + $0x480] sm:$0xff] }
 0x111   : > { %2228 = vmatmul.mubr.bf16.gmra.mrb[32].mxu0 %v621_v24  ;;  %3000 = vmatmul.mubr.bf16.gmra.mrb[32].mxu1 %v621_v24  ;;  %v393_v24 = vld [vmem:[%s8537_s24 + $0x1b0] sm:$0xff]  ;;  %v637_v9 = vpack.c.bf16 %v490_v6, %v483_v5  ;;  %v8040_v5 = vld [vmem:[%s10314_s3 + $0xac] ss:$16 sps:$4 sm:$0xff]   ;;  %v387_v6 = vld [vmem:[%s8537_s24 + $0x180] sm:$0xff] }
 0x112   : > { %2237 = vmatprep.mubr.bf16.mxu0 %v629_v25  ;;  %3009 = vmatprep.mubr.bf16.mxu1 %v629_v25  ;;  %v581_v25 = vpack.c.bf16 %v378_v22, %v371_v21  ;;  %v589_v26 = vpack.c.bf16 %v393_v24, %v386_v23  ;;  %v533_v21 = vld [vmem:[%s8537_s24 + $0x610] sm:$0xff] }
 0x113   : > { %v525_v24 = vld [vmem:[%s8537_s24 + $0x5d0] sm:$0xff] }
 0x119   : > { %2238 = vmatmul.mubr.bf16.gmra.mrb[36].mxu0 %v628_v31  ;;  %3010 = vmatmul.mubr.bf16.gmra.mrb[36].mxu1 %v628_v31  ;;  %v588_v31 = vpack.c.bf16 %v392_v28, %v385_v27  ;;  %v547_v27 = vld [vmem:[%s8537_s24 + $0x680] sm:$0xff] }
 0x11a   : > { %2247 = vmatprep.mubr.bf16.mxu0 %v636_v32  ;;  %3019 = vmatprep.mubr.bf16.mxu1 %v636_v32  ;;  %v596_v32 = vpack.c.bf16 %v407_v30, %v400_v29  ;;  %v539_v30 = vld [vmem:[%s8537_s24 + $0x640] sm:$0xff] }
 0x121   : > { %2248 = vmatmul.mubr.bf16.gmra.mrb[40].mxu0 %v635_v37  ;;  %3020 = vmatmul.mubr.bf16.gmra.mrb[40].mxu1 %v635_v37  ;;  %v595_v37 = vpack.c.bf16 %v406_v34, %v399_v33  ;;  %v561_v33 = vld [vmem:[%s8537_s24 + $0x6f0] sm:$0xff] }
 0x122   : > { %2257 = vmatprep.mubr.bf16.mxu0 %v643_v38  ;;  %3029 = vmatprep.mubr.bf16.mxu1 %v643_v38  ;;  %v603_v38 = vpack.c.bf16 %v421_v36, %v414_v35  ;;  %v553_v36 = vld [vmem:[%s8537_s24 + $0x6b0] sm:$0xff] }
 0x129   : > { %2258 = vmatmul.mubr.bf16.gmra.mrb[44].mxu0 %v642_v43  ;;  %3030 = vmatmul.mubr.bf16.gmra.mrb[44].mxu1 %v642_v43  ;;  %v602_v43 = vpack.c.bf16 %v420_v40, %v413_v39  ;;  %v8007_v39 = vld [vmem:[%s10314_s3 + $0x4] ss:$16 sps:$4 sm:$0xff]  }
 0x12a   : > { %2267 = vmatprep.mubr.bf16.mxu0 %v650_v44  ;;  %3039 = vmatprep.mubr.bf16.mxu1 %v650_v44  ;;  %v610_v44 = vpack.c.bf16 %v435_v42, %v428_v41  ;;  %v345_v40 = vld [vmem:[%s8537_s24 + $0x30] sm:$0xff]  ;;  %v352_v41 = vld [vmem:[%s8537_s24 + $0x68] sm:$0xff] }
 0x12b   : > { %v8010_v42 = vld [vmem:[%s10314_s3 + $0xc] ss:$16 sps:$4 sm:$0xff]  }
 0x131   : > { %2268 = vmatmul.mubr.bf16.gmra.mrb[48].mxu0 %v649_v49  ;;  %3040 = vmatmul.mubr.bf16.gmra.mrb[48].mxu1 %v649_v49  ;;  %v609_v49 = vpack.c.bf16 %v434_v46, %v427_v45  ;;  %v8008_v45 = vld [vmem:[%s10314_s3 + $0x8] ss:$16 sps:$4 sm:$0xff]   ;;  %v8013_v46 = vld [vmem:[%s10314_s3 + $0x24] ss:$16 sps:$4 sm:$0xff]  }
 0x132   : > { %2277 = vmatprep.mubr.bf16.mxu0 %v657_v50  ;;  %3049 = vmatprep.mubr.bf16.mxu1 %v657_v50  ;;  %v617_v50 = vpack.c.bf16 %v449_v48, %v442_v47  ;;  %v8016_v47 = vld [vmem:[%s10314_s3 + $0x2c] ss:$16 sps:$4 sm:$0xff]   ;;  %v359_v48 = vld [vmem:[%s8537_s24 + $0xa0] sm:$0xff] }
 0x139   : > { %2278 = vmatmul.mubr.bf16.gmra.mrb[52].mxu0 %v656_v55  ;;  %3050 = vmatmul.mubr.bf16.gmra.mrb[52].mxu1 %v656_v55  ;;  %v616_v55 = vpack.c.bf16 %v448_v52, %v441_v51  ;;  %v8014_v51 = vld [vmem:[%s10314_s3 + $0x28] ss:$16 sps:$4 sm:$0xff]   ;;  %v8019_v52 = vld [vmem:[%s10314_s3 + $0x44] ss:$16 sps:$4 sm:$0xff]  }
 0x13a   : > { %2287 = vmatprep.mubr.bf16.mxu0 %v664_v56  ;;  %3059 = vmatprep.mubr.bf16.mxu1 %v664_v56  ;;  %v624_v56 = vpack.c.bf16 %v463_v54, %v456_v53  ;;  %v8022_v53 = vld [vmem:[%s10314_s3 + $0x4c] ss:$16 sps:$4 sm:$0xff]  }
 0x141   : > { %2288 = vmatmul.mubr.bf16.gmra.mrb[56].mxu0 %v663_v61  ;;  %3060 = vmatmul.mubr.bf16.gmra.mrb[56].mxu1 %v663_v61  ;;  %v623_v61 = vpack.c.bf16 %v462_v58, %v455_v57  ;;  %v8025_v57 = vld [vmem:[%s10314_s3 + $0x64] ss:$16 sps:$4 sm:$0xff]   ;;  %v8028_v58 = vld [vmem:[%s10314_s3 + $0x6c] ss:$16 sps:$4 sm:$0xff]  }
 0x142   : > { %2297 = vmatprep.mubr.bf16.mxu0 %v671_v62  ;;  %3069 = vmatprep.mubr.bf16.mxu1 %v671_v62  ;;  %v631_v62 = vpack.c.bf16 %v477_v60, %v470_v59  ;;  %v373_v59 = vld [vmem:[%s8537_s24 + $0x110] sm:$0xff]  ;;  %v380_v60 = vld [vmem:[%s8537_s24 + $0x148] sm:$0xff] }
 0x149   : > { %2298 = vmatmul.mubr.bf16.gmra.mrb[60].mxu0 %v670_v3  ;;  %3070 = vmatmul.mubr.bf16.gmra.mrb[60].mxu1 %v670_v3  ;;  %v630_v3 = vpack.c.bf16 %v476_v0, %v469_v63  ;;  %v8031_v63 = vld [vmem:[%s10314_s3 + $0x84] ss:$16 sps:$4 sm:$0xff]   ;;  %v8034_v0 = vld [vmem:[%s10314_s3 + $0x8c] ss:$16 sps:$4 sm:$0xff]  }
 0x14a   : > { %2340 = vmatprep.mubr.bf16.mxu0 %v568_v4  ;;  %3112 = vmatprep.mubr.bf16.mxu1 %v568_v4  ;;  %v638_v4 = vpack.c.bf16 %v491_v2, %v484_v1  ;;  %v583_v1 = vpack.c.bf16 %v380_v60, %v373_v59  ;;  %v8029_v2 = vld [vmem:[%s10314_s3 + $0x80] ss:$16 sps:$4 sm:$0xff]   ;;  %v478_v60 = vld [vmem:[%s8537_s24 + $0x458] sm:$0xff] }
 0x14b   : > { %v471_v59 = vld [vmem:[%s8537_s24 + $0x420] sm:$0xff] }
 0x151   : > { %2341 = vmatmul.mubr.bf16.vlgmr.msra.gmra.mrb[0].mxu0 %v567_v11  ;;  %3113 = vmatmul.mubr.bf16.vlgmr.msra.gmra.mrb[0].mxu1 %v567_v11  ;;  %v645_v11 = vpack.c.bf16 %v505_v8, %v498_v7  ;;  %v394_v7 = vld [vmem:[%s8537_s24 + $0x1b8] sm:$0xff]  ;;  %v8035_v8 = vld [vmem:[%s10314_s3 + $0xa0] ss:$16 sps:$4 sm:$0xff]  }
 0x152   : > { %2350 = vmatprep.mubr.bf16.mxu0 %v575_v12  ;;  %3122 = vmatprep.mubr.bf16.mxu1 %v575_v12  ;;  %v497_v12 = vld [vmem:[%s8537_s24 + $0x4f0] sm:$0xff] }
 0x153   : > { %2502 = vmatpush1.bf16.msra.mxu0 %v7999_v13  ;;  %3274 = vmatpush1.bf16.msra.mxu1 %v8002_v14  ;;  %v504_v13 = vld [vmem:[%s8537_s24 + $0x528] sm:$0xff] }
 0x154   : > { %v512_v14 = vld [vmem:[%s8537_s24 + $0x568] sm:$0xff]  ;;  %v644_v16 = vpack.c.bf16 %v504_v13, %v497_v12  ;;  %4448 = vmatprep.subr.bf16.mxu0 %v8007_v39  ;;  %4834 = vmatprep.subr.bf16.mxu1 %v8010_v42  ;;  %v590_v13 = vpack.c.bf16 %v394_v7, %v387_v6  ;;  %v8071_v42 = vld [vmem:[%s10314_s3 + $0x160] ss:$16 sps:$4 sm:$0xff]  }
 0x155   : > { %v652_v17 = vpack.c.bf16 %v519_v15, %v512_v14  ;;  %v8046_v12 = vld [vmem:[%s10314_s3 + $0xcc] ss:$16 sps:$4 sm:$0xff]   ;;  %v8041_v14 = vld [vmem:[%s10314_s3 + $0xc0] ss:$16 sps:$4 sm:$0xff]   ;;  %v8044_v15 = vld [vmem:[%s10314_s3 + $0xc8] ss:$16 sps:$4 sm:$0xff]  }
 0x156   : > { %v8076_v39 = vld [vmem:[%s10314_s3 + $0x16c] ss:$16 sps:$4 sm:$0xff]   ;;  %v8089_v6 = vld [vmem:[%s10314_s3 + $0x1c0] ss:$16 sps:$4 sm:$0xff]   ;;  %v8092_v7 = vld [vmem:[%s10314_s3 + $0x1c8] ss:$16 sps:$4 sm:$0xff]  }
 0x159   : > { %2351 = vmatmul.mubr.bf16.gmra.mrb[4].mxu0 %v574_v19  ;;  %3123 = vmatmul.mubr.bf16.gmra.mrb[4].mxu1 %v574_v19  ;;  %v518_v19 = vld [vmem:[%s8537_s24 + $0x598] sm:$0xff] }
 0x15a   : > { %2360 = vmatprep.mubr.bf16.mxu0 %v582_v20  ;;  %3132 = vmatprep.mubr.bf16.mxu1 %v582_v20  ;;  %v526_v20 = vld [vmem:[%s8537_s24 + $0x5d8] sm:$0xff]  ;;  %v651_v22 = vpack.c.bf16 %v518_v19, %v511_v18  ;;  %v401_v18 = vld [vmem:[%s8537_s24 + $0x1f0] sm:$0xff]  ;;  %v408_v19 = vld [vmem:[%s8537_s24 + $0x228] sm:$0xff] }
 0x15b   : > { %v659_v23 = vpack.c.bf16 %v533_v21, %v526_v20  ;;  %v8047_v20 = vld [vmem:[%s10314_s3 + $0xe0] ss:$16 sps:$4 sm:$0xff]   ;;  %v8050_v21 = vld [vmem:[%s10314_s3 + $0xe8] ss:$16 sps:$4 sm:$0xff]  }
 0x161   : > { %2361 = vmatmul.mubr.bf16.gmra.mrb[8].mxu0 %v581_v25  ;;  %3133 = vmatmul.mubr.bf16.gmra.mrb[8].mxu1 %v581_v25  ;;  %v532_v25 = vld [vmem:[%s8537_s24 + $0x608] sm:$0xff] }
 0x162   : > { %2370 = vmatprep.mubr.bf16.mxu0 %v589_v26  ;;  %3142 = vmatprep.mubr.bf16.mxu1 %v589_v26  ;;  %v540_v26 = vld [vmem:[%s8537_s24 + $0x648] sm:$0xff]  ;;  %v658_v28 = vpack.c.bf16 %v532_v25, %v525_v24  ;;  %v597_v24 = vpack.c.bf16 %v408_v19, %v401_v18  ;;  %v8053_v25 = vld [vmem:[%s10314_s3 + $0x100] ss:$16 sps:$4 sm:$0xff]  }
 0x163   : > { %v666_v29 = vpack.c.bf16 %v547_v27, %v540_v26  ;;  %v8056_v26 = vld [vmem:[%s10314_s3 + $0x108] ss:$16 sps:$4 sm:$0xff]   ;;  %v8061_v27 = vld [vmem:[%s10314_s3 + $0x124] ss:$16 sps:$4 sm:$0xff]  }
 0x164   : > { %v541_v19 = vld [vmem:[%s8537_s24 + $0x650] sm:$0xff] }
 0x169   : > { %2371 = vmatmul.mubr.bf16.gmra.mrb[12].mxu0 %v588_v31  ;;  %3143 = vmatmul.mubr.bf16.gmra.mrb[12].mxu1 %v588_v31  ;;  %v546_v31 = vld [vmem:[%s8537_s24 + $0x678] sm:$0xff] }
 0x16a   : > { %2380 = vmatprep.mubr.bf16.mxu0 %v596_v32  ;;  %3152 = vmatprep.mubr.bf16.mxu1 %v596_v32  ;;  %v554_v32 = vld [vmem:[%s8537_s24 + $0x6b8] sm:$0xff]  ;;  %v665_v34 = vpack.c.bf16 %v546_v31, %v539_v30  ;;  %v8059_v31 = vld [vmem:[%s10314_s3 + $0x120] ss:$16 sps:$4 sm:$0xff]  }
 0x16b   : > { %v673_v35 = vpack.c.bf16 %v561_v33, %v554_v32  ;;  %v422_v30 = vld [vmem:[%s8537_s24 + $0x298] sm:$0xff]  ;;  %v8067_v33 = vld [vmem:[%s10314_s3 + $0x144] ss:$16 sps:$4 sm:$0xff]  }
 0x16c   : > { %v8062_v32 = vld [vmem:[%s10314_s3 + $0x128] ss:$16 sps:$4 sm:$0xff]  }
 0x171   : > { %2381 = vmatmul.mubr.bf16.gmra.mrb[16].mxu0 %v595_v37  ;;  %3153 = vmatmul.mubr.bf16.gmra.mrb[16].mxu1 %v595_v37  ;;  %v560_v37 = vld [vmem:[%s8537_s24 + $0x6e8] sm:$0xff] }
 0x172   : > { %2390 = vmatprep.mubr.bf16.mxu0 %v603_v38  ;;  %3162 = vmatprep.mubr.bf16.mxu1 %v603_v38  ;;  %v672_v38 = vpack.c.bf16 %v560_v37, %v553_v36  ;;  %v8065_v36 = vld [vmem:[%s10314_s3 + $0x140] ss:$16 sps:$4 sm:$0xff]   ;;  %v8068_v37 = vld [vmem:[%s10314_s3 + $0x148] ss:$16 sps:$4 sm:$0xff]  }
 0x179   : > { %2391 = vmatmul.mubr.bf16.gmra.mrb[20].mxu0 %v602_v43  ;;  %3163 = vmatmul.mubr.bf16.gmra.mrb[20].mxu1 %v602_v43  ;;  %v569_v43 = vpack.c.bf16 %v352_v41, %v345_v40  ;;  %v429_v40 = vld [vmem:[%s8537_s24 + $0x2d0] sm:$0xff]  ;;  %v436_v41 = vld [vmem:[%s8537_s24 + $0x308] sm:$0xff] }
 0x17a   : > { %2400 = vmatprep.mubr.bf16.mxu0 %v610_v44  ;;  %3172 = vmatprep.mubr.bf16.mxu1 %v610_v44  ;;  %v8005_v44 = vld [vmem:[%s10314_s3] ss:$16 sps:$4 sm:$0xff]  }
 0x181   : > { %2401 = vmatmul.mubr.bf16.gmra.mrb[24].mxu0 %v609_v49  ;;  %3173 = vmatmul.mubr.bf16.gmra.mrb[24].mxu1 %v609_v49  ;;  %v366_v49 = vld [vmem:[%s8537_s24 + $0xd8] sm:$0xff] }
 0x182   : > { %2410 = vmatprep.mubr.bf16.mxu0 %v617_v50  ;;  %3182 = vmatprep.mubr.bf16.mxu1 %v617_v50  ;;  %v8011_v50 = vld [vmem:[%s10314_s3 + $0x20] ss:$16 sps:$4 sm:$0xff]   ;;  %v576_v54 = vpack.c.bf16 %v366_v49, %v359_v48  ;;  %v8080_v48 = vld [vmem:[%s10314_s3 + $0x188] ss:$16 sps:$4 sm:$0xff]   ;;  %v8085_v49 = vld [vmem:[%s10314_s3 + $0x1a4] ss:$16 sps:$4 sm:$0xff]  }
 0x189   : > { %2411 = vmatmul.mubr.bf16.gmra.mrb[28].mxu0 %v616_v55  ;;  %3183 = vmatmul.mubr.bf16.gmra.mrb[28].mxu1 %v616_v55  ;;  %v8017_v55 = vld [vmem:[%s10314_s3 + $0x40] ss:$16 sps:$4 sm:$0xff]  }
 0x18a   : > { %2420 = vmatprep.mubr.bf16.mxu0 %v624_v56  ;;  %3192 = vmatprep.mubr.bf16.mxu1 %v624_v56  ;;  %v8020_v56 = vld [vmem:[%s10314_s3 + $0x48] ss:$16 sps:$4 sm:$0xff]  }
 0x191   : > { %2421 = vmatmul.mubr.bf16.gmra.mrb[32].mxu0 %v623_v61  ;;  %3193 = vmatmul.mubr.bf16.gmra.mrb[32].mxu1 %v623_v61  ;;  %v8023_v61 = vld [vmem:[%s10314_s3 + $0x60] ss:$16 sps:$4 sm:$0xff]  }
 0x192   : > { %2430 = vmatprep.mubr.bf16.mxu0 %v631_v62  ;;  %3202 = vmatprep.mubr.bf16.mxu1 %v631_v62  ;;  %v8026_v62 = vld [vmem:[%s10314_s3 + $0x68] ss:$16 sps:$4 sm:$0xff]  }
 0x199   : > { %2431 = vmatmul.mubr.bf16.gmra.mrb[36].mxu0 %v630_v3  ;;  %3203 = vmatmul.mubr.bf16.gmra.mrb[36].mxu1 %v630_v3  ;;  %v8032_v3 = vld [vmem:[%s10314_s3 + $0x88] ss:$16 sps:$4 sm:$0xff]  }
 0x19a   : > { %2440 = vmatprep.mubr.bf16.mxu0 %v638_v4  ;;  %3212 = vmatprep.mubr.bf16.mxu1 %v638_v4  ;;  %v8037_v4 = vld [vmem:[%s10314_s3 + $0xa4] ss:$16 sps:$4 sm:$0xff]  }
 0x1a1   : > { %2441 = vmatmul.mubr.bf16.gmra.mrb[40].mxu0 %v637_v9  ;;  %3213 = vmatmul.mubr.bf16.gmra.mrb[40].mxu1 %v637_v9  ;;  %v8038_v9 = vld [vmem:[%s10314_s3 + $0xa8] ss:$16 sps:$4 sm:$0xff]  }
 0x1a2   : > { %2450 = vmatprep.mubr.bf16.mxu0 %v645_v11  ;;  %3222 = vmatprep.mubr.bf16.mxu1 %v645_v11  ;;  %v8043_v11 = vld [vmem:[%s10314_s3 + $0xc4] ss:$16 sps:$4 sm:$0xff]  }
 0x1a9   : > { %2451 = vmatmul.mubr.bf16.gmra.mrb[44].mxu0 %v644_v16  ;;  %3223 = vmatmul.mubr.bf16.gmra.mrb[44].mxu1 %v644_v16  ;;  %v8049_v16 = vld [vmem:[%s10314_s3 + $0xe4] ss:$16 sps:$4 sm:$0xff]  }
 0x1aa   : > { %2460 = vmatprep.mubr.bf16.mxu0 %v652_v17  ;;  %3232 = vmatprep.mubr.bf16.mxu1 %v652_v17  ;;  %v8052_v17 = vld [vmem:[%s10314_s3 + $0xec] ss:$16 sps:$4 sm:$0xff]  }
 0x1b1   : > { %2461 = vmatmul.mubr.bf16.gmra.mrb[48].mxu0 %v651_v22  ;;  %3233 = vmatmul.mubr.bf16.gmra.mrb[48].mxu1 %v651_v22  ;;  %v8055_v22 = vld [vmem:[%s10314_s3 + $0x104] ss:$16 sps:$4 sm:$0xff]  }
 0x1b2   : > { %2470 = vmatprep.mubr.bf16.mxu0 %v659_v23  ;;  %3242 = vmatprep.mubr.bf16.mxu1 %v659_v23  ;;  %v8058_v23 = vld [vmem:[%s10314_s3 + $0x10c] ss:$16 sps:$4 sm:$0xff]  }
 0x1b9   : > { %2471 = vmatmul.mubr.bf16.gmra.mrb[52].mxu0 %v658_v28  ;;  %3243 = vmatmul.mubr.bf16.gmra.mrb[52].mxu1 %v658_v28  ;;  %v8064_v28 = vld [vmem:[%s10314_s3 + $0x12c] ss:$16 sps:$4 sm:$0xff]  }
 0x1ba   : > { %2480 = vmatprep.mubr.bf16.mxu0 %v666_v29  ;;  %3252 = vmatprep.mubr.bf16.mxu1 %v666_v29  ;;  %v415_v29 = vld [vmem:[%s8537_s24 + $0x260] sm:$0xff] }
 0x1c1   : > { %2481 = vmatmul.mubr.bf16.gmra.mrb[56].mxu0 %v665_v34  ;;  %3253 = vmatmul.mubr.bf16.gmra.mrb[56].mxu1 %v665_v34  ;;  %v8070_v34 = vld [vmem:[%s10314_s3 + $0x14c] ss:$16 sps:$4 sm:$0xff]  }
 0x1c2   : > { %2490 = vmatprep.mubr.bf16.mxu0 %v673_v35  ;;  %3262 = vmatprep.mubr.bf16.mxu1 %v673_v35  ;;  %v604_v35 = vpack.c.bf16 %v422_v30, %v415_v29  ;;  %v871_v30 = vld [vmem:[%s10313_s2] sm:$0xf] }
 0x1c9   : > { %2491 = vmatmul.mubr.bf16.gmra.mrb[60].mxu0 %v672_v38  ;;  %3263 = vmatmul.mubr.bf16.gmra.mrb[60].mxu1 %v672_v38  ;;  %v8073_v38 = vld [vmem:[%s10314_s3 + $0x164] ss:$16 sps:$4 sm:$0xff]  }
 0x1ca   : > { %2533 = vmatprep.mubr.bf16.mxu0 %v8293_v10  ;;  %3305 = vmatprep.mubr.bf16.mxu1 %v8293_v10 }
 0x1d1   : > { %6411 = vmatmul.mubr.msk.bf16.vlgmr.msra.gmra.mrb[0].mxu0 %vm1873_vm0, %v569_v43  ;;  %6427 = vmatmul.mubr.msk.bf16.vlgmr.msra.gmra.mrb[0].mxu1 %vm1873_vm0, %v569_v43  ;;  %v8074_v43 = vld [vmem:[%s10314_s3 + $0x168] ss:$16 sps:$4 sm:$0xff]  }
 0x1d2   : > { %2543 = vmatprep.mubr.bf16.mxu0 %v8293_v10  ;;  %3315 = vmatprep.mubr.bf16.mxu1 %v8293_v10 }
 0x1d3   : > { %4449 = vmatpush1.bf16.msra.mxu0 %v8005_v44  ;;  %4835 = vmatpush1.bf16.msra.mxu1 %v8008_v45  ;;  %v8079_v44 = vld [vmem:[%s10314_s3 + $0x184] ss:$16 sps:$4 sm:$0xff]   ;;  %v8082_v45 = vld [vmem:[%s10314_s3 + $0x18c] ss:$16 sps:$4 sm:$0xff]  }
 0x1d4   : > { %4450 = vmatprep.subr.bf16.mxu0 %v8013_v46  ;;  %4836 = vmatprep.subr.bf16.mxu1 %v8016_v47  ;;  %v611_v46 = vpack.c.bf16 %v436_v41, %v429_v40  ;;  %v8077_v47 = vld [vmem:[%s10314_s3 + $0x180] ss:$16 sps:$4 sm:$0xff]  }
 0x1d7   : > { %4451 = vmatpush1.bf16.msra.mxu0 %v8011_v50  ;;  %4837 = vmatpush1.bf16.msra.mxu1 %v8014_v51  ;;  %v8088_v50 = vld [vmem:[%s10314_s3 + $0x1ac] ss:$16 sps:$4 sm:$0xff]   ;;  %v443_v51 = vld [vmem:[%s8537_s24 + $0x340] sm:$0xff] }
 0x1d8   : > { %4452 = vmatprep.subr.bf16.mxu0 %v8019_v52  ;;  %4838 = vmatprep.subr.bf16.mxu1 %v8022_v53  ;;  %v450_v52 = vld [vmem:[%s8537_s24 + $0x378] sm:$0xff]  ;;  %v8083_v53 = vld [vmem:[%s10314_s3 + $0x1a0] ss:$16 sps:$4 sm:$0xff]  }
 0x1d9   : > { %6412 = vmatmul.mubr.msk.bf16.gmra.mrb[4].mxu0 %vm1873_vm0, %v576_v54  ;;  %6428 = vmatmul.mubr.msk.bf16.gmra.mrb[4].mxu1 %vm1873_vm0, %v576_v54  ;;  %v8086_v54 = vld [vmem:[%s10314_s3 + $0x1a8] ss:$16 sps:$4 sm:$0xff]  }
 0x1da   : > { %2553 = vmatprep.mubr.bf16.mxu0 %v8293_v10  ;;  %3325 = vmatprep.mubr.bf16.mxu1 %v8293_v10 }
 0x1db   : > { %4453 = vmatpush1.bf16.msra.mxu0 %v8017_v55  ;;  %4839 = vmatpush1.bf16.msra.mxu1 %v8020_v56  ;;  %v618_v55 = vpack.c.bf16 %v450_v52, %v443_v51  ;;  %v457_v56 = vld [vmem:[%s8537_s24 + $0x3b0] sm:$0xff] }
 0x1dc   : > { %4454 = vmatprep.subr.bf16.mxu0 %v8025_v57  ;;  %4840 = vmatprep.subr.bf16.mxu1 %v8028_v58  ;;  %v464_v57 = vld [vmem:[%s8537_s24 + $0x3e8] sm:$0xff] }
 0x1dd   : > { %v625_v58 = vpack.c.bf16 %v464_v57, %v457_v56 }
 0x1df   : > { %4455 = vmatpush1.bf16.msra.mxu0 %v8023_v61  ;;  %4841 = vmatpush1.bf16.msra.mxu1 %v8026_v62  ;;  %v632_v61 = vpack.c.bf16 %v478_v60, %v471_v59  ;;  %v485_v62 = vld [vmem:[%s8537_s24 + $0x490] sm:$0xff] }
 0x1e0   : > { %4456 = vmatprep.subr.bf16.mxu0 %v8031_v63  ;;  %4842 = vmatprep.subr.bf16.mxu1 %v8034_v0  ;;  %v492_v63 = vld [vmem:[%s8537_s24 + $0x4c8] sm:$0xff] }
 0x1e1   : > { %6413 = vmatmul.mubr.msk.bf16.gmra.mrb[8].mxu0 %vm1873_vm0, %v583_v1  ;;  %6429 = vmatmul.mubr.msk.bf16.gmra.mrb[8].mxu1 %vm1873_vm0, %v583_v1  ;;  %v639_v0 = vpack.c.bf16 %v492_v63, %v485_v62  ;;  %v499_v1 = vld [vmem:[%s8537_s24 + $0x500] sm:$0xff] }
 0x1e2   : > { %2563 = vmatprep.mubr.bf16.mxu0 %v8293_v10  ;;  %3335 = vmatprep.mubr.bf16.mxu1 %v8293_v10 }
 0x1e3   : > { %4457 = vmatpush1.bf16.msra.mxu0 %v8029_v2  ;;  %4843 = vmatpush1.bf16.msra.mxu1 %v8032_v3  ;;  %v506_v2 = vld [vmem:[%s8537_s24 + $0x538] sm:$0xff] }
 0x1e4   : > { %4458 = vmatprep.subr.bf16.mxu0 %v8037_v4  ;;  %4844 = vmatprep.subr.bf16.mxu1 %v8040_v5  ;;  %v646_v3 = vpack.c.bf16 %v506_v2, %v499_v1  ;;  %v8091_v4 = vld [vmem:[%s10314_s3 + $0x1c4] ss:$16 sps:$4 sm:$0xff]   ;;  %v8094_v5 = vld [vmem:[%s10314_s3 + $0x1cc] ss:$16 sps:$4 sm:$0xff]  }
 0x1e7   : > { %4459 = vmatpush1.bf16.msra.mxu0 %v8035_v8  ;;  %4845 = vmatpush1.bf16.msra.mxu1 %v8038_v9  ;;  %v513_v8 = vld [vmem:[%s8537_s24 + $0x570] sm:$0xff] }
 0x1e8   : > { %4460 = vmatprep.subr.bf16.mxu0 %v8043_v11  ;;  %4846 = vmatprep.subr.bf16.mxu1 %v8046_v12  ;;  %v8097_v9 = vld [vmem:[%s10314_s3 + $0x1e4] ss:$16 sps:$4 sm:$0xff]   ;;  %v8100_v11 = vld [vmem:[%s10314_s3 + $0x1ec] ss:$16 sps:$4 sm:$0xff]  }
 0x1e9   : > { %6414 = vmatmul.mubr.msk.bf16.gmra.mrb[12].mxu0 %vm1873_vm0, %v590_v13  ;;  %6430 = vmatmul.mubr.msk.bf16.gmra.mrb[12].mxu1 %vm1873_vm0, %v590_v13  ;;  %v520_v12 = vld [vmem:[%s8537_s24 + $0x5a8] sm:$0xff]  ;;  %v8095_v13 = vld [vmem:[%s10314_s3 + $0x1e0] ss:$16 sps:$4 sm:$0xff]  }
 0x1ea   : > { %2573 = vmatprep.mubr.bf16.mxu0 %v8293_v10  ;;  %3345 = vmatprep.mubr.bf16.mxu1 %v8293_v10 }
 0x1eb   : > { %4461 = vmatpush1.bf16.msra.mxu0 %v8041_v14  ;;  %4847 = vmatpush1.bf16.msra.mxu1 %v8044_v15  ;;  %v8098_v14 = vld [vmem:[%s10314_s3 + $0x1e8] ss:$16 sps:$4 sm:$0xff]   ;;  %v653_v15 = vpack.c.bf16 %v520_v12, %v513_v8 }
 0x1ec   : > { %4462 = vmatprep.subr.bf16.mxu0 %v8049_v16  ;;  %4848 = vmatprep.subr.bf16.mxu1 %v8052_v17  ;;  %v527_v16 = vld [vmem:[%s8537_s24 + $0x5e0] sm:$0xff]  ;;  %v534_v17 = vld [vmem:[%s8537_s24 + $0x618] sm:$0xff] }
 0x1ed   : > { %v660_v18 = vpack.c.bf16 %v534_v17, %v527_v16 }
 0x1ef   : > { %4463 = vmatpush1.bf16.msra.mxu0 %v8047_v20  ;;  %4849 = vmatpush1.bf16.msra.mxu1 %v8050_v21  ;;  %v548_v20 = vld [vmem:[%s8537_s24 + $0x688] sm:$0xff] }
 0x1f0   : > { %4464 = vmatprep.subr.bf16.mxu0 %v8055_v22  ;;  %4850 = vmatprep.subr.bf16.mxu1 %v8058_v23  ;;  %v667_v21 = vpack.c.bf16 %v548_v20, %v541_v19  ;;  %v555_v22 = vld [vmem:[%s8537_s24 + $0x6c0] sm:$0xff]  ;;  %v562_v23 = vld [vmem:[%s8537_s24 + $0x6f8] sm:$0xff] }
 0x1f1   : > { %6415 = vmatmul.mubr.msk.bf16.gmra.mrb[16].mxu0 %vm1873_vm0, %v597_v24  ;;  %6431 = vmatmul.mubr.msk.bf16.gmra.mrb[16].mxu1 %vm1873_vm0, %v597_v24  ;;  %v674_v24 = vpack.c.bf16 %v562_v23, %v555_v22  ;;  %v8107_v22 = vld [vmem:[%s10314_s3 + $0x220] ss:$16 sps:$4 sm:$0xff]   ;;  %v8110_v23 = vld [vmem:[%s10314_s3 + $0x228] ss:$16 sps:$4 sm:$0xff]  }
 0x1f2   : > { %2583 = vmatprep.mubr.bf16.mxu0 %v8293_v10  ;;  %3355 = vmatprep.mubr.bf16.mxu1 %v8293_v10 }
 0x1f3   : > { %4465 = vmatpush1.bf16.msra.mxu0 %v8053_v25  ;;  %4851 = vmatpush1.bf16.msra.mxu1 %v8056_v26  ;;  %v8103_v25 = vld [vmem:[%s10314_s3 + $0x204] ss:$16 sps:$4 sm:$0xff]   ;;  %v8106_v26 = vld [vmem:[%s10314_s3 + $0x20c] ss:$16 sps:$4 sm:$0xff]  }
 0x1f4   : > { %4466 = vmatprep.subr.bf16.mxu0 %v8061_v27  ;;  %4852 = vmatprep.subr.bf16.mxu1 %v8064_v28  ;;  %v873_v27 = vlaneseq }
 0x1f6   : > { %vm6131_vm1 = vcmp.lt.s32.totalorder %v873_v27, 256 }
 0x1f7   : > { %4467 = vmatpush1.bf16.msra.mxu0 %v8059_v31  ;;  %4853 = vmatpush1.bf16.msra.mxu1 %v8062_v32 }
 0x1f8   : > { %4468 = vmatprep.subr.bf16.mxu0 %v8067_v33  ;;  %4854 = vmatprep.subr.bf16.mxu1 %v8070_v34 }
 0x1f9   : > { %6416 = vmatmul.mubr.msk.bf16.gmra.mrb[20].mxu0 %vm1873_vm0, %v604_v35  ;;  %6432 = vmatmul.mubr.msk.bf16.gmra.mrb[20].mxu1 %vm1873_vm0, %v604_v35 }
 0x1fa   : > { %2593 = vmatprep.mubr.bf16.mxu0 %v8293_v10  ;;  %3365 = vmatprep.mubr.bf16.mxu1 %v8293_v10 }
 0x1fb   : > { %4469 = vmatpush1.bf16.msra.mxu0 %v8065_v36  ;;  %4855 = vmatpush1.bf16.msra.mxu1 %v8068_v37 }
 0x1fc   : > { %4470 = vmatprep.subr.bf16.mxu0 %v8073_v38  ;;  %4856 = vmatprep.subr.bf16.mxu1 %v8076_v39 }
 0x1ff   : > { %4471 = vmatpush1.bf16.msra.mxu0 %v8071_v42  ;;  %4857 = vmatpush1.bf16.msra.mxu1 %v8074_v43 }
 0x200   : > { %4472 = vmatprep.subr.bf16.mxu0 %v8079_v44  ;;  %4858 = vmatprep.subr.bf16.mxu1 %v8082_v45 }
 0x201   : > { %6417 = vmatmul.mubr.msk.bf16.gmra.mrb[24].mxu0 %vm1873_vm0, %v611_v46  ;;  %6433 = vmatmul.mubr.msk.bf16.gmra.mrb[24].mxu1 %vm1873_vm0, %v611_v46 }
 0x202   : > { %2603 = vmatprep.mubr.bf16.mxu0 %v8293_v10  ;;  %3375 = vmatprep.mubr.bf16.mxu1 %v8293_v10 }
 0x203   : > { %4473 = vmatpush1.bf16.msra.mxu0 %v8077_v47  ;;  %4859 = vmatpush1.bf16.msra.mxu1 %v8080_v48 }
 0x204   : > { %4474 = vmatprep.subr.bf16.mxu0 %v8085_v49  ;;  %4860 = vmatprep.subr.bf16.mxu1 %v8088_v50 }
 0x207   : > { %4475 = vmatpush1.bf16.msra.mxu0 %v8083_v53  ;;  %4861 = vmatpush1.bf16.msra.mxu1 %v8086_v54 }
 0x208   : > { %4476 = vmatprep.subr.bf16.mxu0 %v8091_v4  ;;  %4862 = vmatprep.subr.bf16.mxu1 %v8094_v5  ;;  %v8104_v4 = vld [vmem:[%s10314_s3 + $0x208] ss:$16 sps:$4 sm:$0xff]  }
 0x209   : > { %6418 = vmatmul.mubr.msk.bf16.gmra.mrb[28].mxu0 %vm1873_vm0, %v618_v55  ;;  %6434 = vmatmul.mubr.msk.bf16.gmra.mrb[28].mxu1 %vm1873_vm0, %v618_v55 }
 0x20a   : > { %2613 = vmatprep.mubr.bf16.mxu0 %v8293_v10  ;;  %3385 = vmatprep.mubr.bf16.mxu1 %v8293_v10 }
 0x20b   : > { %4477 = vmatpush1.bf16.msra.mxu0 %v8089_v6  ;;  %4863 = vmatpush1.bf16.msra.mxu1 %v8092_v7 }
 0x20c   : > { %4478 = vmatprep.subr.bf16.mxu0 %v8097_v9  ;;  %4864 = vmatprep.subr.bf16.mxu1 %v8100_v11  ;;  %v8109_v9 = vld [vmem:[%s10314_s3 + $0x224] ss:$16 sps:$4 sm:$0xff]   ;;  %v8112_v11 = vld [vmem:[%s10314_s3 + $0x22c] ss:$16 sps:$4 sm:$0xff]  }
 0x20f   : > { %4479 = vmatpush1.bf16.msra.mxu0 %v8095_v13  ;;  %4865 = vmatpush1.bf16.msra.mxu1 %v8098_v14 }
 0x210   : > { %4641 = vmatprep.subr.bf16.mxu0 %v8103_v25  ;;  %5027 = vmatprep.subr.bf16.mxu1 %v8106_v26 }
 0x211   : > { %6419 = vmatmul.mubr.msk.bf16.gmra.mrb[32].mxu0 %vm1873_vm0, %v625_v58  ;;  %6435 = vmatmul.mubr.msk.bf16.gmra.mrb[32].mxu1 %vm1873_vm0, %v625_v58 }
 0x212   : > { %2623 = vmatprep.mubr.bf16.mxu0 %v8293_v10  ;;  %3395 = vmatprep.mubr.bf16.mxu1 %v8293_v10 }
 0x219   : > { %6420 = vmatmul.mubr.msk.bf16.gmra.mrb[36].mxu0 %vm1873_vm0, %v632_v61  ;;  %6436 = vmatmul.mubr.msk.bf16.gmra.mrb[36].mxu1 %vm1873_vm0, %v632_v61 }
 0x21a   : > { %2633 = vmatprep.mubr.bf16.mxu0 %v8293_v10  ;;  %3405 = vmatprep.mubr.bf16.mxu1 %v8293_v10 }
 0x221   : > { %6421 = vmatmul.mubr.msk.bf16.gmra.mrb[40].mxu0 %vm1873_vm0, %v639_v0  ;;  %6437 = vmatmul.mubr.msk.bf16.gmra.mrb[40].mxu1 %vm1873_vm0, %v639_v0 }
 0x222   : > { %2643 = vmatprep.mubr.bf16.mxu0 %v8293_v10  ;;  %3415 = vmatprep.mubr.bf16.mxu1 %v8293_v10 }
 0x229   : > { %6422 = vmatmul.mubr.msk.bf16.gmra.mrb[44].mxu0 %vm1873_vm0, %v646_v3  ;;  %6438 = vmatmul.mubr.msk.bf16.gmra.mrb[44].mxu1 %vm1873_vm0, %v646_v3  ;;  %v8101_v3 = vld [vmem:[%s10314_s3 + $0x200] ss:$16 sps:$4 sm:$0xff]  }
 0x22a   : > { %2653 = vmatprep.mubr.bf16.mxu0 %v8293_v10  ;;  %3425 = vmatprep.mubr.bf16.mxu1 %v8293_v10 }
 0x231   : > { %6423 = vmatmul.mubr.msk.bf16.gmra.mrb[48].mxu0 %vm1873_vm0, %v653_v15  ;;  %6439 = vmatmul.mubr.msk.bf16.gmra.mrb[48].mxu1 %vm1873_vm0, %v653_v15 }
 0x232   : > { %2663 = vmatprep.mubr.bf16.mxu0 %v8293_v10  ;;  %3435 = vmatprep.mubr.bf16.mxu1 %v8293_v10 }
 0x239   : > { %6424 = vmatmul.mubr.msk.bf16.gmra.mrb[52].mxu0 %vm1873_vm0, %v660_v18  ;;  %6440 = vmatmul.mubr.msk.bf16.gmra.mrb[52].mxu1 %vm1873_vm0, %v660_v18 }
 0x23a   : > { %2673 = vmatprep.mubr.bf16.mxu0 %v8293_v10  ;;  %3445 = vmatprep.mubr.bf16.mxu1 %v8293_v10 }
 0x241   : > { %6425 = vmatmul.mubr.msk.bf16.gmra.mrb[56].mxu0 %vm1873_vm0, %v667_v21  ;;  %6441 = vmatmul.mubr.msk.bf16.gmra.mrb[56].mxu1 %vm1873_vm0, %v667_v21 }
 0x242   : > { %2683 = vmatprep.mubr.bf16.mxu0 %v8293_v10  ;;  %3455 = vmatprep.mubr.bf16.mxu1 %v8293_v10  ;;  %v9483_v10 = vshrl.u32 %v873_v27, 7 }
 0x244   : > { %v9486_v28 = vsub.s32 0, %v9483_v10  ;;  %v883_v29 = vsub.s32 2, %v9483_v10  ;;  %v879_v31 = vsub.s32 1, %v9483_v10  ;;  %v887_v32 = vsub.s32 3, %v9483_v10 }
 0x246   : > { %v9495_v33 = vrot.slane %v871_v30, %v9486_v28  ;;  %v9499_v34 = vrot.slane %v871_v30, %v883_v29  ;;  %v9503_v35 = vrot.slane %v871_v30, %v879_v31  ;;  %v9507_v36 = vrot.slane %v871_v30, %v887_v32 }
 0x249   : > { %6426 = vmatmul.mubr.msk.bf16.gmra.mrb[60].mxu0 %vm1873_vm0, %v674_v24  ;;  %6442 = vmatmul.mubr.msk.bf16.gmra.mrb[60].mxu1 %vm1873_vm0, %v674_v24  ;;  %v8115_v24 = vld [vmem:[%s10314_s3 + $0x244] ss:$16 sps:$4 sm:$0xff]  }
 0x2a4   : > { %v2535_v37 = vpop.f32.mrb[0].mxu0  ;;  %v3307_v38 = vpop.f32.mrb[0].mxu1 }
 0x2a5   : > { %v6900_v39 = vadd.f32 %v2535_v37, %v9495_v33  ;;  %v6964_v40 = vadd.f32 %v3307_v38, %v9499_v34  ;;  %v2537_v41 = vpop.f32.mrb[1].mxu0  ;;  %v3309_v42 = vpop.f32.mrb[1].mxu1  ;;  %v8118_v38 = vld [vmem:[%s10314_s3 + $0x24c] ss:$16 sps:$4 sm:$0xff]  }
 0x2a6   : > { %v6901_v43 = vadd.f32 %v2537_v41, %v9503_v35  ;;  %v6965_v44 = vadd.f32 %v3309_v42, %v9507_v36  ;;  %v2539_v45 = vpop.f32.mrb[2].mxu0  ;;  %v3311_v46 = vpop.f32.mrb[2].mxu1 }
 0x2a7   : > { %v6902_v47 = vadd.f32 %v2539_v45, %v9495_v33  ;;  %v6966_v48 = vadd.f32 %v3311_v46, %v9499_v34  ;;  %v2541_v49 = vpop.f32.mrb[3].mxu0  ;;  %v3313_v50 = vpop.f32.mrb[3].mxu1  ;;  %v3466_v53 = vmax.f32 %v6900_v39, 0.0  ;;  %v3468_v54 = vmax.f32 %v6964_v40, 0.0 }
 0x2a8   : > { %v6903_v51 = vadd.f32 %v2541_v49, %v9503_v35  ;;  %v6967_v52 = vadd.f32 %v3313_v50, %v9507_v36  ;;  %v3467_v57 = vmax.f32 %v6901_v43, 0.0  ;;  %v3469_v58 = vmax.f32 %v6965_v44, 0.0  ;;  %v8113_v49 = vld [vmem:[%s10314_s3 + $0x240] ss:$16 sps:$4 sm:$0xff]   ;;  %v8116_v50 = vld [vmem:[%s10314_s3 + $0x248] ss:$16 sps:$4 sm:$0xff]  }
 0x2a9   : > { %v3470_v55 = vmax.f32 %v6902_v47, 0.0  ;;  %v3472_v56 = vmax.f32 %v6966_v48, 0.0 }
 0x2aa   : > { %v3471_v59 = vmax.f32 %v6903_v51, 0.0  ;;  %v3473_v60 = vmax.f32 %v6967_v52, 0.0 }
 0x2ab   : > { %v3594_v61 = vpack.c.bf16 %v3470_v55, %v3466_v53  ;;  %v9517_v62 = vpack.c.bf16 %v3472_v56, %v3468_v54  ;;  %v8121_v55 = vld [vmem:[%s10314_s3 + $0x264] ss:$16 sps:$4 sm:$0xff]   ;;  %v8124_v56 = vld [vmem:[%s10314_s3 + $0x26c] ss:$16 sps:$4 sm:$0xff]  }
 0x2ac   : > { %v3595_v63 = vpack.c.bf16 %v3471_v59, %v3467_v57  ;;  %v9519_v0 = vpack.c.bf16 %v3473_v60, %v3469_v58  ;;  %v2545_v1 = vpop.f32.mrb[4].mxu0  ;;  %v3317_v2 = vpop.f32.mrb[4].mxu1 }
 0x2ad   : > { %v6904_v5 = vadd.f32 %v2545_v1, %v9495_v33  ;;  %v6968_v6 = vadd.f32 %v3317_v2, %v9499_v34  ;;  %v2547_v7 = vpop.f32.mrb[5].mxu0  ;;  %v3319_v8 = vpop.f32.mrb[5].mxu1 }
 0x2ae   : > { %v6905_v12 = vadd.f32 %v2547_v7, %v9503_v35  ;;  %v6969_v13 = vadd.f32 %v3319_v8, %v9507_v36  ;;  %v2549_v14 = vpop.f32.mrb[6].mxu0  ;;  %v3321_v15 = vpop.f32.mrb[6].mxu1  ;;  %4480 = vmatprep.mubr.bf16.mxu0 %v3595_v63  ;;  %4866 = vmatprep.mubr.bf16.mxu1 %v3595_v63  ;;  %v8127_v7 = vld [vmem:[%s10314_s3 + $0x284] ss:$16 sps:$4 sm:$0xff]  }
 0x2af   : > { %v6906_v16 = vadd.f32 %v2549_v14, %v9495_v33  ;;  %v6970_v17 = vadd.f32 %v3321_v15, %v9499_v34  ;;  %v2551_v18 = vpop.f32.mrb[7].mxu0  ;;  %v3323_v19 = vpop.f32.mrb[7].mxu1  ;;  %4481 = vmatmul.mubr.bf16.vlgmr.msra.gmra.mrb[64].mxu0 %v3594_v61  ;;  %4867 = vmatmul.mubr.bf16.vlgmr.msra.gmra.mrb[64].mxu1 %v3594_v61  ;;  %v3474_v25 = vmax.f32 %v6904_v5, 0.0  ;;  %v3476_v26 = vmax.f32 %v6968_v6, 0.0  ;;  %v8119_v5 = vld [vmem:[%s10314_s3 + $0x260] ss:$16 sps:$4 sm:$0xff]  }
 0x2b0   : > { %v6907_v20 = vadd.f32 %v2551_v18, %v9503_v35  ;;  %v6971_v21 = vadd.f32 %v3323_v19, %v9507_v36  ;;  %4642 = vmatpush1.bf16.msra.mxu0 %v8101_v3  ;;  %5028 = vmatpush1.bf16.msra.mxu1 %v8104_v4  ;;  %v3475_v39 = vmax.f32 %v6905_v12, 0.0  ;;  %v3477_v40 = vmax.f32 %v6969_v13, 0.0  ;;  %v8122_v6 = vld [vmem:[%s10314_s3 + $0x268] ss:$16 sps:$4 sm:$0xff]   ;;  %v8130_v13 = vld [vmem:[%s10314_s3 + $0x28c] ss:$16 sps:$4 sm:$0xff]  }
 0x2b1   : > { %v3478_v30 = vmax.f32 %v6906_v16, 0.0  ;;  %v3480_v37 = vmax.f32 %v6970_v17, 0.0  ;;  %4643 = vmatprep.subr.bf16.mxu0 %v8109_v9  ;;  %5029 = vmatprep.subr.bf16.mxu1 %v8112_v11 }
 0x2b2   : > { %v3479_v41 = vmax.f32 %v6907_v20, 0.0  ;;  %v3481_v42 = vmax.f32 %v6971_v21, 0.0 }
 0x2b3   : > { %v3598_v43 = vpack.c.bf16 %v3478_v30, %v3474_v25  ;;  %v9553_v44 = vpack.c.bf16 %v3480_v37, %v3476_v26  ;;  %v8128_v25 = vld [vmem:[%s10314_s3 + $0x288] ss:$16 sps:$4 sm:$0xff]  }
 0x2b4   : > { %v3599_v45 = vpack.c.bf16 %v3479_v41, %v3475_v39  ;;  %v9555_v46 = vpack.c.bf16 %v3481_v42, %v3477_v40  ;;  %v2555_v47 = vpop.f32.mrb[8].mxu0  ;;  %v3327_v48 = vpop.f32.mrb[8].mxu1  ;;  %4644 = vmatpush1.bf16.msra.mxu0 %v8107_v22  ;;  %5030 = vmatpush1.bf16.msra.mxu1 %v8110_v23  ;;  %v8133_v39 = vld [vmem:[%s10314_s3 + $0x2a4] ss:$16 sps:$4 sm:$0xff]   ;;  %v8136_v40 = vld [vmem:[%s10314_s3 + $0x2ac] ss:$16 sps:$4 sm:$0xff]  }
 0x2b5   : > { %v6908_v51 = vadd.f32 %v2555_v47, %v9495_v33  ;;  %v6972_v52 = vadd.f32 %v3327_v48, %v9499_v34  ;;  %v2557_v53 = vpop.f32.mrb[9].mxu0  ;;  %v3329_v54 = vpop.f32.mrb[9].mxu1  ;;  %4645 = vmatprep.subr.bf16.mxu0 %v8115_v24  ;;  %5031 = vmatprep.subr.bf16.mxu1 %v8118_v38  ;;  %v8125_v24 = vld [vmem:[%s10314_s3 + $0x280] ss:$16 sps:$4 sm:$0xff]  }
 0x2b6   : > { %v6909_v57 = vadd.f32 %v2557_v53, %v9503_v35  ;;  %v6973_v58 = vadd.f32 %v3329_v54, %v9507_v36  ;;  %v2559_v59 = vpop.f32.mrb[10].mxu0  ;;  %v3331_v60 = vpop.f32.mrb[10].mxu1  ;;  %4490 = vmatprep.mubr.bf16.mxu0 %v3599_v45  ;;  %4876 = vmatprep.mubr.bf16.mxu1 %v3599_v45  ;;  %v8131_v53 = vld [vmem:[%s10314_s3 + $0x2a0] ss:$16 sps:$4 sm:$0xff]   ;;  %v8134_v54 = vld [vmem:[%s10314_s3 + $0x2a8] ss:$16 sps:$4 sm:$0xff]  }
 0x2b7   : > { %v6910_v61 = vadd.f32 %v2559_v59, %v9495_v33  ;;  %v6974_v63 = vadd.f32 %v3331_v60, %v9499_v34  ;;  %v2561_v1 = vpop.f32.mrb[11].mxu0  ;;  %v3333_v2 = vpop.f32.mrb[11].mxu1  ;;  %4491 = vmatmul.mubr.bf16.gmra.mrb[68].mxu0 %v3598_v43  ;;  %4877 = vmatmul.mubr.bf16.gmra.mrb[68].mxu1 %v3598_v43  ;;  %v3482_v8 = vmax.f32 %v6908_v51, 0.0  ;;  %v3484_v9 = vmax.f32 %v6972_v52, 0.0  ;;  %v8142_v60 = vld [vmem:[%s10314_s3 + $0x2cc] ss:$16 sps:$4 sm:$0xff]  }
 0x2b8   : > { %v6911_v3 = vadd.f32 %v2561_v1, %v9503_v35  ;;  %v6975_v4 = vadd.f32 %v3333_v2, %v9507_v36  ;;  %4646 = vmatpush1.bf16.msra.mxu0 %v8113_v49  ;;  %5032 = vmatpush1.bf16.msra.mxu1 %v8116_v50  ;;  %v3483_v14 = vmax.f32 %v6909_v57, 0.0  ;;  %v3485_v15 = vmax.f32 %v6973_v58, 0.0 }
 0x2b9   : > { %v3486_v11 = vmax.f32 %v6910_v61, 0.0  ;;  %v3488_v12 = vmax.f32 %v6974_v63, 0.0  ;;  %4647 = vmatprep.subr.bf16.mxu0 %v8121_v55  ;;  %5033 = vmatprep.subr.bf16.mxu1 %v8124_v56  ;;  %v8139_v55 = vld [vmem:[%s10314_s3 + $0x2c4] ss:$16 sps:$4 sm:$0xff]  }
 0x2ba   : > { %v3487_v16 = vmax.f32 %v6911_v3, 0.0  ;;  %v3489_v17 = vmax.f32 %v6975_v4, 0.0 }
 0x2bb   : > { %v3602_v18 = vpack.c.bf16 %v3486_v11, %v3482_v8  ;;  %v9589_v19 = vpack.c.bf16 %v3488_v12, %v3484_v9  ;;  %v8137_v9 = vld [vmem:[%s10314_s3 + $0x2c0] ss:$16 sps:$4 sm:$0xff]   ;;  %v8140_v11 = vld [vmem:[%s10314_s3 + $0x2c8] ss:$16 sps:$4 sm:$0xff]  }
 0x2bc   : > { %v3603_v20 = vpack.c.bf16 %v3487_v16, %v3483_v14  ;;  %v9591_v21 = vpack.c.bf16 %v3489_v17, %v3485_v15  ;;  %v2565_v22 = vpop.f32.mrb[12].mxu0  ;;  %v3337_v23 = vpop.f32.mrb[12].mxu1  ;;  %4648 = vmatpush1.bf16.msra.mxu0 %v8119_v5  ;;  %5034 = vmatpush1.bf16.msra.mxu1 %v8122_v6  ;;  %v8145_v16 = vld [vmem:[%s10314_s3 + $0x2e4] ss:$16 sps:$4 sm:$0xff]   ;;  %v8148_v17 = vld [vmem:[%s10314_s3 + $0x2ec] ss:$16 sps:$4 sm:$0xff]  }
 0x2bd   : > { %v6912_v26 = vadd.f32 %v2565_v22, %v9495_v33  ;;  %v6976_v30 = vadd.f32 %v3337_v23, %v9499_v34  ;;  %v2567_v37 = vpop.f32.mrb[13].mxu0  ;;  %v3339_v38 = vpop.f32.mrb[13].mxu1  ;;  %4649 = vmatprep.subr.bf16.mxu0 %v8127_v7  ;;  %5035 = vmatprep.subr.bf16.mxu1 %v8130_v13 }
 0x2be   : > { %v6913_v41 = vadd.f32 %v2567_v37, %v9503_v35  ;;  %v6977_v42 = vadd.f32 %v3339_v38, %v9507_v36  ;;  %v2569_v43 = vpop.f32.mrb[14].mxu0  ;;  %v3341_v45 = vpop.f32.mrb[14].mxu1  ;;  %4500 = vmatprep.mubr.bf16.mxu0 %v3603_v20  ;;  %4886 = vmatprep.mubr.bf16.mxu1 %v3603_v20 }
 0x2bf   : > { %v6914_v47 = vadd.f32 %v2569_v43, %v9495_v33  ;;  %v6978_v48 = vadd.f32 %v3341_v45, %v9499_v34  ;;  %v2571_v49 = vpop.f32.mrb[15].mxu0  ;;  %v3343_v50 = vpop.f32.mrb[15].mxu1  ;;  %4501 = vmatmul.mubr.bf16.gmra.mrb[72].mxu0 %v3602_v18  ;;  %4887 = vmatmul.mubr.bf16.gmra.mrb[72].mxu1 %v3602_v18  ;;  %v3490_v56 = vmax.f32 %v6912_v26, 0.0  ;;  %v3492_v57 = vmax.f32 %v6976_v30, 0.0 }
 0x2c0   : > { %v6915_v51 = vadd.f32 %v2571_v49, %v9503_v35  ;;  %v6979_v52 = vadd.f32 %v3343_v50, %v9507_v36  ;;  %4650 = vmatpush1.bf16.msra.mxu0 %v8125_v24  ;;  %5036 = vmatpush1.bf16.msra.mxu1 %v8128_v25  ;;  %v3491_v61 = vmax.f32 %v6913_v41, 0.0  ;;  %v3493_v63 = vmax.f32 %v6977_v42, 0.0  ;;  %v8151_v41 = vld [vmem:[%s10314_s3 + $0x304] ss:$16 sps:$4 sm:$0xff]  }
 0x2c1   : > { %v3494_v58 = vmax.f32 %v6914_v47, 0.0  ;;  %v3496_v59 = vmax.f32 %v6978_v48, 0.0  ;;  %4651 = vmatprep.subr.bf16.mxu0 %v8133_v39  ;;  %5037 = vmatprep.subr.bf16.mxu1 %v8136_v40  ;;  %v8143_v39 = vld [vmem:[%s10314_s3 + $0x2e0] ss:$16 sps:$4 sm:$0xff]   ;;  %v8146_v40 = vld [vmem:[%s10314_s3 + $0x2e8] ss:$16 sps:$4 sm:$0xff]  }
 0x2c2   : > { %v3495_v1 = vmax.f32 %v6915_v51, 0.0  ;;  %v3497_v2 = vmax.f32 %v6979_v52, 0.0  ;;  %v8154_v48 = vld [vmem:[%s10314_s3 + $0x30c] ss:$16 sps:$4 sm:$0xff]  }
 0x2c3   : > { %v3606_v3 = vpack.c.bf16 %v3494_v58, %v3490_v56  ;;  %v9625_v4 = vpack.c.bf16 %v3496_v59, %v3492_v57  ;;  %v8149_v59 = vld [vmem:[%s10314_s3 + $0x300] ss:$16 sps:$4 sm:$0xff]  }
 0x2c4   : > { %v3607_v5 = vpack.c.bf16 %v3495_v1, %v3491_v61  ;;  %v9627_v6 = vpack.c.bf16 %v3497_v2, %v3493_v63  ;;  %v2575_v7 = vpop.f32.mrb[16].mxu0  ;;  %v3347_v8 = vpop.f32.mrb[16].mxu1  ;;  %4652 = vmatpush1.bf16.msra.mxu0 %v8131_v53  ;;  %5038 = vmatpush1.bf16.msra.mxu1 %v8134_v54 }
 0x2c5   : > { %v6916_v12 = vadd.f32 %v2575_v7, %v9495_v33  ;;  %v6980_v13 = vadd.f32 %v3347_v8, %v9499_v34  ;;  %v2577_v14 = vpop.f32.mrb[17].mxu0  ;;  %v3349_v15 = vpop.f32.mrb[17].mxu1  ;;  %4653 = vmatprep.subr.bf16.mxu0 %v8139_v55  ;;  %5039 = vmatprep.subr.bf16.mxu1 %v8142_v60  ;;  %v8152_v60 = vld [vmem:[%s10314_s3 + $0x308] ss:$16 sps:$4 sm:$0xff]  }
 0x2c6   : > { %v6917_v18 = vadd.f32 %v2577_v14, %v9503_v35  ;;  %v6981_v20 = vadd.f32 %v3349_v15, %v9507_v36  ;;  %v2579_v22 = vpop.f32.mrb[18].mxu0  ;;  %v3351_v23 = vpop.f32.mrb[18].mxu1  ;;  %4510 = vmatprep.mubr.bf16.mxu0 %v3607_v5  ;;  %4896 = vmatprep.mubr.bf16.mxu1 %v3607_v5  ;;  %v8160_v5 = vld [vmem:[%s10314_s3 + $0x32c] ss:$16 sps:$4 sm:$0xff]  }
 0x2c7   : > { %v6918_v24 = vadd.f32 %v2579_v22, %v9495_v33  ;;  %v6982_v25 = vadd.f32 %v3351_v23, %v9499_v34  ;;  %v2581_v26 = vpop.f32.mrb[19].mxu0  ;;  %v3353_v30 = vpop.f32.mrb[19].mxu1  ;;  %4511 = vmatmul.mubr.bf16.gmra.mrb[76].mxu0 %v3606_v3  ;;  %4897 = vmatmul.mubr.bf16.gmra.mrb[76].mxu1 %v3606_v3  ;;  %v3498_v42 = vmax.f32 %v6916_v12, 0.0  ;;  %v3500_v43 = vmax.f32 %v6980_v13, 0.0  ;;  %v8157_v3 = vld [vmem:[%s10314_s3 + $0x324] ss:$16 sps:$4 sm:$0xff]  }
 0x2c8   : > { %v6919_v37 = vadd.f32 %v2581_v26, %v9503_v35  ;;  %v6983_v38 = vadd.f32 %v3353_v30, %v9507_v36  ;;  %4654 = vmatpush1.bf16.msra.mxu0 %v8137_v9  ;;  %5040 = vmatpush1.bf16.msra.mxu1 %v8140_v11  ;;  %v3499_v49 = vmax.f32 %v6917_v18, 0.0  ;;  %v3501_v50 = vmax.f32 %v6981_v20, 0.0  ;;  %v8155_v18 = vld [vmem:[%s10314_s3 + $0x320] ss:$16 sps:$4 sm:$0xff]   ;;  %v8158_v20 = vld [vmem:[%s10314_s3 + $0x328] ss:$16 sps:$4 sm:$0xff]  }
 0x2c9   : > { %v3502_v45 = vmax.f32 %v6918_v24, 0.0  ;;  %v3504_v47 = vmax.f32 %v6982_v25, 0.0  ;;  %4655 = vmatprep.subr.bf16.mxu0 %v8145_v16  ;;  %5041 = vmatprep.subr.bf16.mxu1 %v8148_v17  ;;  %v8163_v22 = vld [vmem:[%s10314_s3 + $0x344] ss:$16 sps:$4 sm:$0xff]   ;;  %v8166_v30 = vld [vmem:[%s10314_s3 + $0x34c] ss:$16 sps:$4 sm:$0xff]  }
 0x2ca   : > { %v3503_v51 = vmax.f32 %v6919_v37, 0.0  ;;  %v3505_v52 = vmax.f32 %v6983_v38, 0.0 }
 0x2cb   : > { %v3610_v53 = vpack.c.bf16 %v3502_v45, %v3498_v42  ;;  %v9661_v54 = vpack.c.bf16 %v3504_v47, %v3500_v43 }
 0x2cc   : > { %v3611_v55 = vpack.c.bf16 %v3503_v51, %v3499_v49  ;;  %v9663_v56 = vpack.c.bf16 %v3505_v52, %v3501_v50  ;;  %v2585_v57 = vpop.f32.mrb[20].mxu0  ;;  %v3357_v58 = vpop.f32.mrb[20].mxu1  ;;  %4656 = vmatpush1.bf16.msra.mxu0 %v8143_v39  ;;  %5042 = vmatpush1.bf16.msra.mxu1 %v8146_v40  ;;  %v8161_v49 = vld [vmem:[%s10314_s3 + $0x340] ss:$16 sps:$4 sm:$0xff]   ;;  %v8164_v50 = vld [vmem:[%s10314_s3 + $0x348] ss:$16 sps:$4 sm:$0xff]  }
 0x2cd   : > { %v6920_v61 = vadd.f32 %v2585_v57, %v9495_v33  ;;  %v6984_v63 = vadd.f32 %v3357_v58, %v9499_v34  ;;  %v2587_v1 = vpop.f32.mrb[21].mxu0  ;;  %v3359_v2 = vpop.f32.mrb[21].mxu1  ;;  %4657 = vmatprep.subr.bf16.mxu0 %v8151_v41  ;;  %5043 = vmatprep.subr.bf16.mxu1 %v8154_v48  ;;  %v8169_v57 = vld [vmem:[%s10314_s3 + $0x364] ss:$16 sps:$4 sm:$0xff]   ;;  %v8172_v58 = vld [vmem:[%s10314_s3 + $0x36c] ss:$16 sps:$4 sm:$0xff]  }
 0x2ce   : > { %v6921_v7 = vadd.f32 %v2587_v1, %v9503_v35  ;;  %v6985_v8 = vadd.f32 %v3359_v2, %v9507_v36  ;;  %v2589_v9 = vpop.f32.mrb[22].mxu0  ;;  %v3361_v11 = vpop.f32.mrb[22].mxu1  ;;  %4520 = vmatprep.mubr.bf16.mxu0 %v3611_v55  ;;  %4906 = vmatprep.mubr.bf16.mxu1 %v3611_v55 }
 0x2cf   : > { %v6922_v12 = vadd.f32 %v2589_v9, %v9495_v33  ;;  %v6986_v13 = vadd.f32 %v3361_v11, %v9499_v34  ;;  %v2591_v14 = vpop.f32.mrb[23].mxu0  ;;  %v3363_v15 = vpop.f32.mrb[23].mxu1  ;;  %4521 = vmatmul.mubr.bf16.gmra.mrb[80].mxu0 %v3610_v53  ;;  %4907 = vmatmul.mubr.bf16.gmra.mrb[80].mxu1 %v3610_v53  ;;  %v3506_v23 = vmax.f32 %v6920_v61, 0.0  ;;  %v3508_v24 = vmax.f32 %v6984_v63, 0.0  ;;  %v8167_v9 = vld [vmem:[%s10314_s3 + $0x360] ss:$16 sps:$4 sm:$0xff]  }
 0x2d0   : > { %v6923_v16 = vadd.f32 %v2591_v14, %v9503_v35  ;;  %v6987_v17 = vadd.f32 %v3363_v15, %v9507_v36  ;;  %4658 = vmatpush1.bf16.msra.mxu0 %v8149_v59  ;;  %5044 = vmatpush1.bf16.msra.mxu1 %v8152_v60  ;;  %v3507_v37 = vmax.f32 %v6921_v7, 0.0  ;;  %v3509_v38 = vmax.f32 %v6985_v8, 0.0  ;;  %v8170_v11 = vld [vmem:[%s10314_s3 + $0x368] ss:$16 sps:$4 sm:$0xff]  }
 0x2d1   : > { %v3510_v25 = vmax.f32 %v6922_v12, 0.0  ;;  %v3512_v26 = vmax.f32 %v6986_v13, 0.0  ;;  %4659 = vmatprep.subr.bf16.mxu0 %v8157_v3  ;;  %5045 = vmatprep.subr.bf16.mxu1 %v8160_v5  ;;  %v8175_v12 = vld [vmem:[%s10314_s3 + $0x384] ss:$16 sps:$4 sm:$0xff]  }
 0x2d2   : > { %v3511_v39 = vmax.f32 %v6923_v16, 0.0  ;;  %v3513_v40 = vmax.f32 %v6987_v17, 0.0  ;;  %v8178_v17 = vld [vmem:[%s10314_s3 + $0x38c] ss:$16 sps:$4 sm:$0xff]  }
 0x2d3   : > { %v3614_v41 = vpack.c.bf16 %v3510_v25, %v3506_v23  ;;  %v9697_v42 = vpack.c.bf16 %v3512_v26, %v3508_v24 }
 0x2d4   : > { %v3615_v43 = vpack.c.bf16 %v3511_v39, %v3507_v37  ;;  %v9699_v45 = vpack.c.bf16 %v3513_v40, %v3509_v38  ;;  %v2595_v47 = vpop.f32.mrb[24].mxu0  ;;  %v3367_v48 = vpop.f32.mrb[24].mxu1  ;;  %4660 = vmatpush1.bf16.msra.mxu0 %v8155_v18  ;;  %5046 = vmatpush1.bf16.msra.mxu1 %v8158_v20  ;;  %v8173_v39 = vld [vmem:[%s10314_s3 + $0x380] ss:$16 sps:$4 sm:$0xff]   ;;  %v8176_v40 = vld [vmem:[%s10314_s3 + $0x388] ss:$16 sps:$4 sm:$0xff]  }
 0x2d5   : > { %v6924_v51 = vadd.f32 %v2595_v47, %v9495_v33  ;;  %v6988_v52 = vadd.f32 %v3367_v48, %v9499_v34  ;;  %v2597_v53 = vpop.f32.mrb[25].mxu0  ;;  %v3369_v55 = vpop.f32.mrb[25].mxu1  ;;  %4661 = vmatprep.subr.bf16.mxu0 %v8163_v22  ;;  %5047 = vmatprep.subr.bf16.mxu1 %v8166_v30 }
 0x2d6   : > { %v6925_v59 = vadd.f32 %v2597_v53, %v9503_v35  ;;  %v6989_v60 = vadd.f32 %v3369_v55, %v9507_v36  ;;  %v2599_v61 = vpop.f32.mrb[26].mxu0  ;;  %v3371_v63 = vpop.f32.mrb[26].mxu1  ;;  %4530 = vmatprep.mubr.bf16.mxu0 %v3615_v43  ;;  %4916 = vmatprep.mubr.bf16.mxu1 %v3615_v43 }
 0x2d7   : > { %v6926_v1 = vadd.f32 %v2599_v61, %v9495_v33  ;;  %v6990_v2 = vadd.f32 %v3371_v63, %v9499_v34  ;;  %v2601_v3 = vpop.f32.mrb[27].mxu0  ;;  %v3373_v5 = vpop.f32.mrb[27].mxu1  ;;  %4531 = vmatmul.mubr.bf16.gmra.mrb[84].mxu0 %v3614_v41  ;;  %4917 = vmatmul.mubr.bf16.gmra.mrb[84].mxu1 %v3614_v41  ;;  %v3514_v13 = vmax.f32 %v6924_v51, 0.0  ;;  %v3516_v14 = vmax.f32 %v6988_v52, 0.0 }
 0x2d8   : > { %v6927_v7 = vadd.f32 %v2601_v3, %v9503_v35  ;;  %v6991_v8 = vadd.f32 %v3373_v5, %v9507_v36  ;;  %4662 = vmatpush1.bf16.msra.mxu0 %v8161_v49  ;;  %5048 = vmatpush1.bf16.msra.mxu1 %v8164_v50  ;;  %v3515_v18 = vmax.f32 %v6925_v59, 0.0  ;;  %v3517_v20 = vmax.f32 %v6989_v60, 0.0  ;;  %v8181_v49 = vld [vmem:[%s10314_s3 + $0x3a4] ss:$16 sps:$4 sm:$0xff]   ;;  %v8184_v50 = vld [vmem:[%s10314_s3 + $0x3ac] ss:$16 sps:$4 sm:$0xff]  }
 0x2d9   : > { %v3518_v15 = vmax.f32 %v6926_v1, 0.0  ;;  %v3520_v16 = vmax.f32 %v6990_v2, 0.0  ;;  %4663 = vmatprep.subr.bf16.mxu0 %v8169_v57  ;;  %5049 = vmatprep.subr.bf16.mxu1 %v8172_v58  ;;  %v8179_v1 = vld [vmem:[%s10314_s3 + $0x3a0] ss:$16 sps:$4 sm:$0xff]   ;;  %v8182_v2 = vld [vmem:[%s10314_s3 + $0x3a8] ss:$16 sps:$4 sm:$0xff]  }
 0x2da   : > { %v3519_v22 = vmax.f32 %v6927_v7, 0.0  ;;  %v3521_v23 = vmax.f32 %v6991_v8, 0.0  ;;  %v8187_v3 = vld [vmem:[%s10314_s3 + $0x3c4] ss:$16 sps:$4 sm:$0xff]  }
 0x2db   : > { %v3618_v24 = vpack.c.bf16 %v3518_v15, %v3514_v13  ;;  %v9733_v25 = vpack.c.bf16 %v3520_v16, %v3516_v14 }
 0x2dc   : > { %v3619_v26 = vpack.c.bf16 %v3519_v22, %v3515_v18  ;;  %v9735_v30 = vpack.c.bf16 %v3521_v23, %v3517_v20  ;;  %v2605_v37 = vpop.f32.mrb[28].mxu0  ;;  %v3377_v38 = vpop.f32.mrb[28].mxu1  ;;  %4664 = vmatpush1.bf16.msra.mxu0 %v8167_v9  ;;  %5050 = vmatpush1.bf16.msra.mxu1 %v8170_v11  ;;  %v8190_v11 = vld [vmem:[%s10314_s3 + $0x3cc] ss:$16 sps:$4 sm:$0xff]  }
 0x2dd   : > { %v6928_v41 = vadd.f32 %v2605_v37, %v9495_v33  ;;  %v6992_v43 = vadd.f32 %v3377_v38, %v9499_v34  ;;  %v2607_v47 = vpop.f32.mrb[29].mxu0  ;;  %v3379_v48 = vpop.f32.mrb[29].mxu1  ;;  %4665 = vmatprep.subr.bf16.mxu0 %v8175_v12  ;;  %5051 = vmatprep.subr.bf16.mxu1 %v8178_v17 }
 0x2de   : > { %v6929_v51 = vadd.f32 %v2607_v47, %v9503_v35  ;;  %v6993_v52 = vadd.f32 %v3379_v48, %v9507_v36  ;;  %v2609_v53 = vpop.f32.mrb[30].mxu0  ;;  %v3381_v55 = vpop.f32.mrb[30].mxu1  ;;  %4540 = vmatprep.mubr.bf16.mxu0 %v3619_v26  ;;  %4926 = vmatprep.mubr.bf16.mxu1 %v3619_v26  ;;  %v8188_v26 = vld [vmem:[%s10314_s3 + $0x3c8] ss:$16 sps:$4 sm:$0xff]  }
 0x2df   : > { %v6930_v57 = vadd.f32 %v2609_v53, %v9495_v33  ;;  %v6994_v58 = vadd.f32 %v3381_v55, %v9499_v34  ;;  %v2611_v59 = vpop.f32.mrb[31].mxu0  ;;  %v3383_v60 = vpop.f32.mrb[31].mxu1  ;;  %4541 = vmatmul.mubr.bf16.gmra.mrb[88].mxu0 %v3618_v24  ;;  %4927 = vmatmul.mubr.bf16.gmra.mrb[88].mxu1 %v3618_v24  ;;  %v3522_v5 = vmax.f32 %v6928_v41, 0.0  ;;  %v3524_v7 = vmax.f32 %v6992_v43, 0.0  ;;  %v8185_v24 = vld [vmem:[%s10314_s3 + $0x3c0] ss:$16 sps:$4 sm:$0xff]  }
 0x2e0   : > { %v6931_v61 = vadd.f32 %v2611_v59, %v9503_v35  ;;  %v6995_v63 = vadd.f32 %v3383_v60, %v9507_v36  ;;  %4666 = vmatpush1.bf16.msra.mxu0 %v8173_v39  ;;  %5052 = vmatpush1.bf16.msra.mxu1 %v8176_v40  ;;  %v3523_v12 = vmax.f32 %v6929_v51, 0.0  ;;  %v3525_v13 = vmax.f32 %v6993_v52, 0.0  ;;  %v8193_v41 = vld [vmem:[%s10314_s3 + $0x3e4] ss:$16 sps:$4 sm:$0xff]   ;;  %v8196_v43 = vld [vmem:[%s10314_s3 + $0x3ec] ss:$16 sps:$4 sm:$0xff]  }
 0x2e1   : > { %v3526_v8 = vmax.f32 %v6930_v57, 0.0  ;;  %v3528_v9 = vmax.f32 %v6994_v58, 0.0  ;;  %4667 = vmatprep.subr.bf16.mxu0 %v8181_v49  ;;  %5053 = vmatprep.subr.bf16.mxu1 %v8184_v50  ;;  %v8191_v59 = vld [vmem:[%s10314_s3 + $0x3e0] ss:$16 sps:$4 sm:$0xff]   ;;  %v8194_v60 = vld [vmem:[%s10314_s3 + $0x3e8] ss:$16 sps:$4 sm:$0xff]  }
 0x2e2   : > { %v3527_v14 = vmax.f32 %v6931_v61, 0.0  ;;  %v3529_v15 = vmax.f32 %v6995_v63, 0.0 }
 0x2e3   : > { %v3622_v16 = vpack.c.bf16 %v3526_v8, %v3522_v5  ;;  %v9769_v17 = vpack.c.bf16 %v3528_v9, %v3524_v7 }
 0x2e4   : > { %v3623_v18 = vpack.c.bf16 %v3527_v14, %v3523_v12  ;;  %v9771_v20 = vpack.c.bf16 %v3529_v15, %v3525_v13  ;;  %v2615_v22 = vpop.f32.mrb[32].mxu0  ;;  %v3387_v23 = vpop.f32.mrb[32].mxu1  ;;  %4668 = vmatpush1.bf16.msra.mxu0 %v8179_v1  ;;  %5054 = vmatpush1.bf16.msra.mxu1 %v8182_v2 }
 0x2e5   : > { %v6932_v37 = vadd.f32 %v2615_v22, %v9495_v33  ;;  %v6996_v38 = vadd.f32 %v3387_v23, %v9499_v34  ;;  %v2617_v39 = vpop.f32.mrb[33].mxu0  ;;  %v3389_v40 = vpop.f32.mrb[33].mxu1  ;;  %4669 = vmatprep.subr.bf16.mxu0 %v8187_v3  ;;  %5055 = vmatprep.subr.bf16.mxu1 %v8190_v11 }
 0x2e6   : > { %v6933_v47 = vadd.f32 %v2617_v39, %v9503_v35  ;;  %v6997_v48 = vadd.f32 %v3389_v40, %v9507_v36  ;;  %v2619_v49 = vpop.f32.mrb[34].mxu0  ;;  %v3391_v50 = vpop.f32.mrb[34].mxu1  ;;  %4550 = vmatprep.mubr.bf16.mxu0 %v3623_v18  ;;  %4936 = vmatprep.mubr.bf16.mxu1 %v3623_v18 }
 0x2e7   : > { %v6934_v51 = vadd.f32 %v2619_v49, %v9495_v33  ;;  %v6998_v52 = vadd.f32 %v3391_v50, %v9499_v34  ;;  %v2621_v53 = vpop.f32.mrb[35].mxu0  ;;  %v3393_v55 = vpop.f32.mrb[35].mxu1  ;;  %4551 = vmatmul.mubr.bf16.gmra.mrb[92].mxu0 %v3622_v16  ;;  %4937 = vmatmul.mubr.bf16.gmra.mrb[92].mxu1 %v3622_v16  ;;  %v3530_v61 = vmax.f32 %v6932_v37, 0.0  ;;  %v3532_v63 = vmax.f32 %v6996_v38, 0.0 }
 0x2e8   : > { %v6935_v57 = vadd.f32 %v2621_v53, %v9503_v35  ;;  %v6999_v58 = vadd.f32 %v3393_v55, %v9507_v36  ;;  %4670 = vmatpush1.bf16.msra.mxu0 %v8185_v24  ;;  %5056 = vmatpush1.bf16.msra.mxu1 %v8188_v26  ;;  %v3531_v3 = vmax.f32 %v6933_v47, 0.0  ;;  %v3533_v5 = vmax.f32 %v6997_v48, 0.0 }
 0x2e9   : > { %v3534_v1 = vmax.f32 %v6934_v51, 0.0  ;;  %v3536_v2 = vmax.f32 %v6998_v52, 0.0  ;;  %4671 = vmatprep.subr.bf16.mxu0 %v8193_v41  ;;  %5057 = vmatprep.subr.bf16.mxu1 %v8196_v43 }
 0x2ea   : > { %v3535_v7 = vmax.f32 %v6935_v57, 0.0  ;;  %v3537_v8 = vmax.f32 %v6999_v58, 0.0 }
 0x2eb   : > { %v3626_v9 = vpack.c.bf16 %v3534_v1, %v3530_v61  ;;  %v9799_v11 = vpack.c.bf16 %v3536_v2, %v3532_v63 }
 0x2ec   : > { %v3627_v12 = vpack.c.bf16 %v3535_v7, %v3531_v3  ;;  %v9801_v13 = vpack.c.bf16 %v3537_v8, %v3533_v5  ;;  %v2625_v14 = vpop.f32.mrb[36].mxu0  ;;  %v3397_v15 = vpop.f32.mrb[36].mxu1  ;;  %4672 = vmatpush1.bf16.msra.mxu0 %v8191_v59  ;;  %5058 = vmatpush1.bf16.msra.mxu1 %v8194_v60 }
 0x2ed   : > { %v6936_v16 = vadd.f32 %v2625_v14, %v9495_v33  ;;  %v7000_v18 = vadd.f32 %v3397_v15, %v9499_v34  ;;  %v2627_v22 = vpop.f32.mrb[37].mxu0  ;;  %v3399_v23 = vpop.f32.mrb[37].mxu1 }
 0x2ee   : > { %v6937_v24 = vadd.f32 %v2627_v22, %v9503_v35  ;;  %v7001_v26 = vadd.f32 %v3399_v23, %v9507_v36  ;;  %v2629_v37 = vpop.f32.mrb[38].mxu0  ;;  %v3401_v38 = vpop.f32.mrb[38].mxu1  ;;  %4560 = vmatprep.mubr.bf16.mxu0 %v3627_v12  ;;  %4946 = vmatprep.mubr.bf16.mxu1 %v3627_v12 }
 0x2ef   : > { %v6938_v39 = vadd.f32 %v2629_v37, %v9495_v33  ;;  %v7002_v40 = vadd.f32 %v3401_v38, %v9499_v34  ;;  %v2631_v41 = vpop.f32.mrb[39].mxu0  ;;  %v3403_v43 = vpop.f32.mrb[39].mxu1  ;;  %4561 = vmatmul.mubr.bf16.gmra.mrb[96].mxu0 %v3626_v9  ;;  %4947 = vmatmul.mubr.bf16.gmra.mrb[96].mxu1 %v3626_v9  ;;  %v3538_v49 = vmax.f32 %v6936_v16, 0.0  ;;  %v3540_v50 = vmax.f32 %v7000_v18, 0.0 }
 0x2f0   : > { %v6939_v47 = vadd.f32 %v2631_v41, %v9503_v35  ;;  %v7003_v48 = vadd.f32 %v3403_v43, %v9507_v36  ;;  %v3539_v53 = vmax.f32 %v6937_v24, 0.0  ;;  %v3541_v55 = vmax.f32 %v7001_v26, 0.0 }
 0x2f1   : > { %v3542_v51 = vmax.f32 %v6938_v39, 0.0  ;;  %v3544_v52 = vmax.f32 %v7002_v40, 0.0 }
 0x2f2   : > { %v3543_v57 = vmax.f32 %v6939_v47, 0.0  ;;  %v3545_v58 = vmax.f32 %v7003_v48, 0.0 }
 0x2f3   : > { %v3630_v59 = vpack.c.bf16 %v3542_v51, %v3538_v49  ;;  %v9811_v60 = vpack.c.bf16 %v3544_v52, %v3540_v50 }
 0x2f4   : > { %v3631_v61 = vpack.c.bf16 %v3543_v57, %v3539_v53  ;;  %v9813_v63 = vpack.c.bf16 %v3545_v58, %v3541_v55  ;;  %v2635_v1 = vpop.f32.mrb[40].mxu0  ;;  %v3407_v2 = vpop.f32.mrb[40].mxu1 }
 0x2f5   : > { %v6940_v3 = vadd.f32 %v2635_v1, %v9495_v33  ;;  %v7004_v5 = vadd.f32 %v3407_v2, %v9499_v34  ;;  %v2637_v7 = vpop.f32.mrb[41].mxu0  ;;  %v3409_v8 = vpop.f32.mrb[41].mxu1 }
 0x2f6   : > { %v6941_v9 = vadd.f32 %v2637_v7, %v9503_v35  ;;  %v7005_v12 = vadd.f32 %v3409_v8, %v9507_v36  ;;  %v2639_v14 = vpop.f32.mrb[42].mxu0  ;;  %v3411_v15 = vpop.f32.mrb[42].mxu1  ;;  %4570 = vmatprep.mubr.bf16.mxu0 %v3631_v61  ;;  %4956 = vmatprep.mubr.bf16.mxu1 %v3631_v61 }
 0x2f7   : > { %v6942_v16 = vadd.f32 %v2639_v14, %v9495_v33  ;;  %v7006_v18 = vadd.f32 %v3411_v15, %v9499_v34  ;;  %v2641_v22 = vpop.f32.mrb[43].mxu0  ;;  %v3413_v23 = vpop.f32.mrb[43].mxu1  ;;  %4571 = vmatmul.mubr.bf16.gmra.mrb[100].mxu0 %v3630_v59  ;;  %4957 = vmatmul.mubr.bf16.gmra.mrb[100].mxu1 %v3630_v59  ;;  %v3546_v37 = vmax.f32 %v6940_v3, 0.0  ;;  %v3548_v38 = vmax.f32 %v7004_v5, 0.0 }
 0x2f8   : > { %v6943_v24 = vadd.f32 %v2641_v22, %v9503_v35  ;;  %v7007_v26 = vadd.f32 %v3413_v23, %v9507_v36  ;;  %v3547_v41 = vmax.f32 %v6941_v9, 0.0  ;;  %v3549_v43 = vmax.f32 %v7005_v12, 0.0 }
 0x2f9   : > { %v3550_v39 = vmax.f32 %v6942_v16, 0.0  ;;  %v3552_v40 = vmax.f32 %v7006_v18, 0.0 }
 0x2fa   : > { %v3551_v47 = vmax.f32 %v6943_v24, 0.0  ;;  %v3553_v48 = vmax.f32 %v7007_v26, 0.0 }
 0x2fb   : > { %v3634_v49 = vpack.c.bf16 %v3550_v39, %v3546_v37  ;;  %v9823_v50 = vpack.c.bf16 %v3552_v40, %v3548_v38 }
 0x2fc   : > { %v3635_v51 = vpack.c.bf16 %v3551_v47, %v3547_v41  ;;  %v9825_v52 = vpack.c.bf16 %v3553_v48, %v3549_v43  ;;  %v2645_v53 = vpop.f32.mrb[44].mxu0  ;;  %v3417_v55 = vpop.f32.mrb[44].mxu1 }
 0x2fd   : > { %v6944_v57 = vadd.f32 %v2645_v53, %v9495_v33  ;;  %v7008_v58 = vadd.f32 %v3417_v55, %v9499_v34  ;;  %v2647_v59 = vpop.f32.mrb[45].mxu0  ;;  %v3419_v61 = vpop.f32.mrb[45].mxu1 }
 0x2fe   : > { %v6945_v1 = vadd.f32 %v2647_v59, %v9503_v35  ;;  %v7009_v2 = vadd.f32 %v3419_v61, %v9507_v36  ;;  %v2649_v3 = vpop.f32.mrb[46].mxu0  ;;  %v3421_v5 = vpop.f32.mrb[46].mxu1  ;;  %4580 = vmatprep.mubr.bf16.mxu0 %v3635_v51  ;;  %4966 = vmatprep.mubr.bf16.mxu1 %v3635_v51 }
 0x2ff   : > { %v6946_v7 = vadd.f32 %v2649_v3, %v9495_v33  ;;  %v7010_v8 = vadd.f32 %v3421_v5, %v9499_v34  ;;  %v2651_v9 = vpop.f32.mrb[47].mxu0  ;;  %v3423_v12 = vpop.f32.mrb[47].mxu1  ;;  %4581 = vmatmul.mubr.bf16.gmra.mrb[104].mxu0 %v3634_v49  ;;  %4967 = vmatmul.mubr.bf16.gmra.mrb[104].mxu1 %v3634_v49  ;;  %v3554_v16 = vmax.f32 %v6944_v57, 0.0  ;;  %v3556_v18 = vmax.f32 %v7008_v58, 0.0 }
 0x300   : > { %v6947_v14 = vadd.f32 %v2651_v9, %v9503_v35  ;;  %v7011_v15 = vadd.f32 %v3423_v12, %v9507_v36  ;;  %v3555_v24 = vmax.f32 %v6945_v1, 0.0  ;;  %v3557_v26 = vmax.f32 %v7009_v2, 0.0 }
 0x301   : > { %v3558_v22 = vmax.f32 %v6946_v7, 0.0  ;;  %v3560_v23 = vmax.f32 %v7010_v8, 0.0 }
 0x302   : > { %v3559_v37 = vmax.f32 %v6947_v14, 0.0  ;;  %v3561_v38 = vmax.f32 %v7011_v15, 0.0 }
 0x303   : > { %v3638_v39 = vpack.c.bf16 %v3558_v22, %v3554_v16  ;;  %v9835_v40 = vpack.c.bf16 %v3560_v23, %v3556_v18 }
 0x304   : > { %v3639_v41 = vpack.c.bf16 %v3559_v37, %v3555_v24  ;;  %v9837_v43 = vpack.c.bf16 %v3561_v38, %v3557_v26  ;;  %v2655_v47 = vpop.f32.mrb[48].mxu0  ;;  %v3427_v48 = vpop.f32.mrb[48].mxu1 }
 0x305   : > { %v6948_v49 = vadd.f32 %v2655_v47, %v9495_v33  ;;  %v7012_v51 = vadd.f32 %v3427_v48, %v9499_v34  ;;  %v2657_v53 = vpop.f32.mrb[49].mxu0  ;;  %v3429_v55 = vpop.f32.mrb[49].mxu1 }
 0x306   : > { %v6949_v57 = vadd.f32 %v2657_v53, %v9503_v35  ;;  %v7013_v58 = vadd.f32 %v3429_v55, %v9507_v36  ;;  %v2659_v59 = vpop.f32.mrb[50].mxu0  ;;  %v3431_v61 = vpop.f32.mrb[50].mxu1  ;;  %4590 = vmatprep.mubr.bf16.mxu0 %v3639_v41  ;;  %4976 = vmatprep.mubr.bf16.mxu1 %v3639_v41 }
 0x307   : > { %v6950_v1 = vadd.f32 %v2659_v59, %v9495_v33  ;;  %v7014_v2 = vadd.f32 %v3431_v61, %v9499_v34  ;;  %v2661_v3 = vpop.f32.mrb[51].mxu0  ;;  %v3433_v5 = vpop.f32.mrb[51].mxu1  ;;  %4591 = vmatmul.mubr.bf16.gmra.mrb[108].mxu0 %v3638_v39  ;;  %4977 = vmatmul.mubr.bf16.gmra.mrb[108].mxu1 %v3638_v39  ;;  %v3562_v9 = vmax.f32 %v6948_v49, 0.0  ;;  %v3564_v12 = vmax.f32 %v7012_v51, 0.0 }
 0x308   : > { %v6951_v7 = vadd.f32 %v2661_v3, %v9503_v35  ;;  %v7015_v8 = vadd.f32 %v3433_v5, %v9507_v36  ;;  %v3563_v16 = vmax.f32 %v6949_v57, 0.0  ;;  %v3565_v18 = vmax.f32 %v7013_v58, 0.0 }
 0x309   : > { %v3566_v14 = vmax.f32 %v6950_v1, 0.0  ;;  %v3568_v15 = vmax.f32 %v7014_v2, 0.0 }
 0x30a   : > { %v3567_v22 = vmax.f32 %v6951_v7, 0.0  ;;  %v3569_v23 = vmax.f32 %v7015_v8, 0.0 }
 0x30b   : > { %v3642_v24 = vpack.c.bf16 %v3566_v14, %v3562_v9  ;;  %v9847_v26 = vpack.c.bf16 %v3568_v15, %v3564_v12 }
 0x30c   : > { %v3643_v37 = vpack.c.bf16 %v3567_v22, %v3563_v16  ;;  %v9849_v38 = vpack.c.bf16 %v3569_v23, %v3565_v18  ;;  %v2665_v41 = vpop.f32.mrb[52].mxu0  ;;  %v3437_v39 = vpop.f32.mrb[52].mxu1 }
 0x30d   : > { %v6952_v47 = vadd.f32 %v2665_v41, %v9495_v33  ;;  %v7016_v48 = vadd.f32 %v3437_v39, %v9499_v34  ;;  %v2667_v49 = vpop.f32.mrb[53].mxu0  ;;  %v3439_v51 = vpop.f32.mrb[53].mxu1 }
 0x30e   : > { %v6953_v53 = vadd.f32 %v2667_v49, %v9503_v35  ;;  %v7017_v55 = vadd.f32 %v3439_v51, %v9507_v36  ;;  %v2669_v57 = vpop.f32.mrb[54].mxu0  ;;  %v3441_v58 = vpop.f32.mrb[54].mxu1  ;;  %4600 = vmatprep.mubr.bf16.mxu0 %v3643_v37  ;;  %4986 = vmatprep.mubr.bf16.mxu1 %v3643_v37 }
 0x30f   : > { %v6954_v59 = vadd.f32 %v2669_v57, %v9495_v33  ;;  %v7018_v61 = vadd.f32 %v3441_v58, %v9499_v34  ;;  %v2671_v1 = vpop.f32.mrb[55].mxu0  ;;  %v3443_v2 = vpop.f32.mrb[55].mxu1  ;;  %4601 = vmatmul.mubr.bf16.gmra.mrb[112].mxu0 %v3642_v24  ;;  %4987 = vmatmul.mubr.bf16.gmra.mrb[112].mxu1 %v3642_v24  ;;  %v3570_v7 = vmax.f32 %v6952_v47, 0.0  ;;  %v3572_v8 = vmax.f32 %v7016_v48, 0.0 }
 0x310   : > { %v6955_v3 = vadd.f32 %v2671_v1, %v9503_v35  ;;  %v7019_v5 = vadd.f32 %v3443_v2, %v9507_v36  ;;  %v3571_v14 = vmax.f32 %v6953_v53, 0.0  ;;  %v3573_v15 = vmax.f32 %v7017_v55, 0.0 }
 0x311   : > { %v3574_v9 = vmax.f32 %v6954_v59, 0.0  ;;  %v3576_v12 = vmax.f32 %v7018_v61, 0.0 }
 0x312   : > { %v3575_v16 = vmax.f32 %v6955_v3, 0.0  ;;  %v3577_v18 = vmax.f32 %v7019_v5, 0.0 }
 0x313   : > { %v3646_v22 = vpack.c.bf16 %v3574_v9, %v3570_v7  ;;  %v9859_v23 = vpack.c.bf16 %v3576_v12, %v3572_v8 }
 0x314   : > { %v3647_v37 = vpack.c.bf16 %v3575_v16, %v3571_v14  ;;  %v9861_v41 = vpack.c.bf16 %v3577_v18, %v3573_v15  ;;  %v2675_v39 = vpop.f32.mrb[56].mxu0  ;;  %v3447_v24 = vpop.f32.mrb[56].mxu1 }
 0x315   : > { %v6956_v49 = vadd.f32 %v2675_v39, %v9495_v33  ;;  %v7020_v51 = vadd.f32 %v3447_v24, %v9499_v34  ;;  %v2677_v47 = vpop.f32.mrb[57].mxu0  ;;  %v3449_v48 = vpop.f32.mrb[57].mxu1 }
 0x316   : > { %v6957_v57 = vadd.f32 %v2677_v47, %v9503_v35  ;;  %v7021_v53 = vadd.f32 %v3449_v48, %v9507_v36  ;;  %v2679_v55 = vpop.f32.mrb[58].mxu0  ;;  %v3451_v58 = vpop.f32.mrb[58].mxu1  ;;  %4610 = vmatprep.mubr.bf16.mxu0 %v3647_v37  ;;  %4996 = vmatprep.mubr.bf16.mxu1 %v3647_v37 }
 0x317   : > { %v6958_v59 = vadd.f32 %v2679_v55, %v9495_v33  ;;  %v7022_v61 = vadd.f32 %v3451_v58, %v9499_v34  ;;  %v2681_v1 = vpop.f32.mrb[59].mxu0  ;;  %v3453_v2 = vpop.f32.mrb[59].mxu1  ;;  %4611 = vmatmul.mubr.bf16.gmra.mrb[116].mxu0 %v3646_v22  ;;  %4997 = vmatmul.mubr.bf16.gmra.mrb[116].mxu1 %v3646_v22  ;;  %v3578_v7 = vmax.f32 %v6956_v49, 0.0  ;;  %v3580_v8 = vmax.f32 %v7020_v51, 0.0 }
 0x318   : > { %v6959_v3 = vadd.f32 %v2681_v1, %v9503_v35  ;;  %v7023_v5 = vadd.f32 %v3453_v2, %v9507_v36  ;;  %v3579_v14 = vmax.f32 %v6957_v57, 0.0  ;;  %v3581_v15 = vmax.f32 %v7021_v53, 0.0 }
 0x319   : > { %v3582_v9 = vmax.f32 %v6958_v59, 0.0  ;;  %v3584_v12 = vmax.f32 %v7022_v61, 0.0 }
 0x31a   : > { %v3583_v16 = vmax.f32 %v6959_v3, 0.0  ;;  %v3585_v18 = vmax.f32 %v7023_v5, 0.0 }
 0x31b   : > { %v3650_v37 = vpack.c.bf16 %v3582_v9, %v3578_v7  ;;  %v9871_v39 = vpack.c.bf16 %v3584_v12, %v3580_v8 }
 0x31c   : > { %v3651_v24 = vpack.c.bf16 %v3583_v16, %v3579_v14  ;;  %v9873_v47 = vpack.c.bf16 %v3585_v18, %v3581_v15  ;;  %v2685_v48 = vpop.f32.mrb[60].mxu0  ;;  %v3457_v22 = vpop.f32.mrb[60].mxu1 }
 0x31d   : > { %v6960_v55 = vadd.f32 %v2685_v48, %v9495_v33  ;;  %v7024_v58 = vadd.f32 %v3457_v22, %v9499_v34  ;;  %v2687_v49 = vpop.f32.mrb[61].mxu0  ;;  %v3459_v51 = vpop.f32.mrb[61].mxu1 }
 0x31e   : > { %v6961_v59 = vadd.f32 %v2687_v49, %v9503_v35  ;;  %v7025_v57 = vadd.f32 %v3459_v51, %v9507_v36  ;;  %v2689_v53 = vpop.f32.mrb[62].mxu0  ;;  %v3461_v61 = vpop.f32.mrb[62].mxu1  ;;  %4620 = vmatprep.mubr.bf16.mxu0 %v3651_v24  ;;  %5006 = vmatprep.mubr.bf16.mxu1 %v3651_v24  ;;  %v8203_v51 = vld [vmem:[%s10316_s5 + $0xc8] sm:$0xff]  }
 0x31f   : > { %v6962_v1 = vadd.f32 %v2689_v53, %v9495_v33  ;;  %v7026_v2 = vadd.f32 %v3461_v61, %v9499_v34  ;;  %v2691_v3 = vpop.f32.mrb[63].mxu0  ;;  %v3463_v5 = vpop.f32.mrb[63].mxu1  ;;  %4621 = vmatmul.mubr.bf16.gmra.mrb[120].mxu0 %v3650_v37  ;;  %5007 = vmatmul.mubr.bf16.gmra.mrb[120].mxu1 %v3650_v37  ;;  %v3586_v9 = vmax.f32 %v6960_v55, 0.0  ;;  %v3588_v12 = vmax.f32 %v7024_v58, 0.0  ;;  %v8198_v37 = vld [vmem:[%s10316_s5] sm:$0xff]   ;;  %v8201_v58 = vld [vmem:[%s10316_s5 + $0x48] sm:$0xff]  }
 0x320   : > { %v6963_v7 = vadd.f32 %v2691_v3, %v9503_v35  ;;  %v7027_v8 = vadd.f32 %v3463_v5, %v9507_v36  ;;  %v3587_v16 = vmax.f32 %v6961_v59, 0.0  ;;  %v3589_v18 = vmax.f32 %v7025_v57, 0.0  ;;  %v8197_v35 = vld [vmem:[%s10316_s5 + $0x40] sm:$0xff]   ;;  %v8204_v59 = vld [vmem:[%s10316_s5 + $0x88] sm:$0xff]   ;;  %v8206_v57 = vld [vmem:[%s10316_s5 + $0x10] sm:$0xff]  }
 0x321   : > { %v3590_v14 = vmax.f32 %v6962_v1, 0.0  ;;  %v3592_v15 = vmax.f32 %v7026_v2, 0.0  ;;  %v8199_v36 = vld [vmem:[%s10316_s5 + $0xc0] sm:$0xff]   ;;  %6610 = vmatprep.subr.bf16.mxu0 %v8197_v35  ;;  %v8208_v53 = vld [vmem:[%s10316_s5 + $0x90] sm:$0xff]   ;;  %v8209_v61 = vld [vmem:[%s10316_s5 + $0x58] sm:$0xff]  }
 0x322   : > { %v3591_v48 = vmax.f32 %v6963_v7, 0.0  ;;  %v3593_v24 = vmax.f32 %v7027_v8, 0.0  ;;  %6722 = vmatprep.subr.bf16.mxu1 %v8199_v36  ;;  %v8200_v55 = vld [vmem:[%s10316_s5 + $0x80] sm:$0xff]   ;;  %v8210_v1 = vld [vmem:[%s10316_s5 + $0xd8] sm:$0xff]   ;;  %v8217_v8 = vld [vmem:[%s10316_s5 + $0x68] sm:$0xff]  }
 0x323   : > { %v3654_v22 = vpack.c.bf16 %v3590_v14, %v3586_v9  ;;  %v9883_v33 = vpack.c.bf16 %v3592_v15, %v3588_v12  ;;  %v8211_v2 = vld [vmem:[%s10316_s5 + $0x18] sm:$0xff]   ;;  %v8215_v5 = vld [vmem:[%s10316_s5 + $0x20] sm:$0xff]   ;;  %v8218_v9 = vld [vmem:[%s10316_s5 + $0xe8] sm:$0xff]  }
 0x324   : > { %v3655_v34 = vpack.c.bf16 %v3591_v48, %v3587_v16  ;;  %v9885_v49 = vpack.c.bf16 %v3593_v24, %v3589_v18  ;;  %v8212_v3 = vld [vmem:[%s10316_s5 + $0x98] sm:$0xff]   ;;  %v8216_v7 = vld [vmem:[%s10316_s5 + $0xa0] sm:$0xff]  }
 0x326   : > { %4630 = vmatprep.mubr.bf16.mxu0 %v3655_v34  ;;  %5016 = vmatprep.mubr.bf16.mxu1 %v3655_v34 }
 0x327   : > { %4631 = vmatmul.mubr.bf16.gmra.mrb[124].mxu0 %v3654_v22  ;;  %5017 = vmatmul.mubr.bf16.gmra.mrb[124].mxu1 %v3654_v22 }
 0x328   : > { %4673 = vmatprep.mubr.bf16.mxu0 %v9519_v0  ;;  %5059 = vmatprep.mubr.bf16.mxu1 %v9519_v0  ;;  %v8202_v0 = vld [vmem:[%s10316_s5 + $0x8] sm:$0xff]  }
 0x32f   : > { %4674 = vmatmul.mubr.bf16.vlgmr.msra.gmra.mrb[64].mxu0 %v9517_v62  ;;  %5060 = vmatmul.mubr.bf16.vlgmr.msra.gmra.mrb[64].mxu1 %v9517_v62  ;;  %v8205_v62 = vld [vmem:[%s10316_s5 + $0x50] sm:$0xff]  }
 0x330   : > { %4683 = vmatprep.mubr.bf16.mxu0 %v9555_v46  ;;  %5069 = vmatprep.mubr.bf16.mxu1 %v9555_v46  ;;  %v8207_v46 = vld [vmem:[%s10316_s5 + $0xd0] sm:$0xff]  }
 0x331   : > { %6611 = vmatpush3.bf16.msra.mxu0 %v8198_v37  ;;  %6723 = vmatpush3.bf16.msra.mxu1 %v8200_v55 }
 0x332   : > { %6612 = vmatprep.subr.bf16.mxu0 %v8201_v58  ;;  %6724 = vmatprep.subr.bf16.mxu1 %v8203_v51 }
 0x335   : > { %6613 = vmatpush3.bf16.msra.mxu0 %v8202_v0  ;;  %6725 = vmatpush3.bf16.msra.mxu1 %v8204_v59 }
 0x336   : > { %6614 = vmatprep.subr.bf16.mxu0 %v8205_v62  ;;  %6726 = vmatprep.subr.bf16.mxu1 %v8207_v46 }
 0x337   : > { %4684 = vmatmul.mubr.bf16.gmra.mrb[68].mxu0 %v9553_v44  ;;  %5070 = vmatmul.mubr.bf16.gmra.mrb[68].mxu1 %v9553_v44  ;;  %v8213_v44 = vld [vmem:[%s10316_s5 + $0x60] sm:$0xff]  }
 0x338   : > { %4693 = vmatprep.mubr.bf16.mxu0 %v9591_v21  ;;  %5079 = vmatprep.mubr.bf16.mxu1 %v9591_v21  ;;  %v8214_v21 = vld [vmem:[%s10316_s5 + $0xe0] sm:$0xff]  }
 0x339   : > { %6615 = vmatpush3.bf16.msra.mxu0 %v8206_v57  ;;  %6727 = vmatpush3.bf16.msra.mxu1 %v8208_v53 }
 0x33a   : > { %6616 = vmatprep.subr.bf16.mxu0 %v8209_v61  ;;  %6728 = vmatprep.subr.bf16.mxu1 %v8210_v1 }
 0x33d   : > { %6617 = vmatpush3.bf16.msra.mxu0 %v8211_v2  ;;  %6729 = vmatpush3.bf16.msra.mxu1 %v8212_v3 }
 0x33e   : > { %6618 = vmatprep.subr.bf16.mxu0 %v8213_v44  ;;  %6730 = vmatprep.subr.bf16.mxu1 %v8214_v21 }
 0x33f   : > { %4694 = vmatmul.mubr.bf16.gmra.mrb[72].mxu0 %v9589_v19  ;;  %5080 = vmatmul.mubr.bf16.gmra.mrb[72].mxu1 %v9589_v19  ;;  %v8219_v19 = vld [vmem:[%s10316_s5 + $0x28] sm:$0xff]  }
 0x340   : > { %4703 = vmatprep.mubr.bf16.mxu0 %v9627_v6  ;;  %5089 = vmatprep.mubr.bf16.mxu1 %v9627_v6  ;;  %v8221_v6 = vld [vmem:[%s10316_s5 + $0x70] sm:$0xff]  }
 0x341   : > { %6619 = vmatpush3.bf16.msra.mxu0 %v8215_v5  ;;  %6731 = vmatpush3.bf16.msra.mxu1 %v8216_v7 }
 0x342   : > { %6620 = vmatprep.subr.bf16.mxu0 %v8217_v8  ;;  %6732 = vmatprep.subr.bf16.mxu1 %v8218_v9 }
 0x345   : > { %6621 = vmatpush3.bf16.msra.mxu0 %v8219_v19 }
 0x346   : > { %6622 = vmatprep.subr.bf16.mxu0 %v8221_v6 }
 0x347   : > { %4704 = vmatmul.mubr.bf16.gmra.mrb[76].mxu0 %v9625_v4  ;;  %5090 = vmatmul.mubr.bf16.gmra.mrb[76].mxu1 %v9625_v4  ;;  %v8220_v4 = vld [vmem:[%s10316_s5 + $0xa8] sm:$0xff]  }
 0x348   : > { %4713 = vmatprep.mubr.bf16.mxu0 %v9663_v56  ;;  %5099 = vmatprep.mubr.bf16.mxu1 %v9663_v56  ;;  %v8223_v56 = vld [vmem:[%s10316_s5 + $0x30] sm:$0xff]  }
 0x349   : > { %6733 = vmatpush3.bf16.msra.mxu1 %v8220_v4  ;;  %6623 = vmatpush3.bf16.msra.mxu0 %v8223_v56 }
 0x34f   : > { %4714 = vmatmul.mubr.bf16.gmra.mrb[80].mxu0 %v9661_v54  ;;  %5100 = vmatmul.mubr.bf16.gmra.mrb[80].mxu1 %v9661_v54  ;;  %v8222_v54 = vld [vmem:[%s10316_s5 + $0xf0] sm:$0xff]  }
 0x350   : > { %4723 = vmatprep.mubr.bf16.mxu0 %v9699_v45  ;;  %5109 = vmatprep.mubr.bf16.mxu1 %v9699_v45  ;;  %v8225_v45 = vld [vmem:[%s10316_s5 + $0x78] sm:$0xff]  }
 0x351   : > { %6734 = vmatprep.subr.bf16.mxu1 %v8222_v54  ;;  %6624 = vmatprep.subr.bf16.mxu0 %v8225_v45 }
 0x357   : > { %4724 = vmatmul.mubr.bf16.gmra.mrb[84].mxu0 %v9697_v42  ;;  %5110 = vmatmul.mubr.bf16.gmra.mrb[84].mxu1 %v9697_v42  ;;  %v8224_v42 = vld [vmem:[%s10316_s5 + $0xb0] sm:$0xff]  }
 0x358   : > { %4733 = vmatprep.mubr.bf16.mxu0 %v9735_v30  ;;  %5119 = vmatprep.mubr.bf16.mxu1 %v9735_v30  ;;  %v8227_v30 = vld [vmem:[%s10316_s5 + $0x38] sm:$0xff]  }
 0x359   : > { %6735 = vmatpush3.bf16.msra.mxu1 %v8224_v42  ;;  %6625 = vmatpush3.bf16.msra.mxu0 %v8227_v30 }
 0x35f   : > { %4734 = vmatmul.mubr.bf16.gmra.mrb[88].mxu0 %v9733_v25  ;;  %5120 = vmatmul.mubr.bf16.gmra.mrb[88].mxu1 %v9733_v25  ;;  %v8226_v25 = vld [vmem:[%s10316_s5 + $0xf8] sm:$0xff]  }
 0x360   : > { %4743 = vmatprep.mubr.bf16.mxu0 %v9771_v20  ;;  %5129 = vmatprep.mubr.bf16.mxu1 %v9771_v20  ;;  %v3786_v20 = vld [vmem:[%s10315_s4] sm:$0xf] }
 0x361   : > { %6736 = vmatprep.subr.bf16.mxu1 %v8226_v25 }
 0x367   : > { %4744 = vmatmul.mubr.bf16.gmra.mrb[92].mxu0 %v9769_v17  ;;  %5130 = vmatmul.mubr.bf16.gmra.mrb[92].mxu1 %v9769_v17  ;;  %v8228_v17 = vld [vmem:[%s10316_s5 + $0xb8] sm:$0xff]  }
 0x368   : > { %4753 = vmatprep.mubr.bf16.mxu0 %v9801_v13  ;;  %5139 = vmatprep.mubr.bf16.mxu1 %v9801_v13  ;;  %v10055_v13 = vrot.slane %v3786_v20, %v883_v29 }
 0x369   : > { %6737 = vmatpush3.bf16.msra.mxu1 %v8228_v17 }
 0x36f   : > { %4754 = vmatmul.mubr.bf16.gmra.mrb[96].mxu0 %v9799_v11  ;;  %5140 = vmatmul.mubr.bf16.gmra.mrb[96].mxu1 %v9799_v11  ;;  %v10051_v11 = vrot.slane %v3786_v20, %v9486_v28 }
 0x370   : > { %4763 = vmatprep.mubr.bf16.mxu0 %v9813_v63  ;;  %5149 = vmatprep.mubr.bf16.mxu1 %v9813_v63  ;;  %v10063_v63 = vrot.slane %v3786_v20, %v887_v32 }
 0x377   : > { %4764 = vmatmul.mubr.bf16.gmra.mrb[100].mxu0 %v9811_v60  ;;  %5150 = vmatmul.mubr.bf16.gmra.mrb[100].mxu1 %v9811_v60  ;;  %v10059_v60 = vrot.slane %v3786_v20, %v879_v31 }
 0x378   : > { %4773 = vmatprep.mubr.bf16.mxu0 %v9825_v52  ;;  %5159 = vmatprep.mubr.bf16.mxu1 %v9825_v52 }
 0x37f   : > { %4774 = vmatmul.mubr.bf16.gmra.mrb[104].mxu0 %v9823_v50  ;;  %5160 = vmatmul.mubr.bf16.gmra.mrb[104].mxu1 %v9823_v50 }
 0x380   : > { %4783 = vmatprep.mubr.bf16.mxu0 %v9837_v43  ;;  %5169 = vmatprep.mubr.bf16.mxu1 %v9837_v43 }
 0x387   : > { %4784 = vmatmul.mubr.bf16.gmra.mrb[108].mxu0 %v9835_v40  ;;  %5170 = vmatmul.mubr.bf16.gmra.mrb[108].mxu1 %v9835_v40 }
 0x388   : > { %4793 = vmatprep.mubr.bf16.mxu0 %v9849_v38  ;;  %5179 = vmatprep.mubr.bf16.mxu1 %v9849_v38 }
 0x38f   : > { %4794 = vmatmul.mubr.bf16.gmra.mrb[112].mxu0 %v9847_v26  ;;  %5180 = vmatmul.mubr.bf16.gmra.mrb[112].mxu1 %v9847_v26 }
 0x390   : > { %4803 = vmatprep.mubr.bf16.mxu0 %v9861_v41  ;;  %5189 = vmatprep.mubr.bf16.mxu1 %v9861_v41 }
 0x397   : > { %4804 = vmatmul.mubr.bf16.gmra.mrb[116].mxu0 %v9859_v23  ;;  %5190 = vmatmul.mubr.bf16.gmra.mrb[116].mxu1 %v9859_v23 }
 0x398   : > { %4813 = vmatprep.mubr.bf16.mxu0 %v9873_v47  ;;  %5199 = vmatprep.mubr.bf16.mxu1 %v9873_v47 }
 0x39f   : > { %4814 = vmatmul.mubr.bf16.gmra.mrb[120].mxu0 %v9871_v39  ;;  %5200 = vmatmul.mubr.bf16.gmra.mrb[120].mxu1 %v9871_v39 }
 0x3a0   : > { %4823 = vmatprep.mubr.bf16.mxu0 %v9885_v49  ;;  %5209 = vmatprep.mubr.bf16.mxu1 %v9885_v49 }
 0x3a7   : > { %4824 = vmatmul.mubr.bf16.gmra.mrb[124].mxu0 %v9883_v33  ;;  %5210 = vmatmul.mubr.bf16.gmra.mrb[124].mxu1 %v9883_v33 }
 0x402   : > { %v4675_v50 = vpop.f32.mrb[64].mxu0  ;;  %v5061_v52 = vpop.f32.mrb[64].mxu1 }
 0x403   : > { %v7028_v40 = vadd.f32 %v4675_v50, %v10051_v11  ;;  %v7092_v43 = vadd.f32 %v5061_v52, %v10055_v13  ;;  %v4677_v26 = vpop.f32.mrb[65].mxu0  ;;  %v5063_v38 = vpop.f32.mrb[65].mxu1 }
 0x404   : > { %v7029_v23 = vadd.f32 %v4677_v26, %v10059_v60  ;;  %v7093_v29 = vadd.f32 %v5063_v38, %v10063_v63  ;;  %v4679_v41 = vpop.f32.mrb[66].mxu0  ;;  %v5065_v39 = vpop.f32.mrb[66].mxu1 }
 0x405   : > { %v7030_v31 = vadd.f32 %v4679_v41, %v10051_v11  ;;  %v7094_v47 = vadd.f32 %v5065_v39, %v10055_v13  ;;  %v4681_v32 = vpop.f32.mrb[67].mxu0  ;;  %v5067_v12 = vpop.f32.mrb[67].mxu1  ;;  %v5220_v16 = vmax.f32 %v7028_v40, 0.0  ;;  %v5222_v18 = vmax.f32 %v7092_v43, 0.0 }
 0x406   : > { %v7031_v14 = vadd.f32 %v4681_v32, %v10059_v60  ;;  %v7095_v15 = vadd.f32 %v5067_v12, %v10063_v63  ;;  %v5221_v22 = vmax.f32 %v7029_v23, 0.0  ;;  %v5223_v33 = vmax.f32 %v7093_v29, 0.0 }
 0x407   : > { %v5224_v48 = vmax.f32 %v7030_v31, 0.0  ;;  %v5226_v24 = vmax.f32 %v7094_v47, 0.0 }
 0x408   : > { %v5225_v34 = vmax.f32 %v7031_v14, 0.0  ;;  %v5227_v49 = vmax.f32 %v7095_v15, 0.0 }
 0x409   : > { %v5348_v35 = vpack.c.bf16 %v5224_v48, %v5220_v16  ;;  %v5350_v36 = vpack.c.bf16 %v5226_v24, %v5222_v18 }
 0x40a   : > { %v5349_v37 = vpack.c.bf16 %v5225_v34, %v5221_v22  ;;  %v5351_v55 = vpack.c.bf16 %v5227_v49, %v5223_v33  ;;  %v4685_v58 = vpop.f32.mrb[68].mxu0  ;;  %v5071_v51 = vpop.f32.mrb[68].mxu1 }
 0x40b   : > { %v7032_v0 = vadd.f32 %v4685_v58, %v10051_v11  ;;  %v7096_v59 = vadd.f32 %v5071_v51, %v10055_v13  ;;  %v4687_v62 = vpop.f32.mrb[69].mxu0  ;;  %v5073_v46 = vpop.f32.mrb[69].mxu1 }
 0x40c   : > { %v7033_v57 = vadd.f32 %v4687_v62, %v10059_v60  ;;  %v7097_v53 = vadd.f32 %v5073_v46, %v10063_v63  ;;  %v4689_v61 = vpop.f32.mrb[70].mxu0  ;;  %v5075_v1 = vpop.f32.mrb[70].mxu1  ;;  %5707 = vmatprep.mubr.bf16.mxu0 %v5349_v37  ;;  %5868 = vmatprep.mubr.bf16.mxu1 %v5351_v55 }
 0x40d   : > { %v7034_v2 = vadd.f32 %v4689_v61, %v10051_v11  ;;  %v7098_v3 = vadd.f32 %v5075_v1, %v10055_v13  ;;  %v4691_v44 = vpop.f32.mrb[71].mxu0  ;;  %v5077_v21 = vpop.f32.mrb[71].mxu1  ;;  %5708 = vmatmul.mubr.bf16.vlgmr.msra.gmra.mrb[128].mxu0 %v5348_v35  ;;  %5869 = vmatmul.mubr.bf16.vlgmr.msra.gmra.mrb[128].mxu1 %v5350_v36  ;;  %v5228_v8 = vmax.f32 %v7032_v0, 0.0  ;;  %v5230_v9 = vmax.f32 %v7096_v59, 0.0 }
 0x40e   : > { %v7035_v5 = vadd.f32 %v4691_v44, %v10059_v60  ;;  %v7099_v7 = vadd.f32 %v5077_v21, %v10063_v63  ;;  %v5229_v6 = vmax.f32 %v7033_v57, 0.0  ;;  %v5231_v54 = vmax.f32 %v7097_v53, 0.0 }
 0x40f   : > { %v5232_v19 = vmax.f32 %v7034_v2, 0.0  ;;  %v5234_v4 = vmax.f32 %v7098_v3, 0.0 }
 0x410   : > { %v5233_v56 = vmax.f32 %v7035_v5, 0.0  ;;  %v5235_v42 = vmax.f32 %v7099_v7, 0.0 }
 0x411   : > { %v5352_v45 = vpack.c.bf16 %v5232_v19, %v5228_v8  ;;  %v5354_v25 = vpack.c.bf16 %v5234_v4, %v5230_v9 }
 0x412   : > { %v5353_v30 = vpack.c.bf16 %v5233_v56, %v5229_v6  ;;  %v5355_v17 = vpack.c.bf16 %v5235_v42, %v5231_v54  ;;  %v4695_v20 = vpop.f32.mrb[72].mxu0  ;;  %v5081_v50 = vpop.f32.mrb[72].mxu1 }
 0x413   : > { %v7036_v52 = vadd.f32 %v4695_v20, %v10051_v11  ;;  %v7100_v40 = vadd.f32 %v5081_v50, %v10055_v13  ;;  %v4697_v43 = vpop.f32.mrb[73].mxu0  ;;  %v5083_v26 = vpop.f32.mrb[73].mxu1 }
 0x414   : > { %v7037_v38 = vadd.f32 %v4697_v43, %v10059_v60  ;;  %v7101_v23 = vadd.f32 %v5083_v26, %v10063_v63  ;;  %v4699_v29 = vpop.f32.mrb[74].mxu0  ;;  %v5085_v41 = vpop.f32.mrb[74].mxu1  ;;  %5715 = vmatprep.mubr.bf16.mxu0 %v5353_v30  ;;  %5876 = vmatprep.mubr.bf16.mxu1 %v5355_v17 }
 0x415   : > { %v7038_v39 = vadd.f32 %v4699_v29, %v10051_v11  ;;  %v7102_v31 = vadd.f32 %v5085_v41, %v10055_v13  ;;  %v4701_v47 = vpop.f32.mrb[75].mxu0  ;;  %v5087_v32 = vpop.f32.mrb[75].mxu1  ;;  %5716 = vmatmul.mubr.bf16.gmra.mrb[132].mxu0 %v5352_v45  ;;  %5877 = vmatmul.mubr.bf16.gmra.mrb[132].mxu1 %v5354_v25  ;;  %v5236_v15 = vmax.f32 %v7036_v52, 0.0  ;;  %v5238_v16 = vmax.f32 %v7100_v40, 0.0 }
 0x416   : > { %v7039_v12 = vadd.f32 %v4701_v47, %v10059_v60  ;;  %v7103_v14 = vadd.f32 %v5087_v32, %v10063_v63  ;;  %v5237_v24 = vmax.f32 %v7037_v38, 0.0  ;;  %v5239_v22 = vmax.f32 %v7101_v23, 0.0 }
 0x417   : > { %v5240_v18 = vmax.f32 %v7038_v39, 0.0  ;;  %v5242_v48 = vmax.f32 %v7102_v31, 0.0 }
 0x418   : > { %v5241_v33 = vmax.f32 %v7039_v12, 0.0  ;;  %v5243_v34 = vmax.f32 %v7103_v14, 0.0 }
 0x419   : > { %v5356_v49 = vpack.c.bf16 %v5240_v18, %v5236_v15  ;;  %v5358_v35 = vpack.c.bf16 %v5242_v48, %v5238_v16 }
 0x41a   : > { %v5357_v36 = vpack.c.bf16 %v5241_v33, %v5237_v24  ;;  %v5359_v37 = vpack.c.bf16 %v5243_v34, %v5239_v22  ;;  %v4705_v55 = vpop.f32.mrb[76].mxu0  ;;  %v5091_v58 = vpop.f32.mrb[76].mxu1 }
 0x41b   : > { %v7040_v51 = vadd.f32 %v4705_v55, %v10051_v11  ;;  %v7104_v0 = vadd.f32 %v5091_v58, %v10055_v13  ;;  %v4707_v59 = vpop.f32.mrb[77].mxu0  ;;  %v5093_v62 = vpop.f32.mrb[77].mxu1 }
 0x41c   : > { %v7041_v46 = vadd.f32 %v4707_v59, %v10059_v60  ;;  %v7105_v57 = vadd.f32 %v5093_v62, %v10063_v63  ;;  %v4709_v53 = vpop.f32.mrb[78].mxu0  ;;  %v5095_v61 = vpop.f32.mrb[78].mxu1  ;;  %5723 = vmatprep.mubr.bf16.mxu0 %v5357_v36  ;;  %5884 = vmatprep.mubr.bf16.mxu1 %v5359_v37 }
 0x41d   : > { %v7042_v1 = vadd.f32 %v4709_v53, %v10051_v11  ;;  %v7106_v2 = vadd.f32 %v5095_v61, %v10055_v13  ;;  %v4711_v3 = vpop.f32.mrb[79].mxu0  ;;  %v5097_v44 = vpop.f32.mrb[79].mxu1  ;;  %5724 = vmatmul.mubr.bf16.gmra.mrb[136].mxu0 %v5356_v49  ;;  %5885 = vmatmul.mubr.bf16.gmra.mrb[136].mxu1 %v5358_v35  ;;  %v5244_v7 = vmax.f32 %v7040_v51, 0.0  ;;  %v5246_v8 = vmax.f32 %v7104_v0, 0.0 }
 0x41e   : > { %v7043_v21 = vadd.f32 %v4711_v3, %v10059_v60  ;;  %v7107_v5 = vadd.f32 %v5097_v44, %v10063_v63  ;;  %v5245_v4 = vmax.f32 %v7041_v46, 0.0  ;;  %v5247_v6 = vmax.f32 %v7105_v57, 0.0 }
 0x41f   : > { %v5248_v9 = vmax.f32 %v7042_v1, 0.0  ;;  %v5250_v19 = vmax.f32 %v7106_v2, 0.0 }
 0x420   : > { %v5249_v54 = vmax.f32 %v7043_v21, 0.0  ;;  %v5251_v56 = vmax.f32 %v7107_v5, 0.0 }
 0x421   : > { %v5360_v42 = vpack.c.bf16 %v5248_v9, %v5244_v7  ;;  %v5362_v45 = vpack.c.bf16 %v5250_v19, %v5246_v8 }
 0x422   : > { %v5361_v25 = vpack.c.bf16 %v5249_v54, %v5245_v4  ;;  %v5363_v30 = vpack.c.bf16 %v5251_v56, %v5247_v6  ;;  %v4715_v17 = vpop.f32.mrb[80].mxu0  ;;  %v5101_v20 = vpop.f32.mrb[80].mxu1 }
 0x423   : > { %v7044_v50 = vadd.f32 %v4715_v17, %v10051_v11  ;;  %v7108_v52 = vadd.f32 %v5101_v20, %v10055_v13  ;;  %v4717_v40 = vpop.f32.mrb[81].mxu0  ;;  %v5103_v43 = vpop.f32.mrb[81].mxu1 }
 0x424   : > { %v7045_v26 = vadd.f32 %v4717_v40, %v10059_v60  ;;  %v7109_v38 = vadd.f32 %v5103_v43, %v10063_v63  ;;  %v4719_v23 = vpop.f32.mrb[82].mxu0  ;;  %v5105_v29 = vpop.f32.mrb[82].mxu1  ;;  %5731 = vmatprep.mubr.bf16.mxu0 %v5361_v25  ;;  %5892 = vmatprep.mubr.bf16.mxu1 %v5363_v30 }
 0x425   : > { %v7046_v41 = vadd.f32 %v4719_v23, %v10051_v11  ;;  %v7110_v39 = vadd.f32 %v5105_v29, %v10055_v13  ;;  %v4721_v31 = vpop.f32.mrb[83].mxu0  ;;  %v5107_v47 = vpop.f32.mrb[83].mxu1  ;;  %5732 = vmatmul.mubr.bf16.gmra.mrb[140].mxu0 %v5360_v42  ;;  %5893 = vmatmul.mubr.bf16.gmra.mrb[140].mxu1 %v5362_v45  ;;  %v5252_v14 = vmax.f32 %v7044_v50, 0.0  ;;  %v5254_v15 = vmax.f32 %v7108_v52, 0.0 }
 0x426   : > { %v7047_v32 = vadd.f32 %v4721_v31, %v10059_v60  ;;  %v7111_v12 = vadd.f32 %v5107_v47, %v10063_v63  ;;  %v5253_v48 = vmax.f32 %v7045_v26, 0.0  ;;  %v5255_v24 = vmax.f32 %v7109_v38, 0.0 }
 0x427   : > { %v5256_v16 = vmax.f32 %v7046_v41, 0.0  ;;  %v5258_v18 = vmax.f32 %v7110_v39, 0.0 }
 0x428   : > { %v5257_v22 = vmax.f32 %v7047_v32, 0.0  ;;  %v5259_v33 = vmax.f32 %v7111_v12, 0.0 }
 0x429   : > { %v5364_v34 = vpack.c.bf16 %v5256_v16, %v5252_v14  ;;  %v5366_v49 = vpack.c.bf16 %v5258_v18, %v5254_v15 }
 0x42a   : > { %v5365_v35 = vpack.c.bf16 %v5257_v22, %v5253_v48  ;;  %v5367_v36 = vpack.c.bf16 %v5259_v33, %v5255_v24  ;;  %v4725_v37 = vpop.f32.mrb[84].mxu0  ;;  %v5111_v55 = vpop.f32.mrb[84].mxu1 }
 0x42b   : > { %v7048_v58 = vadd.f32 %v4725_v37, %v10051_v11  ;;  %v7112_v51 = vadd.f32 %v5111_v55, %v10055_v13  ;;  %v4727_v0 = vpop.f32.mrb[85].mxu0  ;;  %v5113_v59 = vpop.f32.mrb[85].mxu1 }
 0x42c   : > { %v7049_v62 = vadd.f32 %v4727_v0, %v10059_v60  ;;  %v7113_v46 = vadd.f32 %v5113_v59, %v10063_v63  ;;  %v4729_v57 = vpop.f32.mrb[86].mxu0  ;;  %v5115_v53 = vpop.f32.mrb[86].mxu1  ;;  %5739 = vmatprep.mubr.bf16.mxu0 %v5365_v35  ;;  %5900 = vmatprep.mubr.bf16.mxu1 %v5367_v36 }
 0x42d   : > { %v7050_v61 = vadd.f32 %v4729_v57, %v10051_v11  ;;  %v7114_v1 = vadd.f32 %v5115_v53, %v10055_v13  ;;  %v4731_v2 = vpop.f32.mrb[87].mxu0  ;;  %v5117_v3 = vpop.f32.mrb[87].mxu1  ;;  %5740 = vmatmul.mubr.bf16.gmra.mrb[144].mxu0 %v5364_v34  ;;  %5901 = vmatmul.mubr.bf16.gmra.mrb[144].mxu1 %v5366_v49  ;;  %v5260_v5 = vmax.f32 %v7048_v58, 0.0  ;;  %v5262_v7 = vmax.f32 %v7112_v51, 0.0 }
 0x42e   : > { %v7051_v44 = vadd.f32 %v4731_v2, %v10059_v60  ;;  %v7115_v21 = vadd.f32 %v5117_v3, %v10063_v63  ;;  %v5261_v19 = vmax.f32 %v7049_v62, 0.0  ;;  %v5263_v4 = vmax.f32 %v7113_v46, 0.0 }
 0x42f   : > { %v5264_v8 = vmax.f32 %v7050_v61, 0.0  ;;  %v5266_v9 = vmax.f32 %v7114_v1, 0.0 }
 0x430   : > { %v5265_v6 = vmax.f32 %v7051_v44, 0.0  ;;  %v5267_v54 = vmax.f32 %v7115_v21, 0.0 }
 0x431   : > { %v5368_v56 = vpack.c.bf16 %v5264_v8, %v5260_v5  ;;  %v5370_v42 = vpack.c.bf16 %v5266_v9, %v5262_v7 }
 0x432   : > { %v5369_v45 = vpack.c.bf16 %v5265_v6, %v5261_v19  ;;  %v5371_v25 = vpack.c.bf16 %v5267_v54, %v5263_v4  ;;  %v4735_v30 = vpop.f32.mrb[88].mxu0  ;;  %v5121_v17 = vpop.f32.mrb[88].mxu1 }
 0x433   : > { %v7052_v20 = vadd.f32 %v4735_v30, %v10051_v11  ;;  %v7116_v50 = vadd.f32 %v5121_v17, %v10055_v13  ;;  %v4737_v52 = vpop.f32.mrb[89].mxu0  ;;  %v5123_v40 = vpop.f32.mrb[89].mxu1 }
 0x434   : > { %v7053_v43 = vadd.f32 %v4737_v52, %v10059_v60  ;;  %v7117_v26 = vadd.f32 %v5123_v40, %v10063_v63  ;;  %v4739_v38 = vpop.f32.mrb[90].mxu0  ;;  %v5125_v23 = vpop.f32.mrb[90].mxu1  ;;  %5747 = vmatprep.mubr.bf16.mxu0 %v5369_v45  ;;  %5908 = vmatprep.mubr.bf16.mxu1 %v5371_v25 }
 0x435   : > { %v7054_v29 = vadd.f32 %v4739_v38, %v10051_v11  ;;  %v7118_v41 = vadd.f32 %v5125_v23, %v10055_v13  ;;  %v4741_v39 = vpop.f32.mrb[91].mxu0  ;;  %v5127_v31 = vpop.f32.mrb[91].mxu1  ;;  %5748 = vmatmul.mubr.bf16.gmra.mrb[148].mxu0 %v5368_v56  ;;  %5909 = vmatmul.mubr.bf16.gmra.mrb[148].mxu1 %v5370_v42  ;;  %v5268_v12 = vmax.f32 %v7052_v20, 0.0  ;;  %v5270_v14 = vmax.f32 %v7116_v50, 0.0 }
 0x436   : > { %v7055_v47 = vadd.f32 %v4741_v39, %v10059_v60  ;;  %v7119_v32 = vadd.f32 %v5127_v31, %v10063_v63  ;;  %v5269_v18 = vmax.f32 %v7053_v43, 0.0  ;;  %v5271_v48 = vmax.f32 %v7117_v26, 0.0 }
 0x437   : > { %v5272_v15 = vmax.f32 %v7054_v29, 0.0  ;;  %v5274_v16 = vmax.f32 %v7118_v41, 0.0 }
 0x438   : > { %v5273_v24 = vmax.f32 %v7055_v47, 0.0  ;;  %v5275_v22 = vmax.f32 %v7119_v32, 0.0 }
 0x439   : > { %v5372_v33 = vpack.c.bf16 %v5272_v15, %v5268_v12  ;;  %v5374_v34 = vpack.c.bf16 %v5274_v16, %v5270_v14 }
 0x43a   : > { %v5373_v49 = vpack.c.bf16 %v5273_v24, %v5269_v18  ;;  %v5375_v35 = vpack.c.bf16 %v5275_v22, %v5271_v48  ;;  %v4745_v36 = vpop.f32.mrb[92].mxu0  ;;  %v5131_v37 = vpop.f32.mrb[92].mxu1 }
 0x43b   : > { %v7056_v55 = vadd.f32 %v4745_v36, %v10051_v11  ;;  %v7120_v58 = vadd.f32 %v5131_v37, %v10055_v13  ;;  %v4747_v51 = vpop.f32.mrb[93].mxu0  ;;  %v5133_v0 = vpop.f32.mrb[93].mxu1 }
 0x43c   : > { %v7057_v59 = vadd.f32 %v4747_v51, %v10059_v60  ;;  %v7121_v62 = vadd.f32 %v5133_v0, %v10063_v63  ;;  %v4749_v46 = vpop.f32.mrb[94].mxu0  ;;  %v5135_v57 = vpop.f32.mrb[94].mxu1  ;;  %5755 = vmatprep.mubr.bf16.mxu0 %v5373_v49  ;;  %5916 = vmatprep.mubr.bf16.mxu1 %v5375_v35 }
 0x43d   : > { %v7058_v53 = vadd.f32 %v4749_v46, %v10051_v11  ;;  %v7122_v61 = vadd.f32 %v5135_v57, %v10055_v13  ;;  %v4751_v1 = vpop.f32.mrb[95].mxu0  ;;  %v5137_v2 = vpop.f32.mrb[95].mxu1  ;;  %5756 = vmatmul.mubr.bf16.gmra.mrb[152].mxu0 %v5372_v33  ;;  %5917 = vmatmul.mubr.bf16.gmra.mrb[152].mxu1 %v5374_v34  ;;  %v5276_v21 = vmax.f32 %v7056_v55, 0.0  ;;  %v5278_v5 = vmax.f32 %v7120_v58, 0.0 }
 0x43e   : > { %v7059_v3 = vadd.f32 %v4751_v1, %v10059_v60  ;;  %v7123_v44 = vadd.f32 %v5137_v2, %v10063_v63  ;;  %v5277_v9 = vmax.f32 %v7057_v59, 0.0  ;;  %v5279_v19 = vmax.f32 %v7121_v62, 0.0 }
 0x43f   : > { %v5280_v7 = vmax.f32 %v7058_v53, 0.0  ;;  %v5282_v8 = vmax.f32 %v7122_v61, 0.0 }
 0x440   : > { %v5281_v4 = vmax.f32 %v7059_v3, 0.0  ;;  %v5283_v6 = vmax.f32 %v7123_v44, 0.0 }
 0x441   : > { %v5376_v54 = vpack.c.bf16 %v5280_v7, %v5276_v21  ;;  %v5378_v56 = vpack.c.bf16 %v5282_v8, %v5278_v5 }
 0x442   : > { %v5377_v42 = vpack.c.bf16 %v5281_v4, %v5277_v9  ;;  %v5379_v45 = vpack.c.bf16 %v5283_v6, %v5279_v19  ;;  %v4755_v25 = vpop.f32.mrb[96].mxu0  ;;  %v5141_v30 = vpop.f32.mrb[96].mxu1 }
 0x443   : > { %v7060_v17 = vadd.f32 %v4755_v25, %v10051_v11  ;;  %v7124_v20 = vadd.f32 %v5141_v30, %v10055_v13  ;;  %v4757_v50 = vpop.f32.mrb[97].mxu0  ;;  %v5143_v52 = vpop.f32.mrb[97].mxu1 }
 0x444   : > { %v7061_v40 = vadd.f32 %v4757_v50, %v10059_v60  ;;  %v7125_v43 = vadd.f32 %v5143_v52, %v10063_v63  ;;  %v4759_v26 = vpop.f32.mrb[98].mxu0  ;;  %v5145_v38 = vpop.f32.mrb[98].mxu1  ;;  %5763 = vmatprep.mubr.bf16.mxu0 %v5377_v42  ;;  %5924 = vmatprep.mubr.bf16.mxu1 %v5379_v45 }
 0x445   : > { %v7062_v23 = vadd.f32 %v4759_v26, %v10051_v11  ;;  %v7126_v29 = vadd.f32 %v5145_v38, %v10055_v13  ;;  %v4761_v41 = vpop.f32.mrb[99].mxu0  ;;  %v5147_v39 = vpop.f32.mrb[99].mxu1  ;;  %5764 = vmatmul.mubr.bf16.gmra.mrb[156].mxu0 %v5376_v54  ;;  %5925 = vmatmul.mubr.bf16.gmra.mrb[156].mxu1 %v5378_v56  ;;  %v5284_v32 = vmax.f32 %v7060_v17, 0.0  ;;  %v5286_v12 = vmax.f32 %v7124_v20, 0.0 }
 0x446   : > { %v7063_v31 = vadd.f32 %v4761_v41, %v10059_v60  ;;  %v7127_v47 = vadd.f32 %v5147_v39, %v10063_v63  ;;  %v5285_v16 = vmax.f32 %v7061_v40, 0.0  ;;  %v5287_v18 = vmax.f32 %v7125_v43, 0.0 }
 0x447   : > { %v5288_v14 = vmax.f32 %v7062_v23, 0.0  ;;  %v5290_v15 = vmax.f32 %v7126_v29, 0.0 }
 0x448   : > { %v5289_v48 = vmax.f32 %v7063_v31, 0.0  ;;  %v5291_v24 = vmax.f32 %v7127_v47, 0.0 }
 0x449   : > { %v5380_v22 = vpack.c.bf16 %v5288_v14, %v5284_v32  ;;  %v5382_v33 = vpack.c.bf16 %v5290_v15, %v5286_v12 }
 0x44a   : > { %v5381_v34 = vpack.c.bf16 %v5289_v48, %v5285_v16  ;;  %v5383_v49 = vpack.c.bf16 %v5291_v24, %v5287_v18  ;;  %v4765_v35 = vpop.f32.mrb[100].mxu0  ;;  %v5151_v36 = vpop.f32.mrb[100].mxu1 }
 0x44b   : > { %v7064_v37 = vadd.f32 %v4765_v35, %v10051_v11  ;;  %v7128_v55 = vadd.f32 %v5151_v36, %v10055_v13  ;;  %v4767_v58 = vpop.f32.mrb[101].mxu0  ;;  %v5153_v51 = vpop.f32.mrb[101].mxu1 }
 0x44c   : > { %v7065_v0 = vadd.f32 %v4767_v58, %v10059_v60  ;;  %v7129_v59 = vadd.f32 %v5153_v51, %v10063_v63  ;;  %v4769_v62 = vpop.f32.mrb[102].mxu0  ;;  %v5155_v46 = vpop.f32.mrb[102].mxu1  ;;  %5771 = vmatprep.mubr.bf16.mxu0 %v5381_v34  ;;  %5932 = vmatprep.mubr.bf16.mxu1 %v5383_v49 }
 0x44d   : > { %v7066_v57 = vadd.f32 %v4769_v62, %v10051_v11  ;;  %v7130_v53 = vadd.f32 %v5155_v46, %v10055_v13  ;;  %v4771_v61 = vpop.f32.mrb[103].mxu0  ;;  %v5157_v1 = vpop.f32.mrb[103].mxu1  ;;  %5772 = vmatmul.mubr.bf16.gmra.mrb[160].mxu0 %v5380_v22  ;;  %5933 = vmatmul.mubr.bf16.gmra.mrb[160].mxu1 %v5382_v33  ;;  %v5292_v44 = vmax.f32 %v7064_v37, 0.0  ;;  %v5294_v21 = vmax.f32 %v7128_v55, 0.0 }
 0x44e   : > { %v7067_v2 = vadd.f32 %v4771_v61, %v10059_v60  ;;  %v7131_v3 = vadd.f32 %v5157_v1, %v10063_v63  ;;  %v5293_v8 = vmax.f32 %v7065_v0, 0.0  ;;  %v5295_v9 = vmax.f32 %v7129_v59, 0.0 }
 0x44f   : > { %v5296_v5 = vmax.f32 %v7066_v57, 0.0  ;;  %v5298_v7 = vmax.f32 %v7130_v53, 0.0 }
 0x450   : > { %v5297_v19 = vmax.f32 %v7067_v2, 0.0  ;;  %v5299_v4 = vmax.f32 %v7131_v3, 0.0 }
 0x451   : > { %v5384_v6 = vpack.c.bf16 %v5296_v5, %v5292_v44  ;;  %v5386_v54 = vpack.c.bf16 %v5298_v7, %v5294_v21 }
 0x452   : > { %v5385_v56 = vpack.c.bf16 %v5297_v19, %v5293_v8  ;;  %v5387_v42 = vpack.c.bf16 %v5299_v4, %v5295_v9  ;;  %v4775_v45 = vpop.f32.mrb[104].mxu0  ;;  %v5161_v25 = vpop.f32.mrb[104].mxu1 }
 0x453   : > { %v7068_v30 = vadd.f32 %v4775_v45, %v10051_v11  ;;  %v7132_v17 = vadd.f32 %v5161_v25, %v10055_v13  ;;  %v4777_v20 = vpop.f32.mrb[105].mxu0  ;;  %v5163_v50 = vpop.f32.mrb[105].mxu1 }
 0x454   : > { %v7069_v52 = vadd.f32 %v4777_v20, %v10059_v60  ;;  %v7133_v40 = vadd.f32 %v5163_v50, %v10063_v63  ;;  %v4779_v43 = vpop.f32.mrb[106].mxu0  ;;  %v5165_v26 = vpop.f32.mrb[106].mxu1  ;;  %5779 = vmatprep.mubr.bf16.mxu0 %v5385_v56  ;;  %5940 = vmatprep.mubr.bf16.mxu1 %v5387_v42 }
 0x455   : > { %v7070_v38 = vadd.f32 %v4779_v43, %v10051_v11  ;;  %v7134_v23 = vadd.f32 %v5165_v26, %v10055_v13  ;;  %v4781_v29 = vpop.f32.mrb[107].mxu0  ;;  %v5167_v41 = vpop.f32.mrb[107].mxu1  ;;  %5780 = vmatmul.mubr.bf16.gmra.mrb[164].mxu0 %v5384_v6  ;;  %5941 = vmatmul.mubr.bf16.gmra.mrb[164].mxu1 %v5386_v54  ;;  %v5300_v47 = vmax.f32 %v7068_v30, 0.0  ;;  %v5302_v32 = vmax.f32 %v7132_v17, 0.0 }
 0x456   : > { %v7071_v39 = vadd.f32 %v4781_v29, %v10059_v60  ;;  %v7135_v31 = vadd.f32 %v5167_v41, %v10063_v63  ;;  %v5301_v15 = vmax.f32 %v7069_v52, 0.0  ;;  %v5303_v16 = vmax.f32 %v7133_v40, 0.0 }
 0x457   : > { %v5304_v12 = vmax.f32 %v7070_v38, 0.0  ;;  %v5306_v14 = vmax.f32 %v7134_v23, 0.0 }
 0x458   : > { %v5305_v18 = vmax.f32 %v7071_v39, 0.0  ;;  %v5307_v48 = vmax.f32 %v7135_v31, 0.0 }
 0x459   : > { %v5388_v24 = vpack.c.bf16 %v5304_v12, %v5300_v47  ;;  %v5390_v22 = vpack.c.bf16 %v5306_v14, %v5302_v32 }
 0x45a   : > { %v5389_v33 = vpack.c.bf16 %v5305_v18, %v5301_v15  ;;  %v5391_v34 = vpack.c.bf16 %v5307_v48, %v5303_v16  ;;  %v4785_v49 = vpop.f32.mrb[108].mxu0  ;;  %v5171_v35 = vpop.f32.mrb[108].mxu1 }
 0x45b   : > { %v7072_v36 = vadd.f32 %v4785_v49, %v10051_v11  ;;  %v7136_v37 = vadd.f32 %v5171_v35, %v10055_v13  ;;  %v4787_v55 = vpop.f32.mrb[109].mxu0  ;;  %v5173_v58 = vpop.f32.mrb[109].mxu1 }
 0x45c   : > { %v7073_v51 = vadd.f32 %v4787_v55, %v10059_v60  ;;  %v7137_v0 = vadd.f32 %v5173_v58, %v10063_v63  ;;  %v4789_v59 = vpop.f32.mrb[110].mxu0  ;;  %v5175_v62 = vpop.f32.mrb[110].mxu1  ;;  %5787 = vmatprep.mubr.bf16.mxu0 %v5389_v33  ;;  %5948 = vmatprep.mubr.bf16.mxu1 %v5391_v34 }
 0x45d   : > { %v7074_v46 = vadd.f32 %v4789_v59, %v10051_v11  ;;  %v7138_v57 = vadd.f32 %v5175_v62, %v10055_v13  ;;  %v4791_v53 = vpop.f32.mrb[111].mxu0  ;;  %v5177_v61 = vpop.f32.mrb[111].mxu1  ;;  %5788 = vmatmul.mubr.bf16.gmra.mrb[168].mxu0 %v5388_v24  ;;  %5949 = vmatmul.mubr.bf16.gmra.mrb[168].mxu1 %v5390_v22  ;;  %v5308_v3 = vmax.f32 %v7072_v36, 0.0  ;;  %v5310_v44 = vmax.f32 %v7136_v37, 0.0 }
 0x45e   : > { %v7075_v1 = vadd.f32 %v4791_v53, %v10059_v60  ;;  %v7139_v2 = vadd.f32 %v5177_v61, %v10063_v63  ;;  %v5309_v7 = vmax.f32 %v7073_v51, 0.0  ;;  %v5311_v8 = vmax.f32 %v7137_v0, 0.0 }
 0x45f   : > { %v5312_v21 = vmax.f32 %v7074_v46, 0.0  ;;  %v5314_v5 = vmax.f32 %v7138_v57, 0.0 }
 0x460   : > { %v5313_v9 = vmax.f32 %v7075_v1, 0.0  ;;  %v5315_v19 = vmax.f32 %v7139_v2, 0.0 }
 0x461   : > { %v5392_v4 = vpack.c.bf16 %v5312_v21, %v5308_v3  ;;  %v5394_v6 = vpack.c.bf16 %v5314_v5, %v5310_v44 }
 0x462   : > { %v5393_v54 = vpack.c.bf16 %v5313_v9, %v5309_v7  ;;  %v5395_v56 = vpack.c.bf16 %v5315_v19, %v5311_v8  ;;  %v4795_v42 = vpop.f32.mrb[112].mxu0  ;;  %v5181_v45 = vpop.f32.mrb[112].mxu1 }
 0x463   : > { %v7076_v25 = vadd.f32 %v4795_v42, %v10051_v11  ;;  %v7140_v30 = vadd.f32 %v5181_v45, %v10055_v13  ;;  %v4797_v17 = vpop.f32.mrb[113].mxu0  ;;  %v5183_v20 = vpop.f32.mrb[113].mxu1 }
 0x464   : > { %v7077_v50 = vadd.f32 %v4797_v17, %v10059_v60  ;;  %v7141_v52 = vadd.f32 %v5183_v20, %v10063_v63  ;;  %v4799_v40 = vpop.f32.mrb[114].mxu0  ;;  %v5185_v43 = vpop.f32.mrb[114].mxu1  ;;  %5795 = vmatprep.mubr.bf16.mxu0 %v5393_v54  ;;  %5956 = vmatprep.mubr.bf16.mxu1 %v5395_v56 }
 0x465   : > { %v7078_v26 = vadd.f32 %v4799_v40, %v10051_v11  ;;  %v7142_v38 = vadd.f32 %v5185_v43, %v10055_v13  ;;  %v4801_v23 = vpop.f32.mrb[115].mxu0  ;;  %v5187_v29 = vpop.f32.mrb[115].mxu1  ;;  %5796 = vmatmul.mubr.bf16.gmra.mrb[172].mxu0 %v5392_v4  ;;  %5957 = vmatmul.mubr.bf16.gmra.mrb[172].mxu1 %v5394_v6  ;;  %v5316_v31 = vmax.f32 %v7076_v25, 0.0  ;;  %v5318_v47 = vmax.f32 %v7140_v30, 0.0 }
 0x466   : > { %v7079_v41 = vadd.f32 %v4801_v23, %v10059_v60  ;;  %v7143_v39 = vadd.f32 %v5187_v29, %v10063_v63  ;;  %v5317_v14 = vmax.f32 %v7077_v50, 0.0  ;;  %v5319_v15 = vmax.f32 %v7141_v52, 0.0 }
 0x467   : > { %v5320_v32 = vmax.f32 %v7078_v26, 0.0  ;;  %v5322_v12 = vmax.f32 %v7142_v38, 0.0 }
 0x468   : > { %v5321_v16 = vmax.f32 %v7079_v41, 0.0  ;;  %v5323_v18 = vmax.f32 %v7143_v39, 0.0 }
 0x469   : > { %v5396_v48 = vpack.c.bf16 %v5320_v32, %v5316_v31  ;;  %v5398_v24 = vpack.c.bf16 %v5322_v12, %v5318_v47 }
 0x46a   : > { %v5397_v22 = vpack.c.bf16 %v5321_v16, %v5317_v14  ;;  %v5399_v33 = vpack.c.bf16 %v5323_v18, %v5319_v15  ;;  %v4805_v34 = vpop.f32.mrb[116].mxu0  ;;  %v5191_v49 = vpop.f32.mrb[116].mxu1 }
 0x46b   : > { %v7080_v35 = vadd.f32 %v4805_v34, %v10051_v11  ;;  %v7144_v36 = vadd.f32 %v5191_v49, %v10055_v13  ;;  %v4807_v37 = vpop.f32.mrb[117].mxu0  ;;  %v5193_v55 = vpop.f32.mrb[117].mxu1 }
 0x46c   : > { %v7081_v58 = vadd.f32 %v4807_v37, %v10059_v60  ;;  %v7145_v51 = vadd.f32 %v5193_v55, %v10063_v63  ;;  %v4809_v0 = vpop.f32.mrb[118].mxu0  ;;  %v5195_v59 = vpop.f32.mrb[118].mxu1  ;;  %5803 = vmatprep.mubr.bf16.mxu0 %v5397_v22  ;;  %5964 = vmatprep.mubr.bf16.mxu1 %v5399_v33 }
 0x46d   : > { %v7082_v62 = vadd.f32 %v4809_v0, %v10051_v11  ;;  %v7146_v46 = vadd.f32 %v5195_v59, %v10055_v13  ;;  %v4811_v57 = vpop.f32.mrb[119].mxu0  ;;  %v5197_v53 = vpop.f32.mrb[119].mxu1  ;;  %5804 = vmatmul.mubr.bf16.gmra.mrb[176].mxu0 %v5396_v48  ;;  %5965 = vmatmul.mubr.bf16.gmra.mrb[176].mxu1 %v5398_v24  ;;  %v5324_v2 = vmax.f32 %v7080_v35, 0.0  ;;  %v5326_v3 = vmax.f32 %v7144_v36, 0.0 }
 0x46e   : > { %v7083_v61 = vadd.f32 %v4811_v57, %v10059_v60  ;;  %v7147_v1 = vadd.f32 %v5197_v53, %v10063_v63  ;;  %v5325_v5 = vmax.f32 %v7081_v58, 0.0  ;;  %v5327_v7 = vmax.f32 %v7145_v51, 0.0 }
 0x46f   : > { %v5328_v44 = vmax.f32 %v7082_v62, 0.0  ;;  %v5330_v21 = vmax.f32 %v7146_v46, 0.0 }
 0x470   : > { %v5329_v8 = vmax.f32 %v7083_v61, 0.0  ;;  %v5331_v9 = vmax.f32 %v7147_v1, 0.0 }
 0x471   : > { %v5400_v19 = vpack.c.bf16 %v5328_v44, %v5324_v2  ;;  %v5402_v4 = vpack.c.bf16 %v5330_v21, %v5326_v3 }
 0x472   : > { %v5401_v6 = vpack.c.bf16 %v5329_v8, %v5325_v5  ;;  %v5403_v54 = vpack.c.bf16 %v5331_v9, %v5327_v7  ;;  %v4815_v56 = vpop.f32.mrb[120].mxu0  ;;  %v5201_v42 = vpop.f32.mrb[120].mxu1 }
 0x473   : > { %v7084_v45 = vadd.f32 %v4815_v56, %v10051_v11  ;;  %v7148_v25 = vadd.f32 %v5201_v42, %v10055_v13  ;;  %v4817_v30 = vpop.f32.mrb[121].mxu0  ;;  %v5203_v17 = vpop.f32.mrb[121].mxu1 }
 0x474   : > { %v7085_v20 = vadd.f32 %v4817_v30, %v10059_v60  ;;  %v7149_v50 = vadd.f32 %v5203_v17, %v10063_v63  ;;  %v4819_v52 = vpop.f32.mrb[122].mxu0  ;;  %v5205_v40 = vpop.f32.mrb[122].mxu1  ;;  %5811 = vmatprep.mubr.bf16.mxu0 %v5401_v6  ;;  %5972 = vmatprep.mubr.bf16.mxu1 %v5403_v54 }
 0x475   : > { %v7086_v43 = vadd.f32 %v4819_v52, %v10051_v11  ;;  %v7150_v26 = vadd.f32 %v5205_v40, %v10055_v13  ;;  %v4821_v38 = vpop.f32.mrb[123].mxu0  ;;  %v5207_v23 = vpop.f32.mrb[123].mxu1  ;;  %5812 = vmatmul.mubr.bf16.gmra.mrb[180].mxu0 %v5400_v19  ;;  %5973 = vmatmul.mubr.bf16.gmra.mrb[180].mxu1 %v5402_v4  ;;  %v5332_v39 = vmax.f32 %v7084_v45, 0.0  ;;  %v5334_v31 = vmax.f32 %v7148_v25, 0.0 }
 0x476   : > { %v7087_v29 = vadd.f32 %v4821_v38, %v10059_v60  ;;  %v7151_v41 = vadd.f32 %v5207_v23, %v10063_v63  ;;  %v5333_v12 = vmax.f32 %v7085_v20, 0.0  ;;  %v5335_v14 = vmax.f32 %v7149_v50, 0.0 }
 0x477   : > { %v5336_v47 = vmax.f32 %v7086_v43, 0.0  ;;  %v5338_v32 = vmax.f32 %v7150_v26, 0.0  ;;  %v10203_v26 = vld [vmem:[%s10318_s7] sm:$0x1] }
 0x478   : > { %v5337_v15 = vmax.f32 %v7087_v29, 0.0  ;;  %v5339_v16 = vmax.f32 %v7151_v41, 0.0 }
 0x479   : > { %v5404_v18 = vpack.c.bf16 %v5336_v47, %v5332_v39  ;;  %v5406_v48 = vpack.c.bf16 %v5338_v32, %v5334_v31 }
 0x47a   : > { %v5405_v24 = vpack.c.bf16 %v5337_v15, %v5333_v12  ;;  %v5407_v22 = vpack.c.bf16 %v5339_v16, %v5335_v14  ;;  %v4825_v33 = vpop.f32.mrb[124].mxu0  ;;  %v5211_v34 = vpop.f32.mrb[124].mxu1 }
 0x47b   : > { %v7088_v49 = vadd.f32 %v4825_v33, %v10051_v11  ;;  %v7152_v35 = vadd.f32 %v5211_v34, %v10055_v13  ;;  %v4827_v36 = vpop.f32.mrb[125].mxu0  ;;  %v5213_v37 = vpop.f32.mrb[125].mxu1 }
 0x47c   : > { %v7089_v55 = vadd.f32 %v4827_v36, %v10059_v60  ;;  %v7153_v58 = vadd.f32 %v5213_v37, %v10063_v63  ;;  %v4829_v51 = vpop.f32.mrb[126].mxu0  ;;  %v5215_v0 = vpop.f32.mrb[126].mxu1  ;;  %5819 = vmatprep.mubr.bf16.mxu0 %v5405_v24  ;;  %5980 = vmatprep.mubr.bf16.mxu1 %v5407_v22 }
 0x47d   : > { %v7090_v59 = vadd.f32 %v4829_v51, %v10051_v11  ;;  %v7154_v62 = vadd.f32 %v5215_v0, %v10055_v13  ;;  %v4831_v46 = vpop.f32.mrb[127].mxu0  ;;  %v5217_v57 = vpop.f32.mrb[127].mxu1  ;;  %5820 = vmatmul.mubr.bf16.gmra.mrb[184].mxu0 %v5404_v18  ;;  %5981 = vmatmul.mubr.bf16.gmra.mrb[184].mxu1 %v5406_v48  ;;  %v5340_v1 = vmax.f32 %v7088_v49, 0.0  ;;  %v5342_v2 = vmax.f32 %v7152_v35, 0.0  ;;  %v6030_v35 = vld [vmem:[#allocation2] sm:$0x1] }
 0x47e   : > { %v7091_v53 = vadd.f32 %v4831_v46, %v10059_v60  ;;  %v7155_v61 = vadd.f32 %v5217_v57, %v10063_v63  ;;  %v5341_v21 = vmax.f32 %v7089_v55, 0.0  ;;  %v5343_v5 = vmax.f32 %v7153_v58, 0.0  ;;  %v10196_v63 = vld [vmem:[%s10317_s6] ss:$0 sm:$0xff]  ;;  %6033 = vperm.xlu0 %7710, %v6030_v35  }
 0x47f   : > { %v5344_v3 = vmax.f32 %v7090_v59, 0.0  ;;  %v5346_v44 = vmax.f32 %v7154_v62, 0.0 }
 0x480   : > { %v5345_v7 = vmax.f32 %v7091_v53, 0.0  ;;  %v5347_v8 = vmax.f32 %v7155_v61, 0.0 }
 0x481   : > { %v5408_v9 = vpack.c.bf16 %v5344_v3, %v5340_v1  ;;  %v5410_v11 = vpack.c.bf16 %v5346_v44, %v5342_v2 }
 0x482   : > { %v5409_v19 = vpack.c.bf16 %v5345_v7, %v5341_v21  ;;  %v5411_v13 = vpack.c.bf16 %v5347_v8, %v5343_v5 }
 0x484   : > { %5827 = vmatprep.mubr.bf16.mxu0 %v5409_v19  ;;  %5988 = vmatprep.mubr.bf16.mxu1 %v5411_v13 }
 0x485   : > { %5828 = vmatmul.mubr.bf16.gmra.mrb[188].mxu0 %v5408_v9  ;;  %5989 = vmatmul.mubr.bf16.gmra.mrb[188].mxu1 %v5410_v11 }
 0x486   : > { %6866 = vmatprep.mubr.f32.mxu0 %v10203_v26 }
 0x4e0   : > { %v6626_v4 = vpop.f32.mrb[128].mxu0  ;;  %v6738_v60 = vpop.f32.mrb[128].mxu1 }
 0x4e1   : > { %v6627_v6 = vpop.f32.mrb[129].mxu0  ;;  %v6739_v54 = vpop.f32.mrb[129].mxu1 }
 0x4e2   : > { %v6628_v56 = vadd.f32 %v6627_v6, %v6626_v4  ;;  %v6740_v42 = vadd.f32 %v6739_v54, %v6738_v60  ;;  %v6629_v45 = vpop.f32.mrb[130].mxu0  ;;  %v6741_v25 = vpop.f32.mrb[130].mxu1 }
 0x4e3   : > { %v6630_v30 = vpop.f32.mrb[131].mxu0  ;;  %v6742_v17 = vpop.f32.mrb[131].mxu1 }
 0x4e4   : > { %v5710_v20 = vadd.f32 %v6628_v56, %v10196_v63  ;;  %v6631_v50 = vadd.f32 %v6630_v30, %v6629_v45  ;;  %v6743_v52 = vadd.f32 %v6742_v17, %v6741_v25 }
 0x4e6   : > { %v5871_v40 = vadd.f32 %v6740_v42, %v5710_v20  ;;  %v5713_v43 = vadd.f32 %v6631_v50, %v10196_v63 }
 0x4e8   : > { %v5874_v38 = vadd.f32 %v6743_v52, %v5713_v43  ;;  %v6632_v23 = vpop.f32.mrb[132].mxu0  ;;  %v6744_v29 = vpop.f32.mrb[132].mxu1  ;;  %v5997_v31 = vmax.f32 %v5871_v40, 0.0 }
 0x4e9   : > { %v6633_v41 = vpop.f32.mrb[133].mxu0  ;;  %v6745_v39 = vpop.f32.mrb[133].mxu1 }
 0x4ea   : > { %v5998_v47 = vmax.f32 %v5874_v38, 0.0  ;;  %v6634_v32 = vadd.f32 %v6633_v41, %v6632_v23  ;;  %v6746_v12 = vadd.f32 %v6745_v39, %v6744_v29  ;;  %v6635_v14 = vpop.f32.mrb[134].mxu0  ;;  %v6747_v15 = vpop.f32.mrb[134].mxu1 }
 0x4eb   : > { %v6636_v16 = vpop.f32.mrb[135].mxu0  ;;  %v6748_v18 = vpop.f32.mrb[135].mxu1 }
 0x4ec   : > { %v10206_v48 = vpack.c.bf16 %v5998_v47, %v5997_v31  ;;  %v5718_v24 = vadd.f32 %v6634_v32, %v10196_v63  ;;  %v6637_v22 = vadd.f32 %v6636_v16, %v6635_v14  ;;  %v6749_v33 = vadd.f32 %v6748_v18, %v6747_v15 }
 0x4ee   : > { %v5879_v34 = vadd.f32 %v6746_v12, %v5718_v24  ;;  %v5721_v49 = vadd.f32 %v6637_v22, %v10196_v63 }
 0x4f0   : > { %v5882_v36 = vadd.f32 %v6749_v33, %v5721_v49  ;;  %v6638_v37 = vpop.f32.mrb[136].mxu0  ;;  %v6750_v55 = vpop.f32.mrb[136].mxu1  ;;  %v5999_v0 = vmax.f32 %v5879_v34, 0.0 }
 0x4f1   : > { %v6639_v58 = vpop.f32.mrb[137].mxu0  ;;  %v6751_v51 = vpop.f32.mrb[137].mxu1 }
 0x4f2   : > { %v6000_v59 = vmax.f32 %v5882_v36, 0.0  ;;  %v6640_v62 = vadd.f32 %v6639_v58, %v6638_v37  ;;  %v6752_v46 = vadd.f32 %v6751_v51, %v6750_v55  ;;  %v6641_v57 = vpop.f32.mrb[138].mxu0  ;;  %v6753_v53 = vpop.f32.mrb[138].mxu1 }
 0x4f3   : > { %v6642_v61 = vpop.f32.mrb[139].mxu0  ;;  %v6754_v1 = vpop.f32.mrb[139].mxu1 }
 0x4f4   : > { %v10210_v2 = vpack.c.bf16 %v6000_v59, %v5999_v0  ;;  %v5726_v3 = vadd.f32 %v6640_v62, %v10196_v63  ;;  %v6643_v44 = vadd.f32 %v6642_v61, %v6641_v57  ;;  %v6755_v21 = vadd.f32 %v6754_v1, %v6753_v53 }
 0x4f6   : > { %v5887_v5 = vadd.f32 %v6752_v46, %v5726_v3  ;;  %v5729_v7 = vadd.f32 %v6643_v44, %v10196_v63 }
 0x4f8   : > { %v5890_v8 = vadd.f32 %v6755_v21, %v5729_v7  ;;  %v6644_v9 = vpop.f32.mrb[140].mxu0  ;;  %v6756_v11 = vpop.f32.mrb[140].mxu1  ;;  %v6001_v4 = vmax.f32 %v5887_v5, 0.0 }
 0x4f9   : > { %v6645_v19 = vpop.f32.mrb[141].mxu0  ;;  %v6757_v13 = vpop.f32.mrb[141].mxu1 }
 0x4fa   : > { %v6002_v60 = vmax.f32 %v5890_v8, 0.0  ;;  %v6646_v6 = vadd.f32 %v6645_v19, %v6644_v9  ;;  %v6758_v54 = vadd.f32 %v6757_v13, %v6756_v11  ;;  %v6647_v56 = vpop.f32.mrb[142].mxu0  ;;  %v6759_v42 = vpop.f32.mrb[142].mxu1 }
 0x4fb   : > { %v6648_v45 = vpop.f32.mrb[143].mxu0  ;;  %v6760_v25 = vpop.f32.mrb[143].mxu1 }
 0x4fc   : > { %v10214_v30 = vpack.c.bf16 %v6002_v60, %v6001_v4  ;;  %v5734_v17 = vadd.f32 %v6646_v6, %v10196_v63  ;;  %v6649_v20 = vadd.f32 %v6648_v45, %v6647_v56  ;;  %v6761_v50 = vadd.f32 %v6760_v25, %v6759_v42 }
 0x4fe   : > { %v5895_v52 = vadd.f32 %v6758_v54, %v5734_v17  ;;  %v5737_v40 = vadd.f32 %v6649_v20, %v10196_v63 }
 0x500   : > { %v5898_v43 = vadd.f32 %v6761_v50, %v5737_v40  ;;  %v6650_v38 = vpop.f32.mrb[144].mxu0  ;;  %v6762_v23 = vpop.f32.mrb[144].mxu1  ;;  %v6003_v39 = vmax.f32 %v5895_v52, 0.0 }
 0x501   : > { %v6651_v29 = vpop.f32.mrb[145].mxu0  ;;  %v6763_v41 = vpop.f32.mrb[145].mxu1 }
 0x502   : > { %v6004_v31 = vmax.f32 %v5898_v43, 0.0  ;;  %v6652_v47 = vadd.f32 %v6651_v29, %v6650_v38  ;;  %v6764_v32 = vadd.f32 %v6763_v41, %v6762_v23  ;;  %v6653_v12 = vpop.f32.mrb[146].mxu0  ;;  %v6765_v14 = vpop.f32.mrb[146].mxu1 }
 0x503   : > { %v6654_v15 = vpop.f32.mrb[147].mxu0  ;;  %v6766_v16 = vpop.f32.mrb[147].mxu1 }
 0x504   : > { %v10218_v18 = vpack.c.bf16 %v6004_v31, %v6003_v39  ;;  %v5742_v24 = vadd.f32 %v6652_v47, %v10196_v63  ;;  %v6655_v22 = vadd.f32 %v6654_v15, %v6653_v12  ;;  %v6767_v33 = vadd.f32 %v6766_v16, %v6765_v14 }
 0x506   : > { %v5903_v34 = vadd.f32 %v6764_v32, %v5742_v24  ;;  %v5745_v49 = vadd.f32 %v6655_v22, %v10196_v63 }
 0x508   : > { %v5906_v35 = vadd.f32 %v6767_v33, %v5745_v49  ;;  %v6656_v36 = vpop.f32.mrb[148].mxu0  ;;  %v6768_v37 = vpop.f32.mrb[148].mxu1  ;;  %v6005_v51 = vmax.f32 %v5903_v34, 0.0 }
 0x509   : > { %v6657_v55 = vpop.f32.mrb[149].mxu0  ;;  %v6769_v58 = vpop.f32.mrb[149].mxu1 }
 0x50a   : > { %v6006_v0 = vmax.f32 %v5906_v35, 0.0  ;;  %v6658_v59 = vadd.f32 %v6657_v55, %v6656_v36  ;;  %v6770_v62 = vadd.f32 %v6769_v58, %v6768_v37  ;;  %v6659_v46 = vpop.f32.mrb[150].mxu0  ;;  %v6771_v57 = vpop.f32.mrb[150].mxu1 }
 0x50b   : > { %v6660_v53 = vpop.f32.mrb[151].mxu0  ;;  %v6772_v61 = vpop.f32.mrb[151].mxu1 }
 0x50c   : > { %v10222_v1 = vpack.c.bf16 %v6006_v0, %v6005_v51  ;;  %v5750_v3 = vadd.f32 %v6658_v59, %v10196_v63  ;;  %v6661_v44 = vadd.f32 %v6660_v53, %v6659_v46  ;;  %v6773_v21 = vadd.f32 %v6772_v61, %v6771_v57 }
 0x50e   : > { %v5911_v5 = vadd.f32 %v6770_v62, %v5750_v3  ;;  %v5753_v7 = vadd.f32 %v6661_v44, %v10196_v63 }
 0x510   : > { %v5914_v8 = vadd.f32 %v6773_v21, %v5753_v7  ;;  %v6662_v9 = vpop.f32.mrb[152].mxu0  ;;  %v6774_v11 = vpop.f32.mrb[152].mxu1  ;;  %v6007_v4 = vmax.f32 %v5911_v5, 0.0 }
 0x511   : > { %v6663_v19 = vpop.f32.mrb[153].mxu0  ;;  %v6775_v13 = vpop.f32.mrb[153].mxu1 }
 0x512   : > { %v6008_v60 = vmax.f32 %v5914_v8, 0.0  ;;  %v6664_v6 = vadd.f32 %v6663_v19, %v6662_v9  ;;  %v6776_v54 = vadd.f32 %v6775_v13, %v6774_v11  ;;  %v6665_v56 = vpop.f32.mrb[154].mxu0  ;;  %v6777_v42 = vpop.f32.mrb[154].mxu1 }
 0x513   : > { %v6666_v45 = vpop.f32.mrb[155].mxu0  ;;  %v6778_v25 = vpop.f32.mrb[155].mxu1 }
 0x514   : > { %v10226_v17 = vpack.c.bf16 %v6008_v60, %v6007_v4  ;;  %v5758_v20 = vadd.f32 %v6664_v6, %v10196_v63  ;;  %v6667_v50 = vadd.f32 %v6666_v45, %v6665_v56  ;;  %v6779_v52 = vadd.f32 %v6778_v25, %v6777_v42 }
 0x516   : > { %v5919_v40 = vadd.f32 %v6776_v54, %v5758_v20  ;;  %v5761_v43 = vadd.f32 %v6667_v50, %v10196_v63 }
 0x518   : > { %v5922_v38 = vadd.f32 %v6779_v52, %v5761_v43  ;;  %v6668_v23 = vpop.f32.mrb[156].mxu0  ;;  %v6780_v29 = vpop.f32.mrb[156].mxu1  ;;  %v6009_v31 = vmax.f32 %v5919_v40, 0.0 }
 0x519   : > { %v6669_v41 = vpop.f32.mrb[157].mxu0  ;;  %v6781_v39 = vpop.f32.mrb[157].mxu1 }
 0x51a   : > { %v6010_v47 = vmax.f32 %v5922_v38, 0.0  ;;  %v6670_v32 = vadd.f32 %v6669_v41, %v6668_v23  ;;  %v6782_v12 = vadd.f32 %v6781_v39, %v6780_v29  ;;  %v6671_v14 = vpop.f32.mrb[158].mxu0  ;;  %v6783_v15 = vpop.f32.mrb[158].mxu1 }
 0x51b   : > { %v6672_v16 = vpop.f32.mrb[159].mxu0  ;;  %v6784_v24 = vpop.f32.mrb[159].mxu1 }
 0x51c   : > { %v10230_v22 = vpack.c.bf16 %v6010_v47, %v6009_v31  ;;  %v5766_v33 = vadd.f32 %v6670_v32, %v10196_v63  ;;  %v6673_v34 = vadd.f32 %v6672_v16, %v6671_v14  ;;  %v6785_v49 = vadd.f32 %v6784_v24, %v6783_v15 }
 0x51e   : > { %v5927_v35 = vadd.f32 %v6782_v12, %v5766_v33  ;;  %v5769_v36 = vadd.f32 %v6673_v34, %v10196_v63 }
 0x520   : > { %v5930_v37 = vadd.f32 %v6785_v49, %v5769_v36  ;;  %v6674_v55 = vpop.f32.mrb[160].mxu0  ;;  %v6786_v58 = vpop.f32.mrb[160].mxu1  ;;  %v6011_v59 = vmax.f32 %v5927_v35, 0.0 }
 0x521   : > { %v6675_v51 = vpop.f32.mrb[161].mxu0  ;;  %v6787_v0 = vpop.f32.mrb[161].mxu1 }
 0x522   : > { %v6012_v62 = vmax.f32 %v5930_v37, 0.0  ;;  %v6676_v46 = vadd.f32 %v6675_v51, %v6674_v55  ;;  %v6788_v57 = vadd.f32 %v6787_v0, %v6786_v58  ;;  %v6677_v53 = vpop.f32.mrb[162].mxu0  ;;  %v6789_v61 = vpop.f32.mrb[162].mxu1 }
 0x523   : > { %v6678_v3 = vpop.f32.mrb[163].mxu0  ;;  %v6790_v44 = vpop.f32.mrb[163].mxu1 }
 0x524   : > { %v10234_v21 = vpack.c.bf16 %v6012_v62, %v6011_v59  ;;  %v5774_v5 = vadd.f32 %v6676_v46, %v10196_v63  ;;  %v6679_v7 = vadd.f32 %v6678_v3, %v6677_v53  ;;  %v6791_v8 = vadd.f32 %v6790_v44, %v6789_v61 }
 0x526   : > { %v5935_v9 = vadd.f32 %v6788_v57, %v5774_v5  ;;  %v5777_v11 = vadd.f32 %v6679_v7, %v10196_v63 }
 0x528   : > { %v5938_v19 = vadd.f32 %v6791_v8, %v5777_v11  ;;  %v6680_v13 = vpop.f32.mrb[164].mxu0  ;;  %v6792_v4 = vpop.f32.mrb[164].mxu1  ;;  %v6013_v54 = vmax.f32 %v5935_v9, 0.0 }
 0x529   : > { %v6681_v60 = vpop.f32.mrb[165].mxu0  ;;  %v6793_v6 = vpop.f32.mrb[165].mxu1 }
 0x52a   : > { %v6014_v56 = vmax.f32 %v5938_v19, 0.0  ;;  %v6682_v42 = vadd.f32 %v6681_v60, %v6680_v13  ;;  %v6794_v45 = vadd.f32 %v6793_v6, %v6792_v4  ;;  %v6683_v25 = vpop.f32.mrb[166].mxu0  ;;  %v6795_v20 = vpop.f32.mrb[166].mxu1 }
 0x52b   : > { %v6684_v50 = vpop.f32.mrb[167].mxu0  ;;  %v6796_v52 = vpop.f32.mrb[167].mxu1 }
 0x52c   : > { %v5782_v40 = vadd.f32 %v6682_v42, %v10196_v63  ;;  %v6685_v43 = vadd.f32 %v6684_v50, %v6683_v25  ;;  %v6797_v38 = vadd.f32 %v6796_v52, %v6795_v20  ;;  %v6868_v23 = vpack.c.bf16 %v6014_v56, %v6013_v54 }
 0x52e   : > { %v5943_v29 = vadd.f32 %v6794_v45, %v5782_v40  ;;  %v5785_v41 = vadd.f32 %v6685_v43, %v10196_v63  ;;  %6869 = vmatprep.subr.bf16.mxu0 %v6868_v23 }
 0x52f   : > { %6871 = vmatpush3.bf16.xpose.msra.mxu0 %v10206_v48 }
 0x530   : > { %v5946_v39 = vadd.f32 %v6797_v38, %v5785_v41  ;;  %v6686_v31 = vpop.f32.mrb[168].mxu0  ;;  %v6798_v47 = vpop.f32.mrb[168].mxu1  ;;  %v6015_v14 = vmax.f32 %v5943_v29, 0.0 }
 0x531   : > { %v6687_v32 = vpop.f32.mrb[169].mxu0  ;;  %v6799_v12 = vpop.f32.mrb[169].mxu1 }
 0x532   : > { %v6016_v15 = vmax.f32 %v5946_v39, 0.0  ;;  %v6688_v16 = vadd.f32 %v6687_v32, %v6686_v31  ;;  %v6800_v24 = vadd.f32 %v6799_v12, %v6798_v47  ;;  %v6689_v33 = vpop.f32.mrb[170].mxu0  ;;  %v6801_v34 = vpop.f32.mrb[170].mxu1 }
 0x533   : > { %v6690_v49 = vpop.f32.mrb[171].mxu0  ;;  %v6802_v35 = vpop.f32.mrb[171].mxu1 }
 0x534   : > { %v5790_v36 = vadd.f32 %v6688_v16, %v10196_v63  ;;  %v6691_v37 = vadd.f32 %v6690_v49, %v6689_v33  ;;  %v6803_v55 = vadd.f32 %v6802_v35, %v6801_v34  ;;  %v6872_v58 = vpack.c.bf16 %v6016_v15, %v6015_v14 }
 0x536   : > { %v5951_v51 = vadd.f32 %v6800_v24, %v5790_v36  ;;  %v5793_v48 = vadd.f32 %v6691_v37, %v10196_v63  ;;  %6873 = vmatprep.subr.bf16.mxu0 %v6872_v58 }
 0x537   : > { %6875 = vmatpush3.bf16.xpose.msra.mxu0 %v10210_v2 }
 0x538   : > { %v5954_v0 = vadd.f32 %v6803_v55, %v5793_v48  ;;  %v6692_v59 = vpop.f32.mrb[172].mxu0  ;;  %v6804_v62 = vpop.f32.mrb[172].mxu1  ;;  %v6017_v53 = vmax.f32 %v5951_v51, 0.0 }
 0x539   : > { %v6693_v46 = vpop.f32.mrb[173].mxu0  ;;  %v6805_v57 = vpop.f32.mrb[173].mxu1 }
 0x53a   : > { %v6018_v61 = vmax.f32 %v5954_v0, 0.0  ;;  %v6694_v3 = vadd.f32 %v6693_v46, %v6692_v59  ;;  %v6806_v44 = vadd.f32 %v6805_v57, %v6804_v62  ;;  %v6695_v5 = vpop.f32.mrb[174].mxu0  ;;  %v6807_v7 = vpop.f32.mrb[174].mxu1 }
 0x53b   : > { %v6696_v8 = vpop.f32.mrb[175].mxu0  ;;  %v6808_v9 = vpop.f32.mrb[175].mxu1 }
 0x53c   : > { %v5798_v11 = vadd.f32 %v6694_v3, %v10196_v63  ;;  %v6697_v19 = vadd.f32 %v6696_v8, %v6695_v5  ;;  %v6809_v13 = vadd.f32 %v6808_v9, %v6807_v7  ;;  %v6876_v4 = vpack.c.bf16 %v6018_v61, %v6017_v53 }
 0x53e   : > { %v5959_v60 = vadd.f32 %v6806_v44, %v5798_v11  ;;  %v5801_v2 = vadd.f32 %v6697_v19, %v10196_v63  ;;  %6877 = vmatprep.subr.bf16.mxu0 %v6876_v4 }
 0x53f   : > { %6879 = vmatpush3.bf16.xpose.msra.mxu0 %v10214_v30 }
 0x540   : > { %v5962_v6 = vadd.f32 %v6809_v13, %v5801_v2  ;;  %v6698_v54 = vpop.f32.mrb[176].mxu0  ;;  %v6810_v56 = vpop.f32.mrb[176].mxu1  ;;  %v6019_v25 = vmax.f32 %v5959_v60, 0.0 }
 0x541   : > { %v6699_v42 = vpop.f32.mrb[177].mxu0  ;;  %v6811_v45 = vpop.f32.mrb[177].mxu1 }
 0x542   : > { %v6020_v20 = vmax.f32 %v5962_v6, 0.0  ;;  %v6700_v50 = vadd.f32 %v6699_v42, %v6698_v54  ;;  %v6812_v52 = vadd.f32 %v6811_v45, %v6810_v56  ;;  %v6701_v40 = vpop.f32.mrb[178].mxu0  ;;  %v6813_v43 = vpop.f32.mrb[178].mxu1 }
 0x543   : > { %v6702_v38 = vpop.f32.mrb[179].mxu0  ;;  %v6814_v23 = vpop.f32.mrb[179].mxu1 }
 0x544   : > { %v5806_v29 = vadd.f32 %v6700_v50, %v10196_v63  ;;  %v6703_v41 = vadd.f32 %v6702_v38, %v6701_v40  ;;  %v6815_v39 = vadd.f32 %v6814_v23, %v6813_v43  ;;  %v6880_v31 = vpack.c.bf16 %v6020_v20, %v6019_v25 }
 0x546   : > { %v5967_v47 = vadd.f32 %v6812_v52, %v5806_v29  ;;  %v5809_v30 = vadd.f32 %v6703_v41, %v10196_v63  ;;  %6881 = vmatprep.subr.bf16.mxu0 %v6880_v31 }
 0x547   : > { %6883 = vmatpush3.bf16.xpose.msra.mxu0 %v10218_v18 }
 0x548   : > { %v5970_v32 = vadd.f32 %v6815_v39, %v5809_v30  ;;  %v6704_v12 = vpop.f32.mrb[180].mxu0  ;;  %v6816_v14 = vpop.f32.mrb[180].mxu1  ;;  %v6021_v24 = vmax.f32 %v5967_v47, 0.0 }
 0x549   : > { %v6705_v15 = vpop.f32.mrb[181].mxu0  ;;  %v6817_v16 = vpop.f32.mrb[181].mxu1 }
 0x54a   : > { %v6022_v33 = vmax.f32 %v5970_v32, 0.0  ;;  %v6706_v34 = vadd.f32 %v6705_v15, %v6704_v12  ;;  %v6818_v49 = vadd.f32 %v6817_v16, %v6816_v14  ;;  %v6707_v35 = vpop.f32.mrb[182].mxu0  ;;  %v6819_v36 = vpop.f32.mrb[182].mxu1 }
 0x54b   : > { %v6708_v37 = vpop.f32.mrb[183].mxu0  ;;  %v6820_v55 = vpop.f32.mrb[183].mxu1 }
 0x54c   : > { %v5814_v58 = vadd.f32 %v6706_v34, %v10196_v63  ;;  %v6709_v51 = vadd.f32 %v6708_v37, %v6707_v35  ;;  %v6821_v48 = vadd.f32 %v6820_v55, %v6819_v36  ;;  %v6884_v0 = vpack.c.bf16 %v6022_v33, %v6021_v24  ;;  %v6034_v16 = vpop.permute.xlu0 %6033 }
 0x54d   : > { %v8294_v24 = vmov 1966171168   ;;  %v6039_v34 = vrot.slane %v6034_v16, %v9486_v28 }
 0x54e   : > { %v5975_v59 = vadd.f32 %v6818_v49, %v5814_v58  ;;  %v5817_v18 = vadd.f32 %v6709_v51, %v10196_v63  ;;  %6885 = vmatprep.subr.bf16.mxu0 %v6884_v0  ;;  %v6115_v33 = vunpack.c.l.s4 %v8294_v24 }
 0x54f   : > { %6887 = vmatpush3.bf16.xpose.msra.mxu0 %v10222_v1 }
 0x550   : > { %v5978_v62 = vadd.f32 %v6821_v48, %v5817_v18  ;;  %v6710_v46 = vpop.f32.mrb[184].mxu0  ;;  %v6822_v57 = vpop.f32.mrb[184].mxu1  ;;  %v6023_v3 = vmax.f32 %v5975_v59, 0.0 }
 0x551   : > { %v6711_v53 = vpop.f32.mrb[185].mxu0  ;;  %v6823_v61 = vpop.f32.mrb[185].mxu1 }
 0x552   : > { %v6024_v44 = vmax.f32 %v5978_v62, 0.0  ;;  %v6712_v5 = vadd.f32 %v6711_v53, %v6710_v46  ;;  %v6824_v7 = vadd.f32 %v6823_v61, %v6822_v57  ;;  %v6713_v8 = vpop.f32.mrb[186].mxu0  ;;  %v6825_v9 = vpop.f32.mrb[186].mxu1 }
 0x553   : > { %v6714_v11 = vpop.f32.mrb[187].mxu0  ;;  %v6826_v19 = vpop.f32.mrb[187].mxu1 }
 0x554   : > { %v5822_v13 = vadd.f32 %v6712_v5, %v10196_v63  ;;  %v6715_v4 = vadd.f32 %v6714_v11, %v6713_v8  ;;  %v6827_v60 = vadd.f32 %v6826_v19, %v6825_v9  ;;  %v6888_v2 = vpack.c.bf16 %v6024_v44, %v6023_v3 }
 0x556   : > { %v5983_v6 = vadd.f32 %v6824_v7, %v5822_v13  ;;  %v5825_v1 = vadd.f32 %v6715_v4, %v10196_v63  ;;  %6889 = vmatprep.subr.bf16.mxu0 %v6888_v2 }
 0x557   : > { %6891 = vmatpush3.bf16.xpose.msra.mxu0 %v10226_v17 }
 0x558   : > { %v5986_v54 = vadd.f32 %v6827_v60, %v5825_v1  ;;  %v6716_v56 = vpop.f32.mrb[188].mxu0  ;;  %v6828_v42 = vpop.f32.mrb[188].mxu1  ;;  %v6025_v20 = vmax.f32 %v5983_v6, 0.0 }
 0x559   : > { %v6717_v45 = vpop.f32.mrb[189].mxu0  ;;  %v6829_v25 = vpop.f32.mrb[189].mxu1 }
 0x55a   : > { %v6026_v50 = vmax.f32 %v5986_v54, 0.0  ;;  %v6718_v52 = vadd.f32 %v6717_v45, %v6716_v56  ;;  %v6830_v40 = vadd.f32 %v6829_v25, %v6828_v42  ;;  %v6719_v43 = vpop.f32.mrb[190].mxu0  ;;  %v6831_v38 = vpop.f32.mrb[190].mxu1 }
 0x55b   : > { %v6720_v23 = vpop.f32.mrb[191].mxu0  ;;  %v6832_v29 = vpop.f32.mrb[191].mxu1 }
 0x55c   : > { %v5830_v41 = vadd.f32 %v6718_v52, %v10196_v63  ;;  %v6721_v39 = vadd.f32 %v6720_v23, %v6719_v43  ;;  %v6833_v31 = vadd.f32 %v6832_v29, %v6831_v38  ;;  %v6892_v47 = vpack.c.bf16 %v6026_v50, %v6025_v20 }
 0x55e   : > { %v5991_v17 = vadd.f32 %v6830_v40, %v5830_v41  ;;  %v5833_v30 = vadd.f32 %v6721_v39, %v10196_v63  ;;  %6893 = vmatprep.subr.bf16.mxu0 %v6892_v47  ;;  %v6116_v63 = vunpack.c.0.s8 %v6115_v33 }
 0x55f   : > { %6895 = vmatpush3.bf16.xpose.msra.mxu0 %v10230_v22 }
 0x560   : > { %v5994_v32 = vadd.f32 %v6833_v31, %v5833_v30  ;;  %v6027_v12 = vmax.f32 %v5991_v17, 0.0  ;;  %v6119_v37 = vsub.s32 %v6116_v63, %v9483_v10 }
 0x562   : > { %v6028_v14 = vmax.f32 %v5994_v32, 0.0 }
 0x564   : > { %v6896_v15 = vpack.c.bf16 %v6028_v14, %v6027_v12 }
 0x566   : > { %6897 = vmatprep.subr.bf16.mxu0 %v6896_v15 }
 0x567   : > { %6899 = vmatpush3.bf16.xpose.msra.mxu0 %v10234_v21 }
 0x56e   : > { %6867 = vmatmul.mubr.f32.vlgmr.msra.gmra.mrb[192].mxu0 %v10203_v26 }
 0x641   : > { %v6106_v49 = vpop.f32.mrb[192].mxu0 }
 0x642   : > { %v6107_v22 = vadd.f32 %v6106_v49, %v6039_v34  ;;  %v6108_v35 = vpop.f32.mrb[193].mxu0 }
 0x643   : > { %v6109_v36 = vadd.f32 %v6108_v35, %v6039_v34 }
 0x645   : > { %v6113_v55 = vcombine.low %v6107_v22, %v6109_v36 }
 0x647   : > { %v6120_v26 = vrot.slane %v6113_v55, %v6119_v37 }
 0x649   : > { %v6127_v21 = vrot.slane %v6120_v26, %v6119_v37 }
 0x64b   : > { %6133 = vst.msk [vmem:[%s330_s15] sm:$0x3] %vm6131_vm1, %v6127_v21 }
 0x64c   : > { %8242 = shalt.err (!%p8239_p3)
}
 0x64d   : > { %s8243_s28 = scalar_lea.hbm %s10269_s8, 32  ;;  %s8247_s10 = scalar_lea.hbm %s10320_s9, 64 }
 0x64e   : > { %p8244_p4 = scmp.ne.s32.totalorder %s10269_s8, %s8243_s28  ;;  %p8248_p9 = scmp.lt.u32.totalorder %s10269_s8, %s10320_s9 }
 0x64f   : > { %p8249_p10 = scmp.lt.u32.totalorder %s8247_s10, %s8243_s28  ;;  %p8251_p12 = scmp.lt.u32.totalorder %s8243_s28, %s10269_s8 }
 0x650   : > { %p8245_p7 = pnand %p8244_p4, %p8386_p5 }
 0x651   : > { %p8250_p11 = por %p8249_p10, %p8248_p9 }
 0x652   : > { %p8246_p8 = pneg %p8245_p7 }
 0x653   : > { %p8252_p13 = por %p8251_p12, %p8250_p11 }
 0x655   : > { %p8253_p0 = pnand %p8252_p13, %p8246_p8 }
 0x657   : > { %8256 = shalt.err (!%p8253_p0)
}
 0x658   : > { %7669 = dma.vmem_to_hbm [thread:$0]  (%p8386_p5), %s10271_s17, 32, %s10269_s8, %s6135_s22  }
 0x659 PF: > { %p7675_p1 = scmp.ge.s32.totalorder %s8291_s14, 2  ;;  %s6161_s18 = sand.u32 1, %s8279_s11  }
 0x65a   : > { %s6162_s25 = scalar_lea.sflag [#allocation4], %s6161_s18 }
 0x65b   : > { %p7672_p2 = pnand %p7675_p1, %p8390_p6 }
 0x65d   : > { %8274 = dma.done.wait (!%p7672_p2), %s6162_s25, 32  }
 0x65e   : > { %8276 = vsyncadd (!%p7672_p2), %s6162_s25, 4294967264  ;;  %p21_p3 = scmp.ge.s32.totalorder %s8372_s16, 4   ;;  %s10323_s11 = smov %s8283_s12 }
 0x65f   : > { %s10324_s12 = smov %s8287_s13  ;;  %s10325_s13 = smov %s8384_s19 }
 0x660   : > { %s10326_s14 = smov %s8372_s16  ;;  %23 = sbr.rel (!%p21_p3) target bundleno = 6 (0x6), region = 91 }
 0x667   :  { %6167 = vsyncpa [#allocation4], 1 }
 0x668   :  { %6169 = vsyncpa [#allocation4 + $0x1], 1 }

</bundles_post_ra>
